<compile_context>
chip_gen: v5e
topology: v5e:2x2
jax: 0.10.0
libtpu: 0.0.40
codegen_flags: <defaults>
</compile_context>

<pallas_src>
import functools

import jax
import jax.numpy as jnp
from jax.experimental import pallas as pl
from jax.experimental.pallas import tpu as pltpu

EPS = 1e-5            # torch.nn.BatchNorm2d default
NEG_SLOPE = 0.01      # torch.nn.LeakyReLU default in the module
LANES = 128           # TPU lane width
MXU_DTYPE = jnp.bfloat16
TAPS = tuple((ky, kx) for ky in range(3) for kx in range(3))


def _round_up(v, m):
    return ((v + m - 1) // m) * m


def _bn_lrelu(acc, gamma, beta):
    """Training-mode BatchNorm folded to one per-channel scale/shift, then LeakyReLU."""
    mean = jnp.mean(acc, axis=0, keepdims=True)
    var = jnp.mean(acc * acc, axis=0, keepdims=True) - mean * mean
    s = gamma * jax.lax.rsqrt(var + EPS)      # rsqrt -> EUP slot (essentially free)
    t = beta - mean * s
    y = acc * s + t                           # 2 full VPU passes instead of 4
    return jnp.where(y >= 0, y, NEG_SLOPE * y)


def convblock_kernel(n, h, w, ho, wo,
                     x_ref, w1_ref, g1_ref, b1_ref, w2_ref, g2_ref, b2_ref,
                     out_ref,
                     xpad_ref, col1_ref, y1pad_ref, col2_ref):
    """Fused conv1(s1)+BN+LReLU -> conv2(s2)+BN+LReLU, everything resident in VMEM."""
    cpi = x_ref.shape[-1]      # lane-padded input channels  (multiple of 128)
    cpo = out_ref.shape[-1]    # lane-padded output channels (multiple of 128)
    rows1 = n * h * w
    rows2 = n * ho * wo

    # ---------------- stage 1: 3x3 conv, stride 1, pad 1 ----------------
    # halo handled in-kernel: zero the scratch once, store the interior
    xpad_ref[...] = jnp.zeros_like(xpad_ref)
    xpad_ref[:, 1:1 + h, 1:1 + w, :] = x_ref[...]

    # im2col once into a lane-dense bf16 slab, then ONE wide-K MXU matmul (f32 acc)
    for k, (ky, kx) in enumerate(TAPS):
        patch = xpad_ref[:, ky:ky + h, kx:kx + w, :]
        col1_ref[:, k * cpi:(k + 1) * cpi] = (
            patch.reshape(rows1, cpi).astype(col1_ref.dtype))
    acc1 = jnp.dot(col1_ref[...], w1_ref[...], preferred_element_type=jnp.float32)
    y1 = _bn_lrelu(acc1, g1_ref[...], b1_ref[...])

    # keep y1 resident in VMEM (halo-padded) -- no HBM round trip between the stages
    y1pad_ref[...] = jnp.zeros_like(y1pad_ref)
    y1pad_ref[:, 1:1 + h, 1:1 + w, :] = y1.reshape(n, h, w, cpo)

    # ---------------- stage 2: 3x3 conv, stride 2, pad 1 ----------------
    # stride-2 taps via in-kernel strided indexing of the VMEM-resident activation
    for k, (ky, kx) in enumerate(TAPS):
        patch = y1pad_ref[:, pl.ds(ky, ho, stride=2), pl.ds(kx, wo, stride=2), :]
        col2_ref[:, k * cpo:(k + 1) * cpo] = (
            patch.reshape(rows2, cpo).astype(col2_ref.dtype))
    acc2 = jnp.dot(col2_ref[...], w2_ref[...], preferred_element_type=jnp.float32)
    y2 = _bn_lrelu(acc2, g2_ref[...], b2_ref[...])
    out_ref[...] = y2.reshape(n, ho, wo, cpo).astype(out_ref.dtype)


def _prep_weight(w_oihw, cin_p, cout_p):
    """OIHW -> (9*cin_p, cout_p) bf16 matrix whose row order matches the im2col slab."""
    cout, cin, kh, kw = w_oihw.shape
    w_hwio = jnp.transpose(w_oihw, (2, 3, 1, 0))                      # (3,3,Cin,Cout)
    w_hwio = jnp.pad(w_hwio, ((0, 0), (0, 0), (0, cin_p - cin), (0, cout_p - cout)))
    return w_hwio.reshape(kh * kw * cin_p, cout_p).astype(MXU_DTYPE)


def _prep_affine(gamma, beta, cout_p):
    cout = gamma.shape[0]
    # pad gamma with 1 / beta with 0 so padded channels stay exactly zero through BN+LReLU
    g = jnp.pad(gamma, (0, cout_p - cout), constant_values=1.0).reshape(1, cout_p)
    b = jnp.pad(beta, (0, cout_p - cout), constant_values=0.0).reshape(1, cout_p)
    return g.astype(jnp.float32), b.astype(jnp.float32)


def conv_block_forward_nhwc(x_nhwc, params):
    """ConvBlock forward, NHWC in / NHWC out.  (N,H,W,Cin) -> (N,H//2,W//2,Cout)."""
    n, h, w, cin = x_nhwc.shape
    assert h % 2 == 0 and w % 2 == 0, "stride-2 stage assumes even spatial dims"
    cout = params["w1"].shape[0]
    cin_p = _round_up(cin, LANES)
    cout_p = _round_up(cout, LANES)
    ho, wo = h // 2, w // 2

    # One-time lane-dense channel padding.  In a stacked discriminator the activations
    # would stay channel-padded NHWC end-to-end, so this copy only exists at the edge.
    x_p = jnp.pad(x_nhwc, ((0, 0), (0, 0), (0, 0), (0, cin_p - cin)))
    w1 = _prep_weight(params["w1"], cin_p, cout_p)
    w2 = _prep_weight(params["w2"], cout_p, cout_p)
    g1, b1 = _prep_affine(params["gamma1"], params["beta1"], cout_p)
    g2, b2 = _prep_affine(params["gamma2"], params["beta2"], cout_p)

    vmem = pl.BlockSpec(memory_space=pltpu.MemorySpace.VMEM)
    y = pl.pallas_call(
        functools.partial(convblock_kernel, n, h, w, ho, wo),
        out_shape=jax.ShapeDtypeStruct((n, ho, wo, cout_p), jnp.float32),
        in_specs=[vmem] * 7,
        out_specs=vmem,
        scratch_shapes=[
            pltpu.VMEM((n, h + 2, w + 2, cin_p), jnp.float32),   # halo-padded input
            pltpu.VMEM((n * h * w, 9 * cin_p), MXU_DTYPE),       # stage-1 im2col slab
            pltpu.VMEM((n, h + 2, w + 2, cout_p), jnp.float32),  # halo-padded y1 (VMEM-resident)
            pltpu.VMEM((n * ho * wo, 9 * cout_p), MXU_DTYPE),    # stage-2 im2col slab
        ],
    )(x_p, w1, g1, b1, w2, g2, b2)
    return y[:, :, :, :cout]


def conv_block_forward(x_nchw, params):
    """PyTorch-interface wrapper: NCHW in / NCHW out (layout converted only at the edge)."""
    x = jnp.transpose(x_nchw, (0, 2, 3, 1))          # NCHW -> NHWC
    y = conv_block_forward_nhwc(x, params)
    return jnp.transpose(y, (0, 3, 1, 2))            # NHWC -> NCHW


def reference_forward(x, params):
    """Pure-JAX reference (lax conv + training-mode BN + LeakyReLU), NCHW."""
    def conv(a, w, stride):
        return jax.lax.conv_general_dilated(
            a, w, window_strides=(stride, stride), padding=((1, 1), (1, 1)),
            dimension_numbers=("NCHW", "OIHW", "NCHW"))

    def bn_lrelu(y, gamma, beta):
        mean = jnp.mean(y, axis=(0, 2, 3), keepdims=True)
        var = jnp.mean(jnp.square(y - mean), axis=(0, 2, 3), keepdims=True)
        y = (y - mean) * jax.lax.rsqrt(var + EPS)
        y = y * gamma.reshape(1, -1, 1, 1) + beta.reshape(1, -1, 1, 1)
        return jnp.where(y >= 0, y, NEG_SLOPE * y)

    y = bn_lrelu(conv(x, params["w1"], 1), params["gamma1"], params["beta1"])
    y = bn_lrelu(conv(y, params["w2"], 2), params["gamma2"], params["beta2"])
    return y


if __name__ == "__main__":
    key = jax.random.PRNGKey(0)
    k_x, k_w1, k_w2, k_g1, k_b1, k_g2, k_b2 = jax.random.split(key, 7)

    N, Cin, H, W = 2, 4, 16, 16
    Cout = 8

    x = jax.random.normal(k_x, (N, Cin, H, W), jnp.float32)
    params = {
        # PyTorch-layout conv weights (Cout, Cin, 3, 3), deterministic synthetic init.
        "w1": 0.2 * jax.random.normal(k_w1, (Cout, Cin, 3, 3), jnp.float32),
        "w2": 0.2 * jax.random.normal(k_w2, (Cout, Cout, 3, 3), jnp.float32),
        # PyTorch default BN init is gamma=1, beta=0; perturb deterministically so the
        # affine path is actually exercised.
        "gamma1": 1.0 + 0.1 * jax.random.normal(k_g1, (Cout,), jnp.float32),
        "beta1": 0.1 * jax.random.normal(k_b1, (Cout,), jnp.float32),
        "gamma2": 1.0 + 0.1 * jax.random.normal(k_g2, (Cout,), jnp.float32),
        "beta2": 0.1 * jax.random.normal(k_b2, (Cout,), jnp.float32),
    }

    out = jax.jit(conv_block_forward)(x, params)
    out = jax.block_until_ready(out)

    assert out.shape == (N, Cout, H // 2, W // 2), out.shape
    ref = reference_forward(x, params)
    # Tolerance accounts for bf16 MXU operands (per the perf review); accumulation and
    # all BatchNorm / LeakyReLU math are f32, so the error stays at the ~1e-2 level.
    max_err = float(jnp.max(jnp.abs(out - ref)))
    assert max_err < 3e-2, f"max abs error {max_err}"

    print("KERNEL_OK")
</pallas_src>

<mosaic_0001>
module attributes {stable_mosaic.version = 11 : i64} {
  func.func @convblock_kernel(%arg0: memref<2x16x16x128xf32, #tpu.memory_space<vmem>>, %arg1: memref<1152x128xbf16, #tpu.memory_space<vmem>>, %arg2: memref<1x128xf32, #tpu.memory_space<vmem>>, %arg3: memref<1x128xf32, #tpu.memory_space<vmem>>, %arg4: memref<1152x128xbf16, #tpu.memory_space<vmem>>, %arg5: memref<1x128xf32, #tpu.memory_space<vmem>>, %arg6: memref<1x128xf32, #tpu.memory_space<vmem>>, %arg7: memref<2x8x8x128xf32, #tpu.memory_space<vmem>>, %arg8: memref<2x18x18x128xf32, #tpu.memory_space<vmem>>, %arg9: memref<512x1152xbf16, #tpu.memory_space<vmem>>, %arg10: memref<2x18x18x128xf32, #tpu.memory_space<vmem>>, %arg11: memref<128x1152xbf16, #tpu.memory_space<vmem>>) attributes {dimension_semantics = [], scalar_prefetch = 0 : i64, scratch_operands = 4 : i64, tpu.core_type = #tpu.core_type<tc>} {
    %cst = arith.constant 0.000000e+00 : f32
    %0 = vector.broadcast %cst : f32 to vector<2x18x18x128xf32>
    %c0 = arith.constant 0 : index
    %c0_0 = arith.constant 0 : index
    %c0_1 = arith.constant 0 : index
    %c0_2 = arith.constant 0 : index
    %1 = vector.load %arg8[%c0, %c0_0, %c0_1, %c0_2] : memref<2x18x18x128xf32, #tpu.memory_space<vmem>>, vector<2x18x18x128xf32>
    tpu.vector_store %arg8[%c0, %c0_0, %c0_1, %c0_2], %0 {strides = array<i32>} : memref<2x18x18x128xf32, #tpu.memory_space<vmem>>, vector<2x18x18x128xf32>,
    %c0_3 = arith.constant 0 : index
    %c0_4 = arith.constant 0 : index
    %c0_5 = arith.constant 0 : index
    %c0_6 = arith.constant 0 : index
    %2 = vector.load %arg0[%c0_3, %c0_4, %c0_5, %c0_6] : memref<2x16x16x128xf32, #tpu.memory_space<vmem>>, vector<2x16x16x128xf32>
    %c0_7 = arith.constant 0 : index
    %c1 = arith.constant 1 : index
    %c1_8 = arith.constant 1 : index
    %c0_9 = arith.constant 0 : index
    %3 = vector.load %arg8[%c0_7, %c1, %c1_8, %c0_9] : memref<2x18x18x128xf32, #tpu.memory_space<vmem>>, vector<2x16x16x128xf32>
    tpu.vector_store %arg8[%c0_7, %c1, %c1_8, %c0_9], %2 {strides = array<i32>} : memref<2x18x18x128xf32, #tpu.memory_space<vmem>>, vector<2x16x16x128xf32>,
    %c0_10 = arith.constant 0 : index
    %c0_11 = arith.constant 0 : index
    %c0_12 = arith.constant 0 : index
    %c0_13 = arith.constant 0 : index
    %4 = vector.load %arg8[%c0_10, %c0_11, %c0_12, %c0_13] : memref<2x18x18x128xf32, #tpu.memory_space<vmem>>, vector<2x16x16x128xf32>
    %5 = vector.shape_cast %4 : vector<2x16x16x128xf32> to vector<512x128xf32>
    %6 = arith.truncf %5 : vector<512x128xf32> to vector<512x128xbf16>
    %c0_14 = arith.constant 0 : index
    %c0_15 = arith.constant 0 : index
    %7 = vector.load %arg9[%c0_14, %c0_15] : memref<512x1152xbf16, #tpu.memory_space<vmem>>, vector<512x128xbf16>
    tpu.vector_store %arg9[%c0_14, %c0_15], %6 {strides = array<i32>} : memref<512x1152xbf16, #tpu.memory_space<vmem>>, vector<512x128xbf16>,
    %c0_16 = arith.constant 0 : index
    %c0_17 = arith.constant 0 : index
    %c1_18 = arith.constant 1 : index
    %c0_19 = arith.constant 0 : index
    %8 = vector.load %arg8[%c0_16, %c0_17, %c1_18, %c0_19] : memref<2x18x18x128xf32, #tpu.memory_space<vmem>>, vector<2x16x16x128xf32>
    %9 = vector.shape_cast %8 : vector<2x16x16x128xf32> to vector<512x128xf32>
    %10 = arith.truncf %9 : vector<512x128xf32> to vector<512x128xbf16>
    %c0_20 = arith.constant 0 : index
    %c128 = arith.constant 128 : index
    %11 = vector.load %arg9[%c0_20, %c128] : memref<512x1152xbf16, #tpu.memory_space<vmem>>, vector<512x128xbf16>
    tpu.vector_store %arg9[%c0_20, %c128], %10 {strides = array<i32>} : memref<512x1152xbf16, #tpu.memory_space<vmem>>, vector<512x128xbf16>,
    %c0_21 = arith.constant 0 : index
    %c0_22 = arith.constant 0 : index
    %c2 = arith.constant 2 : index
    %c0_23 = arith.constant 0 : index
    %12 = vector.load %arg8[%c0_21, %c0_22, %c2, %c0_23] : memref<2x18x18x128xf32, #tpu.memory_space<vmem>>, vector<2x16x16x128xf32>
    %13 = vector.shape_cast %12 : vector<2x16x16x128xf32> to vector<512x128xf32>
    %14 = arith.truncf %13 : vector<512x128xf32> to vector<512x128xbf16>
    %c0_24 = arith.constant 0 : index
    %c256 = arith.constant 256 : index
    %15 = vector.load %arg9[%c0_24, %c256] : memref<512x1152xbf16, #tpu.memory_space<vmem>>, vector<512x128xbf16>
    tpu.vector_store %arg9[%c0_24, %c256], %14 {strides = array<i32>} : memref<512x1152xbf16, #tpu.memory_space<vmem>>, vector<512x128xbf16>,
    %c0_25 = arith.constant 0 : index
    %c1_26 = arith.constant 1 : index
    %c0_27 = arith.constant 0 : index
    %c0_28 = arith.constant 0 : index
    %16 = vector.load %arg8[%c0_25, %c1_26, %c0_27, %c0_28] : memref<2x18x18x128xf32, #tpu.memory_space<vmem>>, vector<2x16x16x128xf32>
    %17 = vector.shape_cast %16 : vector<2x16x16x128xf32> to vector<512x128xf32>
    %18 = arith.truncf %17 : vector<512x128xf32> to vector<512x128xbf16>
    %c0_29 = arith.constant 0 : index
    %c384 = arith.constant 384 : index
    %19 = vector.load %arg9[%c0_29, %c384] : memref<512x1152xbf16, #tpu.memory_space<vmem>>, vector<512x128xbf16>
    tpu.vector_store %arg9[%c0_29, %c384], %18 {strides = array<i32>} : memref<512x1152xbf16, #tpu.memory_space<vmem>>, vector<512x128xbf16>,
    %c0_30 = arith.constant 0 : index
    %c1_31 = arith.constant 1 : index
    %c1_32 = arith.constant 1 : index
    %c0_33 = arith.constant 0 : index
    %20 = vector.load %arg8[%c0_30, %c1_31, %c1_32, %c0_33] : memref<2x18x18x128xf32, #tpu.memory_space<vmem>>, vector<2x16x16x128xf32>
    %21 = vector.shape_cast %20 : vector<2x16x16x128xf32> to vector<512x128xf32>
    %22 = arith.truncf %21 : vector<512x128xf32> to vector<512x128xbf16>
    %c0_34 = arith.constant 0 : index
    %c512 = arith.constant 512 : index
    %23 = vector.load %arg9[%c0_34, %c512] : memref<512x1152xbf16, #tpu.memory_space<vmem>>, vector<512x128xbf16>
    tpu.vector_store %arg9[%c0_34, %c512], %22 {strides = array<i32>} : memref<512x1152xbf16, #tpu.memory_space<vmem>>, vector<512x128xbf16>,
    %c0_35 = arith.constant 0 : index
    %c1_36 = arith.constant 1 : index
    %c2_37 = arith.constant 2 : index
    %c0_38 = arith.constant 0 : index
    %24 = vector.load %arg8[%c0_35, %c1_36, %c2_37, %c0_38] : memref<2x18x18x128xf32, #tpu.memory_space<vmem>>, vector<2x16x16x128xf32>
    %25 = vector.shape_cast %24 : vector<2x16x16x128xf32> to vector<512x128xf32>
    %26 = arith.truncf %25 : vector<512x128xf32> to vector<512x128xbf16>
    %c0_39 = arith.constant 0 : index
    %c640 = arith.constant 640 : index
    %27 = vector.load %arg9[%c0_39, %c640] : memref<512x1152xbf16, #tpu.memory_space<vmem>>, vector<512x128xbf16>
    tpu.vector_store %arg9[%c0_39, %c640], %26 {strides = array<i32>} : memref<512x1152xbf16, #tpu.memory_space<vmem>>, vector<512x128xbf16>,
    %c0_40 = arith.constant 0 : index
    %c2_41 = arith.constant 2 : index
    %c0_42 = arith.constant 0 : index
    %c0_43 = arith.constant 0 : index
    %28 = vector.load %arg8[%c0_40, %c2_41, %c0_42, %c0_43] : memref<2x18x18x128xf32, #tpu.memory_space<vmem>>, vector<2x16x16x128xf32>
    %29 = vector.shape_cast %28 : vector<2x16x16x128xf32> to vector<512x128xf32>
    %30 = arith.truncf %29 : vector<512x128xf32> to vector<512x128xbf16>
    %c0_44 = arith.constant 0 : index
    %c768 = arith.constant 768 : index
    %31 = vector.load %arg9[%c0_44, %c768] : memref<512x1152xbf16, #tpu.memory_space<vmem>>, vector<512x128xbf16>
    tpu.vector_store %arg9[%c0_44, %c768], %30 {strides = array<i32>} : memref<512x1152xbf16, #tpu.memory_space<vmem>>, vector<512x128xbf16>,
    %c0_45 = arith.constant 0 : index
    %c2_46 = arith.constant 2 : index
    %c1_47 = arith.constant 1 : index
    %c0_48 = arith.constant 0 : index
    %32 = vector.load %arg8[%c0_45, %c2_46, %c1_47, %c0_48] : memref<2x18x18x128xf32, #tpu.memory_space<vmem>>, vector<2x16x16x128xf32>
    %33 = vector.shape_cast %32 : vector<2x16x16x128xf32> to vector<512x128xf32>
    %34 = arith.truncf %33 : vector<512x128xf32> to vector<512x128xbf16>
    %c0_49 = arith.constant 0 : index
    %c896 = arith.constant 896 : index
    %35 = vector.load %arg9[%c0_49, %c896] : memref<512x1152xbf16, #tpu.memory_space<vmem>>, vector<512x128xbf16>
    tpu.vector_store %arg9[%c0_49, %c896], %34 {strides = array<i32>} : memref<512x1152xbf16, #tpu.memory_space<vmem>>, vector<512x128xbf16>,
    %c0_50 = arith.constant 0 : index
    %c2_51 = arith.constant 2 : index
    %c2_52 = arith.constant 2 : index
    %c0_53 = arith.constant 0 : index
    %36 = vector.load %arg8[%c0_50, %c2_51, %c2_52, %c0_53] : memref<2x18x18x128xf32, #tpu.memory_space<vmem>>, vector<2x16x16x128xf32>
    %37 = vector.shape_cast %36 : vector<2x16x16x128xf32> to vector<512x128xf32>
    %38 = arith.truncf %37 : vector<512x128xf32> to vector<512x128xbf16>
    %c0_54 = arith.constant 0 : index
    %c1024 = arith.constant 1024 : index
    %39 = vector.load %arg9[%c0_54, %c1024] : memref<512x1152xbf16, #tpu.memory_space<vmem>>, vector<512x128xbf16>
    tpu.vector_store %arg9[%c0_54, %c1024], %38 {strides = array<i32>} : memref<512x1152xbf16, #tpu.memory_space<vmem>>, vector<512x128xbf16>,
    %c0_55 = arith.constant 0 : index
    %c0_56 = arith.constant 0 : index
    %40 = vector.load %arg9[%c0_55, %c0_56] : memref<512x1152xbf16, #tpu.memory_space<vmem>>, vector<512x1152xbf16>
    %c0_57 = arith.constant 0 : index
    %c0_58 = arith.constant 0 : index
    %41 = vector.load %arg1[%c0_57, %c0_58] : memref<1152x128xbf16, #tpu.memory_space<vmem>>, vector<1152x128xbf16>
    %cst_59 = arith.constant dense<0.000000e+00> : vector<512x128xf32>
    %42 = tpu.matmul %40, %41, %cst_59 {dimension_numbers = #tpu.dot_dimension_numbers<[1], [0], [0], [1], [0, 0, 1, 1], [], []>} : vector<512x1152xbf16>, vector<1152x128xbf16>, vector<512x128xf32> -> vector<512x128xf32>
    %c0_60 = arith.constant 0 : index
    %c0_61 = arith.constant 0 : index
    %43 = vector.load %arg2[%c0_60, %c0_61] : memref<1x128xf32, #tpu.memory_space<vmem>>, vector<1x128xf32>
    %c0_62 = arith.constant 0 : index
    %c0_63 = arith.constant 0 : index
    %44 = vector.load %arg3[%c0_62, %c0_63] : memref<1x128xf32, #tpu.memory_space<vmem>>, vector<1x128xf32>
    %cst_64 = arith.constant dense<0.000000e+00> : vector<128xf32>
    %45 = vector.multi_reduction <add>, %42, %cst_64 [0] : vector<512x128xf32> to vector<128xf32>
    %46 = vector.shape_cast %45 : vector<128xf32> to vector<1x128xf32>
    %cst_65 = arith.constant 5.120000e+02 : f32
    %47 = vector.broadcast %cst_65 : f32 to vector<1x128xf32>
    %48 = arith.divf %46, %47 : vector<1x128xf32>
    %49 = arith.mulf %42, %42 : vector<512x128xf32>
    %cst_66 = arith.constant dense<0.000000e+00> : vector<128xf32>
    %50 = vector.multi_reduction <add>, %49, %cst_66 [0] : vector<512x128xf32> to vector<128xf32>
    %51 = vector.shape_cast %50 : vector<128xf32> to vector<1x128xf32>
    %cst_67 = arith.constant 5.120000e+02 : f32
    %52 = vector.broadcast %cst_67 : f32 to vector<1x128xf32>
    %53 = arith.divf %51, %52 : vector<1x128xf32>
    %54 = arith.mulf %48, %48 : vector<1x128xf32>
    %55 = arith.subf %53, %54 : vector<1x128xf32>
    %cst_68 = arith.constant 9.99999974E-6 : f32
    %56 = vector.broadcast %cst_68 : f32 to vector<1x128xf32>
    %57 = arith.addf %55, %56 : vector<1x128xf32>
    %58 = math.rsqrt %57 : vector<1x128xf32>
    %59 = arith.mulf %43, %58 : vector<1x128xf32>
    %60 = arith.mulf %48, %59 : vector<1x128xf32>
    %61 = arith.subf %44, %60 : vector<1x128xf32>
    %62 = vector.broadcast %59 : vector<1x128xf32> to vector<512x128xf32>
    %63 = arith.mulf %42, %62 : vector<512x128xf32>
    %64 = vector.broadcast %61 : vector<1x128xf32> to vector<512x128xf32>
    %65 = arith.addf %63, %64 : vector<512x128xf32>
    %cst_69 = arith.constant 0.000000e+00 : f32
    %66 = vector.broadcast %cst_69 : f32 to vector<512x128xf32>
    %67 = arith.cmpf oge, %65, %66 : vector<512x128xf32>
    %cst_70 = arith.constant 0.00999999977 : f32
    %68 = vector.broadcast %cst_70 : f32 to vector<512x128xf32>
    %69 = arith.mulf %68, %65 : vector<512x128xf32>
    %70 = arith.select %67, %65, %69 : vector<512x128xi1>, vector<512x128xf32>
    %cst_71 = arith.constant 0.000000e+00 : f32
    %71 = vector.broadcast %cst_71 : f32 to vector<2x18x18x128xf32>
    %c0_72 = arith.constant 0 : index
    %c0_73 = arith.constant 0 : index
    %c0_74 = arith.constant 0 : index
    %c0_75 = arith.constant 0 : index
    %72 = vector.load %arg10[%c0_72, %c0_73, %c0_74, %c0_75] : memref<2x18x18x128xf32, #tpu.memory_space<vmem>>, vector<2x18x18x128xf32>
    tpu.vector_store %arg10[%c0_72, %c0_73, %c0_74, %c0_75], %71 {strides = array<i32>} : memref<2x18x18x128xf32, #tpu.memory_space<vmem>>, vector<2x18x18x128xf32>,
    %73 = vector.shape_cast %70 : vector<512x128xf32> to vector<2x16x16x128xf32>
    %c0_76 = arith.constant 0 : index
    %c1_77 = arith.constant 1 : index
    %c1_78 = arith.constant 1 : index
    %c0_79 = arith.constant 0 : index
    %74 = vector.load %arg10[%c0_76, %c1_77, %c1_78, %c0_79] : memref<2x18x18x128xf32, #tpu.memory_space<vmem>>, vector<2x16x16x128xf32>
    tpu.vector_store %arg10[%c0_76, %c1_77, %c1_78, %c0_79], %73 {strides = array<i32>} : memref<2x18x18x128xf32, #tpu.memory_space<vmem>>, vector<2x16x16x128xf32>,
    %c0_80 = arith.constant 0 : index
    %c0_81 = arith.constant 0 : index
    %c0_82 = arith.constant 0 : index
    %c0_83 = arith.constant 0 : index
    %75 = tpu.strided_load %arg10[%c0_80, %c0_81, %c0_82, %c0_83] {strides = array<i32: 1, 2, 2, 1>} : memref<2x18x18x128xf32, #tpu.memory_space<vmem>>, vector<2x8x8x128xf32>
    %76 = vector.shape_cast %75 : vector<2x8x8x128xf32> to vector<128x128xf32>
    %77 = arith.truncf %76 : vector<128x128xf32> to vector<128x128xbf16>
    %c0_84 = arith.constant 0 : index
    %c0_85 = arith.constant 0 : index
    %78 = vector.load %arg11[%c0_84, %c0_85] : memref<128x1152xbf16, #tpu.memory_space<vmem>>, vector<128x128xbf16>
    tpu.vector_store %arg11[%c0_84, %c0_85], %77 {strides = array<i32>} : memref<128x1152xbf16, #tpu.memory_space<vmem>>, vector<128x128xbf16>,
    %c0_86 = arith.constant 0 : index
    %c0_87 = arith.constant 0 : index
    %c1_88 = arith.constant 1 : index
    %c0_89 = arith.constant 0 : index
    %79 = tpu.strided_load %arg10[%c0_86, %c0_87, %c1_88, %c0_89] {strides = array<i32: 1, 2, 2, 1>} : memref<2x18x18x128xf32, #tpu.memory_space<vmem>>, vector<2x8x8x128xf32>
    %80 = vector.shape_cast %79 : vector<2x8x8x128xf32> to vector<128x128xf32>
    %81 = arith.truncf %80 : vector<128x128xf32> to vector<128x128xbf16>
    %c0_90 = arith.constant 0 : index
    %c128_91 = arith.constant 128 : index
    %82 = vector.load %arg11[%c0_90, %c128_91] : memref<128x1152xbf16, #tpu.memory_space<vmem>>, vector<128x128xbf16>
    tpu.vector_store %arg11[%c0_90, %c128_91], %81 {strides = array<i32>} : memref<128x1152xbf16, #tpu.memory_space<vmem>>, vector<128x128xbf16>,
    %c0_92 = arith.constant 0 : index
    %c0_93 = arith.constant 0 : index
    %c2_94 = arith.constant 2 : index
    %c0_95 = arith.constant 0 : index
    %83 = tpu.strided_load %arg10[%c0_92, %c0_93, %c2_94, %c0_95] {strides = array<i32: 1, 2, 2, 1>} : memref<2x18x18x128xf32, #tpu.memory_space<vmem>>, vector<2x8x8x128xf32>
    %84 = vector.shape_cast %83 : vector<2x8x8x128xf32> to vector<128x128xf32>
    %85 = arith.truncf %84 : vector<128x128xf32> to vector<128x128xbf16>
    %c0_96 = arith.constant 0 : index
    %c256_97 = arith.constant 256 : index
    %86 = vector.load %arg11[%c0_96, %c256_97] : memref<128x1152xbf16, #tpu.memory_space<vmem>>, vector<128x128xbf16>
    tpu.vector_store %arg11[%c0_96, %c256_97], %85 {strides = array<i32>} : memref<128x1152xbf16, #tpu.memory_space<vmem>>, vector<128x128xbf16>,
    %c0_98 = arith.constant 0 : index
    %c1_99 = arith.constant 1 : index
    %c0_100 = arith.constant 0 : index
    %c0_101 = arith.constant 0 : index
    %87 = tpu.strided_load %arg10[%c0_98, %c1_99, %c0_100, %c0_101] {strides = array<i32: 1, 2, 2, 1>} : memref<2x18x18x128xf32, #tpu.memory_space<vmem>>, vector<2x8x8x128xf32>
    %88 = vector.shape_cast %87 : vector<2x8x8x128xf32> to vector<128x128xf32>
    %89 = arith.truncf %88 : vector<128x128xf32> to vector<128x128xbf16>
    %c0_102 = arith.constant 0 : index
    %c384_103 = arith.constant 384 : index
    %90 = vector.load %arg11[%c0_102, %c384_103] : memref<128x1152xbf16, #tpu.memory_space<vmem>>, vector<128x128xbf16>
    tpu.vector_store %arg11[%c0_102, %c384_103], %89 {strides = array<i32>} : memref<128x1152xbf16, #tpu.memory_space<vmem>>, vector<128x128xbf16>,
    %c0_104 = arith.constant 0 : index
    %c1_105 = arith.constant 1 : index
    %c1_106 = arith.constant 1 : index
    %c0_107 = arith.constant 0 : index
    %91 = tpu.strided_load %arg10[%c0_104, %c1_105, %c1_106, %c0_107] {strides = array<i32: 1, 2, 2, 1>} : memref<2x18x18x128xf32, #tpu.memory_space<vmem>>, vector<2x8x8x128xf32>
    %92 = vector.shape_cast %91 : vector<2x8x8x128xf32> to vector<128x128xf32>
    %93 = arith.truncf %92 : vector<128x128xf32> to vector<128x128xbf16>
    %c0_108 = arith.constant 0 : index
    %c512_109 = arith.constant 512 : index
    %94 = vector.load %arg11[%c0_108, %c512_109] : memref<128x1152xbf16, #tpu.memory_space<vmem>>, vector<128x128xbf16>
    tpu.vector_store %arg11[%c0_108, %c512_109], %93 {strides = array<i32>} : memref<128x1152xbf16, #tpu.memory_space<vmem>>, vector<128x128xbf16>,
    %c0_110 = arith.constant 0 : index
    %c1_111 = arith.constant 1 : index
    %c2_112 = arith.constant 2 : index
    %c0_113 = arith.constant 0 : index
    %95 = tpu.strided_load %arg10[%c0_110, %c1_111, %c2_112, %c0_113] {strides = array<i32: 1, 2, 2, 1>} : memref<2x18x18x128xf32, #tpu.memory_space<vmem>>, vector<2x8x8x128xf32>
    %96 = vector.shape_cast %95 : vector<2x8x8x128xf32> to vector<128x128xf32>
    %97 = arith.truncf %96 : vector<128x128xf32> to vector<128x128xbf16>
    %c0_114 = arith.constant 0 : index
    %c640_115 = arith.constant 640 : index
    %98 = vector.load %arg11[%c0_114, %c640_115] : memref<128x1152xbf16, #tpu.memory_space<vmem>>, vector<128x128xbf16>
    tpu.vector_store %arg11[%c0_114, %c640_115], %97 {strides = array<i32>} : memref<128x1152xbf16, #tpu.memory_space<vmem>>, vector<128x128xbf16>,
    %c0_116 = arith.constant 0 : index
    %c2_117 = arith.constant 2 : index
    %c0_118 = arith.constant 0 : index
    %c0_119 = arith.constant 0 : index
    %99 = tpu.strided_load %arg10[%c0_116, %c2_117, %c0_118, %c0_119] {strides = array<i32: 1, 2, 2, 1>} : memref<2x18x18x128xf32, #tpu.memory_space<vmem>>, vector<2x8x8x128xf32>
    %100 = vector.shape_cast %99 : vector<2x8x8x128xf32> to vector<128x128xf32>
    %101 = arith.truncf %100 : vector<128x128xf32> to vector<128x128xbf16>
    %c0_120 = arith.constant 0 : index
    %c768_121 = arith.constant 768 : index
    %102 = vector.load %arg11[%c0_120, %c768_121] : memref<128x1152xbf16, #tpu.memory_space<vmem>>, vector<128x128xbf16>
    tpu.vector_store %arg11[%c0_120, %c768_121], %101 {strides = array<i32>} : memref<128x1152xbf16, #tpu.memory_space<vmem>>, vector<128x128xbf16>,
    %c0_122 = arith.constant 0 : index
    %c2_123 = arith.constant 2 : index
    %c1_124 = arith.constant 1 : index
    %c0_125 = arith.constant 0 : index
    %103 = tpu.strided_load %arg10[%c0_122, %c2_123, %c1_124, %c0_125] {strides = array<i32: 1, 2, 2, 1>} : memref<2x18x18x128xf32, #tpu.memory_space<vmem>>, vector<2x8x8x128xf32>
    %104 = vector.shape_cast %103 : vector<2x8x8x128xf32> to vector<128x128xf32>
    %105 = arith.truncf %104 : vector<128x128xf32> to vector<128x128xbf16>
    %c0_126 = arith.constant 0 : index
    %c896_127 = arith.constant 896 : index
    %106 = vector.load %arg11[%c0_126, %c896_127] : memref<128x1152xbf16, #tpu.memory_space<vmem>>, vector<128x128xbf16>
    tpu.vector_store %arg11[%c0_126, %c896_127], %105 {strides = array<i32>} : memref<128x1152xbf16, #tpu.memory_space<vmem>>, vector<128x128xbf16>,
    %c0_128 = arith.constant 0 : index
    %c2_129 = arith.constant 2 : index
    %c2_130 = arith.constant 2 : index
    %c0_131 = arith.constant 0 : index
    %107 = tpu.strided_load %arg10[%c0_128, %c2_129, %c2_130, %c0_131] {strides = array<i32: 1, 2, 2, 1>} : memref<2x18x18x128xf32, #tpu.memory_space<vmem>>, vector<2x8x8x128xf32>
    %108 = vector.shape_cast %107 : vector<2x8x8x128xf32> to vector<128x128xf32>
    %109 = arith.truncf %108 : vector<128x128xf32> to vector<128x128xbf16>
    %c0_132 = arith.constant 0 : index
    %c1024_133 = arith.constant 1024 : index
    %110 = vector.load %arg11[%c0_132, %c1024_133] : memref<128x1152xbf16, #tpu.memory_space<vmem>>, vector<128x128xbf16>
    tpu.vector_store %arg11[%c0_132, %c1024_133], %109 {strides = array<i32>} : memref<128x1152xbf16, #tpu.memory_space<vmem>>, vector<128x128xbf16>,
    %c0_134 = arith.constant 0 : index
    %c0_135 = arith.constant 0 : index
    %111 = vector.load %arg11[%c0_134, %c0_135] : memref<128x1152xbf16, #tpu.memory_space<vmem>>, vector<128x1152xbf16>
    %c0_136 = arith.constant 0 : index
    %c0_137 = arith.constant 0 : index
    %112 = vector.load %arg4[%c0_136, %c0_137] : memref<1152x128xbf16, #tpu.memory_space<vmem>>, vector<1152x128xbf16>
    %cst_138 = arith.constant dense<0.000000e+00> : vector<128x128xf32>
    %113 = tpu.matmul %111, %112, %cst_138 {dimension_numbers = #tpu.dot_dimension_numbers<[1], [0], [0], [1], [0, 0, 1, 1], [], []>} : vector<128x1152xbf16>, vector<1152x128xbf16>, vector<128x128xf32> -> vector<128x128xf32>
    %c0_139 = arith.constant 0 : index
    %c0_140 = arith.constant 0 : index
    %114 = vector.load %arg5[%c0_139, %c0_140] : memref<1x128xf32, #tpu.memory_space<vmem>>, vector<1x128xf32>
    %c0_141 = arith.constant 0 : index
    %c0_142 = arith.constant 0 : index
    %115 = vector.load %arg6[%c0_141, %c0_142] : memref<1x128xf32, #tpu.memory_space<vmem>>, vector<1x128xf32>
    %cst_143 = arith.constant dense<0.000000e+00> : vector<128xf32>
    %116 = vector.multi_reduction <add>, %113, %cst_143 [0] : vector<128x128xf32> to vector<128xf32>
    %117 = vector.shape_cast %116 : vector<128xf32> to vector<1x128xf32>
    %cst_144 = arith.constant 1.280000e+02 : f32
    %118 = vector.broadcast %cst_144 : f32 to vector<1x128xf32>
    %119 = arith.divf %117, %118 : vector<1x128xf32>
    %120 = arith.mulf %113, %113 : vector<128x128xf32>
    %cst_145 = arith.constant dense<0.000000e+00> : vector<128xf32>
    %121 = vector.multi_reduction <add>, %120, %cst_145 [0] : vector<128x128xf32> to vector<128xf32>
    %122 = vector.shape_cast %121 : vector<128xf32> to vector<1x128xf32>
    %cst_146 = arith.constant 1.280000e+02 : f32
    %123 = vector.broadcast %cst_146 : f32 to vector<1x128xf32>
    %124 = arith.divf %122, %123 : vector<1x128xf32>
    %125 = arith.mulf %119, %119 : vector<1x128xf32>
    %126 = arith.subf %124, %125 : vector<1x128xf32>
    %cst_147 = arith.constant 9.99999974E-6 : f32
    %127 = vector.broadcast %cst_147 : f32 to vector<1x128xf32>
    %128 = arith.addf %126, %127 : vector<1x128xf32>
    %129 = math.rsqrt %128 : vector<1x128xf32>
    %130 = arith.mulf %114, %129 : vector<1x128xf32>
    %131 = arith.mulf %119, %130 : vector<1x128xf32>
    %132 = arith.subf %115, %131 : vector<1x128xf32>
    %133 = vector.broadcast %130 : vector<1x128xf32> to vector<128x128xf32>
    %134 = arith.mulf %113, %133 : vector<128x128xf32>
    %135 = vector.broadcast %132 : vector<1x128xf32> to vector<128x128xf32>
    %136 = arith.addf %134, %135 : vector<128x128xf32>
    %cst_148 = arith.constant 0.000000e+00 : f32
    %137 = vector.broadcast %cst_148 : f32 to vector<128x128xf32>
    %138 = arith.cmpf oge, %136, %137 : vector<128x128xf32>
    %cst_149 = arith.constant 0.00999999977 : f32
    %139 = vector.broadcast %cst_149 : f32 to vector<128x128xf32>
    %140 = arith.mulf %139, %136 : vector<128x128xf32>
    %141 = arith.select %138, %136, %140 : vector<128x128xi1>, vector<128x128xf32>
    %142 = vector.shape_cast %141 : vector<128x128xf32> to vector<2x8x8x128xf32>
    %c0_150 = arith.constant 0 : index
    %c0_151 = arith.constant 0 : index
    %c0_152 = arith.constant 0 : index
    %c0_153 = arith.constant 0 : index
    %143 = vector.load %arg7[%c0_150, %c0_151, %c0_152, %c0_153] : memref<2x8x8x128xf32, #tpu.memory_space<vmem>>, vector<2x8x8x128xf32>
    tpu.vector_store %arg7[%c0_150, %c0_151, %c0_152, %c0_153], %142 {strides = array<i32>} : memref<2x8x8x128xf32, #tpu.memory_space<vmem>>, vector<2x8x8x128xf32>,
    return
  }
}

</mosaic_0001>

<bundles_post_ra>
// kernel: conv_block_forward.1
= control target key start
LH: loop header
LB: loop body
LE: loop exit
PB: predicated region body
PF: predicated region fallthrough
CT: control target
= control target key end

     0   :  { %v11491_v1 = vmov 0.0   ;;  %v11492_v3 = vmov 0.0|0.0   ;;  %s14620_s1 = inlined_call_operand.vmem [shape: bf16[1152,128], index: 1, kind: input, shape index: {}]   ;;  %s14621_s0 = inlined_call_operand.vmem [shape: f32[2,16,16,128], index: 0, kind: input, shape index: {}]   ;;  %s14622_s4 = inlined_call_operand.vmem [shape: bf16[1152,128], index: 4, kind: input, shape index: {}]   ;;  %s14623_s2 = inlined_call_operand.vmem [shape: f32[1,128], index: 2, kind: input, shape index: {}]   ;;  %s14624_s3 = inlined_call_operand.vmem [shape: f32[1,128], index: 3, kind: input, shape index: {}]   ;;  %s14625_s5 = inlined_call_operand.vmem [shape: f32[1,128], index: 5, kind: input, shape index: {}]   ;;  %s14626_s6 = inlined_call_operand.vmem [shape: f32[1,128], index: 6, kind: input, shape index: {}]   ;;  %s14627_s7 = inlined_call_operand.vmem [shape: f32[2,8,8,128], index: 7, kind: output, shape index: {}]  }
   0x1   :  { %v11244_v0 = vld [vmem:[%s14620_s1 + $0x38] sm:$0xff]  ;;  %26 = vst [vmem:[#allocation2] sm:$0xff] %v11491_v1  ;;  %v11243_v2 = vld [vmem:[%s14620_s1 + $0x30] sm:$0xff]  ;;  %v11242_v4 = vld [vmem:[%s14620_s1 + $0x28] sm:$0xff] }
   0x2   :  { %27 = vst [vmem:[#allocation2 + $0x8] sm:$0xff] %v11491_v1  ;;  %4360 = vmatpush.bf16.msra.mxu0 %v11244_v0  ;;  %11453 = vmatpush.bf16.msra.mxu1 %v11244_v0  ;;  %v11241_v5 = vld [vmem:[%s14620_s1 + $0x20] sm:$0xff]  ;;  %v11240_v6 = vld [vmem:[%s14620_s1 + $0x18] sm:$0xff]  ;;  %v11239_v7 = vld [vmem:[%s14620_s1 + $0x10] sm:$0xff] }
   0x3   :  { %391 = vst [vmem:[#allocation3] sm:$0xf] %v11492_v3  ;;  %11454 = vmatpush.bf16.msra.mxu2 %v11244_v0  ;;  %11455 = vmatpush.bf16.msra.mxu3 %v11244_v0  ;;  %v11238_v8 = vld [vmem:[%s14620_s1 + $0x8] sm:$0xff]  ;;  %v11237_v9 = vld [vmem:[%s14620_s1] sm:$0xff]  ;;  %v11252_v13 = vld [vmem:[%s14620_s1 + $0x78] sm:$0xff] }
   0x4   :  { %392 = vst [vmem:[#allocation3 + $0x24] sm:$0xf] %v11492_v3  ;;  %v11260_v14 = vld [vmem:[%s14620_s1 + $0xb8] sm:$0xff]  ;;  %v11251_v17 = vld [vmem:[%s14620_s1 + $0x70] sm:$0xff]  ;;  %v11250_v20 = vld [vmem:[%s14620_s1 + $0x68] sm:$0xff] }
   0x5   :  { %28 = vst [vmem:[#allocation2 + $0x10] sm:$0x3] %v11491_v1  ;;  %v11276_v15 = vld [vmem:[%s14620_s1 + $0x138] sm:$0xff]  ;;  %v11259_v18 = vld [vmem:[%s14620_s1 + $0xb0] sm:$0xff]  ;;  %v11258_v21 = vld [vmem:[%s14620_s1 + $0xa8] sm:$0xff] }
   0x6   :  { %29 = vst [vmem:[#allocation2 + $0x18] sm:$0xff] %v11491_v1  ;;  %4361 = vmatpush.bf16.msra.mxu0 %v11243_v2  ;;  %11456 = vmatpush.bf16.msra.mxu1 %v11243_v2  ;;  %v11268_v16 = vld [vmem:[%s14620_s1 + $0xf8] sm:$0xff]  ;;  %v11267_v19 = vld [vmem:[%s14620_s1 + $0xf0] sm:$0xff]  ;;  %v11266_v24 = vld [vmem:[%s14620_s1 + $0xe8] sm:$0xff] }
   0x7   :  { %30 = vst [vmem:[#allocation2 + $0x20] sm:$0xff] %v11491_v1  ;;  %11457 = vmatpush.bf16.msra.mxu2 %v11243_v2  ;;  %11458 = vmatpush.bf16.msra.mxu3 %v11243_v2  ;;  %v184_v22 = vld [vmem:[%s14621_s0 + $0x190] sm:$0xff]  ;;  %v185_v23 = vld [vmem:[%s14621_s0 + $0x198] sm:$0xff]  ;;  %v11249_v27 = vld [vmem:[%s14620_s1 + $0x60] sm:$0xff] }
   0x8   :  { %31 = vst [vmem:[#allocation2 + $0x28] sm:$0x3] %v11491_v1  ;;  %v188_v25 = vld [vmem:[%s14621_s0 + $0x1b0] sm:$0xff]  ;;  %v189_v26 = vld [vmem:[%s14621_s0 + $0x1b8] sm:$0xff]  ;;  %v11257_v28 = vld [vmem:[%s14620_s1 + $0xa0] sm:$0xff] }
   0x9   :  { %32 = vst [vmem:[#allocation2 + $0x30] sm:$0xff] %v11491_v1  ;;  %v192_v29 = vld [vmem:[%s14621_s0 + $0x1d0] sm:$0xff]  ;;  %v193_v30 = vld [vmem:[%s14621_s0 + $0x1d8] sm:$0xff]  ;;  %v11265_v31 = vld [vmem:[%s14620_s1 + $0xe0] sm:$0xff] }
   0xa   :  { %33 = vst [vmem:[#allocation2 + $0x38] sm:$0xff] %v11491_v1  ;;  %4362 = vmatpush.bf16.msra.mxu0 %v11242_v4  ;;  %11459 = vmatpush.bf16.msra.mxu1 %v11242_v4  ;;  %v8935_v10 = vld [vmem:[#allocation3] sm:$0xf]  ;;  %v11834_v33 = vld [vmem:[%s14621_s0 + $0x8] sm:$0xff]  ;;  %v11248_v39 = vld [vmem:[%s14620_s1 + $0x58] sm:$0xff] }
   0xb   :  { %34 = vst [vmem:[#allocation2 + $0x40] sm:$0x3] %v11491_v1  ;;  %11460 = vmatpush.bf16.msra.mxu2 %v11242_v4  ;;  %11461 = vmatpush.bf16.msra.mxu3 %v11242_v4  ;;  %v10953_v11 = vld [vmem:[#allocation3 + $0x20] sm:$0xf0]  ;;  %v187_v35 = vld [vmem:[%s14621_s0 + $0x1a8] sm:$0xff]  ;;  %v11256_v40 = vld [vmem:[%s14620_s1 + $0x98] sm:$0xff] }
   0xc   :  { %35 = vst [vmem:[#allocation2 + $0x48] sm:$0xff] %v11491_v1  ;;  %v8936_v12 = vor.u32 %v10953_v11, %v8935_v10  ;;  %v11829_v32 = vld [vmem:[%s14621_s0] sm:$0xff]  ;;  %v11264_v45 = vld [vmem:[%s14620_s1 + $0xd8] sm:$0xff]  ;;  %v11247_v48 = vld [vmem:[%s14620_s1 + $0x50] sm:$0xff] }
   0xd   :  { %36 = vst [vmem:[#allocation2 + $0x50] sm:$0xff] %v11491_v1  ;;  %v186_v34 = vld [vmem:[%s14621_s0 + $0x1a0] sm:$0xff]  ;;  %v11255_v49 = vld [vmem:[%s14620_s1 + $0x90] sm:$0xff]  ;;  %v11246_v57 = vld [vmem:[%s14620_s1 + $0x48] sm:$0xff] }
   0xe   :  { %37 = vst [vmem:[#allocation2 + $0x58] sm:$0x3] %v11491_v1  ;;  %4363 = vmatpush.bf16.msra.mxu0 %v11241_v5  ;;  %11462 = vmatpush.bf16.msra.mxu1 %v11241_v5  ;;  %v11263_v52 = vld [vmem:[%s14620_s1 + $0xd0] sm:$0xff]  ;;  %v11254_v58 = vld [vmem:[%s14620_s1 + $0x88] sm:$0xff]  ;;  %v190_v63 = vld [vmem:[%s14621_s0 + $0x1c0] sm:$0xff] }
   0xf   :  { %38 = vst [vmem:[#allocation2 + $0x60] sm:$0xff] %v11491_v1  ;;  %11463 = vmatpush.bf16.msra.mxu2 %v11241_v5  ;;  %11464 = vmatpush.bf16.msra.mxu3 %v11241_v5  ;;  %v11262_v0 = vld [vmem:[%s14620_s1 + $0xc8] sm:$0xff]  ;;  %v194_v4 = vld [vmem:[%s14621_s0 + $0x1e0] sm:$0xff] }
  0x10   :  { %39 = vst [vmem:[#allocation2 + $0x68] sm:$0xff] %v11491_v1  ;;  %v191_v3 = vld [vmem:[%s14621_s0 + $0x1c8] sm:$0xff] }
  0x11   :  { %40 = vst [vmem:[#allocation2 + $0x70] sm:$0x3] %v11491_v1  ;;  %v195_v10 = vld [vmem:[%s14621_s0 + $0x1e8] sm:$0xff] }
  0x12   :  { %41 = vst [vmem:[#allocation2 + $0x78] sm:$0xff] %v11491_v1  ;;  %4364 = vmatpush.bf16.msra.mxu0 %v11240_v6  ;;  %11465 = vmatpush.bf16.msra.mxu1 %v11240_v6  ;;  %v455_v11 = vld [vmem:[#allocation2 + $0x1] sm:$0xff] }
  0x13   :  { %42 = vst [vmem:[#allocation2 + $0x80] sm:$0xff] %v11491_v1  ;;  %11466 = vmatpush.bf16.msra.mxu2 %v11240_v6  ;;  %11467 = vmatpush.bf16.msra.mxu3 %v11240_v6  ;;  %v11245_v6 = vld [vmem:[%s14620_s1 + $0x40] sm:$0xff] }
  0x14   :  { %43 = vst [vmem:[#allocation2 + $0x88] sm:$0x3] %v11491_v1 }
  0x15   :  { %44 = vst [vmem:[#allocation2 + $0x90] sm:$0xff] %v11491_v1 }
  0x16   :  { %45 = vst [vmem:[#allocation2 + $0x98] sm:$0xff] %v11491_v1  ;;  %4365 = vmatpush.bf16.msra.mxu0 %v11239_v7  ;;  %11468 = vmatpush.bf16.msra.mxu1 %v11239_v7 }
  0x17   :  { %46 = vst [vmem:[#allocation2 + $0xa0] sm:$0x3] %v11491_v1  ;;  %11469 = vmatpush.bf16.msra.mxu2 %v11239_v7  ;;  %11470 = vmatpush.bf16.msra.mxu3 %v11239_v7  ;;  %v11253_v7 = vld [vmem:[%s14620_s1 + $0x80] sm:$0xff] }
  0x18   :  { %47 = vst [vmem:[#allocation2 + $0xa8] sm:$0xff] %v11491_v1 }
  0x19   :  { %48 = vst [vmem:[#allocation2 + $0xb0] sm:$0xff] %v11491_v1 }
  0x1a   :  { %49 = vst [vmem:[#allocation2 + $0xb8] sm:$0x3] %v11491_v1  ;;  %4366 = vmatpush.bf16.msra.mxu0 %v11238_v8  ;;  %11471 = vmatpush.bf16.msra.mxu1 %v11238_v8 }
  0x1b   :  { %50 = vst [vmem:[#allocation2 + $0xc0] sm:$0xff] %v11491_v1  ;;  %11472 = vmatpush.bf16.msra.mxu2 %v11238_v8  ;;  %11473 = vmatpush.bf16.msra.mxu3 %v11238_v8 }
  0x1c   :  { %51 = vst [vmem:[#allocation2 + $0xc8] sm:$0xff] %v11491_v1 }
  0x1d   :  { %52 = vst [vmem:[#allocation2 + $0xd0] sm:$0x3] %v11491_v1 }
  0x1e   :  { %53 = vst [vmem:[#allocation2 + $0xd8] sm:$0xff] %v11491_v1  ;;  %4367 = vmatpush.bf16.msra.mxu0 %v11237_v9  ;;  %11474 = vmatpush.bf16.msra.mxu1 %v11237_v9 }
  0x1f   :  { %54 = vst [vmem:[#allocation2 + $0xe0] sm:$0xff] %v11491_v1  ;;  %11475 = vmatpush.bf16.msra.mxu2 %v11237_v9  ;;  %11476 = vmatpush.bf16.msra.mxu3 %v11237_v9 }
  0x20   :  { %55 = vst [vmem:[#allocation2 + $0xe8] sm:$0x3] %v11491_v1 }
  0x21   :  { %56 = vst [vmem:[#allocation2 + $0xf0] sm:$0xff] %v11491_v1  ;;  %4368 = vmatmul.bf16.vlgmr.msra.gmra.mxu0 %v8936_v12 }
  0x22   :  { %57 = vst [vmem:[#allocation2 + $0xf8] sm:$0xff] %v11491_v1  ;;  %4529 = vmatpush.bf16.msrb.mxu1 %v11252_v13  ;;  %5036 = vmatpush.bf16.msrb.mxu0 %v11276_v15  ;;  %v11261_v13 = vld [vmem:[%s14620_s1 + $0xc0] sm:$0xff] }
  0x23   :  { %58 = vst [vmem:[#allocation2 + $0x100] sm:$0x3] %v11491_v1  ;;  %4698 = vmatpush.bf16.msrb.mxu2 %v11260_v14  ;;  %4867 = vmatpush.bf16.msrb.mxu3 %v11268_v16  ;;  %v456_v14 = vld [vmem:[#allocation2 + $0x9] sm:$0xff] }
  0x24   :  { %59 = vst [vmem:[#allocation2 + $0x108] sm:$0xff] %v11491_v1 }
  0x25   :  { %60 = vst [vmem:[#allocation2 + $0x110] sm:$0xff] %v11491_v1 }
  0x26   :  { %61 = vst [vmem:[#allocation2 + $0x118] sm:$0x3] %v11491_v1  ;;  %4530 = vmatpush.bf16.msrb.mxu1 %v11251_v17  ;;  %v11901_v17 = vld [vmem:[%s14621_s0 + $0x10] sm:$0xff] }
  0x27   :  { %62 = vst [vmem:[#allocation2 + $0x120] sm:$0xff] %v11491_v1  ;;  %4699 = vmatpush.bf16.msrb.mxu2 %v11259_v18  ;;  %4868 = vmatpush.bf16.msrb.mxu3 %v11267_v19  ;;  %v647_v18 = vld [vmem:[#allocation2 + $0x2] sm:$0xff] }
  0x28   :  { %63 = vst [vmem:[#allocation2 + $0x128] sm:$0xff] %v11491_v1 }
  0x29   :  { %64 = vst [vmem:[#allocation2 + $0x130] sm:$0x3] %v11491_v1 }
  0x2a   :  { %65 = vst [vmem:[#allocation2 + $0x138] sm:$0xff] %v11491_v1  ;;  %4531 = vmatpush.bf16.msrb.mxu1 %v11250_v20  ;;  %v11906_v20 = vld [vmem:[%s14621_s0 + $0x18] sm:$0xff] }
  0x2b   :  { %66 = vst [vmem:[#allocation2 + $0x140] sm:$0xff] %v11491_v1  ;;  %4700 = vmatpush.bf16.msrb.mxu2 %v11258_v21  ;;  %4869 = vmatpush.bf16.msrb.mxu3 %v11266_v24  ;;  %v519_v21 = vpack.c.bf16 %v455_v11, %v455_v11 }
  0x2c   :  { %67 = vst [vmem:[#allocation2 + $0x148] sm:$0x3] %v11491_v1 }
  0x2d   :  { %68 = vst [vmem:[#allocation2 + $0x150] sm:$0xff] %v11491_v1 }
  0x2e   :  { %69 = vst [vmem:[#allocation2 + $0x158] sm:$0xff] %v11491_v1  ;;  %4532 = vmatpush.bf16.msrb.mxu1 %v11249_v27  ;;  %v711_v27 = vpack.c.bf16 %v647_v18, %v647_v18 }
  0x2f   :  { %70 = vst [vmem:[#allocation2 + $0x160] sm:$0x3] %v11491_v1  ;;  %4701 = vmatpush.bf16.msrb.mxu2 %v11257_v28  ;;  %4870 = vmatpush.bf16.msrb.mxu3 %v11265_v31 }
  0x30   :  { %71 = vst [vmem:[#allocation2 + $0x168] sm:$0xff] %v11491_v1 }
  0x31   :  { %72 = vst [vmem:[#allocation2 + $0x170] sm:$0xff] %v11491_v1 }
  0x32   :  { %73 = vst [vmem:[#allocation2 + $0x178] sm:$0x3] %v11491_v1  ;;  %4533 = vmatpush.bf16.msrb.mxu1 %v11248_v39 }
  0x33   :  { %74 = vst [vmem:[#allocation2 + $0x180] sm:$0xff] %v11491_v1  ;;  %4702 = vmatpush.bf16.msrb.mxu2 %v11256_v40  ;;  %4871 = vmatpush.bf16.msrb.mxu3 %v11264_v45 }
  0x34   :  { %75 = vst [vmem:[#allocation2 + $0x188] sm:$0xff] %v11491_v1 }
  0x35   :  { %76 = vst [vmem:[#allocation2 + $0x190] sm:$0x3] %v11491_v1 }
  0x36   :  { %77 = vst [vmem:[#allocation2 + $0x198] sm:$0xff] %v11491_v1  ;;  %4534 = vmatpush.bf16.msrb.mxu1 %v11247_v48 }
  0x37   :  { %78 = vst [vmem:[#allocation2 + $0x1a0] sm:$0xff] %v11491_v1  ;;  %4703 = vmatpush.bf16.msrb.mxu2 %v11255_v49  ;;  %4872 = vmatpush.bf16.msrb.mxu3 %v11263_v52  ;;  %v11919_v49 = vld [vmem:[%s14621_s0 + $0x28] sm:$0xff] }
  0x38   :  { %79 = vst [vmem:[#allocation2 + $0x1a8] sm:$0x3] %v11491_v1 }
  0x39   :  { %80 = vst [vmem:[#allocation2 + $0x1b0] sm:$0xff] %v11491_v1 }
  0x3a   :  { %81 = vst [vmem:[#allocation2 + $0x1b8] sm:$0xff] %v11491_v1  ;;  %4535 = vmatpush.bf16.msrb.mxu1 %v11246_v57 }
  0x3b   :  { %82 = vst [vmem:[#allocation2 + $0x1c0] sm:$0x3] %v11491_v1  ;;  %4704 = vmatpush.bf16.msrb.mxu2 %v11254_v58  ;;  %4873 = vmatpush.bf16.msrb.mxu3 %v11262_v0  ;;  %v11939_v0 = vld [vmem:[%s14621_s0 + $0x38] sm:$0xff] }
  0x3c   :  { %83 = vst [vmem:[#allocation2 + $0x1c8] sm:$0xff] %v11491_v1 }
  0x3d   :  { %84 = vst [vmem:[#allocation2 + $0x1d0] sm:$0xff] %v11491_v1 }
  0x3e   :  { %85 = vst [vmem:[#allocation2 + $0x1d8] sm:$0x3] %v11491_v1  ;;  %4536 = vmatpush.bf16.msrb.mxu1 %v11245_v6 }
  0x3f   :  { %86 = vst [vmem:[#allocation2 + $0x1e0] sm:$0xff] %v11491_v1  ;;  %4705 = vmatpush.bf16.msrb.mxu2 %v11253_v7  ;;  %4874 = vmatpush.bf16.msrb.mxu3 %v11261_v13  ;;  %v523_v7 = vpack.c.bf16 %v11901_v17, %v11901_v17 }
  0x40   :  { %87 = vst [vmem:[#allocation2 + $0x1e8] sm:$0xff] %v11491_v1 }
  0x41   :  { %88 = vst [vmem:[#allocation2 + $0x1f0] sm:$0x3] %v11491_v1 }
  0x42   :  { %89 = vst [vmem:[#allocation2 + $0x1f8] sm:$0xff] %v11491_v1 }
  0x43   :  { %90 = vst [vmem:[#allocation2 + $0x200] sm:$0xff] %v11491_v1 }
  0x44   :  { %91 = vst [vmem:[#allocation2 + $0x208] sm:$0x3] %v11491_v1 }
  0x45   :  { %92 = vst [vmem:[#allocation2 + $0x210] sm:$0xff] %v11491_v1 }
  0x46   :  { %93 = vst [vmem:[#allocation2 + $0x218] sm:$0xff] %v11491_v1 }
  0x47   :  { %94 = vst [vmem:[#allocation2 + $0x220] sm:$0x3] %v11491_v1 }
  0x48   :  { %95 = vst [vmem:[#allocation2 + $0x228] sm:$0xff] %v11491_v1 }
  0x49   :  { %96 = vst [vmem:[#allocation2 + $0x230] sm:$0xff] %v11491_v1 }
  0x4a   :  { %97 = vst [vmem:[#allocation2 + $0x238] sm:$0x3] %v11491_v1 }
  0x4b   :  { %98 = vst [vmem:[#allocation2 + $0x240] sm:$0xff] %v11491_v1 }
  0x4c   :  { %99 = vst [vmem:[#allocation2 + $0x248] sm:$0xff] %v11491_v1 }
  0x4d   :  { %100 = vst [vmem:[#allocation2 + $0x250] sm:$0x3] %v11491_v1 }
  0x4e   :  { %101 = vst [vmem:[#allocation2 + $0x258] sm:$0xff] %v11491_v1 }
  0x4f   :  { %102 = vst [vmem:[#allocation2 + $0x260] sm:$0xff] %v11491_v1 }
  0x50   :  { %103 = vst [vmem:[#allocation2 + $0x268] sm:$0x3] %v11491_v1 }
  0x51   :  { %104 = vst [vmem:[#allocation2 + $0x270] sm:$0xff] %v11491_v1 }
  0x52   :  { %105 = vst [vmem:[#allocation2 + $0x278] sm:$0xff] %v11491_v1 }
  0x53   :  { %106 = vst [vmem:[#allocation2 + $0x280] sm:$0x3] %v11491_v1 }
  0x54   :  { %107 = vst [vmem:[#allocation2 + $0x288] sm:$0xff] %v11491_v1 }
  0x55   :  { %108 = vst [vmem:[#allocation2 + $0x290] sm:$0xff] %v11491_v1 }
  0x56   :  { %109 = vst [vmem:[#allocation2 + $0x298] sm:$0x3] %v11491_v1 }
  0x57   :  { %110 = vst [vmem:[#allocation2 + $0x2a0] sm:$0xff] %v11491_v1 }
  0x58   :  { %111 = vst [vmem:[#allocation2 + $0x2a8] sm:$0xff] %v11491_v1 }
  0x59   :  { %112 = vst [vmem:[#allocation2 + $0x2b0] sm:$0x3] %v11491_v1 }
  0x5a   :  { %113 = vst [vmem:[#allocation2 + $0x2b8] sm:$0xff] %v11491_v1 }
  0x5b   :  { %114 = vst [vmem:[#allocation2 + $0x2c0] sm:$0xff] %v11491_v1 }
  0x5c   :  { %115 = vst [vmem:[#allocation2 + $0x2c8] sm:$0x3] %v11491_v1 }
  0x5d   :  { %116 = vst [vmem:[#allocation2 + $0x2d0] sm:$0xff] %v11491_v1 }
  0x5e   :  { %117 = vst [vmem:[#allocation2 + $0x2d8] sm:$0xff] %v11491_v1 }
  0x5f   :  { %118 = vst [vmem:[#allocation2 + $0x2e0] sm:$0x3] %v11491_v1 }
  0x60   :  { %119 = vst [vmem:[#allocation2 + $0x2e8] sm:$0xff] %v11491_v1 }
  0x61   :  { %120 = vst [vmem:[#allocation2 + $0x2f0] sm:$0xff] %v11491_v1 }
  0x62   :  { %121 = vst [vmem:[#allocation2 + $0x2f8] sm:$0x3] %v11491_v1 }
  0x63   :  { %122 = vst [vmem:[#allocation2 + $0x300] sm:$0xff] %v11491_v1 }
  0x64   :  { %123 = vst [vmem:[#allocation2 + $0x308] sm:$0xff] %v11491_v1 }
  0x65   :  { %124 = vst [vmem:[#allocation2 + $0x310] sm:$0x3] %v11491_v1 }
  0x66   :  { %125 = vst [vmem:[#allocation2 + $0x318] sm:$0xff] %v11491_v1 }
  0x67   :  { %126 = vst [vmem:[#allocation2 + $0x320] sm:$0xff] %v11491_v1 }
  0x68   :  { %127 = vst [vmem:[#allocation2 + $0x328] sm:$0x3] %v11491_v1 }
  0x69   :  { %128 = vst [vmem:[#allocation2 + $0x330] sm:$0xff] %v11491_v1 }
  0x6a   :  { %129 = vst [vmem:[#allocation2 + $0x338] sm:$0xff] %v11491_v1 }
  0x6b   :  { %130 = vst [vmem:[#allocation2 + $0x340] sm:$0x3] %v11491_v1 }
  0x6c   :  { %131 = vst [vmem:[#allocation2 + $0x348] sm:$0xff] %v11491_v1 }
  0x6d   :  { %132 = vst [vmem:[#allocation2 + $0x350] sm:$0xff] %v11491_v1 }
  0x6e   :  { %133 = vst [vmem:[#allocation2 + $0x358] sm:$0x3] %v11491_v1 }
  0x6f   :  { %6436 = vst [vmem:[#allocation4] sm:$0xff] %v11491_v1 }
  0x70   :  { %6437 = vst [vmem:[#allocation4 + $0x8] sm:$0xff] %v11491_v1 }
  0x71   :  { %6438 = vst [vmem:[#allocation4 + $0x10] sm:$0x3] %v11491_v1 }
  0x72   :  { %6439 = vst [vmem:[#allocation4 + $0x18] sm:$0xff] %v11491_v1 }
  0x73   :  { %6440 = vst [vmem:[#allocation4 + $0x20] sm:$0xff] %v11491_v1 }
  0x74   :  { %6441 = vst [vmem:[#allocation4 + $0x28] sm:$0x3] %v11491_v1 }
  0x75   :  { %6442 = vst [vmem:[#allocation4 + $0x30] sm:$0xff] %v11491_v1 }
  0x76   :  { %6443 = vst [vmem:[#allocation4 + $0x38] sm:$0xff] %v11491_v1 }
  0x77   :  { %6444 = vst [vmem:[#allocation4 + $0x40] sm:$0x3] %v11491_v1 }
  0x78   :  { %6445 = vst [vmem:[#allocation4 + $0x48] sm:$0xff] %v11491_v1 }
  0x79   :  { %6446 = vst [vmem:[#allocation4 + $0x50] sm:$0xff] %v11491_v1 }
  0x7a   :  { %6447 = vst [vmem:[#allocation4 + $0x58] sm:$0x3] %v11491_v1 }
  0x7b   :  { %6448 = vst [vmem:[#allocation4 + $0x60] sm:$0xff] %v11491_v1 }
  0x7c   :  { %6449 = vst [vmem:[#allocation4 + $0x68] sm:$0xff] %v11491_v1 }
  0x7d   :  { %6450 = vst [vmem:[#allocation4 + $0x70] sm:$0x3] %v11491_v1 }
  0x7e   :  { %6451 = vst [vmem:[#allocation4 + $0x78] sm:$0xff] %v11491_v1 }
  0x7f   :  { %6452 = vst [vmem:[#allocation4 + $0x80] sm:$0xff] %v11491_v1 }
  0x80   :  { %6453 = vst [vmem:[#allocation4 + $0x88] sm:$0x3] %v11491_v1 }
  0x81   :  { %6454 = vst [vmem:[#allocation4 + $0x90] sm:$0xff] %v11491_v1 }
  0x82   :  { %6455 = vst [vmem:[#allocation4 + $0x98] sm:$0xff] %v11491_v1 }
  0x83   :  { %6456 = vst [vmem:[#allocation4 + $0xa0] sm:$0x3] %v11491_v1 }
  0x84   :  { %6457 = vst [vmem:[#allocation4 + $0xa8] sm:$0xff] %v11491_v1 }
  0x85   :  { %6458 = vst [vmem:[#allocation4 + $0xb0] sm:$0xff] %v11491_v1 }
  0x86   :  { %6459 = vst [vmem:[#allocation4 + $0xb8] sm:$0x3] %v11491_v1 }
  0x87   :  { %6460 = vst [vmem:[#allocation4 + $0xc0] sm:$0xff] %v11491_v1 }
  0x88   :  { %6461 = vst [vmem:[#allocation4 + $0xc8] sm:$0xff] %v11491_v1 }
  0x89   :  { %6462 = vst [vmem:[#allocation4 + $0xd0] sm:$0x3] %v11491_v1 }
  0x8a   :  { %6463 = vst [vmem:[#allocation4 + $0xd8] sm:$0xff] %v11491_v1 }
  0x8b   :  { %6464 = vst [vmem:[#allocation4 + $0xe0] sm:$0xff] %v11491_v1 }
  0x8c   :  { %6465 = vst [vmem:[#allocation4 + $0xe8] sm:$0x3] %v11491_v1 }
  0x8d   :  { %6466 = vst [vmem:[#allocation4 + $0xf0] sm:$0xff] %v11491_v1 }
  0x8e   :  { %6467 = vst [vmem:[#allocation4 + $0xf8] sm:$0xff] %v11491_v1 }
  0x8f   :  { %6468 = vst [vmem:[#allocation4 + $0x100] sm:$0x3] %v11491_v1 }
  0x90   :  { %6469 = vst [vmem:[#allocation4 + $0x108] sm:$0xff] %v11491_v1 }
  0x91   :  { %6470 = vst [vmem:[#allocation4 + $0x110] sm:$0xff] %v11491_v1 }
  0x92   :  { %6471 = vst [vmem:[#allocation4 + $0x118] sm:$0x3] %v11491_v1 }
  0x93   :  { %6472 = vst [vmem:[#allocation4 + $0x120] sm:$0xff] %v11491_v1 }
  0x94   :  { %6473 = vst [vmem:[#allocation4 + $0x128] sm:$0xff] %v11491_v1 }
  0x95   :  { %6474 = vst [vmem:[#allocation4 + $0x130] sm:$0x3] %v11491_v1 }
  0x96   :  { %6475 = vst [vmem:[#allocation4 + $0x138] sm:$0xff] %v11491_v1 }
  0x97   :  { %6476 = vst [vmem:[#allocation4 + $0x140] sm:$0xff] %v11491_v1 }
  0x98   :  { %6477 = vst [vmem:[#allocation4 + $0x148] sm:$0x3] %v11491_v1 }
  0x99   :  { %6478 = vst [vmem:[#allocation4 + $0x150] sm:$0xff] %v11491_v1 }
  0x9a   :  { %6479 = vst [vmem:[#allocation4 + $0x158] sm:$0xff] %v11491_v1 }
  0x9b   :  { %6480 = vst [vmem:[#allocation4 + $0x160] sm:$0x3] %v11491_v1 }
  0x9c   :  { %6481 = vst [vmem:[#allocation4 + $0x168] sm:$0xff] %v11491_v1 }
  0x9d   :  { %6482 = vst [vmem:[#allocation4 + $0x170] sm:$0xff] %v11491_v1 }
  0x9e   :  { %6483 = vst [vmem:[#allocation4 + $0x178] sm:$0x3] %v11491_v1 }
  0x9f   :  { %6484 = vst [vmem:[#allocation4 + $0x180] sm:$0xff] %v11491_v1 }
  0xa0   :  { %6485 = vst [vmem:[#allocation4 + $0x188] sm:$0xff] %v11491_v1 }
  0xa1   :  { %6486 = vst [vmem:[#allocation4 + $0x190] sm:$0x3] %v11491_v1 }
  0xa2   :  { %6490 = vst [vmem:[#allocation4 + $0x1b0] sm:$0xff] %v11491_v1 }
  0xa3   :  { %6491 = vst [vmem:[#allocation4 + $0x1b8] sm:$0xff] %v11491_v1 }
  0xa4   :  { %6492 = vst [vmem:[#allocation4 + $0x1c0] sm:$0x3] %v11491_v1 }
  0xa5   :  { %6493 = vst [vmem:[#allocation4 + $0x1c8] sm:$0xff] %v11491_v1 }
  0xa6   :  { %6494 = vst [vmem:[#allocation4 + $0x1d0] sm:$0xff] %v11491_v1 }
  0xa7   :  { %6495 = vst [vmem:[#allocation4 + $0x1d8] sm:$0x3] %v11491_v1 }
  0xa8   :  { %6496 = vst [vmem:[#allocation4 + $0x1e0] sm:$0xff] %v11491_v1 }
  0xa9   :  { %6497 = vst [vmem:[#allocation4 + $0x1e8] sm:$0xff] %v11491_v1 }
  0xaa   :  { %6498 = vst [vmem:[#allocation4 + $0x1f0] sm:$0x3] %v11491_v1 }
  0xab   :  { %6499 = vst [vmem:[#allocation4 + $0x1f8] sm:$0xff] %v11491_v1 }
  0xac   :  { %6500 = vst [vmem:[#allocation4 + $0x200] sm:$0xff] %v11491_v1 }
  0xad   :  { %6501 = vst [vmem:[#allocation4 + $0x208] sm:$0x3] %v11491_v1 }
  0xae   :  { %6502 = vst [vmem:[#allocation4 + $0x210] sm:$0xff] %v11491_v1 }
  0xaf   :  { %6503 = vst [vmem:[#allocation4 + $0x218] sm:$0xff] %v11491_v1 }
  0xb0   :  { %6504 = vst [vmem:[#allocation4 + $0x220] sm:$0x3] %v11491_v1 }
  0xb1   :  { %6505 = vst [vmem:[#allocation4 + $0x228] sm:$0xff] %v11491_v1 }
  0xb2   :  { %6506 = vst [vmem:[#allocation4 + $0x230] sm:$0xff] %v11491_v1 }
  0xb3   :  { %6507 = vst [vmem:[#allocation4 + $0x238] sm:$0x3] %v11491_v1 }
  0xb4   :  { %6508 = vst [vmem:[#allocation4 + $0x240] sm:$0xff] %v11491_v1 }
  0xb5   :  { %6509 = vst [vmem:[#allocation4 + $0x248] sm:$0xff] %v11491_v1 }
  0xb6   :  { %6510 = vst [vmem:[#allocation4 + $0x250] sm:$0x3] %v11491_v1 }
  0xb7   :  { %6511 = vst [vmem:[#allocation4 + $0x258] sm:$0xff] %v11491_v1 }
  0xb8   :  { %6512 = vst [vmem:[#allocation4 + $0x260] sm:$0xff] %v11491_v1 }
  0xb9   :  { %6513 = vst [vmem:[#allocation4 + $0x268] sm:$0x3] %v11491_v1 }
  0xba   :  { %6514 = vst [vmem:[#allocation4 + $0x270] sm:$0xff] %v11491_v1 }
  0xbb   :  { %6515 = vst [vmem:[#allocation4 + $0x278] sm:$0xff] %v11491_v1 }
  0xbc   :  { %6516 = vst [vmem:[#allocation4 + $0x280] sm:$0x3] %v11491_v1 }
  0xbd   :  { %6517 = vst [vmem:[#allocation4 + $0x288] sm:$0xff] %v11491_v1 }
  0xbe   :  { %6518 = vst [vmem:[#allocation4 + $0x290] sm:$0xff] %v11491_v1 }
  0xbf   :  { %6519 = vst [vmem:[#allocation4 + $0x298] sm:$0x3] %v11491_v1 }
  0xc0   :  { %6520 = vst [vmem:[#allocation4 + $0x2a0] sm:$0xff] %v11491_v1 }
  0xc1   :  { %6521 = vst [vmem:[#allocation4 + $0x2a8] sm:$0xff] %v11491_v1 }
  0xc2   :  { %6522 = vst [vmem:[#allocation4 + $0x2b0] sm:$0x3] %v11491_v1 }
  0xc3   :  { %6523 = vst [vmem:[#allocation4 + $0x2b8] sm:$0xff] %v11491_v1 }
  0xc4   :  { %6524 = vst [vmem:[#allocation4 + $0x2c0] sm:$0xff] %v11491_v1 }
  0xc5   :  { %6525 = vst [vmem:[#allocation4 + $0x2c8] sm:$0x3] %v11491_v1 }
  0xc6   :  { %6526 = vst [vmem:[#allocation4 + $0x2d0] sm:$0xff] %v11491_v1 }
  0xc7   :  { %6527 = vst [vmem:[#allocation4 + $0x2d8] sm:$0xff] %v11491_v1 }
  0xc8   :  { %6528 = vst [vmem:[#allocation4 + $0x2e0] sm:$0x3] %v11491_v1 }
  0xc9   :  { %6529 = vst [vmem:[#allocation4 + $0x2e8] sm:$0xff] %v11491_v1 }
  0xca   :  { %6530 = vst [vmem:[#allocation4 + $0x2f0] sm:$0xff] %v11491_v1 }
  0xcb   :  { %6531 = vst [vmem:[#allocation4 + $0x2f8] sm:$0x3] %v11491_v1 }
  0xcc   :  { %6532 = vst [vmem:[#allocation4 + $0x300] sm:$0xff] %v11491_v1 }
  0xcd   :  { %6533 = vst [vmem:[#allocation4 + $0x308] sm:$0xff] %v11491_v1 }
  0xce   :  { %6534 = vst [vmem:[#allocation4 + $0x310] sm:$0x3] %v11491_v1 }
  0xcf   :  { %6535 = vst [vmem:[#allocation4 + $0x318] sm:$0xff] %v11491_v1 }
  0xd0   :  { %6536 = vst [vmem:[#allocation4 + $0x320] sm:$0xff] %v11491_v1 }
  0xd1   :  { %6537 = vst [vmem:[#allocation4 + $0x328] sm:$0x3] %v11491_v1 }
  0xd2   :  { %6538 = vst [vmem:[#allocation4 + $0x330] sm:$0xff] %v11491_v1 }
  0xd3   :  { %6539 = vst [vmem:[#allocation4 + $0x338] sm:$0xff] %v11491_v1 }
  0xd4   :  { %6540 = vst [vmem:[#allocation4 + $0x340] sm:$0x3] %v11491_v1 }
  0xd5   :  { %249 = vst [vmem:[#allocation2 + $0x2a1] sm:$0xff] %v184_v22  ;;  %v648_v22 = vld [vmem:[#allocation2 + $0xa] sm:$0xff] }
  0xd6   :  { %250 = vst [vmem:[#allocation2 + $0x2a9] sm:$0xff] %v185_v23 }
  0xd7   :  { %253 = vst [vmem:[#allocation2 + $0x2d1] sm:$0xff] %v188_v25  ;;  %v520_v25 = vpack.c.bf16 %v456_v14, %v456_v14 }
  0xd8   :  { %254 = vst [vmem:[#allocation2 + $0x2d9] sm:$0xff] %v189_v26 }
  0xd9   :  { %257 = vst [vmem:[#allocation2 + $0x301] sm:$0xff] %v192_v29  ;;  %v712_v29 = vpack.c.bf16 %v648_v22, %v648_v22 }
  0xda   :  { %258 = vst [vmem:[#allocation2 + $0x309] sm:$0xff] %v193_v30 }
  0xdb   :  { %199 = vst [vmem:[#allocation2 + $0x19] sm:$0xff] %v11829_v32 }
  0xdc   :  { %v315_v36 = vld [vmem:[#allocation2 + $0x2a0] sm:$0xff]  ;;  %200 = vst [vmem:[#allocation2 + $0x21] sm:$0xff] %v11834_v33 }
  0xdd   :  { %v316_v37 = vld [vmem:[#allocation2 + $0x2a8] sm:$0xff]  ;;  %v379_v38 = vpack.c.bf16 %v315_v36, %v315_v36  ;;  %251 = vst [vmem:[#allocation2 + $0x2b9] sm:$0xff] %v186_v34 }
  0xde   :  { %v380_v41 = vpack.c.bf16 %v316_v37, %v316_v37  ;;  %v319_v42 = vld [vmem:[#allocation2 + $0x2d0] sm:$0xff]  ;;  %252 = vst [vmem:[#allocation2 + $0x2c1] sm:$0xff] %v187_v35 }
  0xdf   :  { %443 = vst [vmem:[#allocation3 + $0x750] sm:$0xf] %v379_v38  ;;  %v320_v43 = vld [vmem:[#allocation2 + $0x2d8] sm:$0xff]  ;;  %v383_v44 = vpack.c.bf16 %v319_v42, %v319_v42 }
  0xe0   :  { %444 = vst [vmem:[#allocation3 + $0x774] sm:$0xf] %v380_v41  ;;  %v384_v46 = vpack.c.bf16 %v320_v43, %v320_v43  ;;  %v323_v47 = vld [vmem:[#allocation2 + $0x300] sm:$0xff] }
  0xe1   :  { %447 = vst [vmem:[#allocation3 + $0x7e0] sm:$0xf] %v383_v44  ;;  %v324_v50 = vld [vmem:[#allocation2 + $0x308] sm:$0xff]  ;;  %v387_v51 = vpack.c.bf16 %v323_v47, %v323_v47  ;;  %v11913_v47 = vld [vmem:[%s14621_s0 + $0x20] sm:$0xff] }
  0xe2   :  { %448 = vst [vmem:[#allocation3 + $0x804] sm:$0xf] %v384_v46  ;;  %v388_v53 = vpack.c.bf16 %v324_v50, %v324_v50  ;;  %v265_v54 = vld [vmem:[#allocation2 + $0x18] sm:$0xff]  ;;  %v521_v50 = vpack.c.bf16 %v11829_v32, %v11829_v32 }
  0xe3   :  { %451 = vst [vmem:[#allocation3 + $0x870] sm:$0xf] %v387_v51  ;;  %v266_v55 = vld [vmem:[#allocation2 + $0x20] sm:$0xff]  ;;  %v11862_v56 = vpack.c.bf16 %v265_v54, %v265_v54 }
  0xe4   :  { %452 = vst [vmem:[#allocation3 + $0x894] sm:$0xf] %v388_v53  ;;  %v11870_v59 = vpack.c.bf16 %v266_v55, %v266_v55  ;;  %v317_v60 = vld [vmem:[#allocation2 + $0x2b8] sm:$0xff]  ;;  %v650_v51 = vld [vmem:[#allocation2 + $0x22] sm:$0xff]  ;;  %v522_v53 = vpack.c.bf16 %v11834_v33, %v11834_v33  ;;  %v11275_v33 = vld [vmem:[%s14620_s1 + $0x130] sm:$0xff] }
  0xe5   :  { %393 = vst [vmem:[#allocation3 + $0x48] sm:$0xf] %v11862_v56  ;;  %v318_v61 = vld [vmem:[#allocation2 + $0x2c0] sm:$0xff]  ;;  %v381_v62 = vpack.c.bf16 %v317_v60, %v317_v60  ;;  %v714_v58 = vpack.c.bf16 %v650_v51, %v650_v51  ;;  %5037 = vmatpush.bf16.msrb.mxu0 %v11275_v33 }
  0xe6   :  { %v9871_v1 = vld [vmem:[#allocation3 + $0x750] sm:$0xf]  ;;  %394 = vst [vmem:[#allocation3 + $0x6c] sm:$0xf] %v11870_v59  ;;  %v382_v2 = vpack.c.bf16 %v318_v61, %v318_v61  ;;  %v649_v48 = vld [vmem:[#allocation2 + $0x1a] sm:$0xff] }
  0xe7   :  { %v11187_v5 = vld [vmem:[#allocation3 + $0x770] sm:$0xf0]  ;;  %445 = vst [vmem:[#allocation3 + $0x798] sm:$0xf] %v381_v62  ;;  %v713_v55 = vpack.c.bf16 %v649_v48, %v649_v48 }
  0xe8   :  { %v9872_v8 = vor.u32 %v11187_v5, %v9871_v1  ;;  %v9943_v9 = vld [vmem:[#allocation3 + $0x7e0] sm:$0xf]  ;;  %446 = vst [vmem:[#allocation3 + $0x7bc] sm:$0xf] %v382_v2  ;;  %v11966_v48 = vld [vmem:[%s14621_s0 + $0x50] sm:$0xff] }
  0xe9   :  { %v11205_v12 = vld [vmem:[#allocation3 + $0x800] sm:$0xf0]  ;;  %255 = vst [vmem:[#allocation2 + $0x2e9] sm:$0xff] %v190_v63  ;;  %v11934_v63 = vld [vmem:[%s14621_s0 + $0x30] sm:$0xff] }
  0xea   :  { %4498 = vmatmul.bf16.vlgmr.msra.gmra.mxu1 %v9872_v8  ;;  %v9944_v15 = vor.u32 %v11205_v12, %v9943_v9  ;;  %v10015_v16 = vld [vmem:[#allocation3 + $0x870] sm:$0xf]  ;;  %256 = vst [vmem:[#allocation2 + $0x2f1] sm:$0xff] %v191_v3 }
  0xeb   :  { %v11223_v19 = vld [vmem:[#allocation3 + $0x890] sm:$0xf0]  ;;  %259 = vst [vmem:[#allocation2 + $0x319] sm:$0xff] %v194_v4 }
  0xec   :  { %4508 = vmatmul.bf16.vlgmr.msra.gmra.mxu2 %v9944_v15  ;;  %v10016_v23 = vor.u32 %v11223_v19, %v10015_v16  ;;  %v8971_v24 = vld [vmem:[#allocation3 + $0x48] sm:$0xf]  ;;  %260 = vst [vmem:[#allocation2 + $0x321] sm:$0xff] %v195_v10  ;;  %v524_v10 = vpack.c.bf16 %v11906_v20, %v11906_v20 }
  0xed   :  { %v10962_v26 = vld [vmem:[#allocation3 + $0x68] sm:$0xf0]  ;;  %201 = vst [vmem:[#allocation2 + $0x31] sm:$0xff] %v11901_v17 }
  0xee   :  { %4518 = vmatmul.bf16.vlgmr.msra.gmra.mxu3 %v10016_v23  ;;  %v8972_v28 = vor.u32 %v10962_v26, %v8971_v24  ;;  %202 = vst [vmem:[#allocation2 + $0x39] sm:$0xff] %v11906_v20  ;;  %v9907_v35 = vld [vmem:[#allocation3 + $0x798] sm:$0xf] }
  0xef   :  { %583 = vst [vmem:[#allocation3 + $0x4] sm:$0xf] %v519_v21  ;;  %v11196_v38 = vld [vmem:[#allocation3 + $0x7b8] sm:$0xf0] }
  0xf0   :  { %4373 = vmatmul.bf16.gmra.mxu0 %v8972_v28  ;;  %v321_v30 = vld [vmem:[#allocation2 + $0x2e8] sm:$0xff]  ;;  %584 = vst [vmem:[#allocation3 + $0x28] sm:$0xf] %v520_v25  ;;  %v9908_v45 = vor.u32 %v11196_v38, %v9907_v35  ;;  %v11950_v25 = vld [vmem:[%s14621_s0 + $0x40] sm:$0xff] }
  0xf1   :  { %v322_v31 = vld [vmem:[#allocation2 + $0x2f0] sm:$0xff]  ;;  %v385_v34 = vpack.c.bf16 %v321_v30, %v321_v30  ;;  %775 = vst [vmem:[#allocation3 + $0x8] sm:$0xf] %v711_v27  ;;  %v11955_v27 = vld [vmem:[%s14621_s0 + $0x48] sm:$0xff] }
  0xf2   :  { %v386_v36 = vpack.c.bf16 %v322_v31, %v322_v31  ;;  %v325_v37 = vld [vmem:[#allocation2 + $0x318] sm:$0xff]  ;;  %776 = vst [vmem:[#allocation3 + $0x2c] sm:$0xf] %v712_v29  ;;  %v525_v31 = vpack.c.bf16 %v11913_v47, %v11913_v47 }
  0xf3   :  { %449 = vst [vmem:[#allocation3 + $0x828] sm:$0xf] %v385_v34  ;;  %v326_v39 = vld [vmem:[#allocation2 + $0x320] sm:$0xff]  ;;  %v389_v40 = vpack.c.bf16 %v325_v37, %v325_v37  ;;  %v526_v34 = vpack.c.bf16 %v11919_v49, %v11919_v49 }
  0xf4   :  { %450 = vst [vmem:[#allocation3 + $0x84c] sm:$0xf] %v386_v36  ;;  %v390_v41 = vpack.c.bf16 %v326_v39, %v326_v39  ;;  %v267_v42 = vld [vmem:[#allocation2 + $0x30] sm:$0xff] }
  0xf5   :  { %453 = vst [vmem:[#allocation3 + $0x8b8] sm:$0xf] %v389_v40  ;;  %v268_v43 = vld [vmem:[#allocation2 + $0x38] sm:$0xff]  ;;  %v331_v44 = vpack.c.bf16 %v267_v42, %v267_v42 }
  0xf6   :  { %454 = vst [vmem:[#allocation3 + $0x8dc] sm:$0xf] %v390_v41  ;;  %v332_v46 = vpack.c.bf16 %v268_v43, %v268_v43  ;;  %v10949_v1 = vld [vmem:[#allocation3 + $0x4] sm:$0xf]  ;;  %v651_v3 = vld [vmem:[#allocation2 + $0x32] sm:$0xff]  ;;  %v652_v8 = vld [vmem:[#allocation2 + $0x3a] sm:$0xff] }
  0xf7   :  { %395 = vst [vmem:[#allocation3 + $0x90] sm:$0xf] %v331_v44  ;;  %v8937_v4 = vld [vmem:[#allocation3 + $0x24] sm:$0xf0]  ;;  %v715_v11 = vpack.c.bf16 %v651_v3, %v651_v3  ;;  %v716_v13 = vpack.c.bf16 %v652_v8, %v652_v8 }
  0xf8   :  { %396 = vst [vmem:[#allocation3 + $0xb4] sm:$0xf] %v332_v46  ;;  %v8940_v12 = vor.u32 %v10949_v1, %v8937_v4  ;;  %v8943_v14 = vld [vmem:[#allocation3 + $0x8] sm:$0xf] }
  0xf9   :  { %967 = vst [vmem:[#allocation3 + $0xc] sm:$0xf] %v11862_v56  ;;  %v10954_v15 = vld [vmem:[#allocation3 + $0x28] sm:$0xf0] }
  0xfa   :  { %4503 = vmatmul.bf16.gmra.mxu1 %v9908_v45  ;;  %v9979_v52 = vld [vmem:[#allocation3 + $0x828] sm:$0xf]  ;;  %968 = vst [vmem:[#allocation3 + $0x30] sm:$0xf] %v11870_v59  ;;  %v8944_v17 = vor.u32 %v10954_v15, %v8943_v14 }
  0xfb   :  { %v11214_v54 = vld [vmem:[#allocation3 + $0x848] sm:$0xf0]  ;;  %203 = vst [vmem:[#allocation2 + $0x49] sm:$0xff] %v11913_v47 }
  0xfc   :  { %v9980_v56 = vor.u32 %v11214_v54, %v9979_v52  ;;  %v10051_v57 = vld [vmem:[#allocation3 + $0x8b8] sm:$0xf]  ;;  %204 = vst [vmem:[#allocation2 + $0x51] sm:$0xff] %v11919_v49 }
  0xfd   :  { %v11232_v60 = vld [vmem:[#allocation3 + $0x8d8] sm:$0xf0]  ;;  %585 = vst [vmem:[#allocation3 + $0x4c] sm:$0xf] %v521_v50 }
  0xfe   :  { %4513 = vmatmul.bf16.gmra.mxu2 %v9980_v56  ;;  %v10052_v32 = vor.u32 %v11232_v60, %v10051_v57  ;;  %v9007_v61 = vld [vmem:[#allocation3 + $0x90] sm:$0xf]  ;;  %586 = vst [vmem:[#allocation3 + $0x70] sm:$0xf] %v522_v53  ;;  %v11971_v49 = vld [vmem:[%s14621_s0 + $0x58] sm:$0xff]  ;;  %v527_v57 = vpack.c.bf16 %v11934_v63, %v11934_v63 }
  0xff   :  { %v10971_v62 = vld [vmem:[#allocation3 + $0xb0] sm:$0xf0]  ;;  %777 = vst [vmem:[#allocation3 + $0x50] sm:$0xf] %v713_v55 }
 0x100   :  { %4523 = vmatmul.bf16.gmra.mxu3 %v10052_v32  ;;  %v9008_v59 = vor.u32 %v10971_v62, %v9007_v61  ;;  %778 = vst [vmem:[#allocation3 + $0x74] sm:$0xf] %v714_v58  ;;  %v10950_v16 = vld [vmem:[#allocation3 + $0xc] sm:$0xf] }
 0x101   :  { %969 = vst [vmem:[#allocation3 + $0x54] sm:$0xf] %v331_v44  ;;  %v8945_v18 = vld [vmem:[#allocation3 + $0x2c] sm:$0xf0] }
 0x102   :  { %4378 = vmatmul.bf16.gmra.mxu0 %v9008_v59  ;;  %v269_v2 = vld [vmem:[#allocation2 + $0x48] sm:$0xff]  ;;  %970 = vst [vmem:[#allocation3 + $0x78] sm:$0xf] %v332_v46  ;;  %v8948_v20 = vor.u32 %v10950_v16, %v8945_v18  ;;  %v528_v59 = vpack.c.bf16 %v11939_v0, %v11939_v0 }
 0x103   :  { %v270_v5 = vld [vmem:[#allocation2 + $0x50] sm:$0xff]  ;;  %v333_v6 = vpack.c.bf16 %v269_v2, %v269_v2  ;;  %205 = vst [vmem:[#allocation2 + $0x61] sm:$0xff] %v11934_v63 }
 0x104   :  { %v334_v9 = vpack.c.bf16 %v270_v5, %v270_v5  ;;  %206 = vst [vmem:[#allocation2 + $0x69] sm:$0xff] %v11939_v0  ;;  %v653_v29 = vld [vmem:[#allocation2 + $0x4a] sm:$0xff]  ;;  %v654_v30 = vld [vmem:[#allocation2 + $0x52] sm:$0xff] }
 0x105   :  { %397 = vst [vmem:[#allocation3 + $0xd8] sm:$0xf] %v333_v6  ;;  %v717_v35 = vpack.c.bf16 %v653_v29, %v653_v29  ;;  %v10958_v36 = vld [vmem:[#allocation3 + $0x4c] sm:$0xf]  ;;  %v8973_v37 = vld [vmem:[#allocation3 + $0x6c] sm:$0xf0]  ;;  %v718_v38 = vpack.c.bf16 %v654_v30, %v654_v30 }
 0x106   :  { %398 = vst [vmem:[#allocation3 + $0xfc] sm:$0xf] %v334_v9  ;;  %v8976_v39 = vor.u32 %v10958_v36, %v8973_v37  ;;  %v8979_v40 = vld [vmem:[#allocation3 + $0x50] sm:$0xf]  ;;  %v11987_v0 = vld [vmem:[%s14621_s0 + $0x68] sm:$0xff] }
 0x107   :  { %587 = vst [vmem:[#allocation3 + $0x94] sm:$0xf] %v523_v7  ;;  %v10963_v42 = vld [vmem:[#allocation3 + $0x70] sm:$0xf0]  ;;  %v11982_v7 = vld [vmem:[%s14621_s0 + $0x60] sm:$0xff] }
 0x108   :  { %588 = vst [vmem:[#allocation3 + $0xb8] sm:$0xf] %v524_v10  ;;  %v10959_v45 = vld [vmem:[#allocation3 + $0x54] sm:$0xf]  ;;  %v8980_v50 = vor.u32 %v10963_v42, %v8979_v40 }
 0x109   :  { %779 = vst [vmem:[#allocation3 + $0x98] sm:$0xf] %v715_v11  ;;  %v8981_v47 = vld [vmem:[#allocation3 + $0x74] sm:$0xf0] }
 0x10a   :  { %4537 = vmatmul.bf16.vlgmr.msrb.gmra.mxu1 %v8940_v12  ;;  %v271_v19 = vld [vmem:[#allocation2 + $0x60] sm:$0xff]  ;;  %780 = vst [vmem:[#allocation3 + $0xbc] sm:$0xf] %v716_v13  ;;  %v8984_v53 = vor.u32 %v10959_v45, %v8981_v47  ;;  %v11274_v13 = vld [vmem:[%s14620_s1 + $0x128] sm:$0xff] }
 0x10b   :  { %v272_v21 = vld [vmem:[#allocation2 + $0x68] sm:$0xff]  ;;  %v335_v22 = vpack.c.bf16 %v271_v19, %v271_v19  ;;  %971 = vst [vmem:[#allocation3 + $0x9c] sm:$0xf] %v333_v6  ;;  %5038 = vmatpush.bf16.msrb.mxu0 %v11274_v13 }
 0x10c   :  { %v9043_v23 = vld [vmem:[#allocation3 + $0xd8] sm:$0xf]  ;;  %v336_v24 = vpack.c.bf16 %v272_v21, %v272_v21  ;;  %972 = vst [vmem:[#allocation3 + $0xc0] sm:$0xf] %v334_v9  ;;  %v655_v55 = vld [vmem:[#allocation2 + $0x62] sm:$0xff]  ;;  %v656_v58 = vld [vmem:[#allocation2 + $0x6a] sm:$0xff] }
 0x10d   :  { %v10980_v26 = vld [vmem:[#allocation3 + $0xf8] sm:$0xf0]  ;;  %399 = vst [vmem:[#allocation3 + $0x120] sm:$0xf] %v335_v22  ;;  %v719_v1 = vpack.c.bf16 %v655_v55, %v655_v55  ;;  %v720_v2 = vpack.c.bf16 %v656_v58, %v656_v58 }
 0x10e   :  { %4706 = vmatmul.bf16.vlgmr.msrb.gmra.mxu2 %v8944_v17  ;;  %v9044_v28 = vor.u32 %v10980_v26, %v9043_v23  ;;  %400 = vst [vmem:[#allocation3 + $0x144] sm:$0xf] %v336_v24  ;;  %v10967_v60 = vld [vmem:[#allocation3 + $0x94] sm:$0xf]  ;;  %v529_v17 = vpack.c.bf16 %v11950_v25, %v11950_v25  ;;  %v530_v23 = vpack.c.bf16 %v11955_v27, %v11955_v27 }
 0x10f   :  { %207 = vst [vmem:[#allocation2 + $0x79] sm:$0xff] %v11950_v25  ;;  %v9009_v32 = vld [vmem:[#allocation3 + $0xb4] sm:$0xf0] }
 0x110   :  { %4875 = vmatmul.bf16.vlgmr.msrb.gmra.mxu3 %v8948_v20  ;;  %208 = vst [vmem:[#allocation2 + $0x81] sm:$0xff] %v11955_v27  ;;  %v9012_v3 = vor.u32 %v10967_v60, %v9009_v32  ;;  %v9015_v4 = vld [vmem:[#allocation3 + $0x98] sm:$0xf] }
 0x111   :  { %973 = vst [vmem:[#allocation3 + $0xe4] sm:$0xf] %v335_v22  ;;  %v10972_v5 = vld [vmem:[#allocation3 + $0xb8] sm:$0xf0] }
 0x112   :  { %4383 = vmatmul.bf16.gmra.mxu0 %v9044_v28  ;;  %974 = vst [vmem:[#allocation3 + $0x108] sm:$0xf] %v336_v24  ;;  %v10968_v6 = vld [vmem:[#allocation3 + $0x9c] sm:$0xf]  ;;  %v9016_v8 = vor.u32 %v10972_v5, %v9015_v4  ;;  %v533_v4 = vpack.c.bf16 %v11982_v7, %v11982_v7 }
 0x113   :  { %589 = vst [vmem:[#allocation3 + $0xdc] sm:$0xf] %v525_v31  ;;  %v9017_v63 = vld [vmem:[#allocation3 + $0xbc] sm:$0xf0]  ;;  %v12006_v27 = vld [vmem:[%s14621_s0 + $0x78] sm:$0xff] }
 0x114   :  { %590 = vst [vmem:[#allocation3 + $0x100] sm:$0xf] %v526_v34  ;;  %v9079_v51 = vld [vmem:[#allocation3 + $0x120] sm:$0xf]  ;;  %v9020_v11 = vor.u32 %v10968_v6, %v9017_v63  ;;  %v12001_v34 = vld [vmem:[%s14621_s0 + $0x70] sm:$0xff] }
 0x115   :  { %781 = vst [vmem:[#allocation3 + $0xe0] sm:$0xf] %v717_v35  ;;  %v10989_v52 = vld [vmem:[#allocation3 + $0x140] sm:$0xf0] }
 0x116   :  { %v273_v41 = vld [vmem:[#allocation2 + $0x78] sm:$0xff]  ;;  %782 = vst [vmem:[#allocation3 + $0x104] sm:$0xf] %v718_v38  ;;  %v9080_v54 = vor.u32 %v10989_v52, %v9079_v51  ;;  %v532_v51 = vpack.c.bf16 %v11971_v49, %v11971_v49 }
 0x117   :  { %v274_v43 = vld [vmem:[#allocation2 + $0x80] sm:$0xff]  ;;  %v337_v44 = vpack.c.bf16 %v273_v41, %v273_v41  ;;  %209 = vst [vmem:[#allocation2 + $0x91] sm:$0xff] %v11966_v48 }
 0x118   :  { %v338_v46 = vpack.c.bf16 %v274_v43, %v274_v43  ;;  %210 = vst [vmem:[#allocation2 + $0x99] sm:$0xff] %v11971_v49  ;;  %v657_v15 = vld [vmem:[#allocation2 + $0x7a] sm:$0xff]  ;;  %v658_v19 = vld [vmem:[#allocation2 + $0x82] sm:$0xff] }
 0x119   :  { %401 = vst [vmem:[#allocation3 + $0x168] sm:$0xf] %v337_v44  ;;  %v721_v24 = vpack.c.bf16 %v657_v15, %v657_v15  ;;  %v722_v26 = vpack.c.bf16 %v658_v19, %v658_v19  ;;  %v10977_v31 = vld [vmem:[#allocation3 + $0xe4] sm:$0xf]  ;;  %v9053_v25 = vld [vmem:[#allocation3 + $0x104] sm:$0xf0] }
 0x11a   :  { %4542 = vmatmul.bf16.gmra.mxu1 %v8976_v39  ;;  %402 = vst [vmem:[#allocation3 + $0x18c] sm:$0xf] %v338_v46  ;;  %v10976_v21 = vld [vmem:[#allocation3 + $0xdc] sm:$0xf]  ;;  %v9056_v38 = vor.u32 %v10977_v31, %v9053_v25  ;;  %v12022_v49 = vld [vmem:[%s14621_s0 + $0x88] sm:$0xff] }
 0x11b   :  { %975 = vst [vmem:[#allocation3 + $0x12c] sm:$0xf] %v337_v44  ;;  %v9045_v22 = vld [vmem:[#allocation3 + $0xfc] sm:$0xf0]  ;;  %v531_v44 = vpack.c.bf16 %v11966_v48, %v11966_v48 }
 0x11c   :  { %976 = vst [vmem:[#allocation3 + $0x150] sm:$0xf] %v338_v46  ;;  %v9048_v28 = vor.u32 %v10976_v21, %v9045_v22  ;;  %v9051_v29 = vld [vmem:[#allocation3 + $0xe0] sm:$0xf] }
 0x11d   :  { %591 = vst [vmem:[#allocation3 + $0x124] sm:$0xf] %v527_v57  ;;  %v10981_v30 = vld [vmem:[#allocation3 + $0x100] sm:$0xf0] }
 0x11e   :  { %4711 = vmatmul.bf16.gmra.mxu2 %v8980_v50  ;;  %v275_v56 = vld [vmem:[#allocation2 + $0x90] sm:$0xff]  ;;  %592 = vst [vmem:[#allocation3 + $0x148] sm:$0xf] %v528_v59  ;;  %v9052_v35 = vor.u32 %v10981_v30, %v9051_v29  ;;  %v12017_v48 = vld [vmem:[%s14621_s0 + $0x80] sm:$0xff]  ;;  %v535_v29 = vpack.c.bf16 %v12001_v34, %v12001_v34 }
 0x11f   :  { %v276_v61 = vld [vmem:[#allocation2 + $0x98] sm:$0xff]  ;;  %v339_v62 = vpack.c.bf16 %v275_v56, %v275_v56  ;;  %783 = vst [vmem:[#allocation3 + $0x128] sm:$0xf] %v719_v1 }
 0x120   :  { %4880 = vmatmul.bf16.gmra.mxu3 %v8984_v53  ;;  %v340_v33 = vpack.c.bf16 %v276_v61, %v276_v61  ;;  %784 = vst [vmem:[#allocation3 + $0x14c] sm:$0xf] %v720_v2  ;;  %v9115_v9 = vld [vmem:[#allocation3 + $0x168] sm:$0xf]  ;;  %v659_v41 = vld [vmem:[#allocation2 + $0x92] sm:$0xff]  ;;  %v660_v45 = vld [vmem:[#allocation2 + $0x9a] sm:$0xff] }
 0x121   :  { %403 = vst [vmem:[#allocation3 + $0x1b0] sm:$0xf] %v339_v62  ;;  %v10998_v10 = vld [vmem:[#allocation3 + $0x188] sm:$0xf0]  ;;  %v723_v52 = vpack.c.bf16 %v659_v41, %v659_v41  ;;  %v724_v53 = vpack.c.bf16 %v660_v45, %v660_v45  ;;  %v11273_v45 = vld [vmem:[%s14620_s1 + $0x120] sm:$0xff] }
 0x122   :  { %4388 = vmatmul.bf16.gmra.mxu0 %v9080_v54  ;;  %404 = vst [vmem:[#allocation3 + $0x1d4] sm:$0xf] %v340_v33  ;;  %v9116_v12 = vor.u32 %v10998_v10, %v9115_v9  ;;  %v10986_v57 = vld [vmem:[#allocation3 + $0x12c] sm:$0xf]  ;;  %v534_v9 = vpack.c.bf16 %v11987_v0, %v11987_v0 }
 0x123   :  { %211 = vst [vmem:[#allocation2 + $0xa9] sm:$0xff] %v11982_v7  ;;  %v9089_v58 = vld [vmem:[#allocation3 + $0x14c] sm:$0xf0]  ;;  %v12030_v7 = vpop.f32.mrf.mxu0  ;;  %5039 = vmatpush.bf16.msrb.mxu0 %v11273_v45 }
 0x124   :  { %212 = vst [vmem:[#allocation2 + $0xb1] sm:$0xff] %v11987_v0  ;;  %v10985_v46 = vld [vmem:[#allocation3 + $0x124] sm:$0xf]  ;;  %v12040_v0 = vld [vmem:[%s14621_s0 + $0x98] sm:$0xff] }
 0x125   :  { %977 = vst [vmem:[#allocation3 + $0x174] sm:$0xf] %v339_v62  ;;  %v9081_v47 = vld [vmem:[#allocation3 + $0x144] sm:$0xf0]  ;;  %v9092_v62 = vor.u32 %v10986_v57, %v9089_v58 }
 0x126   :  { %978 = vst [vmem:[#allocation3 + $0x198] sm:$0xf] %v340_v33  ;;  %v9084_v54 = vor.u32 %v10985_v46, %v9081_v47  ;;  %v9087_v55 = vld [vmem:[#allocation3 + $0x128] sm:$0xf] }
 0x127   :  { %593 = vst [vmem:[#allocation3 + $0x16c] sm:$0xf] %v529_v17  ;;  %v10990_v56 = vld [vmem:[#allocation3 + $0x148] sm:$0xf0] }
 0x128   :  { %594 = vst [vmem:[#allocation3 + $0x190] sm:$0xf] %v530_v23  ;;  %v9151_v36 = vld [vmem:[#allocation3 + $0x1b0] sm:$0xf]  ;;  %v9088_v60 = vor.u32 %v10990_v56, %v9087_v55  ;;  %v12063_v46 = vld [vmem:[%s14621_s0 + $0xa8] sm:$0xff] }
 0x129   :  { %785 = vst [vmem:[#allocation3 + $0x170] sm:$0xf] %v721_v24  ;;  %v11007_v37 = vld [vmem:[#allocation3 + $0x1d0] sm:$0xf0] }
 0x12a   :  { %4547 = vmatmul.bf16.gmra.mxu1 %v9012_v3  ;;  %v277_v14 = vld [vmem:[#allocation2 + $0xa8] sm:$0xff]  ;;  %786 = vst [vmem:[#allocation3 + $0x194] sm:$0xf] %v722_v26  ;;  %v9152_v39 = vor.u32 %v11007_v37, %v9151_v36  ;;  %v536_v37 = vpack.c.bf16 %v12006_v27, %v12006_v27 }
 0x12b   :  { %v278_v16 = vld [vmem:[#allocation2 + $0xb0] sm:$0xff]  ;;  %v341_v18 = vpack.c.bf16 %v277_v14, %v277_v14  ;;  %213 = vst [vmem:[#allocation2 + $0xc1] sm:$0xff] %v12001_v34 }
 0x12c   :  { %v342_v20 = vpack.c.bf16 %v278_v16, %v278_v16  ;;  %214 = vst [vmem:[#allocation2 + $0xc9] sm:$0xff] %v12006_v27  ;;  %v661_v1 = vld [vmem:[#allocation2 + $0xaa] sm:$0xff]  ;;  %v662_v5 = vld [vmem:[#allocation2 + $0xb2] sm:$0xff]  ;;  %v12058_v27 = vld [vmem:[%s14621_s0 + $0xa0] sm:$0xff] }
 0x12d   :  { %405 = vst [vmem:[#allocation3 + $0x1f8] sm:$0xf] %v341_v18  ;;  %v725_v10 = vpack.c.bf16 %v661_v1, %v661_v1  ;;  %v10995_v15 = vld [vmem:[#allocation3 + $0x174] sm:$0xf]  ;;  %v9125_v16 = vld [vmem:[#allocation3 + $0x194] sm:$0xf0] }
 0x12e   :  { %4716 = vmatmul.bf16.gmra.mxu2 %v9016_v8  ;;  %406 = vst [vmem:[#allocation3 + $0x21c] sm:$0xf] %v342_v20  ;;  %v10994_v6 = vld [vmem:[#allocation3 + $0x16c] sm:$0xf]  ;;  %v9128_v22 = vor.u32 %v10995_v15, %v9125_v16 }
 0x12f   :  { %979 = vst [vmem:[#allocation3 + $0x1bc] sm:$0xf] %v341_v18  ;;  %v9117_v63 = vld [vmem:[#allocation3 + $0x18c] sm:$0xf0] }
 0x130   :  { %4885 = vmatmul.bf16.gmra.mxu3 %v9020_v11  ;;  %980 = vst [vmem:[#allocation3 + $0x1e0] sm:$0xf] %v342_v20  ;;  %v726_v11 = vpack.c.bf16 %v662_v5, %v662_v5  ;;  %v9123_v13 = vld [vmem:[#allocation3 + $0x170] sm:$0xf] }
 0x131   :  { %595 = vst [vmem:[#allocation3 + $0x1b4] sm:$0xf] %v531_v44  ;;  %v10999_v14 = vld [vmem:[#allocation3 + $0x190] sm:$0xf0] }
 0x132   :  { %4393 = vmatmul.bf16.gmra.mxu0 %v9116_v12  ;;  %v279_v40 = vld [vmem:[#allocation2 + $0xc0] sm:$0xff]  ;;  %596 = vst [vmem:[#allocation3 + $0x1d8] sm:$0xf] %v532_v51  ;;  %v9120_v12 = vor.u32 %v10994_v6, %v9117_v63  ;;  %v12035_v18 = vld [vmem:[%s14621_s0 + $0x90] sm:$0xff]  ;;  %v9124_v17 = vor.u32 %v10999_v14, %v9123_v13  ;;  %v12095_v14 = vld [vmem:[%s14621_s0 + $0xb8] sm:$0xff] }
 0x133   :  { %v280_v42 = vld [vmem:[#allocation2 + $0xc8] sm:$0xff]  ;;  %v343_v43 = vpack.c.bf16 %v279_v40, %v279_v40  ;;  %787 = vst [vmem:[#allocation3 + $0x1b8] sm:$0xf] %v723_v52  ;;  %v12090_v13 = vld [vmem:[%s14621_s0 + $0xb0] sm:$0xff] }
 0x134   :  { %v344_v50 = vpack.c.bf16 %v280_v42, %v280_v42  ;;  %788 = vst [vmem:[#allocation3 + $0x1dc] sm:$0xf] %v724_v53  ;;  %v9187_v32 = vld [vmem:[#allocation3 + $0x1f8] sm:$0xf]  ;;  %v663_v24 = vld [vmem:[#allocation2 + $0xc2] sm:$0xff]  ;;  %v664_v30 = vld [vmem:[#allocation2 + $0xca] sm:$0xff] }
 0x135   :  { %407 = vst [vmem:[#allocation3 + $0x240] sm:$0xf] %v343_v43  ;;  %v11016_v61 = vld [vmem:[#allocation3 + $0x218] sm:$0xf0] }
 0x136   :  { %408 = vst [vmem:[#allocation3 + $0x264] sm:$0xf] %v344_v50  ;;  %v9188_v59 = vor.u32 %v11016_v61, %v9187_v32  ;;  %v11004_v34 = vld [vmem:[#allocation3 + $0x1bc] sm:$0xf] }
 0x137   :  { %215 = vst [vmem:[#allocation2 + $0xd9] sm:$0xff] %v12017_v48  ;;  %v9161_v44 = vld [vmem:[#allocation3 + $0x1dc] sm:$0xf0] }
 0x138   :  { %216 = vst [vmem:[#allocation2 + $0xe1] sm:$0xff] %v12022_v49  ;;  %v11003_v31 = vld [vmem:[#allocation3 + $0x1b4] sm:$0xf]  ;;  %v9164_v52 = vor.u32 %v11004_v34, %v9161_v44 }
 0x139   :  { %981 = vst [vmem:[#allocation3 + $0x204] sm:$0xf] %v343_v43  ;;  %v9153_v25 = vld [vmem:[#allocation3 + $0x1d4] sm:$0xf0] }
 0x13a   :  { %4552 = vmatmul.bf16.gmra.mxu1 %v9048_v28  ;;  %982 = vst [vmem:[#allocation3 + $0x228] sm:$0xf] %v344_v50  ;;  %v9156_v40 = vor.u32 %v11003_v31, %v9153_v25  ;;  %v9159_v42 = vld [vmem:[#allocation3 + $0x1b8] sm:$0xf] }
 0x13b   :  { %597 = vst [vmem:[#allocation3 + $0x1fc] sm:$0xf] %v533_v4  ;;  %v11008_v43 = vld [vmem:[#allocation3 + $0x1d8] sm:$0xf0] }
 0x13c   :  { %598 = vst [vmem:[#allocation3 + $0x220] sm:$0xf] %v534_v9  ;;  %v9223_v19 = vld [vmem:[#allocation3 + $0x240] sm:$0xf]  ;;  %v9160_v47 = vor.u32 %v11008_v43, %v9159_v42 }
 0x13d   :  { %789 = vst [vmem:[#allocation3 + $0x200] sm:$0xf] %v725_v10  ;;  %v11025_v21 = vld [vmem:[#allocation3 + $0x260] sm:$0xf0] }
 0x13e   :  { %4721 = vmatmul.bf16.gmra.mxu2 %v9052_v35  ;;  %v281_v33 = vld [vmem:[#allocation2 + $0xd8] sm:$0xff]  ;;  %790 = vst [vmem:[#allocation3 + $0x224] sm:$0xf] %v726_v11  ;;  %v9224_v20 = vor.u32 %v11025_v21, %v9223_v19  ;;  %v12046_v35 = vpop.f32.mrf.mxu0 }
 0x13f   :  { %v282_v2 = vld [vmem:[#allocation2 + $0xe0] sm:$0xff]  ;;  %v345_v3 = vpack.c.bf16 %v281_v33, %v281_v33  ;;  %217 = vst [vmem:[#allocation2 + $0xf1] sm:$0xff] %v12035_v18 }
 0x140   :  { %4890 = vmatmul.bf16.gmra.mxu3 %v9056_v38  ;;  %v346_v8 = vpack.c.bf16 %v282_v2, %v282_v2  ;;  %218 = vst [vmem:[#allocation2 + $0xf9] sm:$0xff] %v12040_v0  ;;  %v727_v38 = vpack.c.bf16 %v663_v24, %v663_v24  ;;  %v11013_v11 = vld [vmem:[#allocation3 + $0x204] sm:$0xf] }
 0x141   :  { %409 = vst [vmem:[#allocation3 + $0x288] sm:$0xf] %v345_v3 }
 0x142   :  { %4398 = vmatmul.bf16.gmra.mxu0 %v9152_v39  ;;  %410 = vst [vmem:[#allocation3 + $0x2ac] sm:$0xf] %v346_v8  ;;  %v728_v39 = vpack.c.bf16 %v664_v30, %v664_v30  ;;  %v11012_v33 = vld [vmem:[#allocation3 + $0x1fc] sm:$0xf]  ;;  %v539_v30 = vpack.c.bf16 %v12035_v18, %v12035_v18 }
 0x143   :  { %983 = vst [vmem:[#allocation3 + $0x24c] sm:$0xf] %v345_v3  ;;  %v9189_v1 = vld [vmem:[#allocation3 + $0x21c] sm:$0xf0]  ;;  %v538_v3 = vpack.c.bf16 %v12022_v49, %v12022_v49  ;;  %v9197_v49 = vld [vmem:[#allocation3 + $0x224] sm:$0xf0] }
 0x144   :  { %984 = vst [vmem:[#allocation3 + $0x270] sm:$0xf] %v346_v8  ;;  %v9192_v63 = vor.u32 %v11012_v33, %v9189_v1  ;;  %v9200_v19 = vor.u32 %v11013_v11, %v9197_v49 }
 0x145   :  { %599 = vst [vmem:[#allocation3 + $0x244] sm:$0xf] %v535_v29  ;;  %v11017_v10 = vld [vmem:[#allocation3 + $0x220] sm:$0xf0] }
 0x146   :  { %v283_v23 = vld [vmem:[#allocation2 + $0xf0] sm:$0xff]  ;;  %600 = vst [vmem:[#allocation3 + $0x268] sm:$0xf] %v536_v37 }
 0x147   :  { %v284_v26 = vld [vmem:[#allocation2 + $0xf8] sm:$0xff]  ;;  %v347_v28 = vpack.c.bf16 %v283_v23, %v283_v23  ;;  %791 = vst [vmem:[#allocation3 + $0x248] sm:$0xf] %v727_v38 }
 0x148   :  { %v348_v36 = vpack.c.bf16 %v284_v26, %v284_v26  ;;  %792 = vst [vmem:[#allocation3 + $0x26c] sm:$0xf] %v728_v39  ;;  %v9259_v50 = vld [vmem:[#allocation3 + $0x288] sm:$0xf]  ;;  %v667_v26 = vld [vmem:[#allocation2 + $0xf2] sm:$0xff]  ;;  %v668_v31 = vld [vmem:[#allocation2 + $0xfa] sm:$0xff]  ;;  %v540_v39 = vpack.c.bf16 %v12040_v0, %v12040_v0 }
 0x149   :  { %411 = vst [vmem:[#allocation3 + $0x2d0] sm:$0xf] %v347_v28  ;;  %v11034_v51 = vld [vmem:[#allocation3 + $0x2a8] sm:$0xf0]  ;;  %v732_v42 = vpack.c.bf16 %v668_v31, %v668_v31  ;;  %v12119_v0 = vld [vmem:[%s14621_s0 + $0xc0] sm:$0xff] }
 0x14a   :  { %4557 = vmatmul.bf16.gmra.mxu1 %v9084_v54  ;;  %412 = vst [vmem:[#allocation3 + $0x2f4] sm:$0xf] %v348_v36  ;;  %v9260_v54 = vor.u32 %v11034_v51, %v9259_v50  ;;  %v11022_v50 = vld [vmem:[#allocation3 + $0x24c] sm:$0xf] }
 0x14b   :  { %219 = vst [vmem:[#allocation2 + $0x109] sm:$0xff] %v12058_v27 }
 0x14c   :  { %220 = vst [vmem:[#allocation2 + $0x111] sm:$0xff] %v12063_v46 }
 0x14d   :  { %985 = vst [vmem:[#allocation3 + $0x294] sm:$0xf] %v347_v28  ;;  %v9225_v37 = vld [vmem:[#allocation3 + $0x264] sm:$0xf0] }
 0x14e   :  { %4726 = vmatmul.bf16.gmra.mxu2 %v9088_v60  ;;  %986 = vst [vmem:[#allocation3 + $0x2b8] sm:$0xf] %v348_v36  ;;  %v665_v60 = vld [vmem:[#allocation2 + $0xda] sm:$0xff]  ;;  %v11021_v36 = vld [vmem:[#allocation3 + $0x244] sm:$0xf] }
 0x14f   :  { %v729_v4 = vpack.c.bf16 %v665_v60, %v665_v60  ;;  %602 = vst [vmem:[#allocation3 + $0x2b0] sm:$0xf] %v538_v3  ;;  %v9228_v43 = vor.u32 %v11021_v36, %v9225_v37  ;;  %v9231_v44 = vld [vmem:[#allocation3 + $0x248] sm:$0xf]  ;;  %v11026_v45 = vld [vmem:[#allocation3 + $0x268] sm:$0xf0] }
 0x150   :  { %4895 = vmatmul.bf16.gmra.mxu3 %v9092_v62  ;;  %v537_v62 = vpack.c.bf16 %v12017_v48, %v12017_v48  ;;  %v9195_v48 = vld [vmem:[#allocation3 + $0x200] sm:$0xf]  ;;  %221 = vst [vmem:[#allocation2 + $0x121] sm:$0xff] %v12090_v13  ;;  %v9295_v16 = vld [vmem:[#allocation3 + $0x2d0] sm:$0xf] }
 0x151   :  { %793 = vst [vmem:[#allocation3 + $0x290] sm:$0xf] %v729_v4  ;;  %v9196_v15 = vor.u32 %v11017_v10, %v9195_v48  ;;  %v541_v10 = vpack.c.bf16 %v12058_v27, %v12058_v27 }
 0x152   :  { %4403 = vmatmul.bf16.gmra.mxu0 %v9188_v59  ;;  %v285_v58 = vld [vmem:[#allocation2 + $0x108] sm:$0xff]  ;;  %601 = vst [vmem:[#allocation3 + $0x28c] sm:$0xf] %v537_v62 }
 0x153   :  { %v286_v32 = vld [vmem:[#allocation2 + $0x110] sm:$0xff]  ;;  %v349_v61 = vpack.c.bf16 %v285_v58, %v285_v58  ;;  %v666_v59 = vld [vmem:[#allocation2 + $0xe2] sm:$0xff]  ;;  %222 = vst [vmem:[#allocation2 + $0x129] sm:$0xff] %v12095_v14  ;;  %v9232_v58 = vor.u32 %v11026_v45, %v9231_v44 }
 0x154   :  { %v350_v2 = vpack.c.bf16 %v286_v32, %v286_v32  ;;  %v730_v6 = vpack.c.bf16 %v666_v59, %v666_v59  ;;  %603 = vst [vmem:[#allocation3 + $0x2d4] sm:$0xf] %v539_v30  ;;  %v669_v4 = vld [vmem:[#allocation2 + $0x10a] sm:$0xff]  ;;  %v670_v11 = vld [vmem:[#allocation2 + $0x112] sm:$0xff] }
 0x155   :  { %413 = vst [vmem:[#allocation3 + $0x318] sm:$0xf] %v349_v61  ;;  %v11031_v36 = vld [vmem:[#allocation3 + $0x294] sm:$0xf] }
 0x156   :  { %414 = vst [vmem:[#allocation3 + $0x33c] sm:$0xf] %v350_v2 }
 0x157   :  { %794 = vst [vmem:[#allocation3 + $0x2b4] sm:$0xf] %v730_v6  ;;  %v287_v24 = vld [vmem:[#allocation2 + $0x120] sm:$0xff] }
 0x158   :  { %987 = vst [vmem:[#allocation3 + $0x2dc] sm:$0xf] %v349_v61  ;;  %v351_v29 = vpack.c.bf16 %v287_v24, %v287_v24  ;;  %v734_v24 = vpack.c.bf16 %v670_v11, %v670_v11  ;;  %v544_v11 = vpack.c.bf16 %v12095_v14, %v12095_v14 }
 0x159   :  { %988 = vst [vmem:[#allocation3 + $0x300] sm:$0xf] %v350_v2 }
 0x15a   :  { %4562 = vmatmul.bf16.gmra.mxu1 %v9120_v12  ;;  %v288_v28 = vld [vmem:[#allocation2 + $0x128] sm:$0xff]  ;;  %415 = vst [vmem:[#allocation3 + $0x360] sm:$0xf] %v351_v29 }
 0x15b   :  { %v352_v38 = vpack.c.bf16 %v288_v28, %v288_v28  ;;  %604 = vst [vmem:[#allocation3 + $0x2f8] sm:$0xf] %v540_v39  ;;  %v12150_v39 = vld [vmem:[%s14621_s0 + $0xd8] sm:$0xff] }
 0x15c   :  { %796 = vst [vmem:[#allocation3 + $0x2fc] sm:$0xf] %v732_v42  ;;  %v9331_v60 = vld [vmem:[#allocation3 + $0x318] sm:$0xf] }
 0x15d   :  { %416 = vst [vmem:[#allocation3 + $0x384] sm:$0xf] %v352_v38  ;;  %v11052_v32 = vld [vmem:[#allocation3 + $0x338] sm:$0xf0] }
 0x15e   :  { %4731 = vmatmul.bf16.gmra.mxu2 %v9124_v17  ;;  %v11043_v17 = vld [vmem:[#allocation3 + $0x2f0] sm:$0xf0]  ;;  %223 = vst [vmem:[#allocation2 + $0x139] sm:$0xff] %v12119_v0  ;;  %v9332_v62 = vor.u32 %v11052_v32, %v9331_v60 }
 0x15f   :  { %v9296_v21 = vor.u32 %v11043_v17, %v9295_v16  ;;  %989 = vst [vmem:[#allocation3 + $0x324] sm:$0xf] %v351_v29  ;;  %v9261_v16 = vld [vmem:[#allocation3 + $0x2ac] sm:$0xf0]  ;;  %v11035_v30 = vld [vmem:[#allocation3 + $0x2b0] sm:$0xf0] }
 0x160   :  { %4900 = vmatmul.bf16.gmra.mxu3 %v9128_v22  ;;  %990 = vst [vmem:[#allocation3 + $0x348] sm:$0xf] %v352_v38  ;;  %v9267_v29 = vld [vmem:[#allocation3 + $0x290] sm:$0xf]  ;;  %v9305_v14 = vld [vmem:[#allocation3 + $0x2fc] sm:$0xf0] }
 0x161   :  { %605 = vst [vmem:[#allocation3 + $0x31c] sm:$0xf] %v541_v10  ;;  %v12145_v38 = vld [vmem:[%s14621_s0 + $0xd0] sm:$0xff]  ;;  %v9268_v42 = vor.u32 %v11035_v30, %v9267_v29  ;;  %v12174_v29 = vld [vmem:[%s14621_s0 + $0xe0] sm:$0xff]  ;;  %v12179_v30 = vld [vmem:[%s14621_s0 + $0xe8] sm:$0xff] }
 0x162   :  { %4408 = vmatmul.bf16.gmra.mxu0 %v9224_v20  ;;  %798 = vst [vmem:[#allocation3 + $0x344] sm:$0xf] %v734_v24 }
 0x163   :  { %225 = vst [vmem:[#allocation2 + $0x151] sm:$0xff] %v12145_v38 }
 0x164   :  { %226 = vst [vmem:[#allocation2 + $0x159] sm:$0xff] %v12150_v39 }
 0x165   :  { %v289_v3 = vld [vmem:[#allocation2 + $0x138] sm:$0xff]  ;;  %608 = vst [vmem:[#allocation3 + $0x388] sm:$0xf] %v544_v11 }
 0x166   :  { %v353_v48 = vpack.c.bf16 %v289_v3, %v289_v3  ;;  %v543_v3 = vpack.c.bf16 %v12090_v13, %v12090_v13  ;;  %227 = vst [vmem:[#allocation2 + $0x169] sm:$0xff] %v12174_v29 }
 0x167   :  { %v12050_v41 = vpop.f32.mrf.mxu1  ;;  %228 = vst [vmem:[#allocation2 + $0x171] sm:$0xff] %v12179_v30 }
 0x168   :  { %417 = vst [vmem:[#allocation3 + $0x3a8] sm:$0xf] %v353_v48 }
 0x169   :  { %991 = vst [vmem:[#allocation3 + $0x36c] sm:$0xf] %v353_v48  ;;  %v9297_v48 = vld [vmem:[#allocation3 + $0x2f4] sm:$0xf0] }
 0x16a   :  { %4567 = vmatmul.bf16.gmra.mxu1 %v9156_v40  ;;  %v731_v40 = vpack.c.bf16 %v667_v26, %v667_v26  ;;  %607 = vst [vmem:[#allocation3 + $0x364] sm:$0xf] %v543_v3 }
 0x16c   :  { %795 = vst [vmem:[#allocation3 + $0x2d8] sm:$0xf] %v731_v40 }
 0x16d   :  { %v12067_v53 = vpop.f32.mrf.mxu0 }
 0x16e   :  { %4736 = vmatmul.bf16.gmra.mxu2 %v9160_v47 }
 0x16f   :  { %v12069_v55 = vpop.f32.mrf.mxu2  ;;  %v12071_v56 = vpop.f32.mrf.mxu1 }
 0x170   :  { %4905 = vmatmul.bf16.gmra.mxu3 %v9164_v52  ;;  %v9233_v52 = vld [vmem:[#allocation3 + $0x26c] sm:$0xf0] }
 0x171   :  { %v12073_v57 = vpop.f32.mrf.mxu3  ;;  %v9236_v61 = vor.u32 %v11022_v50, %v9233_v52  ;;  %v11272_v50 = vld [vmem:[%s14620_s1 + $0x118] sm:$0xff] }
 0x172   :  { %4413 = vmatmul.bf16.gmra.mxu0 %v9260_v54  ;;  %v12124_v54 = vld [vmem:[%s14621_s0 + $0xc8] sm:$0xff] }
 0x173   :  { %224 = vst [vmem:[#allocation2 + $0x141] sm:$0xff] %v12124_v54  ;;  %5040 = vmatpush.bf16.msrb.mxu0 %v11272_v50  ;;  %v293_v50 = vld [vmem:[#allocation2 + $0x168] sm:$0xff] }
 0x175   :  { %v12079_v5 = vpop.f32.mrf.mxu0 }
 0x177   :  { %v12081_v8 = vpop.f32.mrf.mxu2  ;;  %v12083_v9 = vpop.f32.mrf.mxu1 }
 0x179   :  { %v12085_v12 = vpop.f32.mrf.mxu3 }
 0x17a   :  { %4572 = vmatmul.bf16.gmra.mxu1 %v9192_v63  ;;  %v290_v63 = vld [vmem:[#allocation2 + $0x140] sm:$0xff] }
 0x17b   :  { %v354_v17 = vpack.c.bf16 %v290_v63, %v290_v63  ;;  %v11039_v63 = vld [vmem:[#allocation3 + $0x2d4] sm:$0xf] }
 0x17d   :  { %418 = vst [vmem:[#allocation3 + $0x3cc] sm:$0xf] %v354_v17 }
 0x17e   :  { %4741 = vmatmul.bf16.gmra.mxu2 %v9196_v15  ;;  %v11030_v15 = vld [vmem:[#allocation3 + $0x28c] sm:$0xf]  ;;  %992 = vst [vmem:[#allocation3 + $0x390] sm:$0xf] %v354_v17 }
 0x17f   :  { %v12099_v22 = vpop.f32.mrf.mxu1  ;;  %v12101_v20 = vpop.f32.mrf.mxu0  ;;  %v9264_v26 = vor.u32 %v11030_v15, %v9261_v16  ;;  %v9300_v16 = vor.u32 %v11039_v63, %v9297_v48 }
 0x180   :  { %4910 = vmatmul.bf16.gmra.mxu3 %v9200_v19  ;;  %v542_v19 = vpack.c.bf16 %v12063_v46, %v12063_v46  ;;  %v9269_v46 = vld [vmem:[#allocation3 + $0x2b4] sm:$0xf0] }
 0x181   :  { %v12103_v23 = vpop.f32.mrf.mxu2  ;;  %v9272_v45 = vor.u32 %v11031_v36, %v9269_v46 }
 0x182   :  { %4418 = vmatmul.bf16.gmra.mxu0 %v9296_v21  ;;  %606 = vst [vmem:[#allocation3 + $0x340] sm:$0xf] %v542_v19  ;;  %v9303_v19 = vld [vmem:[#allocation3 + $0x2d8] sm:$0xf] }
 0x183   :  { %v12107_v25 = vpop.f32.mrf.mxu3 }
 0x184   :  { %v11070_v46 = vld [vmem:[#allocation3 + $0x3c8] sm:$0xf0] }
 0x187   :  { %v4538_v34 = vpop.f32.mrf.mxu1  ;;  %v12111_v47 = vpop.f32.mrf.mxu0 }
 0x188   :  { %v4539_v18 = vadd.f32 %v4538_v34, %v12030_v7  ;;  %v11061_v34 = vld [vmem:[#allocation3 + $0x380] sm:$0xf0] }
 0x189   :  { %v12114_v51 = vpop.f32.mrf.mxu2  ;;  %v9333_v3 = vld [vmem:[#allocation3 + $0x33c] sm:$0xf0] }
 0x18a   :  { %4577 = vmatmul.bf16.gmra.mxu1 %v9228_v43  ;;  %v9367_v43 = vld [vmem:[#allocation3 + $0x360] sm:$0xf] }
 0x18b   :  { %v12127_v7 = vpop.f32.mrf.mxu3 }
 0x18e   :  { %4746 = vmatmul.bf16.gmra.mxu2 %v9232_v58 }
 0x18f   :  { %v4540_v59 = vpop.f32.mrf.mxu1  ;;  %v12130_v33 = vpop.f32.mrf.mxu0 }
 0x190   :  { %4915 = vmatmul.bf16.gmra.mxu3 %v9236_v61  ;;  %v4541_v1 = vadd.f32 %v4540_v59, %v12046_v35  ;;  %v733_v35 = vpack.c.bf16 %v669_v4, %v669_v4  ;;  %v291_v61 = vld [vmem:[#allocation2 + $0x150] sm:$0xff] }
 0x191   :  { %v4707_v2 = vpop.f32.mrf.mxu2  ;;  %v672_v4 = vld [vmem:[#allocation2 + $0x12a] sm:$0xff] }
 0x192   :  { %v4708_v6 = vadd.f32 %v4707_v2, %v4539_v18  ;;  %4423 = vmatmul.bf16.gmra.mxu0 %v9332_v62  ;;  %797 = vst [vmem:[#allocation3 + $0x320] sm:$0xf] %v733_v35  ;;  %v9368_v18 = vor.u32 %v11061_v34, %v9367_v43  ;;  %v671_v62 = vld [vmem:[#allocation2 + $0x122] sm:$0xff]  ;;  %v355_v2 = vpack.c.bf16 %v291_v61, %v291_v61  ;;  %v11044_v35 = vld [vmem:[#allocation3 + $0x2f8] sm:$0xf0] }
 0x193   :  { %v4876_v49 = vpop.f32.mrf.mxu3  ;;  %v736_v15 = vpack.c.bf16 %v672_v4, %v672_v4  ;;  %v9304_v36 = vor.u32 %v11044_v35, %v9303_v19  ;;  %v357_v61 = vpack.c.bf16 %v293_v50, %v293_v50  ;;  %v11049_v19 = vld [vmem:[#allocation3 + $0x324] sm:$0xf]  ;;  %v547_v50 = vpack.c.bf16 %v12145_v38, %v12145_v38 }
 0x194   :  { %v12137_v21 = vadd.f32 %v4876_v49, %v4708_v6  ;;  %419 = vst [vmem:[#allocation3 + $0x3f0] sm:$0xf] %v355_v2  ;;  %v735_v49 = vpack.c.bf16 %v671_v62, %v671_v62  ;;  %v545_v62 = vpack.c.bf16 %v12119_v0, %v12119_v0 }
 0x195   :  { %800 = vst [vmem:[#allocation3 + $0x38c] sm:$0xf] %v736_v15  ;;  %v11053_v15 = vld [vmem:[#allocation3 + $0x340] sm:$0xf0] }
 0x196   :  { %799 = vst [vmem:[#allocation3 + $0x368] sm:$0xf] %v735_v49 }
 0x197   :  { %v4543_v28 = vpop.f32.mrf.mxu1  ;;  %v12139_v27 = vpop.f32.mrf.mxu0  ;;  %993 = vst [vmem:[#allocation3 + $0x3b4] sm:$0xf] %v355_v2  ;;  %v11048_v2 = vld [vmem:[#allocation3 + $0x31c] sm:$0xf] }
 0x198   :  { %v4544_v31 = vadd.f32 %v4543_v28, %v12067_v53  ;;  %421 = vst [vmem:[#allocation3 + $0x438] sm:$0xf] %v357_v61 }
 0x199   :  { %v4709_v37 = vpop.f32.mrf.mxu2  ;;  %609 = vst [vmem:[#allocation3 + $0x3ac] sm:$0xf] %v545_v62  ;;  %v9339_v49 = vld [vmem:[#allocation3 + $0x320] sm:$0xf]  ;;  %v548_v62 = vpack.c.bf16 %v12150_v39, %v12150_v39  ;;  %v9377_v39 = vld [vmem:[#allocation3 + $0x38c] sm:$0xf0] }
 0x19a   :  { %v4710_v40 = vadd.f32 %v4709_v37, %v4541_v1  ;;  %4582 = vmatmul.bf16.gmra.mxu1 %v9264_v26  ;;  %v292_v1 = vld [vmem:[#allocation2 + $0x158] sm:$0xff]  ;;  %v9403_v37 = vld [vmem:[#allocation3 + $0x3a8] sm:$0xf]  ;;  %995 = vst [vmem:[#allocation3 + $0x3fc] sm:$0xf] %v357_v61 }
 0x19b   :  { %v4878_v53 = vpop.f32.mrf.mxu3  ;;  %v356_v10 = vpack.c.bf16 %v292_v1, %v292_v1  ;;  %v11040_v26 = vld [vmem:[#allocation3 + $0x2dc] sm:$0xf]  ;;  %v9369_v61 = vld [vmem:[#allocation3 + $0x384] sm:$0xf0]  ;;  %611 = vst [vmem:[#allocation3 + $0x3f4] sm:$0xf] %v547_v50  ;;  %v549_v50 = vpack.c.bf16 %v12174_v29, %v12174_v29 }
 0x19c   :  { %v12154_v44 = vadd.f32 %v4878_v53, %v4710_v40  ;;  %v9404_v53 = vor.u32 %v11070_v46, %v9403_v37  ;;  %612 = vst [vmem:[#allocation3 + $0x418] sm:$0xf] %v548_v62 }
 0x19d   :  { %420 = vst [vmem:[#allocation3 + $0x414] sm:$0xf] %v356_v10 }
 0x19e   :  { %4751 = vmatmul.bf16.gmra.mxu2 %v9268_v42  ;;  %v9308_v42 = vor.u32 %v11040_v26, %v9305_v14  ;;  %994 = vst [vmem:[#allocation3 + $0x3d8] sm:$0xf] %v356_v10  ;;  %v9336_v10 = vor.u32 %v11048_v2, %v9333_v3 }
 0x19f   :  { %v4545_v52 = vpop.f32.mrf.mxu1  ;;  %v12159_v58 = vpop.f32.mrf.mxu0  ;;  %613 = vst [vmem:[#allocation3 + $0x43c] sm:$0xf] %v549_v50  ;;  %v487_v50 = vld [vmem:[#allocation2 + $0x1b1] sm:$0xff] }
 0x1a0   :  { %4920 = vmatmul.bf16.gmra.mxu3 %v9272_v45  ;;  %v4546_v60 = vadd.f32 %v4545_v52, %v12079_v5  ;;  %v673_v52 = vld [vmem:[#allocation2 + $0x13a] sm:$0xff] }
 0x1a1   :  { %v4712_v32 = vpop.f32.mrf.mxu2 }
 0x1a2   :  { %v4713_v59 = vadd.f32 %v4712_v32, %v4544_v31  ;;  %4428 = vmatmul.bf16.gmra.mxu0 %v9368_v18  ;;  %v294_v32 = vld [vmem:[#allocation2 + $0x170] sm:$0xff] }
 0x1a3   :  { %v4881_v6 = vpop.f32.mrf.mxu3  ;;  %v358_v4 = vpack.c.bf16 %v294_v32, %v294_v32  ;;  %v11057_v32 = vld [vmem:[#allocation3 + $0x364] sm:$0xf] }
 0x1a4   :  { %v12166_v5 = vadd.f32 %v4881_v6, %v4713_v59  ;;  %v674_v59 = vld [vmem:[#allocation2 + $0x142] sm:$0xff]  ;;  %v546_v6 = vpack.c.bf16 %v12124_v54, %v12124_v54  ;;  %v11079_v14 = vld [vmem:[#allocation3 + $0x410] sm:$0xf0]  ;;  %v9372_v2 = vor.u32 %v11057_v32, %v9369_v61  ;;  %v11066_v32 = vld [vmem:[#allocation3 + $0x3ac] sm:$0xf] }
 0x1a5   :  { %422 = vst [vmem:[#allocation3 + $0x45c] sm:$0xf] %v358_v4  ;;  %v738_v48 = vpack.c.bf16 %v674_v59, %v674_v59  ;;  %v9341_v54 = vld [vmem:[#allocation3 + $0x344] sm:$0xf0] }
 0x1a6   :  { %610 = vst [vmem:[#allocation3 + $0x3d0] sm:$0xf] %v546_v6  ;;  %v11062_v6 = vld [vmem:[#allocation3 + $0x388] sm:$0xf0] }
 0x1a7   :  { %v4548_v17 = vpop.f32.mrf.mxu1  ;;  %v12168_v13 = vpop.f32.mrf.mxu0  ;;  %802 = vst [vmem:[#allocation3 + $0x3d4] sm:$0xf] %v738_v48  ;;  %v11058_v48 = vld [vmem:[#allocation3 + $0x36c] sm:$0xf] }
 0x1a8   :  { %v4549_v24 = vadd.f32 %v4548_v17, %v12101_v20  ;;  %996 = vst [vmem:[#allocation3 + $0x420] sm:$0xf] %v358_v4  ;;  %v9375_v4 = vld [vmem:[#allocation3 + $0x368] sm:$0xf] }
 0x1a9   :  { %v4714_v28 = vpop.f32.mrf.mxu2 }
 0x1aa   :  { %v4715_v31 = vadd.f32 %v4714_v28, %v4546_v60  ;;  %4587 = vmatmul.bf16.gmra.mxu1 %v9300_v16  ;;  %v9439_v28 = vld [vmem:[#allocation3 + $0x3f0] sm:$0xf] }
 0x1ab   :  { %v4883_v20 = vpop.f32.mrf.mxu3 }
 0x1ac   :  { %v12183_v40 = vadd.f32 %v4883_v20, %v4715_v31  ;;  %v9440_v20 = vor.u32 %v11079_v14, %v9439_v28 }
 0x1ad   :  { %v9405_v61 = vld [vmem:[#allocation3 + $0x3cc] sm:$0xf0] }
 0x1ae   :  { %4756 = vmatmul.bf16.gmra.mxu2 %v9304_v36  ;;  %v9344_v36 = vor.u32 %v11049_v19, %v9341_v54  ;;  %v11088_v19 = vld [vmem:[#allocation3 + $0x458] sm:$0xf0]  ;;  %v164_v54 = vld [vmem:[%s14621_s0 + $0xf0] sm:$0xff] }
 0x1af   :  { %v4550_v43 = vpop.f32.mrf.mxu1  ;;  %v12185_v34 = vpop.f32.mrf.mxu0  ;;  %229 = vst [vmem:[#allocation2 + $0x181] sm:$0xff] %v164_v54 }
 0x1b0   :  { %4925 = vmatmul.bf16.gmra.mxu3 %v9308_v42  ;;  %v4551_v45 = vadd.f32 %v4550_v43, %v12111_v47  ;;  %v737_v47 = vpack.c.bf16 %v673_v52, %v673_v52  ;;  %v676_v52 = vld [vmem:[#allocation2 + $0x15a] sm:$0xff] }
 0x1b1   :  { %v4717_v18 = vpop.f32.mrf.mxu2 }
 0x1b2   :  { %v4718_v60 = vadd.f32 %v4717_v18, %v4549_v24  ;;  %4433 = vmatmul.bf16.gmra.mxu0 %v9404_v53  ;;  %801 = vst [vmem:[#allocation3 + $0x3b0] sm:$0xf] %v737_v47  ;;  %v9340_v24 = vor.u32 %v11053_v15, %v9339_v49  ;;  %v675_v53 = vld [vmem:[#allocation2 + $0x152] sm:$0xff]  ;;  %v12219_v49 = vld [vmem:[%s14621_s0 + $0x108] sm:$0xff] }
 0x1b3   :  { %v4886_v1 = vpop.f32.mrf.mxu3  ;;  %232 = vst [vmem:[#allocation2 + $0x1d1] sm:$0xff] %v12219_v49 }
 0x1b4   :  { %v12192_v63 = vadd.f32 %v4886_v1, %v4718_v60  ;;  %v740_v1 = vpack.c.bf16 %v676_v52, %v676_v52  ;;  %v678_v52 = vld [vmem:[#allocation2 + $0x172] sm:$0xff] }
 0x1b6   :  { %804 = vst [vmem:[#allocation3 + $0x41c] sm:$0xf] %v740_v1 }
 0x1b7   :  { %v4553_v11 = vpop.f32.mrf.mxu1  ;;  %v12194_v0 = vpop.f32.mrf.mxu0 }
 0x1b8   :  { %v4554_v16 = vadd.f32 %v4553_v11, %v12130_v33  ;;  %v12214_v11 = vld [vmem:[%s14621_s0 + $0x100] sm:$0xff] }
 0x1b9   :  { %v4719_v17 = vpop.f32.mrf.mxu2  ;;  %231 = vst [vmem:[#allocation2 + $0x1c9] sm:$0xff] %v12214_v11 }
 0x1ba   :  { %v4720_v35 = vadd.f32 %v4719_v17, %v4551_v45  ;;  %4592 = vmatmul.bf16.gmra.mxu1 %v9336_v10  ;;  %v11488_v45 = vld [vmem:[#allocation2] sm:$0xff]  ;;  %v9475_v17 = vld [vmem:[#allocation3 + $0x438] sm:$0xf] }
 0x1bb   :  { %v4888_v26 = vpop.f32.mrf.mxu3  ;;  %v359_v18 = vpack.c.bf16 %v11488_v45, %v11488_v45  ;;  %v9476_v28 = vor.u32 %v11088_v19, %v9475_v17  ;;  %v12249_v19 = vld [vmem:[%s14621_s0 + $0x110] sm:$0xff] }
 0x1bc   :  { %v12197_v31 = vadd.f32 %v4888_v26, %v4720_v35  ;;  %v165_v35 = vld [vmem:[%s14621_s0 + $0xf8] sm:$0xff]  ;;  %v9380_v26 = vor.u32 %v11058_v48, %v9377_v39  ;;  %v9411_v48 = vld [vmem:[#allocation3 + $0x3b0] sm:$0xf]  ;;  %233 = vst [vmem:[#allocation2 + $0x1e1] sm:$0xff] %v12249_v19 }
 0x1bd   :  { %423 = vst [vmem:[#allocation3 + $0x480] sm:$0xf] %v359_v18 }
 0x1be   :  { %4761 = vmatmul.bf16.gmra.mxu2 %v9340_v24  ;;  %424 = vst [vmem:[#allocation3 + $0x4a4] sm:$0xf] %v359_v18 }
 0x1bf   :  { %v4555_v37 = vpop.f32.mrf.mxu1  ;;  %v12199_v33 = vpop.f32.mrf.mxu0  ;;  %230 = vst [vmem:[#allocation2 + $0x189] sm:$0xff] %v165_v35 }
 0x1c0   :  { %4930 = vmatmul.bf16.gmra.mxu3 %v9344_v36  ;;  %v4556_v46 = vadd.f32 %v4555_v37, %v12139_v27  ;;  %v739_v27 = vpack.c.bf16 %v675_v53, %v675_v53  ;;  %v298_v45 = vld [vmem:[#allocation2 + $0x1d0] sm:$0xff] }
 0x1c1   :  { %v4722_v42 = vpop.f32.mrf.mxu2  ;;  %v362_v62 = vpack.c.bf16 %v298_v45, %v298_v45 }
 0x1c2   :  { %v4723_v43 = vadd.f32 %v4722_v42, %v4554_v16  ;;  %4438 = vmatmul.bf16.gmra.mxu0 %v9440_v20  ;;  %803 = vst [vmem:[#allocation3 + $0x3f8] sm:$0xf] %v739_v27  ;;  %v9376_v16 = vor.u32 %v11062_v6, %v9375_v4  ;;  %v677_v42 = vld [vmem:[#allocation2 + $0x16a] sm:$0xff]  ;;  %v869_v27 = vld [vmem:[#allocation2 + $0x180] sm:$0xff]  ;;  %v9408_v6 = vor.u32 %v11066_v32, %v9405_v61 }
 0x1c3   :  { %v4891_v60 = vpop.f32.mrf.mxu3  ;;  %426 = vst [vmem:[#allocation3 + $0x4ec] sm:$0xf] %v362_v62  ;;  %v933_v29 = vpack.c.bf16 %v869_v27, %v869_v27  ;;  %v551_v32 = vpack.c.bf16 %v487_v50, %v487_v50  ;;  %v680_v27 = vld [vmem:[#allocation2 + $0x1ba] sm:$0xff] }
 0x1c4   :  { %v12206_v59 = vadd.f32 %v4891_v60, %v4723_v43  ;;  %v11271_v43 = vld [vmem:[%s14620_s1 + $0x110] sm:$0xff]  ;;  %1000 = vst [vmem:[#allocation3 + $0x4b0] sm:$0xf] %v362_v62 }
 0x1c5   :  { %5041 = vmatpush.bf16.msrb.mxu0 %v11271_v43  ;;  %997 = vst [vmem:[#allocation3 + $0x444] sm:$0xf] %v933_v29 }
 0x1c6   :  { %v870_v4 = vld [vmem:[#allocation2 + $0x188] sm:$0xff]  ;;  %615 = vst [vmem:[#allocation3 + $0x484] sm:$0xf] %v551_v32 }
 0x1c7   :  { %v4558_v3 = vpop.f32.mrf.mxu1  ;;  %v12208_v47 = vpop.f32.mrf.mxu0 }
 0x1c8   :  { %v4559_v38 = vadd.f32 %v4558_v3, %v12159_v58  ;;  %v742_v3 = vpack.c.bf16 %v678_v52, %v678_v52  ;;  %v488_v52 = vld [vmem:[#allocation2 + $0x1b9] sm:$0xff] }
 0x1c9   :  { %v4724_v10 = vpop.f32.mrf.mxu2  ;;  %v552_v61 = vpack.c.bf16 %v488_v52, %v488_v52 }
 0x1ca   :  { %v4725_v15 = vadd.f32 %v4724_v10, %v4556_v46  ;;  %4597 = vmatmul.bf16.gmra.mxu1 %v9372_v2  ;;  %v297_v46 = vld [vmem:[#allocation2 + $0x1c8] sm:$0xff]  ;;  %v741_v2 = vpack.c.bf16 %v677_v42, %v677_v42  ;;  %v11071_v10 = vld [vmem:[#allocation3 + $0x3d0] sm:$0xf0]  ;;  %806 = vst [vmem:[#allocation3 + $0x464] sm:$0xf] %v742_v3 }
 0x1cb   :  { %v4893_v58 = vpop.f32.mrf.mxu3  ;;  %v361_v18 = vpack.c.bf16 %v297_v46, %v297_v46  ;;  %v9412_v35 = vor.u32 %v11071_v10, %v9411_v48  ;;  %v11075_v3 = vld [vmem:[#allocation3 + $0x3f4] sm:$0xf]  ;;  %616 = vst [vmem:[#allocation3 + $0x4a8] sm:$0xf] %v552_v61  ;;  %v744_v48 = vpack.c.bf16 %v680_v27, %v680_v27 }
 0x1cc   :  { %v12229_v24 = vadd.f32 %v4893_v58, %v4725_v15  ;;  %v934_v15 = vpack.c.bf16 %v870_v4, %v870_v4  ;;  %805 = vst [vmem:[#allocation3 + $0x440] sm:$0xf] %v741_v2  ;;  %v9413_v58 = vld [vmem:[#allocation3 + $0x3d4] sm:$0xf0] }
 0x1cd   :  { %425 = vst [vmem:[#allocation3 + $0x4c8] sm:$0xf] %v361_v18  ;;  %v9441_v4 = vld [vmem:[#allocation3 + $0x414] sm:$0xf0] }
 0x1ce   :  { %4766 = vmatmul.bf16.gmra.mxu2 %v9376_v16  ;;  %v11067_v16 = vld [vmem:[#allocation3 + $0x3b4] sm:$0xf]  ;;  %998 = vst [vmem:[#allocation3 + $0x468] sm:$0xf] %v934_v15  ;;  %v9444_v10 = vor.u32 %v11075_v3, %v9441_v4 }
 0x1cf   :  { %v4560_v14 = vpop.f32.mrf.mxu1  ;;  %v12231_v36 = vpop.f32.mrf.mxu0  ;;  %v9416_v46 = vor.u32 %v11067_v16, %v9413_v58  ;;  %999 = vst [vmem:[#allocation3 + $0x48c] sm:$0xf] %v361_v18  ;;  %v299_v18 = vld [vmem:[#allocation2 + $0x1e0] sm:$0xff]  ;;  %v11080_v16 = vld [vmem:[#allocation3 + $0x418] sm:$0xf0] }
 0x1d0   :  { %4935 = vmatmul.bf16.gmra.mxu3 %v9380_v26  ;;  %v4561_v20 = vadd.f32 %v4560_v14, %v12168_v13  ;;  %v550_v13 = vpack.c.bf16 %v12179_v30, %v12179_v30  ;;  %v12254_v26 = vld [vmem:[%s14621_s0 + $0x118] sm:$0xff]  ;;  %v11097_v14 = vld [vmem:[#allocation3 + $0x4a0] sm:$0xf0]  ;;  %v363_v62 = vpack.c.bf16 %v299_v18, %v299_v18  ;;  %808 = vst [vmem:[#allocation3 + $0x4ac] sm:$0xf] %v744_v48 }
 0x1d1   :  { %v4727_v37 = vpop.f32.mrf.mxu2  ;;  %234 = vst [vmem:[#allocation2 + $0x1e9] sm:$0xff] %v12254_v26  ;;  %v11084_v48 = vld [vmem:[#allocation3 + $0x43c] sm:$0xf] }
 0x1d2   :  { %v4728_v53 = vadd.f32 %v4727_v37, %v4559_v38  ;;  %4443 = vmatmul.bf16.gmra.mxu0 %v9476_v28  ;;  %614 = vst [vmem:[#allocation3 + $0x460] sm:$0xf] %v550_v13  ;;  %v9511_v28 = vld [vmem:[#allocation3 + $0x480] sm:$0xf]  ;;  %v679_v13 = vld [vmem:[#allocation2 + $0x1b2] sm:$0xff] }
 0x1d3   :  { %v4896_v60 = vpop.f32.mrf.mxu3  ;;  %427 = vst [vmem:[#allocation3 + $0x510] sm:$0xf] %v363_v62 }
 0x1d4   :  { %v12241_v1 = vadd.f32 %v4896_v60, %v4728_v53  ;;  %1001 = vst [vmem:[#allocation3 + $0x4d4] sm:$0xf] %v363_v62  ;;  %v682_v62 = vld [vmem:[#allocation2 + $0x1d2] sm:$0xff] }
 0x1d7   :  { %v4563_v38 = vpop.f32.mrf.mxu1  ;;  %v12243_v39 = vpop.f32.mrf.mxu0 }
 0x1d8   :  { %v4564_v30 = vadd.f32 %v4563_v38, %v12185_v34  ;;  %v300_v29 = vld [vmem:[#allocation2 + $0x1e8] sm:$0xff]  ;;  %v743_v38 = vpack.c.bf16 %v679_v13, %v679_v13 }
 0x1d9   :  { %v4729_v17 = vpop.f32.mrf.mxu2 }
 0x1da   :  { %v4730_v54 = vadd.f32 %v4729_v17, %v4561_v20  ;;  %4602 = vmatmul.bf16.gmra.mxu1 %v9408_v6  ;;  %v9512_v20 = vor.u32 %v11097_v14, %v9511_v28  ;;  %807 = vst [vmem:[#allocation3 + $0x488] sm:$0xf] %v743_v38  ;;  %v12271_v28 = vld [vmem:[%s14621_s0 + $0x120] sm:$0xff]  ;;  %v12276_v14 = vld [vmem:[%s14621_s0 + $0x128] sm:$0xff] }
 0x1db   :  { %v4898_v34 = vpop.f32.mrf.mxu3  ;;  %235 = vst [vmem:[#allocation2 + $0x1f9] sm:$0xff] %v12271_v28 }
 0x1dc   :  { %v12256_v37 = vadd.f32 %v4898_v34, %v4730_v54  ;;  %v11076_v54 = vld [vmem:[#allocation3 + $0x3fc] sm:$0xf]  ;;  %v9449_v34 = vld [vmem:[#allocation3 + $0x41c] sm:$0xf0]  ;;  %236 = vst [vmem:[#allocation2 + $0x201] sm:$0xff] %v12276_v14 }
 0x1dd   :  { %v9452_v52 = vor.u32 %v11076_v54, %v9449_v34  ;;  %v11089_v34 = vld [vmem:[#allocation3 + $0x460] sm:$0xf0] }
 0x1de   :  { %4771 = vmatmul.bf16.gmra.mxu2 %v9412_v35 }
 0x1df   :  { %v4565_v42 = vpop.f32.mrf.mxu1  ;;  %v12260_v53 = vpop.f32.mrf.mxu0 }
 0x1e0   :  { %4940 = vmatmul.bf16.gmra.mxu3 %v9416_v46  ;;  %v4566_v43 = vadd.f32 %v4565_v42, %v12194_v0  ;;  %v364_v0 = vpack.c.bf16 %v300_v29, %v300_v29  ;;  %v9547_v42 = vld [vmem:[#allocation3 + $0x4c8] sm:$0xf]  ;;  %v553_v29 = vpack.c.bf16 %v12214_v11, %v12214_v11 }
 0x1e1   :  { %v4732_v45 = vpop.f32.mrf.mxu2 }
 0x1e2   :  { %v4733_v60 = vadd.f32 %v4732_v45, %v4564_v30  ;;  %4448 = vmatmul.bf16.gmra.mxu0 %v9512_v20  ;;  %v9447_v30 = vld [vmem:[#allocation3 + $0x3f8] sm:$0xf]  ;;  %428 = vst [vmem:[#allocation3 + $0x534] sm:$0xf] %v364_v0  ;;  %v11106_v45 = vld [vmem:[#allocation3 + $0x4e8] sm:$0xf0] }
 0x1e3   :  { %v4901_v2 = vpop.f32.mrf.mxu3  ;;  %v9448_v20 = vor.u32 %v11080_v16, %v9447_v30  ;;  %1002 = vst [vmem:[#allocation3 + $0x4f8] sm:$0xf] %v364_v0  ;;  %v301_v27 = vld [vmem:[#allocation2 + $0x1f8] sm:$0xff]  ;;  %v302_v4 = vld [vmem:[#allocation2 + $0x200] sm:$0xff]  ;;  %v746_v16 = vpack.c.bf16 %v682_v62, %v682_v62 }
 0x1e4   :  { %v12263_v6 = vadd.f32 %v4901_v2, %v4733_v60  ;;  %v9548_v60 = vor.u32 %v11106_v45, %v9547_v42  ;;  %v681_v2 = vld [vmem:[#allocation2 + $0x1ca] sm:$0xff]  ;;  %v365_v18 = vpack.c.bf16 %v301_v27, %v301_v27  ;;  %v9477_v0 = vld [vmem:[#allocation3 + $0x45c] sm:$0xf0]  ;;  %617 = vst [vmem:[#allocation3 + $0x4cc] sm:$0xf] %v553_v29  ;;  %v12302_v45 = vld [vmem:[%s14621_s0 + $0x138] sm:$0xff] }
 0x1e5   :  { %810 = vst [vmem:[#allocation3 + $0x4f4] sm:$0xf] %v746_v16  ;;  %v12297_v42 = vld [vmem:[%s14621_s0 + $0x130] sm:$0xff]  ;;  %v555_v16 = vpack.c.bf16 %v12249_v19, %v12249_v19 }
 0x1e6   :  { %429 = vst [vmem:[#allocation3 + $0x558] sm:$0xf] %v365_v18 }
 0x1e7   :  { %v4568_v15 = vpop.f32.mrf.mxu1  ;;  %v12265_v17 = vpop.f32.mrf.mxu0  ;;  %237 = vst [vmem:[#allocation2 + $0x211] sm:$0xff] %v12297_v42 }
 0x1e8   :  { %v4569_v58 = vadd.f32 %v4568_v15, %v12199_v33  ;;  %v554_v15 = vpack.c.bf16 %v12219_v49, %v12219_v49  ;;  %v9485_v49 = vld [vmem:[#allocation3 + $0x464] sm:$0xf0]  ;;  %238 = vst [vmem:[#allocation2 + $0x219] sm:$0xff] %v12302_v45 }
 0x1e9   :  { %v4734_v35 = vpop.f32.mrf.mxu2  ;;  %1003 = vst [vmem:[#allocation3 + $0x51c] sm:$0xf] %v365_v18  ;;  %v684_v18 = vld [vmem:[#allocation2 + $0x1ea] sm:$0xff] }
 0x1ea   :  { %v4735_v46 = vadd.f32 %v4734_v35, %v4566_v43  ;;  %4607 = vmatmul.bf16.gmra.mxu1 %v9444_v10  ;;  %v366_v10 = vpack.c.bf16 %v302_v4, %v302_v4  ;;  %v9483_v35 = vld [vmem:[#allocation3 + $0x440] sm:$0xf]  ;;  %618 = vst [vmem:[#allocation3 + $0x4f0] sm:$0xf] %v554_v15 }
 0x1eb   :  { %v4903_v33 = vpop.f32.mrf.mxu3  ;;  %619 = vst [vmem:[#allocation3 + $0x514] sm:$0xf] %v555_v16 }
 0x1ec   :  { %v12280_v50 = vadd.f32 %v4903_v33, %v4735_v46  ;;  %430 = vst [vmem:[#allocation3 + $0x57c] sm:$0xf] %v366_v10 }
 0x1ed   :  { %1004 = vst [vmem:[#allocation3 + $0x540] sm:$0xf] %v366_v10  ;;  %v9513_v10 = vld [vmem:[#allocation3 + $0x4a4] sm:$0xf0] }
 0x1ee   :  { %4776 = vmatmul.bf16.gmra.mxu2 %v9448_v20  ;;  %v11085_v20 = vld [vmem:[#allocation3 + $0x444] sm:$0xf] }
 0x1ef   :  { %v4570_v32 = vpop.f32.mrf.mxu1  ;;  %v12282_v61 = vpop.f32.mrf.mxu0  ;;  %v304_v15 = vld [vmem:[#allocation2 + $0x218] sm:$0xff] }
 0x1f0   :  { %4945 = vmatmul.bf16.gmra.mxu3 %v9452_v52  ;;  %v4571_v43 = vadd.f32 %v4570_v32, %v12208_v47  ;;  %v745_v47 = vpack.c.bf16 %v681_v2, %v681_v2  ;;  %v9583_v32 = vld [vmem:[#allocation3 + $0x510] sm:$0xf]  ;;  %v9488_v2 = vor.u32 %v11085_v20, %v9485_v49 }
 0x1f1   :  { %v4737_v13 = vpop.f32.mrf.mxu2 }
 0x1f2   :  { %v4738_v3 = vadd.f32 %v4737_v13, %v4569_v58  ;;  %4453 = vmatmul.bf16.gmra.mxu0 %v9548_v60  ;;  %v9480_v58 = vor.u32 %v11084_v48, %v9477_v0  ;;  %809 = vst [vmem:[#allocation3 + $0x4d0] sm:$0xf] %v745_v47  ;;  %v9484_v60 = vor.u32 %v11089_v34, %v9483_v35  ;;  %v11115_v13 = vld [vmem:[#allocation3 + $0x530] sm:$0xf0]  ;;  %v683_v48 = vld [vmem:[#allocation2 + $0x1e2] sm:$0xff] }
 0x1f3   :  { %v4906_v38 = vpop.f32.mrf.mxu3  ;;  %v368_v35 = vpack.c.bf16 %v304_v15, %v304_v15  ;;  %v556_v34 = vpack.c.bf16 %v12254_v26, %v12254_v26 }
 0x1f4   :  { %v12289_v30 = vadd.f32 %v4906_v38, %v4738_v3  ;;  %v9584_v3 = vor.u32 %v11115_v13, %v9583_v32  ;;  %v303_v38 = vld [vmem:[#allocation2 + $0x210] sm:$0xff]  ;;  %v11094_v32 = vld [vmem:[#allocation3 + $0x48c] sm:$0xf] }
 0x1f5   :  { %v367_v47 = vpack.c.bf16 %v303_v38, %v303_v38  ;;  %432 = vst [vmem:[#allocation3 + $0x5c4] sm:$0xf] %v368_v35 }
 0x1f6   :  { %620 = vst [vmem:[#allocation3 + $0x538] sm:$0xf] %v556_v34 }
 0x1f7   :  { %v4573_v54 = vpop.f32.mrf.mxu1  ;;  %v12291_v11 = vpop.f32.mrf.mxu0  ;;  %431 = vst [vmem:[#allocation3 + $0x5a0] sm:$0xf] %v367_v47 }
 0x1f8   :  { %v4574_v46 = vadd.f32 %v4573_v54, %v12231_v36  ;;  %v11093_v54 = vld [vmem:[#allocation3 + $0x484] sm:$0xf]  ;;  %1005 = vst [vmem:[#allocation3 + $0x564] sm:$0xf] %v367_v47 }
 0x1f9   :  { %v4739_v33 = vpop.f32.mrf.mxu2  ;;  %v9516_v49 = vor.u32 %v11093_v54, %v9513_v10  ;;  %1006 = vst [vmem:[#allocation3 + $0x588] sm:$0xf] %v368_v35  ;;  %v686_v47 = vld [vmem:[#allocation2 + $0x202] sm:$0xff]  ;;  %v9549_v35 = vld [vmem:[#allocation3 + $0x4ec] sm:$0xf0] }
 0x1fa   :  { %v4740_v52 = vadd.f32 %v4739_v33, %v4571_v43  ;;  %4612 = vmatmul.bf16.gmra.mxu1 %v9480_v58  ;;  %v748_v33 = vpack.c.bf16 %v684_v18, %v684_v18 }
 0x1fb   :  { %v4908_v36 = vpop.f32.mrf.mxu3 }
 0x1fc   :  { %v12306_v27 = vadd.f32 %v4908_v36, %v4740_v52  ;;  %v9519_v52 = vld [vmem:[#allocation3 + $0x488] sm:$0xf]  ;;  %812 = vst [vmem:[#allocation3 + $0x53c] sm:$0xf] %v748_v33 }
 0x1fe   :  { %4781 = vmatmul.bf16.gmra.mxu2 %v9484_v60  ;;  %v11098_v60 = vld [vmem:[#allocation3 + $0x4a8] sm:$0xf0] }
 0x1ff   :  { %v4575_v4 = vpop.f32.mrf.mxu1  ;;  %v12308_v29 = vpop.f32.mrf.mxu0  ;;  %v9520_v38 = vor.u32 %v11098_v60, %v9519_v52  ;;  %v11102_v60 = vld [vmem:[#allocation3 + $0x4cc] sm:$0xf] }
 0x200   :  { %4950 = vmatmul.bf16.gmra.mxu3 %v9488_v2  ;;  %v4576_v43 = vadd.f32 %v4575_v4, %v12243_v39  ;;  %v11270_v39 = vld [vmem:[%s14620_s1 + $0x108] sm:$0xff]  ;;  %v9521_v2 = vld [vmem:[#allocation3 + $0x4ac] sm:$0xf0] }
 0x201   :  { %v4742_v62 = vpop.f32.mrf.mxu2  ;;  %5042 = vmatpush.bf16.msrb.mxu0 %v11270_v39  ;;  %v12331_v4 = vld [vmem:[%s14621_s0 + $0x148] sm:$0xff]  ;;  %v9524_v16 = vor.u32 %v11094_v32, %v9521_v2  ;;  %v685_v39 = vld [vmem:[#allocation2 + $0x1fa] sm:$0xff] }
 0x202   :  { %v4743_v0 = vadd.f32 %v4742_v62, %v4574_v46  ;;  %4458 = vmatmul.bf16.gmra.mxu0 %v9584_v3  ;;  %v747_v46 = vpack.c.bf16 %v683_v48, %v683_v48  ;;  %v12326_v3 = vld [vmem:[%s14621_s0 + $0x140] sm:$0xff]  ;;  %v9619_v48 = vld [vmem:[#allocation3 + $0x558] sm:$0xf]  ;;  %240 = vst [vmem:[#allocation2 + $0x231] sm:$0xff] %v12331_v4 }
 0x203   :  { %v4911_v58 = vpop.f32.mrf.mxu3  ;;  %239 = vst [vmem:[#allocation2 + $0x229] sm:$0xff] %v12326_v3 }
 0x204   :  { %v12315_v20 = vadd.f32 %v4911_v58, %v4743_v0  ;;  %811 = vst [vmem:[#allocation3 + $0x518] sm:$0xf] %v747_v46  ;;  %v11124_v0 = vld [vmem:[#allocation3 + $0x578] sm:$0xf0] }
 0x205   :  { %v9620_v18 = vor.u32 %v11124_v0, %v9619_v48  ;;  %v11107_v48 = vld [vmem:[#allocation3 + $0x4f0] sm:$0xf0] }
 0x207   :  { %v4578_v19 = vpop.f32.mrf.mxu1  ;;  %v12320_v36 = vpop.f32.mrf.mxu0 }
 0x208   :  { %v4579_v26 = vadd.f32 %v4578_v19, %v12260_v53  ;;  %v557_v19 = vpack.c.bf16 %v12271_v28, %v12271_v28 }
 0x209   :  { %v4744_v13 = vpop.f32.mrf.mxu2 }
 0x20a   :  { %v4745_v62 = vadd.f32 %v4744_v13, %v4576_v43  ;;  %4617 = vmatmul.bf16.gmra.mxu1 %v9516_v49  ;;  %v305_v34 = vld [vmem:[#allocation2 + $0x228] sm:$0xff]  ;;  %v306_v33 = vld [vmem:[#allocation2 + $0x230] sm:$0xff]  ;;  %v558_v13 = vpack.c.bf16 %v12276_v14, %v12276_v14  ;;  %621 = vst [vmem:[#allocation3 + $0x55c] sm:$0xf] %v557_v19  ;;  %v9557_v14 = vld [vmem:[#allocation3 + $0x4f4] sm:$0xf0] }
 0x20b   :  { %v4913_v53 = vpop.f32.mrf.mxu3  ;;  %v369_v49 = vpack.c.bf16 %v305_v34, %v305_v34  ;;  %v370_v32 = vpack.c.bf16 %v306_v33, %v306_v33  ;;  %v11133_v33 = vld [vmem:[#allocation3 + $0x5c0] sm:$0xf0] }
 0x20c   :  { %v12335_v15 = vadd.f32 %v4913_v53, %v4745_v62  ;;  %v9552_v62 = vor.u32 %v11102_v60, %v9549_v35  ;;  %v9555_v53 = vld [vmem:[#allocation3 + $0x4d0] sm:$0xf]  ;;  %622 = vst [vmem:[#allocation3 + $0x580] sm:$0xf] %v558_v13 }
 0x20d   :  { %433 = vst [vmem:[#allocation3 + $0x5e8] sm:$0xf] %v369_v49 }
 0x20e   :  { %4786 = vmatmul.bf16.gmra.mxu2 %v9520_v38  ;;  %434 = vst [vmem:[#allocation3 + $0x60c] sm:$0xf] %v370_v32 }
 0x20f   :  { %v4580_v58 = vpop.f32.mrf.mxu1  ;;  %v12337_v54 = vpop.f32.mrf.mxu0  ;;  %1007 = vst [vmem:[#allocation3 + $0x5ac] sm:$0xf] %v369_v49  ;;  %v688_v49 = vld [vmem:[#allocation2 + $0x21a] sm:$0xff] }
 0x210   :  { %4955 = vmatmul.bf16.gmra.mxu3 %v9524_v16  ;;  %v4581_v43 = vadd.f32 %v4580_v58, %v12265_v17  ;;  %v749_v17 = vpack.c.bf16 %v685_v39, %v685_v39  ;;  %v11103_v16 = vld [vmem:[#allocation3 + $0x4d4] sm:$0xf]  ;;  %v9556_v39 = vor.u32 %v11107_v48, %v9555_v53  ;;  %1008 = vst [vmem:[#allocation3 + $0x5d0] sm:$0xf] %v370_v32  ;;  %v9585_v32 = vld [vmem:[#allocation3 + $0x534] sm:$0xf0] }
 0x211   :  { %v4747_v10 = vpop.f32.mrf.mxu2  ;;  %v12352_v58 = vld [vmem:[%s14621_s0 + $0x150] sm:$0xff]  ;;  %v559_v48 = vpack.c.bf16 %v12297_v42, %v12297_v42 }
 0x212   :  { %v4748_v46 = vadd.f32 %v4747_v10, %v4579_v26  ;;  %4463 = vmatmul.bf16.gmra.mxu0 %v9620_v18  ;;  %v750_v26 = vpack.c.bf16 %v686_v47, %v686_v47  ;;  %813 = vst [vmem:[#allocation3 + $0x560] sm:$0xf] %v749_v17  ;;  %v12357_v10 = vld [vmem:[%s14621_s0 + $0x158] sm:$0xff]  ;;  %v9560_v47 = vor.u32 %v11103_v16, %v9557_v14 }
 0x213   :  { %v4916_v52 = vpop.f32.mrf.mxu3  ;;  %241 = vst [vmem:[#allocation2 + $0x241] sm:$0xff] %v12352_v58 }
 0x214   :  { %v12344_v2 = vadd.f32 %v4916_v52, %v4748_v46  ;;  %814 = vst [vmem:[#allocation3 + $0x584] sm:$0xf] %v750_v26  ;;  %v9655_v46 = vld [vmem:[#allocation3 + $0x5a0] sm:$0xf]  ;;  %v687_v26 = vld [vmem:[#allocation2 + $0x212] sm:$0xff] }
 0x215   :  { %242 = vst [vmem:[#allocation2 + $0x249] sm:$0xff] %v12357_v10  ;;  %v9656_v52 = vor.u32 %v11133_v33, %v9655_v46  ;;  %v9591_v33 = vld [vmem:[#allocation3 + $0x518] sm:$0xf] }
 0x216   :  { %623 = vst [vmem:[#allocation3 + $0x5a4] sm:$0xf] %v559_v48  ;;  %v9691_v48 = vld [vmem:[#allocation3 + $0x5e8] sm:$0xf] }
 0x217   :  { %v4583_v38 = vpop.f32.mrf.mxu1  ;;  %v12346_v28 = vpop.f32.mrf.mxu0 }
 0x218   :  { %v4584_v0 = vadd.f32 %v4583_v38, %v12282_v61 }
 0x219   :  { %v4749_v18 = vpop.f32.mrf.mxu2 }
 0x21a   :  { %v4750_v34 = vadd.f32 %v4749_v18, %v4581_v43  ;;  %4622 = vmatmul.bf16.gmra.mxu1 %v9552_v62  ;;  %v307_v17 = vld [vmem:[#allocation2 + $0x240] sm:$0xff]  ;;  %v11111_v18 = vld [vmem:[#allocation3 + $0x514] sm:$0xf] }
 0x21b   :  { %v4918_v61 = vpop.f32.mrf.mxu3  ;;  %v371_v53 = vpack.c.bf16 %v307_v17, %v307_v17  ;;  %v12378_v17 = vld [vmem:[%s14621_s0 + $0x160] sm:$0xff] }
 0x21c   :  { %v12361_v19 = vadd.f32 %v4918_v61, %v4750_v34  ;;  %v308_v38 = vld [vmem:[#allocation2 + $0x248] sm:$0xff]  ;;  %v560_v34 = vpack.c.bf16 %v12302_v45, %v12302_v45  ;;  %v9588_v61 = vor.u32 %v11111_v18, %v9585_v32  ;;  %v9593_v45 = vld [vmem:[#allocation3 + $0x53c] sm:$0xf0]  ;;  %243 = vst [vmem:[#allocation2 + $0x259] sm:$0xff] %v12378_v17 }
 0x21d   :  { %v372_v14 = vpack.c.bf16 %v308_v38, %v308_v38  ;;  %435 = vst [vmem:[#allocation3 + $0x630] sm:$0xf] %v371_v53 }
 0x21e   :  { %4791 = vmatmul.bf16.gmra.mxu2 %v9556_v39  ;;  %624 = vst [vmem:[#allocation3 + $0x5c8] sm:$0xf] %v560_v34 }
 0x21f   :  { %v4585_v60 = vpop.f32.mrf.mxu1  ;;  %v12363_v35 = vpop.f32.mrf.mxu0  ;;  %436 = vst [vmem:[#allocation3 + $0x654] sm:$0xf] %v372_v14 }
 0x220   :  { %4960 = vmatmul.bf16.gmra.mxu3 %v9560_v47  ;;  %v4586_v43 = vadd.f32 %v4585_v60, %v12291_v11  ;;  %v751_v11 = vpack.c.bf16 %v687_v26, %v687_v26  ;;  %v11116_v47 = vld [vmem:[#allocation3 + $0x538] sm:$0xf0]  ;;  %v12383_v26 = vld [vmem:[%s14621_s0 + $0x168] sm:$0xff]  ;;  %1009 = vst [vmem:[#allocation3 + $0x5f4] sm:$0xf] %v371_v53  ;;  %v690_v53 = vld [vmem:[#allocation2 + $0x232] sm:$0xff] }
 0x221   :  { %v4752_v13 = vpop.f32.mrf.mxu2  ;;  %v11112_v60 = vld [vmem:[#allocation3 + $0x51c] sm:$0xf]  ;;  %v9592_v38 = vor.u32 %v11116_v47, %v9591_v33  ;;  %244 = vst [vmem:[#allocation2 + $0x261] sm:$0xff] %v12383_v26 }
 0x222   :  { %v4753_v62 = vadd.f32 %v4752_v13, %v4584_v0  ;;  %4468 = vmatmul.bf16.gmra.mxu0 %v9656_v52  ;;  %v752_v0 = vpack.c.bf16 %v688_v49, %v688_v49  ;;  %815 = vst [vmem:[#allocation3 + $0x5a8] sm:$0xf] %v751_v11  ;;  %v11142_v49 = vld [vmem:[#allocation3 + $0x608] sm:$0xf0]  ;;  %v9596_v18 = vor.u32 %v11112_v60, %v9593_v45 }
 0x223   :  { %v4921_v16 = vpop.f32.mrf.mxu3  ;;  %v9692_v32 = vor.u32 %v11142_v49, %v9691_v48  ;;  %1010 = vst [vmem:[#allocation3 + $0x618] sm:$0xf] %v372_v14  ;;  %v561_v60 = vpack.c.bf16 %v12326_v3, %v12326_v3  ;;  %v9621_v14 = vld [vmem:[#allocation3 + $0x57c] sm:$0xf0] }
 0x224   :  { %v12370_v39 = vadd.f32 %v4921_v16, %v4753_v62  ;;  %816 = vst [vmem:[#allocation3 + $0x5cc] sm:$0xf] %v752_v0 }
 0x225   :  { %625 = vst [vmem:[#allocation3 + $0x5ec] sm:$0xf] %v561_v60 }
 0x227   :  { %v4588_v46 = vpop.f32.mrf.mxu1  ;;  %v12372_v42 = vpop.f32.mrf.mxu0 }
 0x228   :  { %v4589_v52 = vadd.f32 %v4588_v46, %v12308_v29  ;;  %v689_v46 = vld [vmem:[#allocation2 + $0x22a] sm:$0xff]  ;;  %v310_v47 = vld [vmem:[#allocation2 + $0x260] sm:$0xff] }
 0x229   :  { %v4754_v13 = vpop.f32.mrf.mxu2 }
 0x22a   :  { %v4755_v62 = vadd.f32 %v4754_v13, %v4586_v43  ;;  %4627 = vmatmul.bf16.gmra.mxu1 %v9588_v61  ;;  %v309_v61 = vld [vmem:[#allocation2 + $0x258] sm:$0xff] }
 0x22b   :  { %v4923_v29 = vpop.f32.mrf.mxu3  ;;  %v373_v13 = vpack.c.bf16 %v309_v61, %v309_v61  ;;  %v11121_v61 = vld [vmem:[#allocation3 + $0x564] sm:$0xf] }
 0x22c   :  { %v12387_v16 = vadd.f32 %v4923_v29, %v4755_v62  ;;  %v11120_v62 = vld [vmem:[#allocation3 + $0x55c] sm:$0xf]  ;;  %v562_v29 = vpack.c.bf16 %v12331_v4, %v12331_v4  ;;  %v9629_v4 = vld [vmem:[#allocation3 + $0x584] sm:$0xf0] }
 0x22d   :  { %437 = vst [vmem:[#allocation3 + $0x678] sm:$0xf] %v373_v13  ;;  %v9624_v49 = vor.u32 %v11120_v62, %v9621_v14  ;;  %v9727_v62 = vld [vmem:[#allocation3 + $0x630] sm:$0xf]  ;;  %v11151_v14 = vld [vmem:[#allocation3 + $0x650] sm:$0xf0] }
 0x22e   :  { %14689 = vst [vmem:[#allocation6_spill] sm:$0xff] %v12387_v16  ;;  %4796 = vmatmul.bf16.gmra.mxu2 %v9592_v38  ;;  %v374_v38 = vpack.c.bf16 %v310_v47, %v310_v47 }
 0x22f   :  { %v4590_v34 = vpop.f32.mrf.mxu1  ;;  %v12389_v11 = vpop.f32.mrf.mxu0  ;;  %626 = vst [vmem:[#allocation3 + $0x610] sm:$0xf] %v562_v29 }
 0x230   :  { %4965 = vmatmul.bf16.gmra.mxu3 %v9596_v18  ;;  %v4591_v43 = vadd.f32 %v4590_v34, %v12320_v36  ;;  %v753_v36 = vpack.c.bf16 %v689_v46, %v689_v46  ;;  %438 = vst [vmem:[#allocation3 + $0x69c] sm:$0xf] %v374_v38  ;;  %v11125_v34 = vld [vmem:[#allocation3 + $0x580] sm:$0xf0]  ;;  %v12404_v46 = vld [vmem:[%s14621_s0 + $0x170] sm:$0xff] }
 0x231   :  { %v4757_v0 = vpop.f32.mrf.mxu2  ;;  %245 = vst [vmem:[#allocation2 + $0x271] sm:$0xff] %v12404_v46 }
 0x232   :  { %v4758_v33 = vadd.f32 %v4757_v0, %v4589_v52  ;;  %4473 = vmatmul.bf16.gmra.mxu0 %v9692_v32  ;;  %v754_v52 = vpack.c.bf16 %v690_v53, %v690_v53  ;;  %v9627_v32 = vld [vmem:[#allocation3 + $0x560] sm:$0xf]  ;;  %817 = vst [vmem:[#allocation3 + $0x5f0] sm:$0xf] %v753_v36  ;;  %v9632_v36 = vor.u32 %v11121_v61, %v9629_v4 }
 0x233   :  { %v4926_v45 = vpop.f32.mrf.mxu3  ;;  %v9628_v53 = vor.u32 %v11125_v34, %v9627_v32  ;;  %1011 = vst [vmem:[#allocation3 + $0x63c] sm:$0xf] %v373_v13  ;;  %v563_v61 = vpack.c.bf16 %v12352_v58, %v12352_v58  ;;  %v692_v13 = vld [vmem:[#allocation2 + $0x24a] sm:$0xff] }
 0x234   :  { %v12396_v48 = vadd.f32 %v4926_v45, %v4758_v33  ;;  %818 = vst [vmem:[#allocation3 + $0x614] sm:$0xf] %v754_v52  ;;  %v12409_v33 = vld [vmem:[%s14621_s0 + $0x178] sm:$0xff] }
 0x235   :  { %246 = vst [vmem:[#allocation2 + $0x279] sm:$0xff] %v12409_v33 }
 0x236   :  { %14690 = vst [vmem:[#allocation7_spill] sm:$0xff] %v12396_v48 }
 0x237   :  { %v4593_v18 = vpop.f32.mrf.mxu1  ;;  %v12398_v3 = vpop.f32.mrf.mxu0  ;;  %1012 = vst [vmem:[#allocation3 + $0x660] sm:$0xf] %v374_v38  ;;  %v9657_v38 = vld [vmem:[#allocation3 + $0x5c4] sm:$0xf0] }
 0x238   :  { %v4594_v0 = vadd.f32 %v4593_v18, %v12337_v54  ;;  %v11269_v54 = vld [vmem:[%s14620_s1 + $0x100] sm:$0xff]  ;;  %v311_v34 = vld [vmem:[#allocation2 + $0x270] sm:$0xff]  ;;  %627 = vst [vmem:[#allocation3 + $0x634] sm:$0xf] %v563_v61 }
 0x239   :  { %v4759_v47 = vpop.f32.mrf.mxu2  ;;  %5043 = vmatpush.bf16.msrb.mxu0 %v11269_v54 }
 0x23a   :  { %v4760_v60 = vadd.f32 %v4759_v47, %v4591_v43  ;;  %4632 = vmatmul.bf16.gmra.mxu1 %v9624_v49  ;;  %v9728_v43 = vor.u32 %v11151_v14, %v9727_v62  ;;  %v691_v47 = vld [vmem:[#allocation2 + $0x242] sm:$0xff] }
 0x23b   :  { %v4928_v45 = vpop.f32.mrf.mxu3 }
 0x23c   :  { %v12416_v29 = vadd.f32 %v4928_v45, %v4760_v60  ;;  %v312_v16 = vld [vmem:[#allocation2 + $0x278] sm:$0xff]  ;;  %v375_v60 = vpack.c.bf16 %v311_v34, %v311_v34  ;;  %v564_v45 = vpack.c.bf16 %v12357_v10, %v12357_v10  ;;  %v9665_v10 = vld [vmem:[#allocation3 + $0x5cc] sm:$0xf0] }
 0x23d   :  { %v376_v54 = vpack.c.bf16 %v312_v16, %v312_v16  ;;  %v11130_v16 = vld [vmem:[#allocation3 + $0x5ac] sm:$0xf] }
 0x23e   :  { %14691 = vst [vmem:[#allocation8_spill] sm:$0xff] %v12416_v29  ;;  %4801 = vmatmul.bf16.gmra.mxu2 %v9628_v53  ;;  %v11129_v53 = vld [vmem:[#allocation3 + $0x5a4] sm:$0xf] }
 0x23f   :  { %v4595_v52 = vpop.f32.mrf.mxu1  ;;  %v12418_v49 = vpop.f32.mrf.mxu0  ;;  %439 = vst [vmem:[#allocation3 + $0x6c0] sm:$0xf] %v375_v60  ;;  %v9660_v14 = vor.u32 %v11129_v53, %v9657_v38  ;;  %v11160_v53 = vld [vmem:[#allocation3 + $0x698] sm:$0xf0] }
 0x240   :  { %4970 = vmatmul.bf16.gmra.mxu3 %v9632_v36  ;;  %v4596_v18 = vadd.f32 %v4595_v52, %v12346_v28  ;;  %v755_v28 = vpack.c.bf16 %v691_v47, %v691_v47  ;;  %440 = vst [vmem:[#allocation3 + $0x6e4] sm:$0xf] %v376_v54  ;;  %v11134_v52 = vld [vmem:[#allocation3 + $0x5c8] sm:$0xf0] }
 0x241   :  { %v4762_v32 = vpop.f32.mrf.mxu2  ;;  %628 = vst [vmem:[#allocation3 + $0x658] sm:$0xf] %v564_v45  ;;  %v12438_v47 = vld [vmem:[%s14621_s0 + $0x188] sm:$0xff]  ;;  %v9668_v45 = vor.u32 %v11130_v16, %v9665_v10  ;;  %v565_v16 = vpack.c.bf16 %v12378_v17, %v12378_v17 }
 0x242   :  { %v4763_v48 = vadd.f32 %v4762_v32, %v4594_v0  ;;  %4478 = vmatmul.bf16.gmra.mxu0 %v9728_v43  ;;  %v756_v0 = vpack.c.bf16 %v692_v13, %v692_v13  ;;  %v9663_v43 = vld [vmem:[#allocation3 + $0x5a8] sm:$0xf]  ;;  %819 = vst [vmem:[#allocation3 + $0x638] sm:$0xf] %v755_v28 }
 0x243   :  { %v4931_v4 = vpop.f32.mrf.mxu3  ;;  %v9664_v13 = vor.u32 %v11134_v52, %v9663_v43  ;;  %248 = vst [vmem:[#allocation2 + $0x291] sm:$0xff] %v12438_v47  ;;  %v693_v52 = vld [vmem:[#allocation2 + $0x25a] sm:$0xff] }
 0x244   :  { %v12425_v62 = vadd.f32 %v4931_v4, %v4763_v48  ;;  %820 = vst [vmem:[#allocation3 + $0x65c] sm:$0xf] %v756_v0  ;;  %v12433_v48 = vld [vmem:[%s14621_s0 + $0x180] sm:$0xff]  ;;  %v9763_v4 = vld [vmem:[#allocation3 + $0x678] sm:$0xf] }
 0x245   :  { %247 = vst [vmem:[#allocation2 + $0x289] sm:$0xff] %v12433_v48  ;;  %v9764_v28 = vor.u32 %v11160_v53, %v9763_v4 }
 0x246   :  { %14692 = vst [vmem:[#allocation9_spill] sm:$0xff] %v12425_v62 }
 0x247   :  { %v4598_v36 = vpop.f32.mrf.mxu1  ;;  %v12427_v58 = vpop.f32.mrf.mxu0  ;;  %1013 = vst [vmem:[#allocation3 + $0x684] sm:$0xf] %v375_v60  ;;  %v694_v60 = vld [vmem:[#allocation2 + $0x262] sm:$0xff] }
 0x248   :  { %v4599_v32 = vadd.f32 %v4598_v36, %v12363_v35  ;;  %1014 = vst [vmem:[#allocation3 + $0x6a8] sm:$0xf] %v376_v54  ;;  %v9693_v54 = vld [vmem:[#allocation3 + $0x60c] sm:$0xf0] }
 0x249   :  { %v4764_v34 = vpop.f32.mrf.mxu2  ;;  %629 = vst [vmem:[#allocation3 + $0x67c] sm:$0xf] %v565_v16  ;;  %v11169_v16 = vld [vmem:[#allocation3 + $0x6e0] sm:$0xf0] }
 0x24a   :  { %v4765_v61 = vadd.f32 %v4764_v34, %v4596_v18  ;;  %4637 = vmatmul.bf16.gmra.mxu1 %v9660_v14 }
 0x24b   :  { %v4933_v35 = vpop.f32.mrf.mxu3 }
 0x24c   :  { %v12442_v38 = vadd.f32 %v4933_v35, %v4765_v61  ;;  %v313_v43 = vld [vmem:[#allocation2 + $0x288] sm:$0xff]  ;;  %v314_v62 = vld [vmem:[#allocation2 + $0x290] sm:$0xff]  ;;  %v566_v35 = vpack.c.bf16 %v12383_v26, %v12383_v26  ;;  %v9701_v26 = vld [vmem:[#allocation3 + $0x614] sm:$0xf0] }
 0x24d   :  { %v377_v29 = vpack.c.bf16 %v313_v43, %v313_v43  ;;  %v11138_v61 = vld [vmem:[#allocation3 + $0x5ec] sm:$0xf]  ;;  %v11139_v43 = vld [vmem:[#allocation3 + $0x5f4] sm:$0xf] }
 0x24e   :  { %4806 = vmatmul.bf16.gmra.mxu2 %v9664_v13  ;;  %v378_v13 = vpack.c.bf16 %v314_v62, %v314_v62  ;;  %v9696_v53 = vor.u32 %v11138_v61, %v9693_v54  ;;  %630 = vst [vmem:[#allocation3 + $0x6a0] sm:$0xf] %v566_v35  ;;  %v9704_v54 = vor.u32 %v11139_v43, %v9701_v26  ;;  %v11147_v26 = vld [vmem:[#allocation3 + $0x634] sm:$0xf] }
 0x24f   :  { %v4600_v0 = vpop.f32.mrf.mxu1  ;;  %v12444_v36 = vpop.f32.mrf.mxu0  ;;  %441 = vst [vmem:[#allocation3 + $0x708] sm:$0xf] %v377_v29 }
 0x250   :  { %4975 = vmatmul.bf16.gmra.mxu3 %v9668_v45  ;;  %v4601_v18 = vadd.f32 %v4600_v0, %v12372_v42  ;;  %v757_v42 = vpack.c.bf16 %v693_v52, %v693_v52  ;;  %442 = vst [vmem:[#allocation3 + $0x72c] sm:$0xf] %v378_v13  ;;  %v11143_v0 = vld [vmem:[#allocation3 + $0x610] sm:$0xf0] }
 0x251   :  { %v4767_v14 = vpop.f32.mrf.mxu2  ;;  %1015 = vst [vmem:[#allocation3 + $0x6cc] sm:$0xf] %v377_v29 }
 0x252   :  { %v4768_v34 = vadd.f32 %v4767_v14, %v4599_v32  ;;  %4483 = vmatmul.bf16.gmra.mxu0 %v9764_v28  ;;  %v758_v32 = vpack.c.bf16 %v694_v60, %v694_v60  ;;  %v9699_v28 = vld [vmem:[#allocation3 + $0x5f0] sm:$0xf]  ;;  %821 = vst [vmem:[#allocation3 + $0x680] sm:$0xf] %v757_v42 }
 0x253   :  { %v4936_v10 = vpop.f32.mrf.mxu3  ;;  %v9700_v52 = vor.u32 %v11143_v0, %v9699_v28  ;;  %1016 = vst [vmem:[#allocation3 + $0x6f0] sm:$0xf] %v378_v13  ;;  %v567_v13 = vpack.c.bf16 %v12404_v46, %v12404_v46  ;;  %v568_v28 = vpack.c.bf16 %v12409_v33, %v12409_v33  ;;  %v11284_v46 = vld [vmem:[%s14620_s1 + $0x178] sm:$0xff] }
 0x254   :  { %v12451_v4 = vadd.f32 %v4936_v10, %v4768_v34  ;;  %822 = vst [vmem:[#allocation3 + $0x6a4] sm:$0xf] %v758_v32  ;;  %v9799_v10 = vld [vmem:[#allocation3 + $0x6c0] sm:$0xf]  ;;  %5205 = vmatpush.bf16.msra.mxu1 %v11284_v46 }
 0x255   :  { %v9800_v35 = vor.u32 %v11169_v16, %v9799_v10  ;;  %631 = vst [vmem:[#allocation3 + $0x6c4] sm:$0xf] %v567_v13  ;;  %v9737_v13 = vld [vmem:[#allocation3 + $0x65c] sm:$0xf0] }
 0x256   :  { %14693 = vst [vmem:[#allocation10_spill] sm:$0xff] %v12451_v4 }
 0x257   :  { %v4603_v45 = vpop.f32.mrf.mxu1  ;;  %v12453_v17 = vpop.f32.mrf.mxu0  ;;  %632 = vst [vmem:[#allocation3 + $0x6e8] sm:$0xf] %v568_v28 }
 0x258   :  { %v4604_v14 = vadd.f32 %v4603_v45, %v12389_v11  ;;  %v1031_v45 = vld [vmem:[#allocation2 + $0x19] sm:$0xff] }
 0x259   :  { %v4769_v62 = vpop.f32.mrf.mxu2  ;;  %v1095_v33 = vpack.c.bf16 %v1031_v45, %v1031_v45 }
 0x25a   :  { %v4770_v34 = vadd.f32 %v4769_v62, %v4601_v18  ;;  %4642 = vmatmul.bf16.gmra.mxu1 %v9696_v53  ;;  %v695_v18 = vld [vmem:[#allocation2 + $0x272] sm:$0xff]  ;;  %v696_v53 = vld [vmem:[#allocation2 + $0x27a] sm:$0xff] }
 0x25b   :  { %v4938_v60 = vpop.f32.mrf.mxu3  ;;  %v759_v0 = vpack.c.bf16 %v695_v18, %v695_v18  ;;  %v1032_v62 = vld [vmem:[#allocation2 + $0x21] sm:$0xff]  ;;  %1159 = vst [vmem:[#allocation3 + $0x10] sm:$0xf] %v1095_v33  ;;  %v697_v33 = vld [vmem:[#allocation2 + $0x28a] sm:$0xff] }
 0x25c   :  { %v12456_v61 = vadd.f32 %v4938_v60, %v4770_v34  ;;  %v9729_v34 = vld [vmem:[#allocation3 + $0x654] sm:$0xf0] }
 0x25d   :  { %v9732_v10 = vor.u32 %v11147_v26, %v9729_v34  ;;  %823 = vst [vmem:[#allocation3 + $0x6c8] sm:$0xf] %v759_v0  ;;  %v11178_v0 = vld [vmem:[#allocation3 + $0x728] sm:$0xf0] }
 0x25e   :  { %4811 = vmatmul.bf16.gmra.mxu2 %v9700_v52  ;;  %v760_v52 = vpack.c.bf16 %v696_v53, %v696_v53 }
 0x25f   :  { %v4605_v4 = vpop.f32.mrf.mxu1  ;;  %v12458_v11 = vpop.f32.mrf.mxu0 }
 0x260   :  { %4980 = vmatmul.bf16.gmra.mxu3 %v9704_v54  ;;  %v4606_v42 = vadd.f32 %v4605_v4, %v12398_v3  ;;  %v11292_v3 = vld [vmem:[%s14620_s1 + $0x1b8] sm:$0xff]  ;;  %824 = vst [vmem:[#allocation3 + $0x6ec] sm:$0xf] %v760_v52 }
 0x261   :  { %v4772_v32 = vpop.f32.mrf.mxu2  ;;  %v11300_v4 = vld [vmem:[%s14620_s1 + $0x1f8] sm:$0xff]  ;;  %5374 = vmatpush.bf16.msra.mxu2 %v11292_v3 }
 0x262   :  { %v4773_v29 = vadd.f32 %v4772_v32, %v4604_v14  ;;  %4488 = vmatmul.bf16.gmra.mxu0 %v9800_v35  ;;  %v1096_v14 = vpack.c.bf16 %v1032_v62, %v1032_v62  ;;  %5543 = vmatpush.bf16.msra.mxu3 %v11300_v4  ;;  %v9735_v54 = vld [vmem:[#allocation3 + $0x638] sm:$0xf]  ;;  %v11152_v35 = vld [vmem:[#allocation3 + $0x658] sm:$0xf0] }
 0x263   :  { %v4941_v43 = vpop.f32.mrf.mxu3  ;;  %v9736_v28 = vor.u32 %v11152_v35, %v9735_v54  ;;  %v569_v54 = vpack.c.bf16 %v12433_v48, %v12433_v48  ;;  %v570_v35 = vpack.c.bf16 %v12438_v47, %v12438_v47  ;;  %v11161_v47 = vld [vmem:[#allocation3 + $0x6a0] sm:$0xf0] }
 0x264   :  { %v12465_v60 = vadd.f32 %v4941_v43, %v4773_v29  ;;  %v11148_v29 = vld [vmem:[#allocation3 + $0x63c] sm:$0xf]  ;;  %1160 = vst [vmem:[#allocation3 + $0x34] sm:$0xf] %v1096_v14  ;;  %v9835_v43 = vld [vmem:[#allocation3 + $0x708] sm:$0xf] }
 0x265   :  { %v9740_v34 = vor.u32 %v11148_v29, %v9737_v13  ;;  %v9836_v3 = vor.u32 %v11178_v0, %v9835_v43  ;;  %v698_v14 = vld [vmem:[#allocation2 + $0x292] sm:$0xff]  ;;  %633 = vst [vmem:[#allocation3 + $0x70c] sm:$0xf] %v569_v54  ;;  %v9773_v54 = vld [vmem:[#allocation3 + $0x6a4] sm:$0xf0] }
 0x266   :  { %v1034_v29 = vld [vmem:[#allocation2 + $0x39] sm:$0xff]  ;;  %634 = vst [vmem:[#allocation3 + $0x730] sm:$0xf] %v570_v35 }
 0x267   :  { %v4608_v16 = vpop.f32.mrf.mxu1  ;;  %v12476_v32 = vpop.f32.mrf.mxu0 }
 0x268   :  { %v4609_v18 = vadd.f32 %v4608_v16, %v12418_v49  ;;  %v11308_v49 = vld [vmem:[%s14620_s1 + $0x238] sm:$0xff] }
 0x269   :  { %v4774_v53 = vpop.f32.mrf.mxu2  ;;  %5712 = vmatpush.bf16.msra.mxu0 %v11308_v49 }
 0x26a   :  { %v4775_v45 = vadd.f32 %v4774_v53, %v4606_v42  ;;  %4647 = vmatmul.bf16.gmra.mxu1 %v9732_v10  ;;  %v1033_v10 = vld [vmem:[#allocation2 + $0x31] sm:$0xff]  ;;  %v761_v53 = vpack.c.bf16 %v697_v33, %v697_v33 }
 0x26b   :  { %v4943_v62 = vpop.f32.mrf.mxu3  ;;  %v1097_v0 = vpack.c.bf16 %v1033_v10, %v1033_v10 }
 0x26c   :  { %v12479_v26 = vadd.f32 %v4943_v62, %v4775_v45  ;;  %v11156_v45 = vld [vmem:[#allocation3 + $0x67c] sm:$0xf]  ;;  %v762_v62 = vpack.c.bf16 %v698_v14, %v698_v14  ;;  %825 = vst [vmem:[#allocation3 + $0x710] sm:$0xf] %v761_v53 }
 0x26d   :  { %1161 = vst [vmem:[#allocation3 + $0x58] sm:$0xf] %v1097_v0 }
 0x26e   :  { %4816 = vmatmul.bf16.gmra.mxu2 %v9736_v28  ;;  %v9765_v28 = vld [vmem:[#allocation3 + $0x69c] sm:$0xf0]  ;;  %826 = vst [vmem:[#allocation3 + $0x734] sm:$0xf] %v762_v62 }
 0x26f   :  { %v4610_v52 = vpop.f32.mrf.mxu1  ;;  %v12484_v4 = vpop.f32.mrf.mxu0  ;;  %1736 = vst [vmem:[#allocation3 + $0x1c] sm:$0xf] %v1097_v0  ;;  %v700_v0 = vld [vmem:[#allocation2 + $0x2aa] sm:$0xff] }
 0x270   :  { %4985 = vmatmul.bf16.gmra.mxu3 %v9740_v34  ;;  %v4611_v42 = vadd.f32 %v4610_v52, %v12427_v58  ;;  %v889_v58 = vld [vmem:[#allocation2 + $0x2a0] sm:$0xff]  ;;  %v890_v34 = vld [vmem:[#allocation2 + $0x2a8] sm:$0xff] }
 0x271   :  { %v4777_v46 = vpop.f32.mrf.mxu2  ;;  %v953_v48 = vpack.c.bf16 %v889_v58, %v889_v58  ;;  %v9771_v52 = vld [vmem:[#allocation3 + $0x680] sm:$0xf]  ;;  %v954_v33 = vpack.c.bf16 %v890_v34, %v890_v34 }
 0x272   :  { %v4778_v16 = vadd.f32 %v4777_v46, %v4609_v18  ;;  %4493 = vmatmul.bf16.gmra.mxu0 %v9836_v3  ;;  %v1098_v18 = vpack.c.bf16 %v1034_v29, %v1034_v29  ;;  %v9768_v3 = vor.u32 %v11156_v45, %v9765_v28  ;;  %v9772_v35 = vor.u32 %v11161_v47, %v9771_v52  ;;  %v8951_v29 = vld [vmem:[#allocation3 + $0x10] sm:$0xf]  ;;  %v10955_v45 = vld [vmem:[#allocation3 + $0x30] sm:$0xf0] }
 0x273   :  { %v4946_v13 = vpop.f32.mrf.mxu3  ;;  %1017 = vst [vmem:[#allocation3 + $0x714] sm:$0xf] %v953_v48  ;;  %v507_v48 = vld [vmem:[#allocation2 + $0x2a1] sm:$0xff]  ;;  %v508_v52 = vld [vmem:[#allocation2 + $0x2a9] sm:$0xff] }
 0x274   :  { %v12491_v43 = vadd.f32 %v4946_v13, %v4778_v16  ;;  %v11157_v13 = vld [vmem:[#allocation3 + $0x684] sm:$0xf]  ;;  %1162 = vst [vmem:[#allocation3 + $0x7c] sm:$0xf] %v1098_v18 }
 0x275   :  { %1018 = vst [vmem:[#allocation3 + $0x738] sm:$0xf] %v954_v33  ;;  %v9776_v58 = vor.u32 %v11157_v13, %v9773_v54  ;;  %v571_v33 = vpack.c.bf16 %v507_v48, %v507_v48  ;;  %v699_v13 = vld [vmem:[#allocation2 + $0x2a2] sm:$0xff] }
 0x276   :  { %14694 = vst [vmem:[#allocation11_spill] sm:$0xff] %v12491_v43  ;;  %v763_v54 = vpack.c.bf16 %v699_v13, %v699_v13  ;;  %v9807_v48 = vld [vmem:[#allocation3 + $0x6c8] sm:$0xf] }
 0x277   :  { %v4613_v49 = vpop.f32.mrf.mxu1  ;;  %v12493_v46 = vpop.f32.mrf.mxu0  ;;  %1737 = vst [vmem:[#allocation3 + $0x40] sm:$0xf] %v1098_v18 }
 0x278   :  { %v4614_v14 = vadd.f32 %v4613_v49, %v12444_v36  ;;  %v8952_v36 = vor.u32 %v10955_v45, %v8951_v29  ;;  %v11165_v49 = vld [vmem:[#allocation3 + $0x6c4] sm:$0xf]  ;;  %v1036_v29 = vld [vmem:[#allocation2 + $0x51] sm:$0xff]  ;;  %635 = vst [vmem:[#allocation3 + $0x754] sm:$0xf] %v571_v33 }
 0x279   :  { %v4779_v16 = vpop.f32.mrf.mxu2  ;;  %v891_v45 = vld [vmem:[#allocation2 + $0x2b8] sm:$0xff]  ;;  %827 = vst [vmem:[#allocation3 + $0x758] sm:$0xf] %v763_v54  ;;  %v9809_v33 = vld [vmem:[#allocation3 + $0x6ec] sm:$0xf0] }
 0x27a   :  { %v4780_v10 = vadd.f32 %v4779_v16, %v4611_v42  ;;  %4652 = vmatmul.bf16.gmra.mxu1 %v9768_v3  ;;  %v9801_v16 = vld [vmem:[#allocation3 + $0x6e4] sm:$0xf0] }
 0x27b   :  { %v4948_v53 = vpop.f32.mrf.mxu3  ;;  %v10964_v54 = vld [vmem:[#allocation3 + $0x78] sm:$0xf0] }
 0x27c   :  { %v12496_v28 = vadd.f32 %v4948_v53, %v4780_v10  ;;  %v572_v10 = vpack.c.bf16 %v508_v52, %v508_v52  ;;  %v1035_v53 = vld [vmem:[#allocation2 + $0x49] sm:$0xff] }
 0x27d   :  { %v11170_v52 = vld [vmem:[#allocation3 + $0x6e8] sm:$0xf0] }
 0x27e   :  { %14695 = vst [vmem:[#allocation12_spill] sm:$0xff] %v12496_v28  ;;  %4821 = vmatmul.bf16.gmra.mxu2 %v9772_v35  ;;  %v764_v35 = vpack.c.bf16 %v700_v0, %v700_v0  ;;  %v1100_v28 = vpack.c.bf16 %v1036_v29, %v1036_v29 }
 0x27f   :  { %v4615_v62 = vpop.f32.mrf.mxu1  ;;  %v12498_v34 = vpop.f32.mrf.mxu0  ;;  %636 = vst [vmem:[#allocation3 + $0x778] sm:$0xf] %v572_v10  ;;  %v9808_v10 = vor.u32 %v11170_v52, %v9807_v48  ;;  %v510_v48 = vld [vmem:[#allocation2 + $0x2c1] sm:$0xff] }
 0x280   :  { %4990 = vmatmul.bf16.gmra.mxu3 %v9776_v58  ;;  %v4616_v42 = vadd.f32 %v4615_v62, %v12453_v17  ;;  %v1099_v17 = vpack.c.bf16 %v1035_v53, %v1035_v53  ;;  %v892_v62 = vld [vmem:[#allocation2 + $0x2c0] sm:$0xff]  ;;  %828 = vst [vmem:[#allocation3 + $0x77c] sm:$0xf] %v764_v35 }
 0x281   :  { %v4782_v3 = vpop.f32.mrf.mxu2  ;;  %v956_v13 = vpack.c.bf16 %v892_v62, %v892_v62  ;;  %1164 = vst [vmem:[#allocation3 + $0xc4] sm:$0xf] %v1100_v28 }
 0x282   :  { %v4783_v47 = vadd.f32 %v4782_v3, %v4614_v14  ;;  %5044 = vmatmul.bf16.vlgmr.msrb.gmra.mxu0 %v8952_v36  ;;  %v9804_v14 = vor.u32 %v11165_v49, %v9801_v16  ;;  %v955_v36 = vpack.c.bf16 %v891_v45, %v891_v45  ;;  %1163 = vst [vmem:[#allocation3 + $0xa0] sm:$0xf] %v1099_v17  ;;  %v8987_v16 = vld [vmem:[#allocation3 + $0x58] sm:$0xf] }
 0x283   :  { %v4951_v18 = vpop.f32.mrf.mxu3  ;;  %1020 = vst [vmem:[#allocation3 + $0x780] sm:$0xf] %v956_v13 }
 0x284   :  { %v12501_v58 = vadd.f32 %v4951_v18, %v4783_v47  ;;  %v11166_v18 = vld [vmem:[#allocation3 + $0x6cc] sm:$0xf]  ;;  %1019 = vst [vmem:[#allocation3 + $0x75c] sm:$0xf] %v955_v36  ;;  %v509_v36 = vld [vmem:[#allocation2 + $0x2b9] sm:$0xff] }
 0x285   :  { %v9812_v45 = vor.u32 %v11166_v18, %v9809_v33  ;;  %1738 = vst [vmem:[#allocation3 + $0x64] sm:$0xf] %v1099_v17  ;;  %v573_v13 = vpack.c.bf16 %v509_v36, %v509_v36  ;;  %v701_v18 = vld [vmem:[#allocation2 + $0x2ba] sm:$0xff]  ;;  %v702_v17 = vld [vmem:[#allocation2 + $0x2c2] sm:$0xff]  ;;  %v9843_v36 = vld [vmem:[#allocation3 + $0x710] sm:$0xf] }
 0x286   :  { %14696 = vst [vmem:[#allocation13_spill] sm:$0xff] %v12501_v58  ;;  %v765_v33 = vpack.c.bf16 %v701_v18, %v701_v18 }
 0x287   :  { %v4618_v3 = vpop.f32.mrf.mxu1  ;;  %v12503_v43 = vpop.f32.mrf.mxu0  ;;  %1739 = vst [vmem:[#allocation3 + $0x88] sm:$0xf] %v1100_v28 }
 0x288   :  { %v4619_v0 = vadd.f32 %v4618_v3, %v12458_v11  ;;  %v8988_v11 = vor.u32 %v10964_v54, %v8987_v16  ;;  %v11174_v3 = vld [vmem:[#allocation3 + $0x70c] sm:$0xf]  ;;  %v893_v54 = vld [vmem:[#allocation2 + $0x2d0] sm:$0xff]  ;;  %637 = vst [vmem:[#allocation3 + $0x79c] sm:$0xf] %v573_v13 }
 0x289   :  { %v4784_v47 = vpop.f32.mrf.mxu2  ;;  %v1038_v16 = vld [vmem:[#allocation2 + $0x69] sm:$0xff]  ;;  %829 = vst [vmem:[#allocation3 + $0x7a0] sm:$0xf] %v765_v33  ;;  %v9845_v13 = vld [vmem:[#allocation3 + $0x734] sm:$0xf0] }
 0x28a   :  { %v4785_v53 = vadd.f32 %v4784_v47, %v4616_v42  ;;  %4657 = vmatmul.bf16.gmra.mxu1 %v9804_v14  ;;  %v9837_v47 = vld [vmem:[#allocation3 + $0x72c] sm:$0xf0]  ;;  %v10973_v33 = vld [vmem:[#allocation3 + $0xc0] sm:$0xf0] }
 0x28b   :  { %v4953_v49 = vpop.f32.mrf.mxu3 }
 0x28c   :  { %v12506_v29 = vadd.f32 %v4953_v49, %v4785_v53  ;;  %v574_v53 = vpack.c.bf16 %v510_v48, %v510_v48  ;;  %v1037_v49 = vld [vmem:[#allocation2 + $0x61] sm:$0xff]  ;;  %v11179_v48 = vld [vmem:[#allocation3 + $0x730] sm:$0xf0] }
 0x28e   :  { %14697 = vst [vmem:[#allocation14_spill] sm:$0xff] %v12506_v29  ;;  %4826 = vmatmul.bf16.gmra.mxu2 %v9808_v10  ;;  %v766_v10 = vpack.c.bf16 %v702_v17, %v702_v17  ;;  %v1102_v29 = vpack.c.bf16 %v1038_v16, %v1038_v16 }
 0x28f   :  { %v4620_v35 = vpop.f32.mrf.mxu1  ;;  %v12508_v62 = vpop.f32.mrf.mxu0  ;;  %638 = vst [vmem:[#allocation3 + $0x7c0] sm:$0xf] %v574_v53  ;;  %v9844_v53 = vor.u32 %v11179_v48, %v9843_v36  ;;  %v512_v36 = vld [vmem:[#allocation2 + $0x2d9] sm:$0xff] }
 0x290   :  { %4995 = vmatmul.bf16.gmra.mxu3 %v9812_v45  ;;  %v4621_v42 = vadd.f32 %v4620_v35, %v12476_v32  ;;  %v1101_v32 = vpack.c.bf16 %v1037_v49, %v1037_v49  ;;  %v894_v35 = vld [vmem:[#allocation2 + $0x2d8] sm:$0xff]  ;;  %830 = vst [vmem:[#allocation3 + $0x7c4] sm:$0xf] %v766_v10 }
 0x291   :  { %v4787_v14 = vpop.f32.mrf.mxu2  ;;  %v958_v18 = vpack.c.bf16 %v894_v35, %v894_v35  ;;  %1166 = vst [vmem:[#allocation3 + $0x10c] sm:$0xf] %v1102_v29 }
 0x292   :  { %v4788_v52 = vadd.f32 %v4787_v14, %v4619_v0  ;;  %5049 = vmatmul.bf16.gmra.mxu0 %v8988_v11  ;;  %v9840_v0 = vor.u32 %v11174_v3, %v9837_v47  ;;  %v957_v11 = vpack.c.bf16 %v893_v54, %v893_v54  ;;  %1165 = vst [vmem:[#allocation3 + $0xe8] sm:$0xf] %v1101_v32  ;;  %v9023_v47 = vld [vmem:[#allocation3 + $0xa0] sm:$0xf] }
 0x293   :  { %v4956_v28 = vpop.f32.mrf.mxu3  ;;  %1022 = vst [vmem:[#allocation3 + $0x7c8] sm:$0xf] %v958_v18 }
 0x294   :  { %v12511_v45 = vadd.f32 %v4956_v28, %v4788_v52  ;;  %v11175_v28 = vld [vmem:[#allocation3 + $0x714] sm:$0xf]  ;;  %1021 = vst [vmem:[#allocation3 + $0x7a4] sm:$0xf] %v957_v11 }
 0x295   :  { %v9848_v54 = vor.u32 %v11175_v28, %v9845_v13  ;;  %1740 = vst [vmem:[#allocation3 + $0xac] sm:$0xf] %v1101_v32  ;;  %v511_v11 = vld [vmem:[#allocation2 + $0x2d1] sm:$0xff]  ;;  %v704_v32 = vld [vmem:[#allocation2 + $0x2da] sm:$0xff] }
 0x296   :  { %14698 = vst [vmem:[#allocation15_spill] sm:$0xff] %v12511_v45  ;;  %v575_v18 = vpack.c.bf16 %v511_v11, %v511_v11  ;;  %v703_v28 = vld [vmem:[#allocation2 + $0x2d2] sm:$0xff] }
 0x297   :  { %v4623_v14 = vpop.f32.mrf.mxu1  ;;  %v12513_v58 = vpop.f32.mrf.mxu0  ;;  %1741 = vst [vmem:[#allocation3 + $0xd0] sm:$0xf] %v1102_v29  ;;  %v767_v13 = vpack.c.bf16 %v703_v28, %v703_v28  ;;  %v896_v11 = vld [vmem:[#allocation2 + $0x2f0] sm:$0xff] }
 0x298   :  { %v4624_v17 = vadd.f32 %v4623_v14, %v12484_v4  ;;  %v9024_v4 = vor.u32 %v10973_v33, %v9023_v47  ;;  %v11183_v14 = vld [vmem:[#allocation3 + $0x754] sm:$0xf]  ;;  %v1040_v47 = vld [vmem:[#allocation2 + $0x81] sm:$0xff]  ;;  %639 = vst [vmem:[#allocation3 + $0x7e4] sm:$0xf] %v575_v18 }
 0x299   :  { %v4789_v52 = vpop.f32.mrf.mxu2  ;;  %v895_v33 = vld [vmem:[#allocation2 + $0x2e8] sm:$0xff]  ;;  %831 = vst [vmem:[#allocation3 + $0x7e8] sm:$0xf] %v767_v13 }
 0x29a   :  { %v4790_v49 = vadd.f32 %v4789_v52, %v4621_v42  ;;  %4662 = vmatmul.bf16.gmra.mxu1 %v9840_v0  ;;  %v9873_v52 = vld [vmem:[#allocation3 + $0x774] sm:$0xf0] }
 0x29b   :  { %v4958_v3 = vpop.f32.mrf.mxu3 }
 0x29c   :  { %v12516_v16 = vadd.f32 %v4958_v3, %v4790_v49  ;;  %v576_v49 = vpack.c.bf16 %v512_v36, %v512_v36  ;;  %v1039_v3 = vld [vmem:[#allocation2 + $0x79] sm:$0xff]  ;;  %v9876_v36 = vor.u32 %v11183_v14, %v9873_v52 }
 0x29e   :  { %14699 = vst [vmem:[#allocation16_spill] sm:$0xff] %v12516_v16  ;;  %4831 = vmatmul.bf16.gmra.mxu2 %v9844_v53  ;;  %v768_v53 = vpack.c.bf16 %v704_v32, %v704_v32  ;;  %v9879_v32 = vld [vmem:[#allocation3 + $0x758] sm:$0xf]  ;;  %v960_v16 = vpack.c.bf16 %v896_v11, %v896_v11 }
 0x29f   :  { %v4625_v10 = vpop.f32.mrf.mxu1  ;;  %v12518_v35 = vpop.f32.mrf.mxu0  ;;  %640 = vst [vmem:[#allocation3 + $0x808] sm:$0xf] %v576_v49  ;;  %v11184_v49 = vld [vmem:[#allocation3 + $0x75c] sm:$0xf] }
 0x2a0   :  { %5000 = vmatmul.bf16.gmra.mxu3 %v9848_v54  ;;  %v4626_v42 = vadd.f32 %v4625_v10, %v12493_v46  ;;  %v11291_v46 = vld [vmem:[%s14620_s1 + $0x1b0] sm:$0xff]  ;;  %v1103_v10 = vpack.c.bf16 %v1039_v3, %v1039_v3  ;;  %832 = vst [vmem:[#allocation3 + $0x80c] sm:$0xf] %v768_v53  ;;  %v9881_v3 = vld [vmem:[#allocation3 + $0x77c] sm:$0xf0] }
 0x2a1   :  { %v4792_v0 = vpop.f32.mrf.mxu2  ;;  %5375 = vmatpush.bf16.msra.mxu2 %v11291_v46  ;;  %1024 = vst [vmem:[#allocation3 + $0x810] sm:$0xf] %v960_v16  ;;  %v11307_v53 = vld [vmem:[%s14620_s1 + $0x230] sm:$0xff]  ;;  %v11192_v16 = vld [vmem:[#allocation3 + $0x79c] sm:$0xf] }
 0x2a2   :  { %v4793_v48 = vadd.f32 %v4792_v0, %v4624_v17  ;;  %5054 = vmatmul.bf16.gmra.mxu0 %v9024_v4  ;;  %v11299_v17 = vld [vmem:[%s14620_s1 + $0x1f0] sm:$0xff]  ;;  %v1104_v0 = vpack.c.bf16 %v1040_v47, %v1040_v47  ;;  %1167 = vst [vmem:[#allocation3 + $0x130] sm:$0xf] %v1103_v10  ;;  %v9059_v47 = vld [vmem:[#allocation3 + $0xe8] sm:$0xf] }
 0x2a3   :  { %v4961_v29 = vpop.f32.mrf.mxu3  ;;  %v11283_v4 = vld [vmem:[%s14620_s1 + $0x170] sm:$0xff]  ;;  %5544 = vmatpush.bf16.msra.mxu3 %v11299_v17  ;;  %v9884_v17 = vor.u32 %v11184_v49, %v9881_v3  ;;  %1742 = vst [vmem:[#allocation3 + $0xf4] sm:$0xf] %v1103_v10  ;;  %5713 = vmatpush.bf16.msra.mxu0 %v11307_v53  ;;  %v9909_v10 = vld [vmem:[#allocation3 + $0x7bc] sm:$0xf0]  ;;  %v898_v53 = vld [vmem:[#allocation2 + $0x308] sm:$0xff] }
 0x2a4   :  { %v12521_v54 = vadd.f32 %v4961_v29, %v4793_v48  ;;  %v959_v48 = vpack.c.bf16 %v895_v33, %v895_v33  ;;  %v11188_v29 = vld [vmem:[#allocation3 + $0x778] sm:$0xf0]  ;;  %5206 = vmatpush.bf16.msra.mxu1 %v11283_v4  ;;  %1168 = vst [vmem:[#allocation3 + $0x154] sm:$0xf] %v1104_v0  ;;  %v10982_v33 = vld [vmem:[#allocation3 + $0x108] sm:$0xf0] }
 0x2a5   :  { %v9880_v52 = vor.u32 %v11188_v29, %v9879_v32  ;;  %1743 = vst [vmem:[#allocation3 + $0x118] sm:$0xf] %v1104_v0  ;;  %v706_v49 = vld [vmem:[#allocation2 + $0x2f2] sm:$0xff] }
 0x2a6   :  { %14700 = vst [vmem:[#allocation17_spill] sm:$0xff] %v12521_v54 }
 0x2a7   :  { %v4628_v28 = vpop.f32.mrf.mxu1  ;;  %v12532_v54 = vpop.f32.mrf.mxu0  ;;  %1023 = vst [vmem:[#allocation3 + $0x7ec] sm:$0xf] %v959_v48  ;;  %v513_v48 = vld [vmem:[#allocation2 + $0x2e9] sm:$0xff] }
 0x2a8   :  { %v4629_v45 = vadd.f32 %v4628_v28, %v12498_v34  ;;  %v9060_v34 = vor.u32 %v10982_v33, %v9059_v47  ;;  %v514_v28 = vld [vmem:[#allocation2 + $0x2f1] sm:$0xff]  ;;  %v577_v0 = vpack.c.bf16 %v513_v48, %v513_v48  ;;  %v1042_v47 = vld [vmem:[#allocation2 + $0x99] sm:$0xff] }
 0x2a9   :  { %v4794_v18 = vpop.f32.mrf.mxu2  ;;  %v578_v29 = vpack.c.bf16 %v514_v28, %v514_v28  ;;  %v897_v33 = vld [vmem:[#allocation2 + $0x300] sm:$0xff] }
 0x2aa   :  { %v4795_v14 = vadd.f32 %v4794_v18, %v4626_v42  ;;  %4667 = vmatmul.bf16.gmra.mxu1 %v9876_v36  ;;  %v705_v18 = vld [vmem:[#allocation2 + $0x2ea] sm:$0xff]  ;;  %641 = vst [vmem:[#allocation3 + $0x82c] sm:$0xf] %v577_v0  ;;  %v9915_v48 = vld [vmem:[#allocation3 + $0x7a0] sm:$0xf] }
 0x2ab   :  { %v4963_v13 = vpop.f32.mrf.mxu3  ;;  %642 = vst [vmem:[#allocation3 + $0x850] sm:$0xf] %v578_v29  ;;  %v11197_v28 = vld [vmem:[#allocation3 + $0x7c0] sm:$0xf0]  ;;  %v9917_v0 = vld [vmem:[#allocation3 + $0x7c4] sm:$0xf0] }
 0x2ac   :  { %v12535_v46 = vadd.f32 %v4963_v13, %v4795_v14  ;;  %v769_v14 = vpack.c.bf16 %v705_v18, %v705_v18  ;;  %v1041_v13 = vld [vmem:[#allocation2 + $0x91] sm:$0xff]  ;;  %v962_v18 = vpack.c.bf16 %v898_v53, %v898_v53  ;;  %v9916_v29 = vor.u32 %v11197_v28, %v9915_v48  ;;  %v516_v48 = vld [vmem:[#allocation2 + $0x309] sm:$0xff] }
 0x2ae   :  { %14701 = vst [vmem:[#allocation18_spill] sm:$0xff] %v12535_v46  ;;  %4836 = vmatmul.bf16.gmra.mxu2 %v9880_v52  ;;  %v770_v52 = vpack.c.bf16 %v706_v49, %v706_v49 }
 0x2af   :  { %v4630_v4 = vpop.f32.mrf.mxu1  ;;  %v12540_v42 = vpop.f32.mrf.mxu0  ;;  %833 = vst [vmem:[#allocation3 + $0x830] sm:$0xf] %v769_v14  ;;  %v10991_v14 = vld [vmem:[#allocation3 + $0x150] sm:$0xf0] }
 0x2b0   :  { %5005 = vmatmul.bf16.gmra.mxu3 %v9884_v17  ;;  %v4631_v11 = vadd.f32 %v4630_v4, %v12503_v43  ;;  %v1105_v43 = vpack.c.bf16 %v1041_v13, %v1041_v13  ;;  %v1106_v4 = vpack.c.bf16 %v1042_v47, %v1042_v47  ;;  %834 = vst [vmem:[#allocation3 + $0x854] sm:$0xf] %v770_v52 }
 0x2b1   :  { %v4797_v36 = vpop.f32.mrf.mxu2  ;;  %1026 = vst [vmem:[#allocation3 + $0x858] sm:$0xf] %v962_v18 }
 0x2b2   :  { %v4798_v32 = vadd.f32 %v4797_v36, %v4629_v45  ;;  %5059 = vmatmul.bf16.gmra.mxu0 %v9060_v34  ;;  %v9912_v45 = vor.u32 %v11192_v16, %v9909_v10  ;;  %v961_v34 = vpack.c.bf16 %v897_v33, %v897_v33  ;;  %1169 = vst [vmem:[#allocation3 + $0x178] sm:$0xf] %v1105_v43  ;;  %v9095_v10 = vld [vmem:[#allocation3 + $0x130] sm:$0xf] }
 0x2b3   :  { %v4966_v3 = vpop.f32.mrf.mxu3  ;;  %1170 = vst [vmem:[#allocation3 + $0x19c] sm:$0xf] %v1106_v4 }
 0x2b4   :  { %v12543_v17 = vadd.f32 %v4966_v3, %v4798_v32  ;;  %v11193_v3 = vld [vmem:[#allocation3 + $0x7a4] sm:$0xf]  ;;  %1025 = vst [vmem:[#allocation3 + $0x834] sm:$0xf] %v961_v34 }
 0x2b5   :  { %v9920_v33 = vor.u32 %v11193_v3, %v9917_v0  ;;  %1744 = vst [vmem:[#allocation3 + $0x13c] sm:$0xf] %v1105_v43  ;;  %v515_v34 = vld [vmem:[#allocation2 + $0x301] sm:$0xff]  ;;  %v708_v43 = vld [vmem:[#allocation2 + $0x30a] sm:$0xff] }
 0x2b6   :  { %14702 = vst [vmem:[#allocation19_spill] sm:$0xff] %v12543_v17  ;;  %v579_v18 = vpack.c.bf16 %v515_v34, %v515_v34  ;;  %v707_v3 = vld [vmem:[#allocation2 + $0x302] sm:$0xff] }
 0x2b7   :  { %v4633_v36 = vpop.f32.mrf.mxu1  ;;  %v12545_v46 = vpop.f32.mrf.mxu0  ;;  %1745 = vst [vmem:[#allocation3 + $0x160] sm:$0xf] %v1106_v4  ;;  %v771_v0 = vpack.c.bf16 %v707_v3, %v707_v3  ;;  %v9951_v34 = vld [vmem:[#allocation3 + $0x7e8] sm:$0xf] }
 0x2b8   :  { %v4634_v49 = vadd.f32 %v4633_v36, %v12508_v62  ;;  %v9096_v62 = vor.u32 %v10991_v14, %v9095_v10  ;;  %v11201_v36 = vld [vmem:[#allocation3 + $0x7e4] sm:$0xf]  ;;  %v1044_v10 = vld [vmem:[#allocation2 + $0xb1] sm:$0xff]  ;;  %643 = vst [vmem:[#allocation3 + $0x874] sm:$0xf] %v579_v18 }
 0x2b9   :  { %v4799_v32 = vpop.f32.mrf.mxu2  ;;  %v899_v14 = vld [vmem:[#allocation2 + $0x318] sm:$0xff]  ;;  %835 = vst [vmem:[#allocation3 + $0x878] sm:$0xf] %v771_v0  ;;  %v9953_v18 = vld [vmem:[#allocation3 + $0x80c] sm:$0xf0] }
 0x2ba   :  { %v4800_v13 = vadd.f32 %v4799_v32, %v4631_v11  ;;  %4672 = vmatmul.bf16.gmra.mxu1 %v9912_v45  ;;  %v9945_v32 = vld [vmem:[#allocation3 + $0x804] sm:$0xf0]  ;;  %v11000_v0 = vld [vmem:[#allocation3 + $0x198] sm:$0xf0] }
 0x2bb   :  { %v4968_v16 = vpop.f32.mrf.mxu3 }
 0x2bc   :  { %v12548_v47 = vadd.f32 %v4968_v16, %v4800_v13  ;;  %v580_v13 = vpack.c.bf16 %v516_v48, %v516_v48  ;;  %v1043_v16 = vld [vmem:[#allocation2 + $0xa9] sm:$0xff] }
 0x2bd   :  { %v11206_v48 = vld [vmem:[#allocation3 + $0x808] sm:$0xf0] }
 0x2be   :  { %14703 = vst [vmem:[#allocation20_spill] sm:$0xff] %v12548_v47  ;;  %4841 = vmatmul.bf16.gmra.mxu2 %v9916_v29  ;;  %v772_v29 = vpack.c.bf16 %v708_v43, %v708_v43  ;;  %v1108_v47 = vpack.c.bf16 %v1044_v10, %v1044_v10 }
 0x2bf   :  { %v4635_v52 = vpop.f32.mrf.mxu1  ;;  %v12550_v53 = vpop.f32.mrf.mxu0  ;;  %644 = vst [vmem:[#allocation3 + $0x898] sm:$0xf] %v580_v13  ;;  %v9952_v13 = vor.u32 %v11206_v48, %v9951_v34  ;;  %v11210_v34 = vld [vmem:[#allocation3 + $0x82c] sm:$0xf]  ;;  %v517_v48 = vld [vmem:[#allocation2 + $0x319] sm:$0xff] }
 0x2c0   :  { %5010 = vmatmul.bf16.gmra.mxu3 %v9920_v33  ;;  %v4636_v11 = vadd.f32 %v4635_v52, %v12513_v58  ;;  %v1107_v58 = vpack.c.bf16 %v1043_v16, %v1043_v16  ;;  %v900_v52 = vld [vmem:[#allocation2 + $0x320] sm:$0xff]  ;;  %836 = vst [vmem:[#allocation3 + $0x89c] sm:$0xf] %v772_v29  ;;  %v196_v29 = vld [vmem:[%s14621_s0 + $0x1f0] sm:$0xff] }
 0x2c1   :  { %v4802_v45 = vpop.f32.mrf.mxu2  ;;  %v964_v3 = vpack.c.bf16 %v900_v52, %v900_v52  ;;  %1172 = vst [vmem:[#allocation3 + $0x1e4] sm:$0xf] %v1108_v47 }
 0x2c2   :  { %v4803_v28 = vadd.f32 %v4802_v45, %v4634_v49  ;;  %5064 = vmatmul.bf16.gmra.mxu0 %v9096_v62  ;;  %v9948_v49 = vor.u32 %v11201_v36, %v9945_v32  ;;  %v963_v62 = vpack.c.bf16 %v899_v14, %v899_v14  ;;  %1171 = vst [vmem:[#allocation3 + $0x1c0] sm:$0xf] %v1107_v58  ;;  %v9131_v36 = vld [vmem:[#allocation3 + $0x178] sm:$0xf] }
 0x2c3   :  { %v4971_v4 = vpop.f32.mrf.mxu3  ;;  %1028 = vst [vmem:[#allocation3 + $0x8a0] sm:$0xf] %v964_v3  ;;  %v518_v3 = vld [vmem:[#allocation2 + $0x321] sm:$0xff] }
 0x2c4   :  { %v12553_v33 = vadd.f32 %v4971_v4, %v4803_v28  ;;  %v11202_v4 = vld [vmem:[#allocation3 + $0x7ec] sm:$0xf]  ;;  %1027 = vst [vmem:[#allocation3 + $0x87c] sm:$0xf] %v963_v62 }
 0x2c5   :  { %v9956_v14 = vor.u32 %v11202_v4, %v9953_v18  ;;  %261 = vst [vmem:[#allocation2 + $0x331] sm:$0xff] %v196_v29  ;;  %v581_v4 = vpack.c.bf16 %v517_v48, %v517_v48  ;;  %v582_v18 = vpack.c.bf16 %v518_v3, %v518_v3  ;;  %v1045_v29 = vld [vmem:[#allocation2 + $0xc1] sm:$0xff]  ;;  %v9987_v3 = vld [vmem:[#allocation3 + $0x830] sm:$0xf] }
 0x2c6   :  { %1746 = vst [vmem:[#allocation3 + $0x184] sm:$0xf] %v1107_v58 }
 0x2c7   :  { %v4638_v45 = vpop.f32.mrf.mxu1  ;;  %v12555_v17 = vpop.f32.mrf.mxu0  ;;  %1747 = vst [vmem:[#allocation3 + $0x1a8] sm:$0xf] %v1108_v47 }
 0x2c8   :  { %v4639_v43 = vadd.f32 %v4638_v45, %v12518_v35  ;;  %v197_v35 = vld [vmem:[%s14621_s0 + $0x1f8] sm:$0xff]  ;;  %645 = vst [vmem:[#allocation3 + $0x8bc] sm:$0xf] %v581_v4 }
 0x2c9   :  { %v4804_v28 = vpop.f32.mrf.mxu2  ;;  %262 = vst [vmem:[#allocation2 + $0x339] sm:$0xff] %v197_v35  ;;  %v1046_v35 = vld [vmem:[#allocation2 + $0xc9] sm:$0xff] }
 0x2ca   :  { %v4805_v16 = vadd.f32 %v4804_v28, %v4636_v11  ;;  %4677 = vmatmul.bf16.gmra.mxu1 %v9948_v49  ;;  %v9132_v11 = vor.u32 %v11000_v0, %v9131_v36  ;;  %646 = vst [vmem:[#allocation3 + $0x8e0] sm:$0xf] %v582_v18  ;;  %v11211_v18 = vld [vmem:[#allocation3 + $0x834] sm:$0xf] }
 0x2cb   :  { %v4973_v32 = vpop.f32.mrf.mxu3 }
 0x2cc   :  { %v12564_v10 = vadd.f32 %v4973_v32, %v4805_v16  ;;  %v9981_v16 = vld [vmem:[#allocation3 + $0x84c] sm:$0xf0]  ;;  %v709_v32 = vld [vmem:[#allocation2 + $0x31a] sm:$0xff] }
 0x2cd   :  { %v773_v58 = vpack.c.bf16 %v709_v32, %v709_v32  ;;  %v901_v47 = vld [vmem:[#allocation2 + $0x330] sm:$0xff]  ;;  %v9984_v48 = vor.u32 %v11210_v34, %v9981_v16  ;;  %v9989_v16 = vld [vmem:[#allocation3 + $0x854] sm:$0xf0] }
 0x2ce   :  { %14704 = vst [vmem:[#allocation21_spill] sm:$0xff] %v12564_v10  ;;  %4846 = vmatmul.bf16.gmra.mxu2 %v9952_v13  ;;  %v710_v13 = vld [vmem:[#allocation2 + $0x322] sm:$0xff] }
 0x2cf   :  { %v4640_v52 = vpop.f32.mrf.mxu1  ;;  %v12566_v49 = vpop.f32.mrf.mxu0  ;;  %v774_v0 = vpack.c.bf16 %v710_v13, %v710_v13  ;;  %837 = vst [vmem:[#allocation3 + $0x8c0] sm:$0xf] %v773_v58  ;;  %v11215_v13 = vld [vmem:[#allocation3 + $0x850] sm:$0xf0]  ;;  %v11281_v58 = vld [vmem:[%s14620_s1 + $0x160] sm:$0xff] }
 0x2d0   :  { %5015 = vmatmul.bf16.gmra.mxu3 %v9956_v14  ;;  %v4641_v62 = vadd.f32 %v4640_v52, %v12532_v54  ;;  %v11282_v54 = vld [vmem:[%s14620_s1 + $0x168] sm:$0xff]  ;;  %v902_v52 = vld [vmem:[#allocation2 + $0x338] sm:$0xff] }
 0x2d1   :  { %v4807_v45 = vpop.f32.mrf.mxu2  ;;  %5207 = vmatpush.bf16.msra.mxu1 %v11282_v54  ;;  %838 = vst [vmem:[#allocation3 + $0x8e4] sm:$0xf] %v774_v0  ;;  %v966_v4 = vpack.c.bf16 %v902_v52, %v902_v52  ;;  %v9988_v0 = vor.u32 %v11215_v13, %v9987_v3  ;;  %v9167_v54 = vld [vmem:[#allocation3 + $0x1c0] sm:$0xf] }
 0x2d2   :  { %v4808_v28 = vadd.f32 %v4807_v45, %v4639_v43  ;;  %5069 = vmatmul.bf16.gmra.mxu0 %v9132_v11  ;;  %v11290_v43 = vld [vmem:[%s14620_s1 + $0x1a8] sm:$0xff]  ;;  %v1109_v11 = vpack.c.bf16 %v1045_v29, %v1045_v29  ;;  %v1110_v45 = vpack.c.bf16 %v1046_v35, %v1046_v35  ;;  %v11289_v35 = vld [vmem:[%s14620_s1 + $0x1a0] sm:$0xff] }
 0x2d3   :  { %v4976_v36 = vpop.f32.mrf.mxu3  ;;  %5376 = vmatpush.bf16.msra.mxu2 %v11290_v43  ;;  %v11009_v43 = vld [vmem:[#allocation3 + $0x1e0] sm:$0xf0]  ;;  %1030 = vst [vmem:[#allocation3 + $0x8e8] sm:$0xf] %v966_v4 }
 0x2d4   :  { %v12569_v14 = vadd.f32 %v4976_v36, %v4808_v28  ;;  %v965_v28 = vpack.c.bf16 %v901_v47, %v901_v47  ;;  %1173 = vst [vmem:[#allocation3 + $0x208] sm:$0xf] %v1109_v11  ;;  %v9168_v3 = vor.u32 %v11009_v43, %v9167_v54 }
 0x2d5   :  { %1174 = vst [vmem:[#allocation3 + $0x22c] sm:$0xf] %v1110_v45  ;;  %5208 = vmatpush.bf16.msra.mxu1 %v11281_v58 }
 0x2d6   :  { %14705 = vst [vmem:[#allocation22_spill] sm:$0xff] %v12569_v14  ;;  %v11298_v14 = vld [vmem:[%s14620_s1 + $0x1e8] sm:$0xff] }
 0x2d7   :  { %v4643_v32 = vpop.f32.mrf.mxu1  ;;  %v12577_v36 = vpop.f32.mrf.mxu0  ;;  %5545 = vmatpush.bf16.msra.mxu3 %v11298_v14  ;;  %1029 = vst [vmem:[#allocation3 + $0x8c4] sm:$0xf] %v965_v28  ;;  %5377 = vmatpush.bf16.msra.mxu2 %v11289_v35  ;;  %v11297_v14 = vld [vmem:[%s14620_s1 + $0x1e0] sm:$0xff]  ;;  %v10017_v35 = vld [vmem:[#allocation3 + $0x894] sm:$0xf0] }
 0x2d8   :  { %v4644_v29 = vadd.f32 %v4643_v32, %v12540_v42  ;;  %v9992_v32 = vor.u32 %v11211_v18, %v9989_v16  ;;  %1748 = vst [vmem:[#allocation3 + $0x1cc] sm:$0xf] %v1109_v11  ;;  %v11296_v11 = vld [vmem:[%s14620_s1 + $0x1d8] sm:$0xff]  ;;  %v11287_v16 = vld [vmem:[%s14620_s1 + $0x190] sm:$0xff] }
 0x2d9   :  { %v4809_v34 = vpop.f32.mrf.mxu2  ;;  %1749 = vst [vmem:[#allocation3 + $0x1f0] sm:$0xf] %v1110_v45  ;;  %v11279_v45 = vld [vmem:[%s14620_s1 + $0x150] sm:$0xff] }
 0x2da   :  { %v4810_v47 = vadd.f32 %v4809_v34, %v4641_v62  ;;  %4682 = vmatmul.bf16.gmra.mxu1 %v9984_v48  ;;  %v11280_v62 = vld [vmem:[%s14620_s1 + $0x158] sm:$0xff]  ;;  %v11219_v34 = vld [vmem:[#allocation3 + $0x874] sm:$0xf]  ;;  %v10061_v10 = vld [vmem:[#allocation3 + $0x8e4] sm:$0xf0] }
 0x2db   :  { %v4978_v42 = vpop.f32.mrf.mxu3  ;;  %5546 = vmatpush.bf16.msra.mxu3 %v11297_v14  ;;  %v11288_v48 = vld [vmem:[%s14620_s1 + $0x198] sm:$0xff]  ;;  %5209 = vmatpush.bf16.msra.mxu1 %v11280_v62 }
 0x2dc   :  { %v12592_v52 = vadd.f32 %v4978_v42, %v4810_v47  ;;  %5378 = vmatpush.bf16.msra.mxu2 %v11288_v48  ;;  %v1047_v47 = vld [vmem:[#allocation2 + $0xd9] sm:$0xff]  ;;  %v11286_v48 = vld [vmem:[%s14620_s1 + $0x188] sm:$0xff] }
 0x2dd   :  { %v1111_v42 = vpack.c.bf16 %v1047_v47, %v1047_v47  ;;  %v1223_v14 = vld [vmem:[#allocation2 + $0x1a] sm:$0xff] }
 0x2de   :  { %14706 = vst [vmem:[#allocation23_spill] sm:$0xff] %v12592_v52  ;;  %4851 = vmatmul.bf16.gmra.mxu2 %v9988_v0  ;;  %v1048_v0 = vld [vmem:[#allocation2 + $0xe1] sm:$0xff]  ;;  %v10023_v47 = vld [vmem:[#allocation3 + $0x878] sm:$0xf] }
 0x2df   :  { %v4645_v28 = vpop.f32.mrf.mxu1  ;;  %v12600_v13 = vpop.f32.mrf.mxu0  ;;  %5547 = vmatpush.bf16.msra.mxu3 %v11296_v11  ;;  %5210 = vmatpush.bf16.msra.mxu1 %v11279_v45  ;;  %v1112_v43 = vpack.c.bf16 %v1048_v0, %v1048_v0  ;;  %v1416_v11 = vld [vmem:[#allocation2 + $0x30] sm:$0xff]  ;;  %1175 = vst [vmem:[#allocation3 + $0x250] sm:$0xf] %v1111_v42 }
 0x2e0   :  { %5020 = vmatmul.bf16.gmra.mxu3 %v9992_v32  ;;  %v4646_v4 = vadd.f32 %v4645_v28, %v12545_v46  ;;  %5379 = vmatpush.bf16.msra.mxu2 %v11287_v16  ;;  %v11295_v46 = vld [vmem:[%s14620_s1 + $0x1d0] sm:$0xff]  ;;  %v1224_v32 = vld [vmem:[#allocation2 + $0x22] sm:$0xff]  ;;  %v1480_v45 = vpack.c.bf16 %v1416_v11, %v1416_v11  ;;  %v10020_v16 = vor.u32 %v11219_v34, %v10017_v35 }
 0x2e1   :  { %v4812_v18 = vpop.f32.mrf.mxu2  ;;  %v1288_v28 = vpack.c.bf16 %v1224_v32, %v1224_v32  ;;  %1176 = vst [vmem:[#allocation3 + $0x274] sm:$0xf] %v1112_v43  ;;  %v11220_v32 = vld [vmem:[#allocation3 + $0x87c] sm:$0xf]  ;;  %v10025_v34 = vld [vmem:[#allocation3 + $0x89c] sm:$0xf0] }
 0x2e2   :  { %v4813_v58 = vadd.f32 %v4812_v18, %v4644_v29  ;;  %5074 = vmatmul.bf16.gmra.mxu0 %v9168_v3  ;;  %v11278_v29 = vld [vmem:[%s14620_s1 + $0x148] sm:$0xff]  ;;  %v1287_v3 = vpack.c.bf16 %v1223_v14, %v1223_v14  ;;  %v1417_v18 = vld [vmem:[#allocation2 + $0x38] sm:$0xff]  ;;  %v11277_v35 = vld [vmem:[%s14620_s1 + $0x140] sm:$0xff]  ;;  %1544 = vst [vmem:[#allocation3 + $0x18] sm:$0xf] %v1480_v45  ;;  %v10028_v52 = vor.u32 %v11220_v32, %v10025_v34 }
 0x2e3   :  { %v4981_v54 = vpop.f32.mrf.mxu3  ;;  %5548 = vmatpush.bf16.msra.mxu3 %v11295_v46  ;;  %5211 = vmatpush.bf16.msra.mxu1 %v11278_v29  ;;  %v11294_v14 = vld [vmem:[%s14620_s1 + $0x1c8] sm:$0xff]  ;;  %1352 = vst [vmem:[#allocation3 + $0x38] sm:$0xf] %v1288_v28  ;;  %v11285_v29 = vld [vmem:[%s14620_s1 + $0x180] sm:$0xff]  ;;  %v1225_v34 = vld [vmem:[#allocation2 + $0x32] sm:$0xff] }
 0x2e4   :  { %v12615_v62 = vadd.f32 %v4981_v54, %v4813_v58  ;;  %v1481_v58 = vpack.c.bf16 %v1417_v18, %v1417_v18  ;;  %v11224_v54 = vld [vmem:[#allocation3 + $0x898] sm:$0xf0]  ;;  %5380 = vmatpush.bf16.msra.mxu2 %v11286_v48  ;;  %1351 = vst [vmem:[#allocation3 + $0x14] sm:$0xf] %v1287_v3  ;;  %v9203_v3 = vld [vmem:[#allocation3 + $0x208] sm:$0xf] }
 0x2e5   :  { %v10024_v18 = vor.u32 %v11224_v54, %v10023_v47  ;;  %v11293_v28 = vld [vmem:[%s14620_s1 + $0x1c0] sm:$0xff]  ;;  %1750 = vst [vmem:[#allocation3 + $0x214] sm:$0xf] %v1111_v42  ;;  %v11306_v45 = vld [vmem:[%s14620_s1 + $0x228] sm:$0xff]  ;;  %v1049_v42 = vld [vmem:[#allocation2 + $0xf1] sm:$0xff] }
 0x2e6   :  { %14707 = vst [vmem:[#allocation24_spill] sm:$0xff] %v12615_v62  ;;  %5714 = vmatpush.bf16.msra.mxu0 %v11306_v45 }
 0x2e7   :  { %v4648_v0 = vpop.f32.mrf.mxu1  ;;  %v12623_v62 = vpop.f32.mrf.mxu0  ;;  %5549 = vmatpush.bf16.msra.mxu3 %v11294_v14  ;;  %1545 = vst [vmem:[#allocation3 + $0x3c] sm:$0xf] %v1481_v58  ;;  %5212 = vmatpush.bf16.msra.mxu1 %v11277_v35 }
 0x2e8   :  { %v4649_v46 = vadd.f32 %v4648_v0, %v12550_v53  ;;  %v11018_v0 = vld [vmem:[#allocation3 + $0x228] sm:$0xf0]  ;;  %5381 = vmatpush.bf16.msra.mxu2 %v11285_v29  ;;  %1751 = vst [vmem:[#allocation3 + $0x238] sm:$0xf] %v1112_v43  ;;  %v1113_v43 = vpack.c.bf16 %v1049_v42, %v1049_v42  ;;  %v1226_v29 = vld [vmem:[#allocation2 + $0x3a] sm:$0xff] }
 0x2e9   :  { %v4814_v11 = vpop.f32.mrf.mxu2 }
 0x2ea   :  { %v4815_v48 = vadd.f32 %v4814_v11, %v4646_v4  ;;  %4687 = vmatmul.bf16.gmra.mxu1 %v10020_v16  ;;  %v9204_v4 = vor.u32 %v11018_v0, %v9203_v3  ;;  %v1050_v11 = vld [vmem:[#allocation2 + $0xf9] sm:$0xff]  ;;  %v1289_v0 = vpack.c.bf16 %v1225_v34, %v1225_v34  ;;  %1177 = vst [vmem:[#allocation3 + $0x298] sm:$0xf] %v1113_v43 }
 0x2eb   :  { %v4983_v53 = vpop.f32.mrf.mxu3  ;;  %5550 = vmatpush.bf16.msra.mxu3 %v11293_v28  ;;  %v1114_v32 = vpack.c.bf16 %v1050_v11, %v1050_v11  ;;  %v11228_v3 = vld [vmem:[#allocation3 + $0x8bc] sm:$0xf]  ;;  %v1290_v28 = vpack.c.bf16 %v1226_v29, %v1226_v29  ;;  %v11229_v29 = vld [vmem:[#allocation3 + $0x8c4] sm:$0xf]  ;;  %1752 = vst [vmem:[#allocation3 + $0x25c] sm:$0xf] %v1113_v43 }
 0x2ec   :  { %v12638_v14 = vadd.f32 %v4983_v53, %v4815_v48  ;;  %v1418_v48 = vld [vmem:[#allocation2 + $0x48] sm:$0xff]  ;;  %v10053_v53 = vld [vmem:[#allocation3 + $0x8dc] sm:$0xf0]  ;;  %1353 = vst [vmem:[#allocation3 + $0x5c] sm:$0xf] %v1289_v0  ;;  %v10064_v0 = vor.u32 %v11229_v29, %v10061_v10  ;;  %v1052_v43 = vld [vmem:[#allocation2 + $0x111] sm:$0xff] }
 0x2ed   :  { %1178 = vst [vmem:[#allocation3 + $0x2bc] sm:$0xf] %v1114_v32  ;;  %v1420_v29 = vld [vmem:[#allocation2 + $0x60] sm:$0xff] }
 0x2ee   :  { %14708 = vst [vmem:[#allocation25_spill] sm:$0xff] %v12638_v14  ;;  %4856 = vmatmul.bf16.gmra.mxu2 %v10024_v18  ;;  %v1419_v14 = vld [vmem:[#allocation2 + $0x50] sm:$0xff] }
 0x2ef   :  { %v4650_v16 = vpop.f32.mrf.mxu1  ;;  %v12643_v47 = vpop.f32.mrf.mxu0  ;;  %v1483_v45 = vpack.c.bf16 %v1419_v14, %v1419_v14  ;;  %1354 = vst [vmem:[#allocation3 + $0x80] sm:$0xf] %v1290_v28 }
 0x2f0   :  { %5025 = vmatmul.bf16.gmra.mxu3 %v10028_v52  ;;  %v4651_v58 = vadd.f32 %v4650_v16, %v12555_v17  ;;  %v1482_v17 = vpack.c.bf16 %v1418_v48, %v1418_v48  ;;  %v10056_v16 = vor.u32 %v11228_v3, %v10053_v53  ;;  %v11027_v3 = vld [vmem:[#allocation3 + $0x270] sm:$0xf0]  ;;  %1753 = vst [vmem:[#allocation3 + $0x280] sm:$0xf] %v1114_v32 }
 0x2f1   :  { %v4817_v54 = vpop.f32.mrf.mxu2  ;;  %1547 = vst [vmem:[#allocation3 + $0x84] sm:$0xf] %v1483_v45 }
 0x2f2   :  { %v4818_v35 = vadd.f32 %v4817_v54, %v4649_v46  ;;  %5079 = vmatmul.bf16.gmra.mxu0 %v9204_v4  ;;  %v10059_v4 = vld [vmem:[#allocation3 + $0x8c0] sm:$0xf]  ;;  %v11233_v54 = vld [vmem:[#allocation3 + $0x8e0] sm:$0xf0]  ;;  %1546 = vst [vmem:[#allocation3 + $0x60] sm:$0xf] %v1482_v17 }
 0x2f3   :  { %v4986_v18 = vpop.f32.mrf.mxu3  ;;  %v10060_v48 = vor.u32 %v11233_v54, %v10059_v4  ;;  %v1116_v54 = vpack.c.bf16 %v1052_v43, %v1052_v43 }
 0x2f4   :  { %v12646_v52 = vadd.f32 %v4986_v18, %v4818_v35  ;;  %v9239_v18 = vld [vmem:[#allocation3 + $0x250] sm:$0xf] }
 0x2f5   :  { %v9240_v28 = vor.u32 %v11027_v3, %v9239_v18  ;;  %v8953_v18 = vld [vmem:[#allocation3 + $0x34] sm:$0xf0]  ;;  %1180 = vst [vmem:[#allocation3 + $0x304] sm:$0xf] %v1116_v54 }
 0x2f6   :  { %14709 = vst [vmem:[#allocation26_spill] sm:$0xff] %v12646_v52 }
 0x2f7   :  { %v4653_v46 = vpop.f32.mrf.mxu1  ;;  %v12648_v42 = vpop.f32.mrf.mxu0  ;;  %1755 = vst [vmem:[#allocation3 + $0x2c8] sm:$0xf] %v1116_v54 }
 0x2f8   :  { %v4654_v11 = vadd.f32 %v4653_v46, %v12566_v49  ;;  %v1227_v46 = vld [vmem:[#allocation2 + $0x4a] sm:$0xff] }
 0x2f9   :  { %v4819_v34 = vpop.f32.mrf.mxu2  ;;  %v1291_v10 = vpack.c.bf16 %v1227_v46, %v1227_v46 }
 0x2fa   :  { %v4820_v35 = vadd.f32 %v4819_v34, %v4651_v58  ;;  %4692 = vmatmul.bf16.gmra.mxu1 %v10056_v16  ;;  %v1051_v16 = vld [vmem:[#allocation2 + $0x109] sm:$0xff]  ;;  %v1228_v34 = vld [vmem:[#allocation2 + $0x52] sm:$0xff] }
 0x2fb   :  { %v4988_v14 = vpop.f32.mrf.mxu3  ;;  %v1115_v32 = vpack.c.bf16 %v1051_v16, %v1051_v16  ;;  %v1292_v3 = vpack.c.bf16 %v1228_v34, %v1228_v34  ;;  %1355 = vst [vmem:[#allocation3 + $0xa4] sm:$0xf] %v1291_v10  ;;  %v8961_v34 = vld [vmem:[#allocation3 + $0x3c] sm:$0xf0] }
 0x2fc   :  { %v12651_v53 = vadd.f32 %v4988_v14, %v4820_v35  ;;  %v1421_v35 = vld [vmem:[#allocation2 + $0x68] sm:$0xff]  ;;  %v10951_v14 = vld [vmem:[#allocation3 + $0x14] sm:$0xf] }
 0x2fd   :  { %1179 = vst [vmem:[#allocation3 + $0x2e0] sm:$0xf] %v1115_v32 }
 0x2fe   :  { %4861 = vmatmul.bf16.gmra.mxu2 %v10060_v48  ;;  %1356 = vst [vmem:[#allocation3 + $0xc8] sm:$0xf] %v1292_v3 }
 0x2ff   :  { %v4655_v52 = vpop.f32.mrf.mxu1  ;;  %v5045_v49 = vpop.f32.mrf.mxu0  ;;  %1754 = vst [vmem:[#allocation3 + $0x2a4] sm:$0xf] %v1115_v32  ;;  %v1054_v32 = vld [vmem:[#allocation2 + $0x129] sm:$0xff] }
 0x300   :  { %5030 = vmatmul.bf16.gmra.mxu3 %v10064_v0  ;;  %v4656_v17 = vadd.f32 %v4655_v52, %v12577_v36  ;;  %v12655_v45 = vadd.f32 %v5045_v49, %v12137_v21  ;;  %v1484_v21 = vpack.c.bf16 %v1420_v29, %v1420_v29  ;;  %v1485_v52 = vpack.c.bf16 %v1421_v35, %v1421_v35  ;;  %v10956_v49 = vld [vmem:[#allocation3 + $0x38] sm:$0xf0] }
 0x301   :  { %v4822_v58 = vpop.f32.mrf.mxu2  ;;  %v8956_v0 = vor.u32 %v10951_v14, %v8953_v18  ;;  %v11036_v14 = vld [vmem:[#allocation3 + $0x2b8] sm:$0xf0] }
 0x302   :  { %v4823_v4 = vadd.f32 %v4822_v58, %v4654_v11  ;;  %5084 = vmatmul.bf16.gmra.mxu0 %v9240_v28  ;;  %v8959_v28 = vld [vmem:[#allocation3 + $0x18] sm:$0xf]  ;;  %1548 = vst [vmem:[#allocation3 + $0xa8] sm:$0xf] %v1484_v21 }
 0x303   :  { %v4991_v48 = vpop.f32.mrf.mxu3  ;;  %1549 = vst [vmem:[#allocation3 + $0xcc] sm:$0xf] %v1485_v52  ;;  %v8960_v35 = vor.u32 %v10956_v49, %v8959_v28  ;;  %v1229_v28 = vld [vmem:[#allocation2 + $0x62] sm:$0xff] }
 0x304   :  { %v12657_v36 = vadd.f32 %v4991_v48, %v4823_v4  ;;  %v10952_v4 = vld [vmem:[#allocation3 + $0x1c] sm:$0xf]  ;;  %v9275_v48 = vld [vmem:[#allocation3 + $0x298] sm:$0xf] }
 0x305   :  { %v8964_v3 = vor.u32 %v10952_v4, %v8961_v34  ;;  %v1293_v4 = vpack.c.bf16 %v1229_v28, %v1229_v28  ;;  %v1422_v34 = vld [vmem:[#allocation2 + $0x78] sm:$0xff] }
 0x307   :  { %v4658_v11 = vpop.f32.mrf.mxu1  ;;  %v5047_v58 = vpop.f32.mrf.mxu0  ;;  %1357 = vst [vmem:[#allocation3 + $0xec] sm:$0xf] %v1293_v4 }
 0x308   :  { %v4659_v16 = vadd.f32 %v4658_v11, %v12600_v13  ;;  %v12661_v43 = vadd.f32 %v5047_v58, %v12154_v44  ;;  %v9276_v13 = vor.u32 %v11036_v14, %v9275_v48  ;;  %v1118_v58 = vpack.c.bf16 %v1054_v32, %v1054_v32  ;;  %v8989_v48 = vld [vmem:[#allocation3 + $0x7c] sm:$0xf0] }
 0x309   :  { %v4824_v46 = vpop.f32.mrf.mxu2 }
 0x30a   :  { %v4825_v29 = vadd.f32 %v4824_v46, %v4656_v17  ;;  %5213 = vmatmul.bf16.vlgmr.msra.gmra.mxu1 %v8956_v0  ;;  %v1053_v0 = vld [vmem:[#allocation2 + $0x121] sm:$0xff]  ;;  %v1230_v46 = vld [vmem:[#allocation2 + $0x6a] sm:$0xff]  ;;  %1182 = vst [vmem:[#allocation3 + $0x34c] sm:$0xf] %v1118_v58 }
 0x30b   :  { %v4993_v10 = vpop.f32.mrf.mxu3  ;;  %v1117_v54 = vpack.c.bf16 %v1053_v0, %v1053_v0  ;;  %v1294_v14 = vpack.c.bf16 %v1230_v46, %v1230_v46  ;;  %v8997_v46 = vld [vmem:[#allocation3 + $0x84] sm:$0xf0]  ;;  %1757 = vst [vmem:[#allocation3 + $0x310] sm:$0xf] %v1118_v58 }
 0x30c   :  { %v12663_v18 = vadd.f32 %v4993_v10, %v4825_v29  ;;  %v1423_v29 = vld [vmem:[#allocation2 + $0x80] sm:$0xff]  ;;  %v10960_v10 = vld [vmem:[#allocation3 + $0x5c] sm:$0xf] }
 0x30d   :  { %1181 = vst [vmem:[#allocation3 + $0x328] sm:$0xf] %v1117_v54 }
 0x30e   :  { %5382 = vmatmul.bf16.vlgmr.msra.gmra.mxu2 %v8960_v35  ;;  %1358 = vst [vmem:[#allocation3 + $0x110] sm:$0xf] %v1294_v14 }
 0x30f   :  { %v4660_v44 = vpop.f32.mrf.mxu1  ;;  %v5050_v11 = vpop.f32.mrf.mxu0  ;;  %1756 = vst [vmem:[#allocation3 + $0x2ec] sm:$0xf] %v1117_v54  ;;  %v1056_v54 = vld [vmem:[#allocation2 + $0x141] sm:$0xff] }
 0x310   :  { %5551 = vmatmul.bf16.vlgmr.msra.gmra.mxu3 %v8964_v3  ;;  %v4661_v21 = vadd.f32 %v4660_v44, %v12623_v62  ;;  %v12667_v52 = vadd.f32 %v5050_v11, %v12166_v5  ;;  %v1486_v5 = vpack.c.bf16 %v1422_v34, %v1422_v34  ;;  %v1487_v3 = vpack.c.bf16 %v1423_v29, %v1423_v29  ;;  %v10965_v11 = vld [vmem:[#allocation3 + $0x80] sm:$0xf0] }
 0x311   :  { %v4827_v17 = vpop.f32.mrf.mxu2  ;;  %v8992_v44 = vor.u32 %v10960_v10, %v8989_v48  ;;  %v11045_v10 = vld [vmem:[#allocation3 + $0x300] sm:$0xf0] }
 0x312   :  { %v4828_v49 = vadd.f32 %v4827_v17, %v4659_v16  ;;  %5089 = vmatmul.bf16.gmra.mxu0 %v9276_v13  ;;  %v8995_v13 = vld [vmem:[#allocation3 + $0x60] sm:$0xf]  ;;  %1550 = vst [vmem:[#allocation3 + $0xf0] sm:$0xf] %v1486_v5 }
 0x313   :  { %v4996_v35 = vpop.f32.mrf.mxu3  ;;  %1551 = vst [vmem:[#allocation3 + $0x114] sm:$0xf] %v1487_v3  ;;  %v8996_v29 = vor.u32 %v10965_v11, %v8995_v13  ;;  %v1231_v13 = vld [vmem:[#allocation2 + $0x7a] sm:$0xff] }
 0x314   :  { %v12669_v62 = vadd.f32 %v4996_v35, %v4828_v49  ;;  %v10961_v49 = vld [vmem:[#allocation3 + $0x64] sm:$0xf]  ;;  %v9311_v35 = vld [vmem:[#allocation3 + $0x2e0] sm:$0xf] }
 0x315   :  { %v9000_v14 = vor.u32 %v10961_v49, %v8997_v46  ;;  %v1295_v49 = vpack.c.bf16 %v1231_v13, %v1231_v13  ;;  %v1424_v46 = vld [vmem:[#allocation2 + $0x90] sm:$0xff]  ;;  %v10970_v13 = vld [vmem:[#allocation3 + $0xac] sm:$0xf] }
 0x317   :  { %v4663_v16 = vpop.f32.mrf.mxu1  ;;  %v5052_v17 = vpop.f32.mrf.mxu0  ;;  %1359 = vst [vmem:[#allocation3 + $0x134] sm:$0xf] %v1295_v49  ;;  %v11054_v49 = vld [vmem:[#allocation3 + $0x348] sm:$0xf0] }
 0x318   :  { %v4664_v0 = vadd.f32 %v4663_v16, %v12643_v47  ;;  %v12673_v32 = vadd.f32 %v5052_v17, %v12183_v40  ;;  %v9312_v47 = vor.u32 %v11045_v10, %v9311_v35  ;;  %v1120_v17 = vpack.c.bf16 %v1056_v54, %v1056_v54  ;;  %v9025_v35 = vld [vmem:[#allocation3 + $0xc4] sm:$0xf0] }
 0x319   :  { %v4829_v28 = vpop.f32.mrf.mxu2 }
 0x31a   :  { %v4830_v34 = vadd.f32 %v4829_v28, %v4661_v21  ;;  %5218 = vmatmul.bf16.gmra.mxu1 %v8992_v44  ;;  %v1055_v44 = vld [vmem:[#allocation2 + $0x139] sm:$0xff]  ;;  %v1232_v28 = vld [vmem:[#allocation2 + $0x82] sm:$0xff]  ;;  %1184 = vst [vmem:[#allocation3 + $0x394] sm:$0xf] %v1120_v17 }
 0x31b   :  { %v4998_v4 = vpop.f32.mrf.mxu3  ;;  %v1119_v58 = vpack.c.bf16 %v1055_v44, %v1055_v44  ;;  %v1296_v10 = vpack.c.bf16 %v1232_v28, %v1232_v28  ;;  %v9033_v28 = vld [vmem:[#allocation3 + $0xcc] sm:$0xf0]  ;;  %1759 = vst [vmem:[#allocation3 + $0x358] sm:$0xf] %v1120_v17 }
 0x31c   :  { %v12675_v48 = vadd.f32 %v4998_v4, %v4830_v34  ;;  %v1425_v34 = vld [vmem:[#allocation2 + $0x98] sm:$0xff]  ;;  %v10969_v4 = vld [vmem:[#allocation3 + $0xa4] sm:$0xf] }
 0x31d   :  { %1183 = vst [vmem:[#allocation3 + $0x370] sm:$0xf] %v1119_v58  ;;  %v1057_v17 = vld [vmem:[#allocation2 + $0x151] sm:$0xff] }
 0x31e   :  { %5387 = vmatmul.bf16.gmra.mxu2 %v8996_v29  ;;  %1360 = vst [vmem:[#allocation3 + $0x158] sm:$0xf] %v1296_v10 }
 0x31f   :  { %v4665_v40 = vpop.f32.mrf.mxu1  ;;  %v5055_v16 = vpop.f32.mrf.mxu0  ;;  %1758 = vst [vmem:[#allocation3 + $0x334] sm:$0xf] %v1119_v58 }
 0x320   :  { %5556 = vmatmul.bf16.gmra.mxu3 %v9000_v14  ;;  %v4666_v5 = vadd.f32 %v4665_v40, %v12648_v42  ;;  %v12679_v3 = vadd.f32 %v5055_v16, %v12192_v63  ;;  %v1488_v63 = vpack.c.bf16 %v1424_v46, %v1424_v46  ;;  %v1489_v14 = vpack.c.bf16 %v1425_v34, %v1425_v34  ;;  %v10974_v16 = vld [vmem:[#allocation3 + $0xc8] sm:$0xf0] }
 0x321   :  { %v4832_v21 = vpop.f32.mrf.mxu2  ;;  %v9028_v40 = vor.u32 %v10969_v4, %v9025_v35  ;;  %v9036_v35 = vor.u32 %v10970_v13, %v9033_v28  ;;  %v1234_v28 = vld [vmem:[#allocation2 + $0x9a] sm:$0xff] }
 0x322   :  { %v4833_v11 = vadd.f32 %v4832_v21, %v4664_v0  ;;  %5094 = vmatmul.bf16.gmra.mxu0 %v9312_v47  ;;  %v9031_v47 = vld [vmem:[#allocation3 + $0xa8] sm:$0xf]  ;;  %1552 = vst [vmem:[#allocation3 + $0x138] sm:$0xf] %v1488_v63 }
 0x323   :  { %v5001_v29 = vpop.f32.mrf.mxu3  ;;  %1553 = vst [vmem:[#allocation3 + $0x15c] sm:$0xf] %v1489_v14  ;;  %v9032_v46 = vor.u32 %v10974_v16, %v9031_v47  ;;  %v1233_v47 = vld [vmem:[#allocation2 + $0x92] sm:$0xff] }
 0x324   :  { %v12681_v42 = vadd.f32 %v5001_v29, %v4833_v11  ;;  %v9347_v29 = vld [vmem:[#allocation3 + $0x328] sm:$0xf] }
 0x325   :  { %v9348_v10 = vor.u32 %v11054_v49, %v9347_v29  ;;  %v10978_v49 = vld [vmem:[#allocation3 + $0xec] sm:$0xf] }
 0x327   :  { %v4668_v0 = vpop.f32.mrf.mxu1  ;;  %v5057_v21 = vpop.f32.mrf.mxu0 }
 0x328   :  { %v12684_v44 = vadd.f32 %v5057_v21, %v12197_v31  ;;  %v11305_v31 = vld [vmem:[%s14620_s1 + $0x220] sm:$0xff] }
 0x329   :  { %v4834_v54 = vpop.f32.mrf.mxu2  ;;  %5715 = vmatpush.bf16.msra.mxu0 %v11305_v31 }
 0x32a   :  { %v4835_v11 = vadd.f32 %v4834_v54, %v4666_v5  ;;  %5223 = vmatmul.bf16.gmra.mxu1 %v9028_v40  ;;  %v4669_v5 = vadd.f32 %v4668_v0, %v12050_v41  ;;  %v1058_v40 = vld [vmem:[#allocation2 + $0x159] sm:$0xff]  ;;  %v1121_v54 = vpack.c.bf16 %v1057_v17, %v1057_v17  ;;  %v9061_v41 = vld [vmem:[#allocation3 + $0x10c] sm:$0xf0]  ;;  %v1298_v0 = vpack.c.bf16 %v1234_v28, %v1234_v28 }
 0x32b   :  { %v5003_v34 = vpop.f32.mrf.mxu3  ;;  %v1122_v13 = vpack.c.bf16 %v1058_v40, %v1058_v40 }
 0x32c   :  { %v12686_v4 = vadd.f32 %v5003_v34, %v4835_v11  ;;  %v1297_v11 = vpack.c.bf16 %v1233_v47, %v1233_v47  ;;  %v1427_v34 = vld [vmem:[#allocation2 + $0xb0] sm:$0xff]  ;;  %1185 = vst [vmem:[#allocation3 + $0x3b8] sm:$0xf] %v1121_v54 }
 0x32d   :  { %1186 = vst [vmem:[#allocation3 + $0x3dc] sm:$0xf] %v1122_v13  ;;  %v1491_v31 = vpack.c.bf16 %v1427_v34, %v1427_v34 }
 0x32e   :  { %5392 = vmatmul.bf16.gmra.mxu2 %v9032_v46  ;;  %v1426_v46 = vld [vmem:[#allocation2 + $0xa8] sm:$0xff]  ;;  %1361 = vst [vmem:[#allocation3 + $0x17c] sm:$0xf] %v1297_v11 }
 0x32f   :  { %v4670_v63 = vpop.f32.mrf.mxu1  ;;  %v5060_v21 = vpop.f32.mrf.mxu0  ;;  %1362 = vst [vmem:[#allocation3 + $0x1a0] sm:$0xf] %v1298_v0 }
 0x330   :  { %5561 = vmatmul.bf16.gmra.mxu3 %v9036_v35  ;;  %v12693_v58 = vadd.f32 %v5060_v21, %v12206_v59  ;;  %v1490_v59 = vpack.c.bf16 %v1426_v46, %v1426_v46  ;;  %v9064_v21 = vor.u32 %v10978_v49, %v9061_v41  ;;  %v4671_v40 = vadd.f32 %v4670_v63, %v12071_v56  ;;  %v9383_v49 = vld [vmem:[#allocation3 + $0x370] sm:$0xf]  ;;  %v11063_v41 = vld [vmem:[#allocation3 + $0x390] sm:$0xf0] }
 0x331   :  { %v4837_v14 = vpop.f32.mrf.mxu2  ;;  %1555 = vst [vmem:[#allocation3 + $0x1a4] sm:$0xf] %v1491_v31  ;;  %v9384_v56 = vor.u32 %v11063_v41, %v9383_v49  ;;  %v9097_v49 = vld [vmem:[#allocation3 + $0x154] sm:$0xf0] }
 0x332   :  { %v4838_v16 = vadd.f32 %v4837_v14, %v4669_v5  ;;  %5099 = vmatmul.bf16.gmra.mxu0 %v9348_v10  ;;  %v9067_v10 = vld [vmem:[#allocation3 + $0xf0] sm:$0xf]  ;;  %v10983_v14 = vld [vmem:[#allocation3 + $0x110] sm:$0xf0]  ;;  %1554 = vst [vmem:[#allocation3 + $0x180] sm:$0xf] %v1490_v59 }
 0x333   :  { %v5006_v29 = vpop.f32.mrf.mxu3  ;;  %v9068_v34 = vor.u32 %v10983_v14, %v9067_v10  ;;  %1760 = vst [vmem:[#allocation3 + $0x37c] sm:$0xf] %v1121_v54  ;;  %v1059_v10 = vld [vmem:[#allocation2 + $0x169] sm:$0xff]  ;;  %v1060_v54 = vld [vmem:[#allocation2 + $0x171] sm:$0xff] }
 0x334   :  { %v12695_v35 = vadd.f32 %v5006_v29, %v4838_v16  ;;  %v10979_v16 = vld [vmem:[#allocation3 + $0xf4] sm:$0xf]  ;;  %v9069_v29 = vld [vmem:[#allocation3 + $0x114] sm:$0xf0]  ;;  %1761 = vst [vmem:[#allocation3 + $0x3a0] sm:$0xf] %v1122_v13  ;;  %v1123_v13 = vpack.c.bf16 %v1059_v10, %v1059_v10 }
 0x335   :  { %v9072_v0 = vor.u32 %v10979_v16, %v9069_v29  ;;  %v1235_v14 = vld [vmem:[#allocation2 + $0xaa] sm:$0xff]  ;;  %v1428_v29 = vld [vmem:[#allocation2 + $0xc0] sm:$0xff] }
 0x336   :  { %14710 = vst [vmem:[#allocation27_spill] sm:$0xff] %v12695_v35  ;;  %v1299_v16 = vpack.c.bf16 %v1235_v14, %v1235_v14 }
 0x337   :  { %v4673_v5 = vpop.f32.mrf.mxu1  ;;  %v5062_v17 = vpop.f32.mrf.mxu0  ;;  %1187 = vst [vmem:[#allocation3 + $0x400] sm:$0xf] %v1123_v13 }
 0x338   :  { %v12699_v47 = vadd.f32 %v5062_v17, %v12229_v24  ;;  %v4674_v59 = vadd.f32 %v4673_v5, %v12083_v9  ;;  %1363 = vst [vmem:[#allocation3 + $0x1c4] sm:$0xf] %v1299_v16 }
 0x339   :  { %v4839_v28 = vpop.f32.mrf.mxu2  ;;  %1762 = vst [vmem:[#allocation3 + $0x3c4] sm:$0xf] %v1123_v13  ;;  %v1062_v13 = vld [vmem:[#allocation2 + $0x189] sm:$0xff] }
 0x33a   :  { %v4840_v46 = vadd.f32 %v4839_v28, %v4671_v40  ;;  %5228 = vmatmul.bf16.gmra.mxu1 %v9064_v21  ;;  %v1124_v40 = vpack.c.bf16 %v1060_v54, %v1060_v54  ;;  %v1236_v28 = vld [vmem:[#allocation2 + $0xb2] sm:$0xff] }
 0x33b   :  { %v5008_v11 = vpop.f32.mrf.mxu3  ;;  %v1300_v9 = vpack.c.bf16 %v1236_v28, %v1236_v28  ;;  %v9105_v28 = vld [vmem:[#allocation3 + $0x15c] sm:$0xf0] }
 0x33c   :  { %v12701_v35 = vadd.f32 %v5008_v11, %v4840_v46  ;;  %v1429_v46 = vld [vmem:[#allocation2 + $0xc8] sm:$0xff]  ;;  %v10987_v11 = vld [vmem:[#allocation3 + $0x134] sm:$0xf]  ;;  %1188 = vst [vmem:[#allocation3 + $0x424] sm:$0xf] %v1124_v40 }
 0x33d   :  { %v1493_v41 = vpack.c.bf16 %v1429_v46, %v1429_v46  ;;  %1364 = vst [vmem:[#allocation3 + $0x1e8] sm:$0xf] %v1300_v9 }
 0x33e   :  { %5397 = vmatmul.bf16.gmra.mxu2 %v9068_v34  ;;  %1763 = vst [vmem:[#allocation3 + $0x3e8] sm:$0xf] %v1124_v40 }
 0x33f   :  { %v4675_v24 = vpop.f32.mrf.mxu1  ;;  %v5065_v63 = vpop.f32.mrf.mxu0  ;;  %1557 = vst [vmem:[#allocation3 + $0x1ec] sm:$0xf] %v1493_v41 }
 0x340   :  { %5566 = vmatmul.bf16.gmra.mxu3 %v9072_v0  ;;  %v12705_v31 = vadd.f32 %v5065_v63, %v12241_v1  ;;  %v1492_v1 = vpack.c.bf16 %v1428_v29, %v1428_v29  ;;  %v9100_v0 = vor.u32 %v10987_v11, %v9097_v49  ;;  %v4676_v10 = vadd.f32 %v4675_v24, %v12099_v22  ;;  %v11072_v11 = vld [vmem:[#allocation3 + $0x3d8] sm:$0xf0] }
 0x341   :  { %v4842_v21 = vpop.f32.mrf.mxu2 }
 0x342   :  { %v4843_v17 = vadd.f32 %v4842_v21, %v4674_v59  ;;  %5104 = vmatmul.bf16.gmra.mxu0 %v9384_v56  ;;  %v9103_v56 = vld [vmem:[#allocation3 + $0x138] sm:$0xf]  ;;  %v10992_v59 = vld [vmem:[#allocation3 + $0x158] sm:$0xf0]  ;;  %1556 = vst [vmem:[#allocation3 + $0x1c8] sm:$0xf] %v1492_v1 }
 0x343   :  { %v5011_v34 = vpop.f32.mrf.mxu3  ;;  %v9104_v46 = vor.u32 %v10992_v59, %v9103_v56  ;;  %v1061_v56 = vld [vmem:[#allocation2 + $0x181] sm:$0xff] }
 0x344   :  { %v12707_v5 = vadd.f32 %v5011_v34, %v4843_v17  ;;  %v10988_v17 = vld [vmem:[#allocation3 + $0x13c] sm:$0xf]  ;;  %v9419_v34 = vld [vmem:[#allocation3 + $0x3b8] sm:$0xf]  ;;  %v1237_v59 = vld [vmem:[#allocation2 + $0xc2] sm:$0xff]  ;;  %v1125_v40 = vpack.c.bf16 %v1061_v56, %v1061_v56 }
 0x345   :  { %v9108_v9 = vor.u32 %v10988_v17, %v9105_v28  ;;  %v9420_v22 = vor.u32 %v11072_v11, %v9419_v34  ;;  %v1301_v17 = vpack.c.bf16 %v1237_v59, %v1237_v59  ;;  %v1430_v28 = vld [vmem:[#allocation2 + $0xd8] sm:$0xff]  ;;  %v9133_v34 = vld [vmem:[#allocation3 + $0x19c] sm:$0xf0] }
 0x346   :  { %1189 = vst [vmem:[#allocation3 + $0x448] sm:$0xf] %v1125_v40 }
 0x347   :  { %v4678_v63 = vpop.f32.mrf.mxu1  ;;  %v5067_v21 = vpop.f32.mrf.mxu0  ;;  %1365 = vst [vmem:[#allocation3 + $0x20c] sm:$0xf] %v1301_v17 }
 0x348   :  { %v12711_v54 = vadd.f32 %v5067_v21, %v12256_v37  ;;  %v4679_v1 = vadd.f32 %v4678_v63, %v12069_v55  ;;  %1764 = vst [vmem:[#allocation3 + $0x40c] sm:$0xf] %v1125_v40  ;;  %v1064_v40 = vld [vmem:[#allocation2 + $0x1d1] sm:$0xff] }
 0x349   :  { %v4844_v14 = vpop.f32.mrf.mxu2 }
 0x34a   :  { %v4845_v29 = vadd.f32 %v4844_v14, %v4676_v10  ;;  %5233 = vmatmul.bf16.gmra.mxu1 %v9100_v0  ;;  %v1126_v10 = vpack.c.bf16 %v1062_v13, %v1062_v13  ;;  %v1238_v14 = vld [vmem:[#allocation2 + $0xca] sm:$0xff] }
 0x34b   :  { %v5013_v16 = vpop.f32.mrf.mxu3  ;;  %v1302_v55 = vpack.c.bf16 %v1238_v14, %v1238_v14  ;;  %v9141_v14 = vld [vmem:[#allocation3 + $0x1a4] sm:$0xf0] }
 0x34c   :  { %v12713_v49 = vadd.f32 %v5013_v16, %v4845_v29  ;;  %v1431_v29 = vld [vmem:[#allocation2 + $0xe0] sm:$0xff]  ;;  %v10996_v16 = vld [vmem:[#allocation3 + $0x17c] sm:$0xf]  ;;  %1190 = vst [vmem:[#allocation3 + $0x46c] sm:$0xf] %v1126_v10 }
 0x34d   :  { %v1495_v11 = vpack.c.bf16 %v1431_v29, %v1431_v29  ;;  %1366 = vst [vmem:[#allocation3 + $0x230] sm:$0xf] %v1302_v55 }
 0x34e   :  { %5402 = vmatmul.bf16.gmra.mxu2 %v9104_v46  ;;  %1765 = vst [vmem:[#allocation3 + $0x430] sm:$0xf] %v1126_v10 }
 0x34f   :  { %v4680_v37 = vpop.f32.mrf.mxu1  ;;  %v5070_v24 = vpop.f32.mrf.mxu0  ;;  %1559 = vst [vmem:[#allocation3 + $0x234] sm:$0xf] %v1495_v11 }
 0x350   :  { %5571 = vmatmul.bf16.gmra.mxu3 %v9108_v9  ;;  %v12717_v41 = vadd.f32 %v5070_v24, %v12263_v6  ;;  %v1494_v6 = vpack.c.bf16 %v1430_v28, %v1430_v28  ;;  %v9136_v9 = vor.u32 %v10996_v16, %v9133_v34  ;;  %v4681_v56 = vadd.f32 %v4680_v37, %v12081_v8  ;;  %v11081_v16 = vld [vmem:[#allocation3 + $0x420] sm:$0xf0] }
 0x351   :  { %v4847_v0 = vpop.f32.mrf.mxu2 }
 0x352   :  { %v4848_v21 = vadd.f32 %v4847_v0, %v4679_v1  ;;  %5109 = vmatmul.bf16.gmra.mxu0 %v9420_v22  ;;  %v9139_v22 = vld [vmem:[#allocation3 + $0x180] sm:$0xf]  ;;  %v11001_v1 = vld [vmem:[#allocation3 + $0x1a0] sm:$0xf0]  ;;  %1558 = vst [vmem:[#allocation3 + $0x210] sm:$0xf] %v1494_v6 }
 0x353   :  { %v5016_v46 = vpop.f32.mrf.mxu3  ;;  %v9140_v29 = vor.u32 %v11001_v1, %v9139_v22  ;;  %v1063_v22 = vld [vmem:[#allocation2 + $0x1c9] sm:$0xff]  ;;  %v1239_v1 = vld [vmem:[#allocation2 + $0xda] sm:$0xff] }
 0x354   :  { %v12719_v63 = vadd.f32 %v5016_v46, %v4848_v21  ;;  %v10997_v21 = vld [vmem:[#allocation3 + $0x184] sm:$0xf]  ;;  %v9455_v46 = vld [vmem:[#allocation3 + $0x400] sm:$0xf]  ;;  %v1127_v10 = vpack.c.bf16 %v1063_v22, %v1063_v22 }
 0x355   :  { %v9144_v55 = vor.u32 %v10997_v21, %v9141_v14  ;;  %v9456_v8 = vor.u32 %v11081_v16, %v9455_v46  ;;  %v1303_v21 = vpack.c.bf16 %v1239_v1, %v1239_v1  ;;  %v1432_v14 = vld [vmem:[#allocation2 + $0xf0] sm:$0xff]  ;;  %v9169_v46 = vld [vmem:[#allocation3 + $0x1e4] sm:$0xf0] }
 0x356   :  { %1191 = vst [vmem:[#allocation3 + $0x490] sm:$0xf] %v1127_v10 }
 0x357   :  { %v4683_v24 = vpop.f32.mrf.mxu1  ;;  %v5072_v0 = vpop.f32.mrf.mxu0  ;;  %1367 = vst [vmem:[#allocation3 + $0x254] sm:$0xf] %v1303_v21  ;;  %v9491_v21 = vld [vmem:[#allocation3 + $0x448] sm:$0xf] }
 0x358   :  { %v12723_v13 = vadd.f32 %v5072_v0, %v12280_v50  ;;  %v4684_v6 = vadd.f32 %v4683_v24, %v12103_v23 }
 0x359   :  { %v4849_v59 = vpop.f32.mrf.mxu2 }
 0x35a   :  { %v4850_v28 = vadd.f32 %v4849_v59, %v4681_v56  ;;  %5238 = vmatmul.bf16.gmra.mxu1 %v9136_v9  ;;  %v1128_v56 = vpack.c.bf16 %v1064_v40, %v1064_v40  ;;  %v1240_v59 = vld [vmem:[#allocation2 + $0xe2] sm:$0xff] }
 0x35b   :  { %v5018_v17 = vpop.f32.mrf.mxu3  ;;  %v1304_v23 = vpack.c.bf16 %v1240_v59, %v1240_v59  ;;  %v9177_v59 = vld [vmem:[#allocation3 + $0x1ec] sm:$0xf0] }
 0x35c   :  { %v12725_v34 = vadd.f32 %v5018_v17, %v4850_v28  ;;  %v1433_v28 = vld [vmem:[#allocation2 + $0xf8] sm:$0xff]  ;;  %v11005_v17 = vld [vmem:[#allocation3 + $0x1c4] sm:$0xf]  ;;  %1192 = vst [vmem:[#allocation3 + $0x4b4] sm:$0xf] %v1128_v56 }
 0x35d   :  { %v1497_v16 = vpack.c.bf16 %v1433_v28, %v1433_v28  ;;  %1368 = vst [vmem:[#allocation3 + $0x278] sm:$0xf] %v1304_v23  ;;  %v11090_v28 = vld [vmem:[#allocation3 + $0x468] sm:$0xf0] }
 0x35e   :  { %5407 = vmatmul.bf16.gmra.mxu2 %v9140_v29 }
 0x35f   :  { %v4685_v50 = vpop.f32.mrf.mxu1  ;;  %v5075_v37 = vpop.f32.mrf.mxu0  ;;  %1561 = vst [vmem:[#allocation3 + $0x27c] sm:$0xf] %v1497_v16 }
 0x360   :  { %5576 = vmatmul.bf16.gmra.mxu3 %v9144_v55  ;;  %v12729_v11 = vadd.f32 %v5075_v37, %v12289_v30  ;;  %v1496_v30 = vpack.c.bf16 %v1432_v14, %v1432_v14  ;;  %v9172_v55 = vor.u32 %v11005_v17, %v9169_v46  ;;  %v4686_v22 = vadd.f32 %v4685_v50, %v12114_v51  ;;  %v11304_v51 = vld [vmem:[%s14620_s1 + $0x218] sm:$0xff] }
 0x361   :  { %v4852_v9 = vpop.f32.mrf.mxu2  ;;  %v9492_v46 = vor.u32 %v11090_v28, %v9491_v21  ;;  %5716 = vmatpush.bf16.msra.mxu0 %v11304_v51  ;;  %v11014_v21 = vld [vmem:[#allocation3 + $0x20c] sm:$0xf] }
 0x362   :  { %v4853_v0 = vadd.f32 %v4852_v9, %v4684_v6  ;;  %5114 = vmatmul.bf16.gmra.mxu0 %v9456_v8  ;;  %v9175_v8 = vld [vmem:[#allocation3 + $0x1c8] sm:$0xf]  ;;  %v11010_v6 = vld [vmem:[#allocation3 + $0x1e8] sm:$0xf0]  ;;  %1560 = vst [vmem:[#allocation3 + $0x258] sm:$0xf] %v1496_v30 }
 0x363   :  { %v5021_v29 = vpop.f32.mrf.mxu3  ;;  %v9176_v56 = vor.u32 %v11010_v6, %v9175_v8  ;;  %v1066_v8 = vld [vmem:[#allocation2 + $0x1e9] sm:$0xff]  ;;  %v1241_v6 = vld [vmem:[#allocation2 + $0xf2] sm:$0xff] }
 0x364   :  { %v12731_v24 = vadd.f32 %v5021_v29, %v4853_v0  ;;  %v11006_v0 = vld [vmem:[#allocation3 + $0x1cc] sm:$0xf] }
 0x365   :  { %v9180_v17 = vor.u32 %v11006_v0, %v9177_v59  ;;  %v1242_v0 = vld [vmem:[#allocation2 + $0xfa] sm:$0xff]  ;;  %v1305_v59 = vpack.c.bf16 %v1241_v6, %v1241_v6 }
 0x367   :  { %v4688_v37 = vpop.f32.mrf.mxu1  ;;  %v5077_v9 = vpop.f32.mrf.mxu0  ;;  %1369 = vst [vmem:[#allocation3 + $0x29c] sm:$0xf] %v1305_v59 }
 0x368   :  { %v12735_v40 = vadd.f32 %v5077_v9, %v12306_v27  ;;  %v4689_v23 = vadd.f32 %v4688_v37, %v12073_v57  ;;  %v9205_v57 = vld [vmem:[#allocation3 + $0x22c] sm:$0xf0]  ;;  %v1306_v37 = vpack.c.bf16 %v1242_v0, %v1242_v0  ;;  %v9213_v0 = vld [vmem:[#allocation3 + $0x234] sm:$0xf0] }
 0x369   :  { %v4854_v1 = vpop.f32.mrf.mxu2  ;;  %v9208_v51 = vor.u32 %v11014_v21, %v9205_v57  ;;  %v11099_v21 = vld [vmem:[#allocation3 + $0x4b0] sm:$0xf0] }
 0x36a   :  { %v4855_v10 = vadd.f32 %v4854_v1, %v4686_v22  ;;  %5243 = vmatmul.bf16.gmra.mxu1 %v9172_v55  ;;  %v1065_v55 = vld [vmem:[#allocation2 + $0x1e1] sm:$0xff]  ;;  %v1130_v1 = vpack.c.bf16 %v1066_v8, %v1066_v8  ;;  %1370 = vst [vmem:[#allocation3 + $0x2c0] sm:$0xf] %v1306_v37 }
 0x36b   :  { %v5023_v14 = vpop.f32.mrf.mxu3  ;;  %v1129_v22 = vpack.c.bf16 %v1065_v55, %v1065_v55 }
 0x36c   :  { %v12737_v29 = vadd.f32 %v5023_v14, %v4855_v10  ;;  %v1434_v10 = vld [vmem:[#allocation2 + $0x108] sm:$0xff]  ;;  %1194 = vst [vmem:[#allocation3 + $0x4fc] sm:$0xf] %v1130_v1 }
 0x36d   :  { %1193 = vst [vmem:[#allocation3 + $0x4d8] sm:$0xf] %v1129_v22 }
 0x36e   :  { %5412 = vmatmul.bf16.gmra.mxu2 %v9176_v56  ;;  %v1435_v56 = vld [vmem:[#allocation2 + $0x110] sm:$0xff]  ;;  %1768 = vst [vmem:[#allocation3 + $0x49c] sm:$0xf] %v1129_v22  ;;  %v1068_v22 = vld [vmem:[#allocation2 + $0x201] sm:$0xff] }
 0x36f   :  { %v4690_v27 = vpop.f32.mrf.mxu1  ;;  %v5080_v50 = vpop.f32.mrf.mxu0  ;;  %1769 = vst [vmem:[#allocation3 + $0x4c0] sm:$0xf] %v1130_v1 }
 0x370   :  { %5581 = vmatmul.bf16.gmra.mxu3 %v9180_v17  ;;  %v12744_v30 = vadd.f32 %v5080_v50, %v12315_v20  ;;  %v1498_v20 = vpack.c.bf16 %v1434_v10, %v1434_v10  ;;  %v1499_v17 = vpack.c.bf16 %v1435_v56, %v1435_v56  ;;  %v4691_v55 = vadd.f32 %v4690_v27, %v12085_v12 }
 0x371   :  { %v4857_v16 = vpop.f32.mrf.mxu2 }
 0x372   :  { %v4858_v9 = vadd.f32 %v4857_v16, %v4689_v23  ;;  %5119 = vmatmul.bf16.gmra.mxu0 %v9492_v46  ;;  %v9211_v46 = vld [vmem:[#allocation3 + $0x210] sm:$0xf]  ;;  %v11019_v23 = vld [vmem:[#allocation3 + $0x230] sm:$0xf0]  ;;  %1562 = vst [vmem:[#allocation3 + $0x2a0] sm:$0xf] %v1498_v20 }
 0x373   :  { %v5026_v14 = vpop.f32.mrf.mxu3  ;;  %1563 = vst [vmem:[#allocation3 + $0x2c4] sm:$0xf] %v1499_v17  ;;  %v9212_v56 = vor.u32 %v11019_v23, %v9211_v46  ;;  %v1067_v46 = vld [vmem:[#allocation2 + $0x1f9] sm:$0xff]  ;;  %v1243_v23 = vld [vmem:[#allocation2 + $0x10a] sm:$0xff] }
 0x374   :  { %v12746_v28 = vadd.f32 %v5026_v14, %v4858_v9  ;;  %v11015_v9 = vld [vmem:[#allocation3 + $0x214] sm:$0xf]  ;;  %v9527_v14 = vld [vmem:[#allocation3 + $0x490] sm:$0xf]  ;;  %v1131_v1 = vpack.c.bf16 %v1067_v46, %v1067_v46 }
 0x375   :  { %v9216_v37 = vor.u32 %v11015_v9, %v9213_v0  ;;  %v9528_v12 = vor.u32 %v11099_v21, %v9527_v14  ;;  %v1307_v9 = vpack.c.bf16 %v1243_v23, %v1243_v23  ;;  %v1436_v0 = vld [vmem:[#allocation2 + $0x120] sm:$0xff]  ;;  %v9241_v14 = vld [vmem:[#allocation3 + $0x274] sm:$0xf0] }
 0x376   :  { %1195 = vst [vmem:[#allocation3 + $0x520] sm:$0xf] %v1131_v1 }
 0x377   :  { %v4693_v50 = vpop.f32.mrf.mxu1  ;;  %v5082_v16 = vpop.f32.mrf.mxu0  ;;  %1371 = vst [vmem:[#allocation3 + $0x2e4] sm:$0xf] %v1307_v9 }
 0x378   :  { %v12750_v8 = vadd.f32 %v5082_v16, %v12335_v15  ;;  %v4694_v20 = vadd.f32 %v4693_v50, %v12107_v25  ;;  %1770 = vst [vmem:[#allocation3 + $0x4e4] sm:$0xf] %v1131_v1  ;;  %v1070_v1 = vld [vmem:[#allocation2 + $0x219] sm:$0xff] }
 0x379   :  { %v4859_v6 = vpop.f32.mrf.mxu2 }
 0x37a   :  { %v4860_v10 = vadd.f32 %v4859_v6, %v4691_v55  ;;  %5248 = vmatmul.bf16.gmra.mxu1 %v9208_v51  ;;  %v1132_v55 = vpack.c.bf16 %v1068_v22, %v1068_v22  ;;  %v1244_v6 = vld [vmem:[#allocation2 + $0x112] sm:$0xff] }
 0x37b   :  { %v5028_v59 = vpop.f32.mrf.mxu3  ;;  %v1308_v25 = vpack.c.bf16 %v1244_v6, %v1244_v6  ;;  %v11024_v6 = vld [vmem:[#allocation3 + $0x25c] sm:$0xf] }
 0x37c   :  { %v12752_v57 = vadd.f32 %v5028_v59, %v4860_v10  ;;  %v1437_v10 = vld [vmem:[#allocation2 + $0x128] sm:$0xff]  ;;  %v11023_v59 = vld [vmem:[#allocation3 + $0x254] sm:$0xf]  ;;  %1196 = vst [vmem:[#allocation3 + $0x544] sm:$0xf] %v1132_v55 }
 0x37d   :  { %v1501_v21 = vpack.c.bf16 %v1437_v10, %v1437_v10  ;;  %1372 = vst [vmem:[#allocation3 + $0x308] sm:$0xf] %v1308_v25 }
 0x37e   :  { %5417 = vmatmul.bf16.gmra.mxu2 %v9212_v56  ;;  %1771 = vst [vmem:[#allocation3 + $0x508] sm:$0xf] %v1132_v55 }
 0x37f   :  { %v4695_v15 = vpop.f32.mrf.mxu1  ;;  %v5085_v27 = vpop.f32.mrf.mxu0  ;;  %1565 = vst [vmem:[#allocation3 + $0x30c] sm:$0xf] %v1501_v21 }
 0x380   :  { %5586 = vmatmul.bf16.gmra.mxu3 %v9216_v37  ;;  %v12756_v17 = vadd.f32 %v5085_v27, %v12344_v2  ;;  %v1500_v2 = vpack.c.bf16 %v1436_v0, %v1436_v0  ;;  %v9244_v37 = vor.u32 %v11023_v59, %v9241_v14  ;;  %v4696_v46 = vadd.f32 %v4695_v15, %v12127_v7  ;;  %v9249_v0 = vld [vmem:[#allocation3 + $0x27c] sm:$0xf0]  ;;  %v9563_v59 = vld [vmem:[#allocation3 + $0x4d8] sm:$0xf]  ;;  %v11108_v14 = vld [vmem:[#allocation3 + $0x4f8] sm:$0xf0] }
 0x381   :  { %v4862_v51 = vpop.f32.mrf.mxu2  ;;  %v9252_v7 = vor.u32 %v11024_v6, %v9249_v0  ;;  %v1438_v6 = vld [vmem:[#allocation2 + $0x138] sm:$0xff]  ;;  %v1439_v0 = vld [vmem:[#allocation2 + $0x140] sm:$0xff] }
 0x382   :  { %v4863_v16 = vadd.f32 %v4862_v51, %v4694_v20  ;;  %5124 = vmatmul.bf16.gmra.mxu0 %v9528_v12  ;;  %v9247_v12 = vld [vmem:[#allocation3 + $0x258] sm:$0xf]  ;;  %v11028_v20 = vld [vmem:[#allocation3 + $0x278] sm:$0xf0]  ;;  %1564 = vst [vmem:[#allocation3 + $0x2e8] sm:$0xf] %v1500_v2 }
 0x383   :  { %v5031_v56 = vpop.f32.mrf.mxu3  ;;  %v9248_v9 = vor.u32 %v11028_v20, %v9247_v12  ;;  %v1245_v12 = vld [vmem:[#allocation2 + $0x122] sm:$0xff] }
 0x384   :  { %v12758_v50 = vadd.f32 %v5031_v56, %v4863_v16 }
 0x387   :  { %v5214_v27 = vpop.f32.mrf.mxu1  ;;  %v5087_v51 = vpop.f32.mrf.mxu0 }
 0x388   :  { %v5215_v22 = vadd.f32 %v5214_v27, %v12655_v45  ;;  %v12763_v23 = vadd.f32 %v5087_v51, %v12361_v19  ;;  %v9564_v45 = vor.u32 %v11108_v14, %v9563_v59  ;;  %v1069_v27 = vld [vmem:[#allocation2 + $0x211] sm:$0xff]  ;;  %v1134_v51 = vpack.c.bf16 %v1070_v1, %v1070_v1 }
 0x389   :  { %v4864_v16 = vpop.f32.mrf.mxu2  ;;  %v1133_v55 = vpack.c.bf16 %v1069_v27, %v1069_v27  ;;  %v1503_v14 = vpack.c.bf16 %v1439_v0, %v1439_v0  ;;  %v14711_v27 = vld [vmem:[#allocation6_spill] sm:$0xff] }
 0x38a   :  { %v4865_v10 = vadd.f32 %v4864_v16, %v4696_v46  ;;  %5253 = vmatmul.bf16.gmra.mxu1 %v9244_v37  ;;  %v1246_v46 = vld [vmem:[#allocation2 + $0x12a] sm:$0xff]  ;;  %v1309_v16 = vpack.c.bf16 %v1245_v12, %v1245_v12  ;;  %1198 = vst [vmem:[#allocation3 + $0x58c] sm:$0xf] %v1134_v51 }
 0x38b   :  { %v5033_v56 = vpop.f32.mrf.mxu3  ;;  %v1310_v59 = vpack.c.bf16 %v1246_v46, %v1246_v46  ;;  %1197 = vst [vmem:[#allocation3 + $0x568] sm:$0xf] %v1133_v55  ;;  %v9285_v46 = vld [vmem:[#allocation3 + $0x2c4] sm:$0xf0] }
 0x38c   :  { %v12765_v25 = vadd.f32 %v5033_v56, %v4865_v10  ;;  %v9277_v56 = vld [vmem:[#allocation3 + $0x2bc] sm:$0xf0]  ;;  %1373 = vst [vmem:[#allocation3 + $0x32c] sm:$0xf] %v1309_v16 }
 0x38d   :  { %1374 = vst [vmem:[#allocation3 + $0x350] sm:$0xf] %v1310_v59 }
 0x38e   :  { %5422 = vmatmul.bf16.gmra.mxu2 %v9248_v9  ;;  %v11032_v9 = vld [vmem:[#allocation3 + $0x29c] sm:$0xf]  ;;  %1567 = vst [vmem:[#allocation3 + $0x354] sm:$0xf] %v1503_v14 }
 0x38f   :  { %v5216_v19 = vpop.f32.mrf.mxu1  ;;  %v5090_v15 = vpop.f32.mrf.mxu0  ;;  %1772 = vst [vmem:[#allocation3 + $0x52c] sm:$0xf] %v1133_v55  ;;  %v1072_v55 = vld [vmem:[#allocation2 + $0x231] sm:$0xff] }
 0x390   :  { %5591 = vmatmul.bf16.gmra.mxu3 %v9252_v7  ;;  %v5217_v2 = vadd.f32 %v5216_v19, %v12661_v43  ;;  %v12769_v21 = vadd.f32 %v5090_v15, %v12370_v39  ;;  %v1502_v39 = vpack.c.bf16 %v1438_v6, %v1438_v6  ;;  %v9280_v7 = vor.u32 %v11032_v9, %v9277_v56  ;;  %v11037_v19 = vld [vmem:[#allocation3 + $0x2c0] sm:$0xf0] }
 0x391   :  { %v5383_v37 = vpop.f32.mrf.mxu2  ;;  %v11117_v9 = vld [vmem:[#allocation3 + $0x540] sm:$0xf0]  ;;  %1773 = vst [vmem:[#allocation3 + $0x550] sm:$0xf] %v1134_v51 }
 0x392   :  { %v5384_v20 = vadd.f32 %v5383_v37, %v5215_v22  ;;  %5129 = vmatmul.bf16.gmra.mxu0 %v9564_v45  ;;  %v9283_v45 = vld [vmem:[#allocation3 + $0x2a0] sm:$0xf]  ;;  %1566 = vst [vmem:[#allocation3 + $0x330] sm:$0xf] %v1502_v39 }
 0x393   :  { %v5552_v10 = vpop.f32.mrf.mxu3  ;;  %v9284_v0 = vor.u32 %v11037_v19, %v9283_v45  ;;  %v1247_v45 = vld [vmem:[#allocation2 + $0x13a] sm:$0xff] }
 0x394   :  { %v12771_v43 = vadd.f32 %v5552_v10, %v5384_v20  ;;  %v11033_v20 = vld [vmem:[#allocation3 + $0x2a4] sm:$0xf]  ;;  %v9599_v10 = vld [vmem:[#allocation3 + $0x520] sm:$0xf] }
 0x395   :  { %v9288_v59 = vor.u32 %v11033_v20, %v9285_v46  ;;  %v1311_v20 = vpack.c.bf16 %v1247_v45, %v1247_v45  ;;  %v1440_v46 = vld [vmem:[#allocation2 + $0x150] sm:$0xff] }
 0x396   :  { %v14715_v45 = vld [vmem:[#allocation8_spill] sm:$0xff] }
 0x397   :  { %v5219_v22 = vpop.f32.mrf.mxu1  ;;  %v5092_v15 = vpop.f32.mrf.mxu0  ;;  %1375 = vst [vmem:[#allocation3 + $0x374] sm:$0xf] %v1311_v20 }
 0x398   :  { %v5220_v37 = vadd.f32 %v5219_v22, %v12667_v52  ;;  %v12775_v1 = vadd.f32 %v5092_v15, %v14711_v27  ;;  %v9600_v52 = vor.u32 %v11117_v9, %v9599_v10  ;;  %v14713_v27 = vld [vmem:[#allocation7_spill] sm:$0xff]  ;;  %v11041_v10 = vld [vmem:[#allocation3 + $0x2e4] sm:$0xf] }
 0x399   :  { %v5385_v12 = vpop.f32.mrf.mxu2  ;;  %v9313_v9 = vld [vmem:[#allocation3 + $0x304] sm:$0xf0] }
 0x39a   :  { %v5386_v6 = vadd.f32 %v5385_v12, %v5217_v2  ;;  %5258 = vmatmul.bf16.gmra.mxu1 %v9280_v7  ;;  %v1071_v7 = vld [vmem:[#allocation2 + $0x229] sm:$0xff]  ;;  %v1136_v12 = vpack.c.bf16 %v1072_v55, %v1072_v55 }
 0x39b   :  { %v5554_v16 = vpop.f32.mrf.mxu3  ;;  %v1135_v51 = vpack.c.bf16 %v1071_v7, %v1071_v7 }
 0x39c   :  { %v12777_v56 = vadd.f32 %v5554_v16, %v5386_v6  ;;  %v1248_v6 = vld [vmem:[#allocation2 + $0x142] sm:$0xff]  ;;  %1200 = vst [vmem:[#allocation3 + $0x5d4] sm:$0xf] %v1136_v12 }
 0x39d   :  { %1199 = vst [vmem:[#allocation3 + $0x5b0] sm:$0xf] %v1135_v51 }
 0x39e   :  { %14712 = vst [vmem:[#allocation6_spill] sm:$0xff] %v12777_v56  ;;  %5427 = vmatmul.bf16.gmra.mxu2 %v9284_v0  ;;  %v1441_v0 = vld [vmem:[#allocation2 + $0x158] sm:$0xff] }
 0x39f   :  { %v5221_v22 = vpop.f32.mrf.mxu1  ;;  %v5095_v15 = vpop.f32.mrf.mxu0  ;;  %1774 = vst [vmem:[#allocation3 + $0x574] sm:$0xf] %v1135_v51 }
 0x3a0   :  { %5596 = vmatmul.bf16.gmra.mxu3 %v9288_v59  ;;  %v5222_v39 = vadd.f32 %v5221_v22, %v12673_v32  ;;  %v12781_v14 = vadd.f32 %v5095_v15, %v14713_v27  ;;  %v1312_v59 = vpack.c.bf16 %v1248_v6, %v1248_v6  ;;  %v1504_v22 = vpack.c.bf16 %v1440_v46, %v1440_v46 }
 0x3a1   :  { %v5388_v2 = vpop.f32.mrf.mxu2  ;;  %v1505_v15 = vpack.c.bf16 %v1441_v0, %v1441_v0  ;;  %v9316_v27 = vor.u32 %v11041_v10, %v9313_v9  ;;  %v9635_v10 = vld [vmem:[#allocation3 + $0x568] sm:$0xf]  ;;  %v11126_v9 = vld [vmem:[#allocation3 + $0x588] sm:$0xf0]  ;;  %1775 = vst [vmem:[#allocation3 + $0x598] sm:$0xf] %v1136_v12 }
 0x3a2   :  { %v5389_v19 = vadd.f32 %v5388_v2, %v5220_v37  ;;  %5134 = vmatmul.bf16.gmra.mxu0 %v9600_v52  ;;  %v9319_v52 = vld [vmem:[#allocation3 + $0x2e8] sm:$0xf]  ;;  %v11046_v2 = vld [vmem:[#allocation3 + $0x308] sm:$0xf0]  ;;  %1376 = vst [vmem:[#allocation3 + $0x398] sm:$0xf] %v1312_v59 }
 0x3a3   :  { %v5557_v16 = vpop.f32.mrf.mxu3  ;;  %1568 = vst [vmem:[#allocation3 + $0x378] sm:$0xf] %v1504_v22  ;;  %v9320_v0 = vor.u32 %v11046_v2, %v9319_v52  ;;  %v11303_v22 = vld [vmem:[%s14620_s1 + $0x210] sm:$0xff]  ;;  %v1073_v12 = vld [vmem:[#allocation2 + $0x241] sm:$0xff] }
 0x3a4   :  { %v12783_v32 = vadd.f32 %v5557_v16, %v5389_v19  ;;  %v11042_v19 = vld [vmem:[#allocation3 + $0x2ec] sm:$0xf]  ;;  %v9321_v16 = vld [vmem:[#allocation3 + $0x30c] sm:$0xf0]  ;;  %1569 = vst [vmem:[#allocation3 + $0x39c] sm:$0xf] %v1505_v15  ;;  %5717 = vmatpush.bf16.msra.mxu0 %v11303_v22 }
 0x3a5   :  { %v9324_v59 = vor.u32 %v11042_v19, %v9321_v16  ;;  %v14716_v15 = vld [vmem:[#allocation9_spill] sm:$0xff]  ;;  %v1074_v52 = vld [vmem:[#allocation2 + $0x249] sm:$0xff] }
 0x3a6   :  { %14714 = vst [vmem:[#allocation7_spill] sm:$0xff] %v12783_v32  ;;  %v1249_v2 = vld [vmem:[#allocation2 + $0x152] sm:$0xff]  ;;  %v1138_v19 = vpack.c.bf16 %v1074_v52, %v1074_v52  ;;  %v1250_v16 = vld [vmem:[#allocation2 + $0x15a] sm:$0xff] }
 0x3a7   :  { %v5224_v37 = vpop.f32.mrf.mxu1  ;;  %v5097_v7 = vpop.f32.mrf.mxu0 }
 0x3a8   :  { %v5225_v55 = vadd.f32 %v5224_v37, %v12679_v3  ;;  %v12787_v56 = vadd.f32 %v5097_v7, %v14715_v45  ;;  %v9636_v3 = vor.u32 %v11126_v9, %v9635_v10  ;;  %v11050_v9 = vld [vmem:[#allocation3 + $0x32c] sm:$0xf]  ;;  %1202 = vst [vmem:[#allocation3 + $0x61c] sm:$0xf] %v1138_v19 }
 0x3a9   :  { %v5390_v6 = vpop.f32.mrf.mxu2  ;;  %1777 = vst [vmem:[#allocation3 + $0x5e0] sm:$0xf] %v1138_v19 }
 0x3aa   :  { %v5391_v46 = vadd.f32 %v5390_v6, %v5222_v39  ;;  %5263 = vmatmul.bf16.gmra.mxu1 %v9316_v27  ;;  %v1137_v6 = vpack.c.bf16 %v1073_v12, %v1073_v12 }
 0x3ab   :  { %v5559_v20 = vpop.f32.mrf.mxu3 }
 0x3ac   :  { %v12789_v32 = vadd.f32 %v5559_v20, %v5391_v46  ;;  %v1313_v46 = vpack.c.bf16 %v1249_v2, %v1249_v2  ;;  %v1443_v20 = vld [vmem:[#allocation2 + $0x170] sm:$0xff]  ;;  %1201 = vst [vmem:[#allocation3 + $0x5f8] sm:$0xf] %v1137_v6 }
 0x3ad   :  { %1776 = vst [vmem:[#allocation3 + $0x5bc] sm:$0xf] %v1137_v6  ;;  %v1076_v6 = vld [vmem:[#allocation2 + $0x261] sm:$0xff] }
 0x3ae   :  { %5432 = vmatmul.bf16.gmra.mxu2 %v9320_v0  ;;  %v1442_v0 = vld [vmem:[#allocation2 + $0x168] sm:$0xff]  ;;  %1377 = vst [vmem:[#allocation3 + $0x3bc] sm:$0xf] %v1313_v46 }
 0x3af   :  { %v5226_v37 = vpop.f32.mrf.mxu1  ;;  %v5100_v7 = vpop.f32.mrf.mxu0  ;;  %v1506_v22 = vpack.c.bf16 %v1442_v0, %v1442_v0 }
 0x3b0   :  { %5601 = vmatmul.bf16.gmra.mxu3 %v9324_v59  ;;  %v5227_v39 = vadd.f32 %v5226_v37, %v12684_v44  ;;  %v12796_v51 = vadd.f32 %v5100_v7, %v14716_v15  ;;  %v9349_v59 = vld [vmem:[#allocation3 + $0x34c] sm:$0xf0]  ;;  %v1314_v44 = vpack.c.bf16 %v1250_v16, %v1250_v16  ;;  %v1507_v7 = vpack.c.bf16 %v1443_v20, %v1443_v20 }
 0x3b1   :  { %v5393_v27 = vpop.f32.mrf.mxu2  ;;  %v9352_v15 = vor.u32 %v11050_v9, %v9349_v59  ;;  %1570 = vst [vmem:[#allocation3 + $0x3c0] sm:$0xf] %v1506_v22  ;;  %v9671_v9 = vld [vmem:[#allocation3 + $0x5b0] sm:$0xf]  ;;  %v11135_v59 = vld [vmem:[#allocation3 + $0x5d0] sm:$0xf0] }
 0x3b2   :  { %v5394_v45 = vadd.f32 %v5393_v27, %v5225_v55  ;;  %5139 = vmatmul.bf16.gmra.mxu0 %v9636_v3  ;;  %v9355_v3 = vld [vmem:[#allocation3 + $0x330] sm:$0xf]  ;;  %v11055_v27 = vld [vmem:[#allocation3 + $0x350] sm:$0xf0]  ;;  %1378 = vst [vmem:[#allocation3 + $0x3e0] sm:$0xf] %v1314_v44 }
 0x3b3   :  { %v5562_v10 = vpop.f32.mrf.mxu3  ;;  %1571 = vst [vmem:[#allocation3 + $0x3e4] sm:$0xf] %v1507_v7  ;;  %v9356_v20 = vor.u32 %v11055_v27, %v9355_v3  ;;  %v1251_v3 = vld [vmem:[#allocation2 + $0x16a] sm:$0xff] }
 0x3b4   :  { %v12798_v37 = vadd.f32 %v5562_v10, %v5394_v45  ;;  %v11051_v45 = vld [vmem:[#allocation3 + $0x334] sm:$0xf]  ;;  %v9357_v10 = vld [vmem:[#allocation3 + $0x354] sm:$0xf0] }
 0x3b5   :  { %v9360_v44 = vor.u32 %v11051_v45, %v9357_v10  ;;  %v1315_v45 = vpack.c.bf16 %v1251_v3, %v1251_v3  ;;  %v1444_v10 = vld [vmem:[#allocation2 + $0x180] sm:$0xff] }
 0x3b6   :  { %14717 = vst [vmem:[#allocation8_spill] sm:$0xff] %v12798_v37 }
 0x3b7   :  { %v5229_v55 = vpop.f32.mrf.mxu1  ;;  %v5102_v12 = vpop.f32.mrf.mxu0  ;;  %1379 = vst [vmem:[#allocation3 + $0x404] sm:$0xf] %v1315_v45 }
 0x3b8   :  { %v5230_v52 = vadd.f32 %v5229_v55, %v12693_v58  ;;  %v12802_v2 = vadd.f32 %v5102_v12, %v12442_v38  ;;  %v9672_v58 = vor.u32 %v11135_v59, %v9671_v9  ;;  %v14718_v12 = vld [vmem:[#allocation10_spill] sm:$0xff]  ;;  %v11059_v9 = vld [vmem:[#allocation3 + $0x374] sm:$0xf]  ;;  %v9385_v59 = vld [vmem:[#allocation3 + $0x394] sm:$0xf0] }
 0x3b9   :  { %v5395_v16 = vpop.f32.mrf.mxu2 }
 0x3ba   :  { %v5396_v0 = vadd.f32 %v5395_v16, %v5227_v39  ;;  %5268 = vmatmul.bf16.gmra.mxu1 %v9352_v15  ;;  %v1075_v15 = vld [vmem:[#allocation2 + $0x259] sm:$0xff]  ;;  %v1140_v16 = vpack.c.bf16 %v1076_v6, %v1076_v6 }
 0x3bb   :  { %v5564_v46 = vpop.f32.mrf.mxu3  ;;  %v1139_v19 = vpack.c.bf16 %v1075_v15, %v1075_v15 }
 0x3bc   :  { %v12804_v37 = vadd.f32 %v5564_v46, %v5396_v0  ;;  %v1252_v0 = vld [vmem:[#allocation2 + $0x172] sm:$0xff]  ;;  %1204 = vst [vmem:[#allocation3 + $0x664] sm:$0xf] %v1140_v16 }
 0x3bd   :  { %1203 = vst [vmem:[#allocation3 + $0x640] sm:$0xf] %v1139_v19 }
 0x3be   :  { %5437 = vmatmul.bf16.gmra.mxu2 %v9356_v20  ;;  %v1445_v20 = vld [vmem:[#allocation2 + $0x188] sm:$0xff]  ;;  %1778 = vst [vmem:[#allocation3 + $0x604] sm:$0xf] %v1139_v19  ;;  %v1078_v19 = vld [vmem:[#allocation2 + $0x279] sm:$0xff] }
 0x3bf   :  { %v5231_v38 = vpop.f32.mrf.mxu1  ;;  %v5105_v55 = vpop.f32.mrf.mxu0  ;;  %1779 = vst [vmem:[#allocation3 + $0x628] sm:$0xf] %v1140_v16 }
 0x3c0   :  { %5606 = vmatmul.bf16.gmra.mxu3 %v9360_v44  ;;  %v5232_v22 = vadd.f32 %v5231_v38, %v12699_v47  ;;  %v12808_v7 = vadd.f32 %v5105_v55, %v14718_v12  ;;  %v1316_v44 = vpack.c.bf16 %v1252_v0, %v1252_v0  ;;  %v1508_v38 = vpack.c.bf16 %v1444_v10, %v1444_v10 }
 0x3c1   :  { %v5398_v39 = vpop.f32.mrf.mxu2  ;;  %v1509_v55 = vpack.c.bf16 %v1445_v20, %v1445_v20  ;;  %v9388_v12 = vor.u32 %v11059_v9, %v9385_v59  ;;  %v9707_v9 = vld [vmem:[#allocation3 + $0x5f8] sm:$0xf]  ;;  %v11144_v59 = vld [vmem:[#allocation3 + $0x618] sm:$0xf0] }
 0x3c2   :  { %v5399_v27 = vadd.f32 %v5398_v39, %v5230_v52  ;;  %5144 = vmatmul.bf16.gmra.mxu0 %v9672_v58  ;;  %v9391_v58 = vld [vmem:[#allocation3 + $0x378] sm:$0xf]  ;;  %v11064_v39 = vld [vmem:[#allocation3 + $0x398] sm:$0xf0]  ;;  %1380 = vst [vmem:[#allocation3 + $0x428] sm:$0xf] %v1316_v44 }
 0x3c3   :  { %v5567_v46 = vpop.f32.mrf.mxu3  ;;  %1572 = vst [vmem:[#allocation3 + $0x408] sm:$0xf] %v1508_v38  ;;  %v9392_v20 = vor.u32 %v11064_v39, %v9391_v58  ;;  %v1253_v58 = vld [vmem:[#allocation2 + $0x182] sm:$0xff] }
 0x3c4   :  { %v12810_v47 = vadd.f32 %v5567_v46, %v5399_v27  ;;  %v11060_v27 = vld [vmem:[#allocation3 + $0x37c] sm:$0xf]  ;;  %v9393_v46 = vld [vmem:[#allocation3 + $0x39c] sm:$0xf0]  ;;  %1573 = vst [vmem:[#allocation3 + $0x42c] sm:$0xf] %v1509_v55 }
 0x3c5   :  { %v9396_v44 = vor.u32 %v11060_v27, %v9393_v46  ;;  %v1317_v27 = vpack.c.bf16 %v1253_v58, %v1253_v58 }
 0x3c6   :  { %14719 = vst [vmem:[#allocation9_spill] sm:$0xff] %v12810_v47 }
 0x3c7   :  { %v5234_v52 = vpop.f32.mrf.mxu1  ;;  %v5107_v15 = vpop.f32.mrf.mxu0  ;;  %1381 = vst [vmem:[#allocation3 + $0x44c] sm:$0xf] %v1317_v27 }
 0x3c8   :  { %v5235_v6 = vadd.f32 %v5234_v52, %v12705_v31  ;;  %v12814_v3 = vadd.f32 %v5107_v15, %v12456_v61  ;;  %v9708_v31 = vor.u32 %v11144_v59, %v9707_v9  ;;  %v1142_v15 = vpack.c.bf16 %v1078_v19, %v1078_v19  ;;  %v1638_v9 = vld [vmem:[#allocation2 + $0x199] sm:$0xff] }
 0x3c9   :  { %v5400_v0 = vpop.f32.mrf.mxu2 }
 0x3ca   :  { %v5401_v10 = vadd.f32 %v5400_v0, %v5232_v22  ;;  %5273 = vmatmul.bf16.gmra.mxu1 %v9388_v12  ;;  %v1077_v12 = vld [vmem:[#allocation2 + $0x271] sm:$0xff]  ;;  %1206 = vst [vmem:[#allocation3 + $0x6ac] sm:$0xf] %v1142_v15 }
 0x3cb   :  { %v5569_v45 = vpop.f32.mrf.mxu3  ;;  %v1141_v16 = vpack.c.bf16 %v1077_v12, %v1077_v12  ;;  %v1254_v0 = vld [vmem:[#allocation2 + $0x18a] sm:$0xff]  ;;  %1781 = vst [vmem:[#allocation3 + $0x670] sm:$0xf] %v1142_v15  ;;  %v1256_v15 = vld [vmem:[#allocation2 + $0x1d2] sm:$0xff] }
 0x3cc   :  { %v12816_v47 = vadd.f32 %v5569_v45, %v5401_v10  ;;  %v11068_v10 = vld [vmem:[#allocation3 + $0x3bc] sm:$0xf]  ;;  %v1318_v45 = vpack.c.bf16 %v1254_v0, %v1254_v0 }
 0x3cd   :  { %1205 = vst [vmem:[#allocation3 + $0x688] sm:$0xf] %v1141_v16 }
 0x3ce   :  { %5442 = vmatmul.bf16.gmra.mxu2 %v9392_v20  ;;  %v9421_v20 = vld [vmem:[#allocation3 + $0x3dc] sm:$0xf0]  ;;  %1382 = vst [vmem:[#allocation3 + $0x470] sm:$0xf] %v1318_v45 }
 0x3cf   :  { %v5236_v61 = vpop.f32.mrf.mxu1  ;;  %v5110_v52 = vpop.f32.mrf.mxu0  ;;  %1780 = vst [vmem:[#allocation3 + $0x64c] sm:$0xf] %v1141_v16  ;;  %v1255_v16 = vld [vmem:[#allocation2 + $0x1ca] sm:$0xff] }
 0x3d0   :  { %5611 = vmatmul.bf16.gmra.mxu3 %v9396_v44  ;;  %v5237_v38 = vadd.f32 %v5236_v61, %v12711_v54  ;;  %v12820_v55 = vadd.f32 %v5110_v52, %v12465_v60  ;;  %v11489_v60 = vld [vmem:[#allocation2] sm:$0xff]  ;;  %v9424_v61 = vor.u32 %v11068_v10, %v9421_v20 }
 0x3d1   :  { %v5403_v22 = vpop.f32.mrf.mxu2  ;;  %v1510_v54 = vpack.c.bf16 %v11489_v60, %v11489_v60  ;;  %v1639_v44 = vld [vmem:[#allocation2 + $0x1a1] sm:$0xff] }
 0x3d2   :  { %v5404_v39 = vadd.f32 %v5403_v22, %v5235_v6  ;;  %5149 = vmatmul.bf16.gmra.mxu0 %v9708_v31  ;;  %v1702_v6 = vpack.c.bf16 %v1638_v9, %v1638_v9  ;;  %v9427_v52 = vld [vmem:[#allocation3 + $0x3c0] sm:$0xf]  ;;  %v11073_v22 = vld [vmem:[#allocation3 + $0x3e0] sm:$0xf0]  ;;  %v1703_v19 = vpack.c.bf16 %v1639_v44, %v1639_v44  ;;  %v9429_v60 = vld [vmem:[#allocation3 + $0x3e4] sm:$0xf0] }
 0x3d3   :  { %v5572_v46 = vpop.f32.mrf.mxu3  ;;  %1574 = vst [vmem:[#allocation3 + $0x450] sm:$0xf] %v1510_v54  ;;  %v9428_v27 = vor.u32 %v11073_v22, %v9427_v52  ;;  %v9743_v20 = vld [vmem:[#allocation3 + $0x640] sm:$0xf]  ;;  %v11153_v9 = vld [vmem:[#allocation3 + $0x660] sm:$0xf0] }
 0x3d4   :  { %v12822_v59 = vadd.f32 %v5572_v46, %v5404_v39  ;;  %v11069_v46 = vld [vmem:[#allocation3 + $0x3c4] sm:$0xf]  ;;  %1575 = vst [vmem:[#allocation3 + $0x474] sm:$0xf] %v1510_v54  ;;  %v1079_v52 = vld [vmem:[#allocation2 + $0x289] sm:$0xff]  ;;  %v1080_v22 = vld [vmem:[#allocation2 + $0x291] sm:$0xff] }
 0x3d5   :  { %1766 = vst [vmem:[#allocation3 + $0x454] sm:$0xf] %v1702_v6  ;;  %v9432_v44 = vor.u32 %v11069_v46, %v9429_v60  ;;  %v9457_v60 = vld [vmem:[#allocation3 + $0x424] sm:$0xf0] }
 0x3d6   :  { %14720 = vst [vmem:[#allocation10_spill] sm:$0xff] %v12822_v59 }
 0x3d7   :  { %v5239_v31 = vpop.f32.mrf.mxu1  ;;  %v5112_v12 = vpop.f32.mrf.mxu0  ;;  %1767 = vst [vmem:[#allocation3 + $0x478] sm:$0xf] %v1703_v19  ;;  %v1143_v19 = vpack.c.bf16 %v1079_v52, %v1079_v52 }
 0x3d8   :  { %v5240_v58 = vadd.f32 %v5239_v31, %v12717_v41  ;;  %v12826_v0 = vadd.f32 %v5112_v12, %v12479_v26  ;;  %v9744_v26 = vor.u32 %v11153_v9, %v9743_v20  ;;  %v1448_v20 = vld [vmem:[#allocation2 + $0x1e0] sm:$0xff]  ;;  %v1449_v9 = vld [vmem:[#allocation2 + $0x1e8] sm:$0xff] }
 0x3d9   :  { %v5405_v39 = vpop.f32.mrf.mxu2  ;;  %1207 = vst [vmem:[#allocation3 + $0x6d0] sm:$0xf] %v1143_v19 }
 0x3da   :  { %v5406_v59 = vadd.f32 %v5405_v39, %v5237_v38  ;;  %5278 = vmatmul.bf16.gmra.mxu1 %v9424_v61  ;;  %v14721_v38 = vld [vmem:[#allocation11_spill] sm:$0xff]  ;;  %v1144_v39 = vpack.c.bf16 %v1080_v22, %v1080_v22  ;;  %v14723_v22 = vld [vmem:[#allocation12_spill] sm:$0xff]  ;;  %1782 = vst [vmem:[#allocation3 + $0x694] sm:$0xf] %v1143_v19 }
 0x3db   :  { %v5574_v10 = vpop.f32.mrf.mxu3 }
 0x3dc   :  { %v12828_v45 = vadd.f32 %v5574_v10, %v5406_v59  ;;  %v11077_v59 = vld [vmem:[#allocation3 + $0x404] sm:$0xf]  ;;  %v1320_v10 = vpack.c.bf16 %v1256_v15, %v1256_v15  ;;  %1208 = vst [vmem:[#allocation3 + $0x6f4] sm:$0xf] %v1144_v39 }
 0x3dd   :  { %1783 = vst [vmem:[#allocation3 + $0x6b8] sm:$0xf] %v1144_v39  ;;  %v1081_v39 = vld [vmem:[#allocation2 + $0x2a1] sm:$0xff] }
 0x3de   :  { %5447 = vmatmul.bf16.gmra.mxu2 %v9428_v27  ;;  %v1319_v27 = vpack.c.bf16 %v1255_v16, %v1255_v16  ;;  %1384 = vst [vmem:[#allocation3 + $0x4b8] sm:$0xf] %v1320_v10 }
 0x3df   :  { %v5241_v41 = vpop.f32.mrf.mxu1  ;;  %v5115_v31 = vpop.f32.mrf.mxu0 }
 0x3e0   :  { %5616 = vmatmul.bf16.gmra.mxu3 %v9432_v44  ;;  %v5242_v54 = vadd.f32 %v5241_v41, %v12723_v13  ;;  %v12832_v61 = vadd.f32 %v5115_v31, %v14721_v38  ;;  %v1512_v44 = vpack.c.bf16 %v1448_v20, %v1448_v20  ;;  %v1513_v41 = vpack.c.bf16 %v1449_v9, %v1449_v9  ;;  %v11082_v38 = vld [vmem:[#allocation3 + $0x428] sm:$0xf0] }
 0x3e1   :  { %v5408_v6 = vpop.f32.mrf.mxu2  ;;  %v9460_v31 = vor.u32 %v11077_v59, %v9457_v60  ;;  %1383 = vst [vmem:[#allocation3 + $0x494] sm:$0xf] %v1319_v27  ;;  %v9779_v60 = vld [vmem:[#allocation3 + $0x688] sm:$0xf]  ;;  %v11162_v27 = vld [vmem:[#allocation3 + $0x6a8] sm:$0xf0] }
 0x3e2   :  { %v5409_v12 = vadd.f32 %v5408_v6, %v5240_v58  ;;  %5154 = vmatmul.bf16.gmra.mxu0 %v9744_v26  ;;  %v9463_v26 = vld [vmem:[#allocation3 + $0x408] sm:$0xf]  ;;  %1576 = vst [vmem:[#allocation3 + $0x498] sm:$0xf] %v1512_v44 }
 0x3e3   :  { %v5577_v46 = vpop.f32.mrf.mxu3  ;;  %1577 = vst [vmem:[#allocation3 + $0x4bc] sm:$0xf] %v1513_v41  ;;  %v9464_v9 = vor.u32 %v11082_v38, %v9463_v26  ;;  %v11302_v44 = vld [vmem:[%s14620_s1 + $0x208] sm:$0xff]  ;;  %v14725_v41 = vld [vmem:[#allocation13_spill] sm:$0xff] }
 0x3e4   :  { %v12834_v13 = vadd.f32 %v5577_v46, %v5409_v12  ;;  %v11078_v12 = vld [vmem:[#allocation3 + $0x40c] sm:$0xf]  ;;  %v9465_v46 = vld [vmem:[#allocation3 + $0x42c] sm:$0xf0]  ;;  %5718 = vmatpush.bf16.msra.mxu0 %v11302_v44  ;;  %v1257_v38 = vld [vmem:[#allocation2 + $0x1e2] sm:$0xff] }
 0x3e5   :  { %v9468_v10 = vor.u32 %v11078_v12, %v9465_v46  ;;  %v1082_v26 = vld [vmem:[#allocation2 + $0x2a9] sm:$0xff] }
 0x3e6   :  { %14722 = vst [vmem:[#allocation11_spill] sm:$0xff] %v12834_v13  ;;  %v1146_v12 = vpack.c.bf16 %v1082_v26, %v1082_v26  ;;  %v1258_v46 = vld [vmem:[#allocation2 + $0x1ea] sm:$0xff] }
 0x3e7   :  { %v5244_v58 = vpop.f32.mrf.mxu1  ;;  %v5117_v6 = vpop.f32.mrf.mxu0 }
 0x3e8   :  { %v5245_v52 = vadd.f32 %v5244_v58, %v12729_v11  ;;  %v12838_v16 = vadd.f32 %v5117_v6, %v14723_v22  ;;  %v9780_v11 = vor.u32 %v11162_v27, %v9779_v60  ;;  %v11086_v27 = vld [vmem:[#allocation3 + $0x44c] sm:$0xf]  ;;  %1210 = vst [vmem:[#allocation3 + $0x73c] sm:$0xf] %v1146_v12 }
 0x3e9   :  { %v5410_v15 = vpop.f32.mrf.mxu2  ;;  %1785 = vst [vmem:[#allocation3 + $0x700] sm:$0xf] %v1146_v12 }
 0x3ea   :  { %v5411_v20 = vadd.f32 %v5410_v15, %v5242_v54  ;;  %5283 = vmatmul.bf16.gmra.mxu1 %v9460_v31  ;;  %v1145_v15 = vpack.c.bf16 %v1081_v39, %v1081_v39 }
 0x3eb   :  { %v5579_v59 = vpop.f32.mrf.mxu3 }
 0x3ec   :  { %v12840_v13 = vadd.f32 %v5579_v59, %v5411_v20  ;;  %v1321_v20 = vpack.c.bf16 %v1257_v38, %v1257_v38  ;;  %v1451_v59 = vld [vmem:[#allocation2 + $0x200] sm:$0xff]  ;;  %1209 = vst [vmem:[#allocation3 + $0x718] sm:$0xf] %v1145_v15 }
 0x3ed   :  { %v14727_v38 = vld [vmem:[#allocation14_spill] sm:$0xff]  ;;  %1784 = vst [vmem:[#allocation3 + $0x6dc] sm:$0xf] %v1145_v15 }
 0x3ee   :  { %14724 = vst [vmem:[#allocation12_spill] sm:$0xff] %v12840_v13  ;;  %5452 = vmatmul.bf16.gmra.mxu2 %v9464_v9  ;;  %v1450_v9 = vld [vmem:[#allocation2 + $0x1f8] sm:$0xff]  ;;  %v1084_v15 = vld [vmem:[#allocation2 + $0x2c1] sm:$0xff] }
 0x3ef   :  { %v5246_v58 = vpop.f32.mrf.mxu1  ;;  %v5120_v6 = vpop.f32.mrf.mxu0  ;;  %v1514_v44 = vpack.c.bf16 %v1450_v9, %v1450_v9  ;;  %1385 = vst [vmem:[#allocation3 + $0x4dc] sm:$0xf] %v1321_v20 }
 0x3f0   :  { %5621 = vmatmul.bf16.gmra.mxu3 %v9468_v10  ;;  %v5247_v54 = vadd.f32 %v5246_v58, %v12735_v40  ;;  %v12847_v19 = vadd.f32 %v5120_v6, %v14725_v41  ;;  %v9493_v10 = vld [vmem:[#allocation3 + $0x46c] sm:$0xf0]  ;;  %v1322_v40 = vpack.c.bf16 %v1258_v46, %v1258_v46  ;;  %v1515_v6 = vpack.c.bf16 %v1451_v59, %v1451_v59 }
 0x3f1   :  { %v5413_v31 = vpop.f32.mrf.mxu2  ;;  %v9496_v41 = vor.u32 %v11086_v27, %v9493_v10  ;;  %1578 = vst [vmem:[#allocation3 + $0x4e0] sm:$0xf] %v1514_v44  ;;  %v9815_v27 = vld [vmem:[#allocation3 + $0x6d0] sm:$0xf]  ;;  %v11171_v10 = vld [vmem:[#allocation3 + $0x6f0] sm:$0xf0] }
 0x3f2   :  { %v5414_v22 = vadd.f32 %v5413_v31, %v5245_v52  ;;  %5159 = vmatmul.bf16.gmra.mxu0 %v9780_v11  ;;  %v9499_v11 = vld [vmem:[#allocation3 + $0x450] sm:$0xf]  ;;  %v11091_v31 = vld [vmem:[#allocation3 + $0x470] sm:$0xf0]  ;;  %1386 = vst [vmem:[#allocation3 + $0x500] sm:$0xf] %v1322_v40 }
 0x3f3   :  { %v5582_v60 = vpop.f32.mrf.mxu3  ;;  %1579 = vst [vmem:[#allocation3 + $0x504] sm:$0xf] %v1515_v6  ;;  %v9500_v59 = vor.u32 %v11091_v31, %v9499_v11  ;;  %v1259_v11 = vld [vmem:[#allocation2 + $0x1fa] sm:$0xff] }
 0x3f4   :  { %v12849_v58 = vadd.f32 %v5582_v60, %v5414_v22  ;;  %v11087_v22 = vld [vmem:[#allocation3 + $0x454] sm:$0xf]  ;;  %v9501_v60 = vld [vmem:[#allocation3 + $0x474] sm:$0xf0] }
 0x3f5   :  { %v9504_v40 = vor.u32 %v11087_v22, %v9501_v60  ;;  %v1323_v22 = vpack.c.bf16 %v1259_v11, %v1259_v11  ;;  %v1452_v60 = vld [vmem:[#allocation2 + $0x210] sm:$0xff] }
 0x3f6   :  { %14726 = vst [vmem:[#allocation13_spill] sm:$0xff] %v12849_v58  ;;  %v14731_v11 = vld [vmem:[#allocation16_spill] sm:$0xff] }
 0x3f7   :  { %v5249_v52 = vpop.f32.mrf.mxu1  ;;  %v5122_v39 = vpop.f32.mrf.mxu0  ;;  %1387 = vst [vmem:[#allocation3 + $0x524] sm:$0xf] %v1323_v22 }
 0x3f8   :  { %v5250_v26 = vadd.f32 %v5249_v52, %v12744_v30  ;;  %v12853_v13 = vadd.f32 %v5122_v39, %v14727_v38  ;;  %v9816_v30 = vor.u32 %v11171_v10, %v9815_v27  ;;  %v14729_v38 = vld [vmem:[#allocation15_spill] sm:$0xff]  ;;  %v11095_v27 = vld [vmem:[#allocation3 + $0x494] sm:$0xf]  ;;  %v9529_v10 = vld [vmem:[#allocation3 + $0x4b4] sm:$0xf0] }
 0x3f9   :  { %v5415_v46 = vpop.f32.mrf.mxu2 }
 0x3fa   :  { %v5416_v9 = vadd.f32 %v5415_v46, %v5247_v54  ;;  %5288 = vmatmul.bf16.gmra.mxu1 %v9496_v41  ;;  %v1083_v41 = vld [vmem:[#allocation2 + $0x2b9] sm:$0xff]  ;;  %v1148_v46 = vpack.c.bf16 %v1084_v15, %v1084_v15 }
 0x3fb   :  { %v5584_v20 = vpop.f32.mrf.mxu3  ;;  %v1147_v12 = vpack.c.bf16 %v1083_v41, %v1083_v41 }
 0x3fc   :  { %v12855_v58 = vadd.f32 %v5584_v20, %v5416_v9  ;;  %v1260_v9 = vld [vmem:[#allocation2 + $0x202] sm:$0xff]  ;;  %1212 = vst [vmem:[#allocation3 + $0x784] sm:$0xf] %v1148_v46 }
 0x3fd   :  { %1211 = vst [vmem:[#allocation3 + $0x760] sm:$0xf] %v1147_v12 }
 0x3fe   :  { %14728 = vst [vmem:[#allocation14_spill] sm:$0xff] %v12855_v58  ;;  %5457 = vmatmul.bf16.gmra.mxu2 %v9500_v59  ;;  %v1453_v59 = vld [vmem:[#allocation2 + $0x218] sm:$0xff] }
 0x3ff   :  { %v5251_v52 = vpop.f32.mrf.mxu1  ;;  %v5125_v39 = vpop.f32.mrf.mxu0  ;;  %1786 = vst [vmem:[#allocation3 + $0x724] sm:$0xf] %v1147_v12  ;;  %v1086_v12 = vld [vmem:[#allocation2 + $0x2d9] sm:$0xff] }
 0x400   :  { %5626 = vmatmul.bf16.gmra.mxu3 %v9504_v40  ;;  %v5252_v44 = vadd.f32 %v5251_v52, %v12750_v8  ;;  %v12859_v6 = vadd.f32 %v5125_v39, %v14729_v38  ;;  %v1324_v40 = vpack.c.bf16 %v1260_v9, %v1260_v9  ;;  %v1516_v52 = vpack.c.bf16 %v1452_v60, %v1452_v60 }
 0x401   :  { %v5418_v54 = vpop.f32.mrf.mxu2  ;;  %v1517_v39 = vpack.c.bf16 %v1453_v59, %v1453_v59  ;;  %v9532_v38 = vor.u32 %v11095_v27, %v9529_v10  ;;  %v9851_v27 = vld [vmem:[#allocation3 + $0x718] sm:$0xf]  ;;  %v11180_v10 = vld [vmem:[#allocation3 + $0x738] sm:$0xf0]  ;;  %1787 = vst [vmem:[#allocation3 + $0x748] sm:$0xf] %v1148_v46 }
 0x402   :  { %v5419_v31 = vadd.f32 %v5418_v54, %v5250_v26  ;;  %5164 = vmatmul.bf16.gmra.mxu0 %v9816_v30  ;;  %v9535_v30 = vld [vmem:[#allocation3 + $0x498] sm:$0xf]  ;;  %v11100_v54 = vld [vmem:[#allocation3 + $0x4b8] sm:$0xf0]  ;;  %1388 = vst [vmem:[#allocation3 + $0x548] sm:$0xf] %v1324_v40 }
 0x403   :  { %v5587_v20 = vpop.f32.mrf.mxu3  ;;  %1580 = vst [vmem:[#allocation3 + $0x528] sm:$0xf] %v1516_v52  ;;  %v9536_v59 = vor.u32 %v11100_v54, %v9535_v30  ;;  %v1261_v30 = vld [vmem:[#allocation2 + $0x212] sm:$0xff] }
 0x404   :  { %v12861_v8 = vadd.f32 %v5587_v20, %v5419_v31  ;;  %v11096_v31 = vld [vmem:[#allocation3 + $0x49c] sm:$0xf]  ;;  %v9537_v20 = vld [vmem:[#allocation3 + $0x4bc] sm:$0xf0]  ;;  %1581 = vst [vmem:[#allocation3 + $0x54c] sm:$0xf] %v1517_v39 }
 0x405   :  { %v9540_v40 = vor.u32 %v11096_v31, %v9537_v20  ;;  %v1325_v31 = vpack.c.bf16 %v1261_v30, %v1261_v30  ;;  %v1454_v20 = vld [vmem:[#allocation2 + $0x228] sm:$0xff]  ;;  %v14735_v30 = vld [vmem:[#allocation18_spill] sm:$0xff] }
 0x406   :  { %14730 = vst [vmem:[#allocation15_spill] sm:$0xff] %v12861_v8 }
 0x407   :  { %v5254_v26 = vpop.f32.mrf.mxu1  ;;  %v5127_v41 = vpop.f32.mrf.mxu0  ;;  %1389 = vst [vmem:[#allocation3 + $0x56c] sm:$0xf] %v1325_v31 }
 0x408   :  { %v5255_v15 = vadd.f32 %v5254_v26, %v12756_v17  ;;  %v12865_v58 = vadd.f32 %v5127_v41, %v14731_v11  ;;  %v9852_v17 = vor.u32 %v11180_v10, %v9851_v27  ;;  %v14733_v11 = vld [vmem:[#allocation17_spill] sm:$0xff]  ;;  %v9565_v10 = vld [vmem:[#allocation3 + $0x4fc] sm:$0xf0] }
 0x409   :  { %v5420_v9 = vpop.f32.mrf.mxu2  ;;  %v11104_v27 = vld [vmem:[#allocation3 + $0x4dc] sm:$0xf] }
 0x40a   :  { %v5421_v60 = vadd.f32 %v5420_v9, %v5252_v44  ;;  %5293 = vmatmul.bf16.gmra.mxu1 %v9532_v38  ;;  %v1085_v38 = vld [vmem:[#allocation2 + $0x2d1] sm:$0xff]  ;;  %v1150_v9 = vpack.c.bf16 %v1086_v12, %v1086_v12 }
 0x40b   :  { %v5589_v22 = vpop.f32.mrf.mxu3  ;;  %v1149_v46 = vpack.c.bf16 %v1085_v38, %v1085_v38 }
 0x40c   :  { %v12867_v8 = vadd.f32 %v5589_v22, %v5421_v60  ;;  %v1262_v60 = vld [vmem:[#allocation2 + $0x21a] sm:$0xff]  ;;  %1214 = vst [vmem:[#allocation3 + $0x7cc] sm:$0xf] %v1150_v9 }
 0x40d   :  { %1213 = vst [vmem:[#allocation3 + $0x7a8] sm:$0xf] %v1149_v46 }
 0x40e   :  { %14732 = vst [vmem:[#allocation16_spill] sm:$0xff] %v12867_v8  ;;  %5462 = vmatmul.bf16.gmra.mxu2 %v9536_v59  ;;  %v1455_v59 = vld [vmem:[#allocation2 + $0x230] sm:$0xff] }
 0x40f   :  { %v5256_v26 = vpop.f32.mrf.mxu1  ;;  %v5130_v41 = vpop.f32.mrf.mxu0  ;;  %1788 = vst [vmem:[#allocation3 + $0x76c] sm:$0xf] %v1149_v46  ;;  %v1088_v46 = vld [vmem:[#allocation2 + $0x2f1] sm:$0xff] }
 0x410   :  { %5631 = vmatmul.bf16.gmra.mxu3 %v9540_v40  ;;  %v5257_v52 = vadd.f32 %v5256_v26, %v12763_v23  ;;  %v12871_v39 = vadd.f32 %v5130_v41, %v14733_v11  ;;  %v1326_v40 = vpack.c.bf16 %v1262_v60, %v1262_v60  ;;  %v1518_v26 = vpack.c.bf16 %v1454_v20, %v1454_v20 }
 0x411   :  { %v5423_v44 = vpop.f32.mrf.mxu2  ;;  %v1519_v41 = vpack.c.bf16 %v1455_v59, %v1455_v59  ;;  %v9568_v11 = vor.u32 %v11104_v27, %v9565_v10  ;;  %v9887_v27 = vld [vmem:[#allocation3 + $0x760] sm:$0xf]  ;;  %v11189_v10 = vld [vmem:[#allocation3 + $0x780] sm:$0xf0]  ;;  %1789 = vst [vmem:[#allocation3 + $0x790] sm:$0xf] %v1150_v9 }
 0x412   :  { %v5424_v54 = vadd.f32 %v5423_v44, %v5255_v15  ;;  %5169 = vmatmul.bf16.gmra.mxu0 %v9852_v17  ;;  %v9571_v17 = vld [vmem:[#allocation3 + $0x4e0] sm:$0xf]  ;;  %v11109_v44 = vld [vmem:[#allocation3 + $0x500] sm:$0xf0]  ;;  %1390 = vst [vmem:[#allocation3 + $0x590] sm:$0xf] %v1326_v40 }
 0x413   :  { %v5592_v22 = vpop.f32.mrf.mxu3  ;;  %1582 = vst [vmem:[#allocation3 + $0x570] sm:$0xf] %v1518_v26  ;;  %v9572_v59 = vor.u32 %v11109_v44, %v9571_v17  ;;  %v1263_v17 = vld [vmem:[#allocation2 + $0x22a] sm:$0xff] }
 0x414   :  { %v12873_v23 = vadd.f32 %v5592_v22, %v5424_v54  ;;  %v11105_v54 = vld [vmem:[#allocation3 + $0x4e4] sm:$0xf]  ;;  %v9573_v22 = vld [vmem:[#allocation3 + $0x504] sm:$0xf0]  ;;  %1583 = vst [vmem:[#allocation3 + $0x594] sm:$0xf] %v1519_v41 }
 0x415   :  { %v9576_v40 = vor.u32 %v11105_v54, %v9573_v22  ;;  %v1327_v54 = vpack.c.bf16 %v1263_v17, %v1263_v17  ;;  %v1456_v22 = vld [vmem:[#allocation2 + $0x240] sm:$0xff]  ;;  %v14739_v17 = vld [vmem:[#allocation20_spill] sm:$0xff] }
 0x416   :  { %14734 = vst [vmem:[#allocation17_spill] sm:$0xff] %v12873_v23 }
 0x417   :  { %v5259_v15 = vpop.f32.mrf.mxu1  ;;  %v5132_v38 = vpop.f32.mrf.mxu0  ;;  %1391 = vst [vmem:[#allocation3 + $0x5b4] sm:$0xf] %v1327_v54 }
 0x418   :  { %v5260_v12 = vadd.f32 %v5259_v15, %v12769_v21  ;;  %v12877_v8 = vadd.f32 %v5132_v38, %v14735_v30  ;;  %v9888_v21 = vor.u32 %v11189_v10, %v9887_v27  ;;  %v14737_v30 = vld [vmem:[#allocation19_spill] sm:$0xff]  ;;  %v11113_v27 = vld [vmem:[#allocation3 + $0x524] sm:$0xf] }
 0x419   :  { %v5425_v60 = vpop.f32.mrf.mxu2  ;;  %v9601_v10 = vld [vmem:[#allocation3 + $0x544] sm:$0xf0] }
 0x41a   :  { %v5426_v20 = vadd.f32 %v5425_v60, %v5257_v52  ;;  %5298 = vmatmul.bf16.gmra.mxu1 %v9568_v11  ;;  %v1087_v11 = vld [vmem:[#allocation2 + $0x2e9] sm:$0xff]  ;;  %v1152_v60 = vpack.c.bf16 %v1088_v46, %v1088_v46 }
 0x41b   :  { %v5594_v31 = vpop.f32.mrf.mxu3  ;;  %v1151_v9 = vpack.c.bf16 %v1087_v11, %v1087_v11 }
 0x41c   :  { %v12879_v23 = vadd.f32 %v5594_v31, %v5426_v20  ;;  %v1264_v20 = vld [vmem:[#allocation2 + $0x232] sm:$0xff]  ;;  %1216 = vst [vmem:[#allocation3 + $0x814] sm:$0xf] %v1152_v60 }
 0x41d   :  { %1215 = vst [vmem:[#allocation3 + $0x7f0] sm:$0xf] %v1151_v9 }
 0x41e   :  { %14736 = vst [vmem:[#allocation18_spill] sm:$0xff] %v12879_v23  ;;  %5467 = vmatmul.bf16.gmra.mxu2 %v9572_v59  ;;  %v1457_v59 = vld [vmem:[#allocation2 + $0x248] sm:$0xff] }
 0x41f   :  { %v5261_v15 = vpop.f32.mrf.mxu1  ;;  %v5135_v38 = vpop.f32.mrf.mxu0  ;;  %1790 = vst [vmem:[#allocation3 + $0x7b4] sm:$0xf] %v1151_v9 }
 0x420   :  { %5636 = vmatmul.bf16.gmra.mxu3 %v9576_v40  ;;  %v5262_v26 = vadd.f32 %v5261_v15, %v12775_v1  ;;  %v12883_v41 = vadd.f32 %v5135_v38, %v14737_v30  ;;  %v1328_v40 = vpack.c.bf16 %v1264_v20, %v1264_v20  ;;  %v1520_v15 = vpack.c.bf16 %v1456_v22, %v1456_v22 }
 0x421   :  { %v5428_v52 = vpop.f32.mrf.mxu2  ;;  %v1521_v38 = vpack.c.bf16 %v1457_v59, %v1457_v59  ;;  %v9604_v30 = vor.u32 %v11113_v27, %v9601_v10  ;;  %v9923_v27 = vld [vmem:[#allocation3 + $0x7a8] sm:$0xf]  ;;  %v11198_v10 = vld [vmem:[#allocation3 + $0x7c8] sm:$0xf0]  ;;  %1791 = vst [vmem:[#allocation3 + $0x7d8] sm:$0xf] %v1152_v60 }
 0x422   :  { %v5429_v44 = vadd.f32 %v5428_v52, %v5260_v12  ;;  %5174 = vmatmul.bf16.gmra.mxu0 %v9888_v21  ;;  %v9607_v21 = vld [vmem:[#allocation3 + $0x528] sm:$0xf]  ;;  %v11118_v52 = vld [vmem:[#allocation3 + $0x548] sm:$0xf0]  ;;  %1392 = vst [vmem:[#allocation3 + $0x5d8] sm:$0xf] %v1328_v40 }
 0x423   :  { %v5597_v31 = vpop.f32.mrf.mxu3  ;;  %1584 = vst [vmem:[#allocation3 + $0x5b8] sm:$0xf] %v1520_v15  ;;  %v9608_v59 = vor.u32 %v11118_v52, %v9607_v21  ;;  %v11301_v15 = vld [vmem:[%s14620_s1 + $0x200] sm:$0xff] }
 0x424   :  { %v12885_v1 = vadd.f32 %v5597_v31, %v5429_v44  ;;  %v11114_v44 = vld [vmem:[#allocation3 + $0x52c] sm:$0xf]  ;;  %v9609_v31 = vld [vmem:[#allocation3 + $0x54c] sm:$0xf0]  ;;  %1585 = vst [vmem:[#allocation3 + $0x5dc] sm:$0xf] %v1521_v38  ;;  %5719 = vmatpush.bf16.msra.mxu0 %v11301_v15 }
 0x425   :  { %v9612_v40 = vor.u32 %v11114_v44, %v9609_v31  ;;  %v1089_v60 = vld [vmem:[#allocation2 + $0x301] sm:$0xff]  ;;  %v1266_v44 = vld [vmem:[#allocation2 + $0x24a] sm:$0xff] }
 0x426   :  { %14738 = vst [vmem:[#allocation19_spill] sm:$0xff] %v12885_v1  ;;  %v1265_v21 = vld [vmem:[#allocation2 + $0x242] sm:$0xff] }
 0x427   :  { %v5264_v12 = vpop.f32.mrf.mxu1  ;;  %v5137_v11 = vpop.f32.mrf.mxu0  ;;  %v1329_v31 = vpack.c.bf16 %v1265_v21, %v1265_v21 }
 0x428   :  { %v5265_v46 = vadd.f32 %v5264_v12, %v12781_v14  ;;  %v12889_v23 = vadd.f32 %v5137_v11, %v14739_v17  ;;  %v9924_v14 = vor.u32 %v11198_v10, %v9923_v27  ;;  %v1153_v17 = vpack.c.bf16 %v1089_v60, %v1089_v60  ;;  %v11122_v27 = vld [vmem:[#allocation3 + $0x56c] sm:$0xf]  ;;  %v9637_v10 = vld [vmem:[#allocation3 + $0x58c] sm:$0xf0] }
 0x429   :  { %v5430_v20 = vpop.f32.mrf.mxu2  ;;  %1393 = vst [vmem:[#allocation3 + $0x5fc] sm:$0xf] %v1329_v31 }
 0x42a   :  { %v5431_v22 = vadd.f32 %v5430_v20, %v5262_v26  ;;  %5303 = vmatmul.bf16.gmra.mxu1 %v9604_v30  ;;  %v1090_v30 = vld [vmem:[#allocation2 + $0x309] sm:$0xff]  ;;  %1217 = vst [vmem:[#allocation3 + $0x838] sm:$0xf] %v1153_v17 }
 0x42b   :  { %v5599_v54 = vpop.f32.mrf.mxu3  ;;  %v1154_v20 = vpack.c.bf16 %v1090_v30, %v1090_v30  ;;  %v14741_v30 = vld [vmem:[#allocation21_spill] sm:$0xff]  ;;  %1792 = vst [vmem:[#allocation3 + $0x7fc] sm:$0xf] %v1153_v17  ;;  %v1092_v17 = vld [vmem:[#allocation2 + $0x321] sm:$0xff] }
 0x42c   :  { %v12891_v1 = vadd.f32 %v5599_v54, %v5431_v22  ;;  %v1458_v22 = vld [vmem:[#allocation2 + $0x258] sm:$0xff] }
 0x42d   :  { %1218 = vst [vmem:[#allocation3 + $0x85c] sm:$0xf] %v1154_v20 }
 0x42e   :  { %5472 = vmatmul.bf16.gmra.mxu2 %v9608_v59  ;;  %v1459_v59 = vld [vmem:[#allocation2 + $0x260] sm:$0xff]  ;;  %1793 = vst [vmem:[#allocation3 + $0x820] sm:$0xf] %v1154_v20 }
 0x42f   :  { %v5266_v12 = vpop.f32.mrf.mxu1  ;;  %v5140_v11 = vpop.f32.mrf.mxu0  ;;  %v1523_v15 = vpack.c.bf16 %v1459_v59, %v1459_v59 }
 0x430   :  { %5641 = vmatmul.bf16.gmra.mxu3 %v9612_v40  ;;  %v5267_v26 = vadd.f32 %v5266_v12, %v12787_v56  ;;  %v12898_v9 = vadd.f32 %v5140_v11, %v12553_v33  ;;  %v1330_v56 = vpack.c.bf16 %v1266_v44, %v1266_v44  ;;  %v1522_v33 = vpack.c.bf16 %v1458_v22, %v1458_v22  ;;  %v11127_v11 = vld [vmem:[#allocation3 + $0x590] sm:$0xf0] }
 0x431   :  { %v5433_v38 = vpop.f32.mrf.mxu2  ;;  %v9640_v12 = vor.u32 %v11122_v27, %v9637_v10  ;;  %1587 = vst [vmem:[#allocation3 + $0x624] sm:$0xf] %v1523_v15  ;;  %v9959_v27 = vld [vmem:[#allocation3 + $0x7f0] sm:$0xf]  ;;  %v11207_v10 = vld [vmem:[#allocation3 + $0x810] sm:$0xf0] }
 0x432   :  { %v5434_v52 = vadd.f32 %v5433_v38, %v5265_v46  ;;  %5179 = vmatmul.bf16.gmra.mxu0 %v9924_v14  ;;  %v9643_v14 = vld [vmem:[#allocation3 + $0x570] sm:$0xf]  ;;  %1394 = vst [vmem:[#allocation3 + $0x620] sm:$0xf] %v1330_v56 }
 0x433   :  { %v5602_v54 = vpop.f32.mrf.mxu3  ;;  %1586 = vst [vmem:[#allocation3 + $0x600] sm:$0xf] %v1522_v33  ;;  %v9644_v59 = vor.u32 %v11127_v11, %v9643_v14  ;;  %v1267_v14 = vld [vmem:[#allocation2 + $0x25a] sm:$0xff] }
 0x434   :  { %v12900_v40 = vadd.f32 %v5602_v54, %v5434_v52  ;;  %v11123_v52 = vld [vmem:[#allocation3 + $0x574] sm:$0xf]  ;;  %v9645_v54 = vld [vmem:[#allocation3 + $0x594] sm:$0xf0] }
 0x435   :  { %v9648_v56 = vor.u32 %v11123_v52, %v9645_v54  ;;  %v1331_v52 = vpack.c.bf16 %v1267_v14, %v1267_v14  ;;  %v1460_v54 = vld [vmem:[#allocation2 + $0x270] sm:$0xff]  ;;  %v14745_v14 = vld [vmem:[#allocation23_spill] sm:$0xff] }
 0x436   :  { %14740 = vst [vmem:[#allocation20_spill] sm:$0xff] %v12900_v40 }
 0x437   :  { %v5269_v46 = vpop.f32.mrf.mxu1  ;;  %v5142_v38 = vpop.f32.mrf.mxu0  ;;  %1395 = vst [vmem:[#allocation3 + $0x644] sm:$0xf] %v1331_v52 }
 0x438   :  { %v5270_v60 = vadd.f32 %v5269_v46, %v12796_v51  ;;  %v12904_v21 = vadd.f32 %v5142_v38, %v14741_v30  ;;  %v9960_v51 = vor.u32 %v11207_v10, %v9959_v27  ;;  %v14743_v30 = vld [vmem:[#allocation22_spill] sm:$0xff]  ;;  %v11131_v27 = vld [vmem:[#allocation3 + $0x5b4] sm:$0xf]  ;;  %v9673_v10 = vld [vmem:[#allocation3 + $0x5d4] sm:$0xf0] }
 0x439   :  { %v5435_v44 = vpop.f32.mrf.mxu2 }
 0x43a   :  { %v5436_v22 = vadd.f32 %v5435_v44, %v5267_v26  ;;  %5308 = vmatmul.bf16.gmra.mxu1 %v9640_v12  ;;  %v1091_v12 = vld [vmem:[#allocation2 + $0x319] sm:$0xff]  ;;  %v1156_v44 = vpack.c.bf16 %v1092_v17, %v1092_v17 }
 0x43b   :  { %v5604_v31 = vpop.f32.mrf.mxu3  ;;  %v1155_v20 = vpack.c.bf16 %v1091_v12, %v1091_v12 }
 0x43c   :  { %v12906_v40 = vadd.f32 %v5604_v31, %v5436_v22  ;;  %v1268_v22 = vld [vmem:[#allocation2 + $0x262] sm:$0xff]  ;;  %1220 = vst [vmem:[#allocation3 + $0x8a4] sm:$0xf] %v1156_v44 }
 0x43d   :  { %1219 = vst [vmem:[#allocation3 + $0x880] sm:$0xf] %v1155_v20 }
 0x43e   :  { %14742 = vst [vmem:[#allocation21_spill] sm:$0xff] %v12906_v40  ;;  %5477 = vmatmul.bf16.gmra.mxu2 %v9644_v59  ;;  %v1461_v59 = vld [vmem:[#allocation2 + $0x278] sm:$0xff] }
 0x43f   :  { %v5271_v46 = vpop.f32.mrf.mxu1  ;;  %v5145_v38 = vpop.f32.mrf.mxu0  ;;  %1794 = vst [vmem:[#allocation3 + $0x844] sm:$0xf] %v1155_v20  ;;  %v1094_v20 = vld [vmem:[#allocation2 + $0x339] sm:$0xff] }
 0x440   :  { %5646 = vmatmul.bf16.gmra.mxu3 %v9648_v56  ;;  %v5272_v33 = vadd.f32 %v5271_v46, %v12802_v2  ;;  %v12910_v15 = vadd.f32 %v5145_v38, %v14743_v30  ;;  %v1332_v56 = vpack.c.bf16 %v1268_v22, %v1268_v22  ;;  %v1524_v46 = vpack.c.bf16 %v1460_v54, %v1460_v54 }
 0x441   :  { %v5438_v26 = vpop.f32.mrf.mxu2  ;;  %v1525_v38 = vpack.c.bf16 %v1461_v59, %v1461_v59  ;;  %v9676_v30 = vor.u32 %v11131_v27, %v9673_v10  ;;  %v9995_v27 = vld [vmem:[#allocation3 + $0x838] sm:$0xf]  ;;  %v11216_v10 = vld [vmem:[#allocation3 + $0x858] sm:$0xf0]  ;;  %1795 = vst [vmem:[#allocation3 + $0x868] sm:$0xf] %v1156_v44 }
 0x442   :  { %v5439_v11 = vadd.f32 %v5438_v26, %v5270_v60  ;;  %5184 = vmatmul.bf16.gmra.mxu0 %v9960_v51  ;;  %v9679_v51 = vld [vmem:[#allocation3 + $0x5b8] sm:$0xf]  ;;  %v11136_v26 = vld [vmem:[#allocation3 + $0x5d8] sm:$0xf0]  ;;  %1396 = vst [vmem:[#allocation3 + $0x668] sm:$0xf] %v1332_v56 }
 0x443   :  { %v5607_v31 = vpop.f32.mrf.mxu3  ;;  %1588 = vst [vmem:[#allocation3 + $0x648] sm:$0xf] %v1524_v46  ;;  %v9680_v59 = vor.u32 %v11136_v26, %v9679_v51  ;;  %v1269_v51 = vld [vmem:[#allocation2 + $0x272] sm:$0xff] }
 0x444   :  { %v12912_v2 = vadd.f32 %v5607_v31, %v5439_v11  ;;  %v11132_v11 = vld [vmem:[#allocation3 + $0x5bc] sm:$0xf]  ;;  %v9681_v31 = vld [vmem:[#allocation3 + $0x5dc] sm:$0xf0]  ;;  %1589 = vst [vmem:[#allocation3 + $0x66c] sm:$0xf] %v1525_v38 }
 0x445   :  { %v9684_v56 = vor.u32 %v11132_v11, %v9681_v31  ;;  %v1333_v11 = vpack.c.bf16 %v1269_v51, %v1269_v51  ;;  %v1462_v31 = vld [vmem:[#allocation2 + $0x288] sm:$0xff]  ;;  %v14749_v51 = vld [vmem:[#allocation25_spill] sm:$0xff] }
 0x446   :  { %14744 = vst [vmem:[#allocation22_spill] sm:$0xff] %v12912_v2 }
 0x447   :  { %v5274_v60 = vpop.f32.mrf.mxu1  ;;  %v5147_v12 = vpop.f32.mrf.mxu0  ;;  %1397 = vst [vmem:[#allocation3 + $0x68c] sm:$0xf] %v1333_v11 }
 0x448   :  { %v5275_v17 = vadd.f32 %v5274_v60, %v12808_v7  ;;  %v12916_v40 = vadd.f32 %v5147_v12, %v14745_v14  ;;  %v9996_v7 = vor.u32 %v11216_v10, %v9995_v27  ;;  %v14747_v14 = vld [vmem:[#allocation24_spill] sm:$0xff]  ;;  %v11140_v27 = vld [vmem:[#allocation3 + $0x5fc] sm:$0xf]  ;;  %v9709_v10 = vld [vmem:[#allocation3 + $0x61c] sm:$0xf0] }
 0x449   :  { %v5440_v22 = vpop.f32.mrf.mxu2 }
 0x44a   :  { %14746 = vst [vmem:[#allocation23_spill] sm:$0xff] %v12916_v40  ;;  %v5441_v54 = vadd.f32 %v5440_v22, %v5272_v33  ;;  %5313 = vmatmul.bf16.gmra.mxu1 %v9676_v30  ;;  %v1093_v30 = vld [vmem:[#allocation2 + $0x331] sm:$0xff]  ;;  %v1158_v22 = vpack.c.bf16 %v1094_v20, %v1094_v20 }
 0x44b   :  { %v5609_v52 = vpop.f32.mrf.mxu3  ;;  %v1157_v44 = vpack.c.bf16 %v1093_v30, %v1093_v30 }
 0x44c   :  { %v12918_v2 = vadd.f32 %v5609_v52, %v5441_v54  ;;  %v1270_v54 = vld [vmem:[#allocation2 + $0x27a] sm:$0xff]  ;;  %1222 = vst [vmem:[#allocation3 + $0x8ec] sm:$0xf] %v1158_v22 }
 0x44d   :  { %1221 = vst [vmem:[#allocation3 + $0x8c8] sm:$0xf] %v1157_v44 }
 0x44e   :  { %5482 = vmatmul.bf16.gmra.mxu2 %v9680_v59  ;;  %v1463_v59 = vld [vmem:[#allocation2 + $0x290] sm:$0xff]  ;;  %1796 = vst [vmem:[#allocation3 + $0x88c] sm:$0xf] %v1157_v44 }
 0x44f   :  { %v5276_v60 = vpop.f32.mrf.mxu1  ;;  %v5150_v12 = vpop.f32.mrf.mxu0  ;;  %1797 = vst [vmem:[#allocation3 + $0x8b0] sm:$0xf] %v1158_v22  ;;  %v1272_v44 = vld [vmem:[#allocation2 + $0x292] sm:$0xff] }
 0x450   :  { %5651 = vmatmul.bf16.gmra.mxu3 %v9684_v56  ;;  %v5277_v46 = vadd.f32 %v5276_v60, %v12814_v3  ;;  %v12922_v38 = vadd.f32 %v5150_v12, %v14747_v14  ;;  %v1334_v56 = vpack.c.bf16 %v1270_v54, %v1270_v54  ;;  %v1526_v60 = vpack.c.bf16 %v1462_v31, %v1462_v31 }
 0x451   :  { %v5443_v33 = vpop.f32.mrf.mxu2  ;;  %v1527_v12 = vpack.c.bf16 %v1463_v59, %v1463_v59  ;;  %v9712_v14 = vor.u32 %v11140_v27, %v9709_v10  ;;  %v10031_v27 = vld [vmem:[#allocation3 + $0x880] sm:$0xf]  ;;  %v11225_v10 = vld [vmem:[#allocation3 + $0x8a0] sm:$0xf0] }
 0x452   :  { %v5444_v26 = vadd.f32 %v5443_v33, %v5275_v17  ;;  %5189 = vmatmul.bf16.gmra.mxu0 %v9996_v7  ;;  %v9715_v7 = vld [vmem:[#allocation3 + $0x600] sm:$0xf]  ;;  %v11145_v33 = vld [vmem:[#allocation3 + $0x620] sm:$0xf0]  ;;  %1398 = vst [vmem:[#allocation3 + $0x6b0] sm:$0xf] %v1334_v56 }
 0x453   :  { %v5612_v52 = vpop.f32.mrf.mxu3  ;;  %1590 = vst [vmem:[#allocation3 + $0x690] sm:$0xf] %v1526_v60  ;;  %v9716_v59 = vor.u32 %v11145_v33, %v9715_v7  ;;  %v1464_v7 = vld [vmem:[#allocation2 + $0x2a0] sm:$0xff] }
 0x454   :  { %v12924_v3 = vadd.f32 %v5612_v52, %v5444_v26  ;;  %v11141_v26 = vld [vmem:[#allocation3 + $0x604] sm:$0xf]  ;;  %v9717_v52 = vld [vmem:[#allocation3 + $0x624] sm:$0xf0]  ;;  %1591 = vst [vmem:[#allocation3 + $0x6b4] sm:$0xf] %v1527_v12 }
 0x455   :  { %v9720_v56 = vor.u32 %v11141_v26, %v9717_v52  ;;  %v1528_v26 = vpack.c.bf16 %v1464_v7, %v1464_v7  ;;  %v1800_v52 = vld [vmem:[#allocation2 + $0x32] sm:$0xff] }
 0x456   :  { %14748 = vst [vmem:[#allocation24_spill] sm:$0xff] %v12924_v3 }
 0x457   :  { %v5279_v17 = vpop.f32.mrf.mxu1  ;;  %v5152_v30 = vpop.f32.mrf.mxu0  ;;  %1592 = vst [vmem:[#allocation3 + $0x6d8] sm:$0xf] %v1528_v26  ;;  %v10067_v26 = vld [vmem:[#allocation3 + $0x8c8] sm:$0xf] }
 0x458   :  { %v5280_v20 = vadd.f32 %v5279_v17, %v12820_v55  ;;  %v12928_v40 = vadd.f32 %v5152_v30, %v14749_v51  ;;  %v10032_v55 = vor.u32 %v11225_v10, %v10031_v27  ;;  %v14750_v51 = vld [vmem:[#allocation26_spill] sm:$0xff]  ;;  %v9745_v10 = vld [vmem:[#allocation3 + $0x664] sm:$0xf0] }
 0x459   :  { %v5445_v54 = vpop.f32.mrf.mxu2  ;;  %v11149_v27 = vld [vmem:[#allocation3 + $0x644] sm:$0xf] }
 0x45a   :  { %v5446_v31 = vadd.f32 %v5445_v54, %v5277_v46  ;;  %5318 = vmatmul.bf16.gmra.mxu1 %v9712_v14  ;;  %v1271_v14 = vld [vmem:[#allocation2 + $0x28a] sm:$0xff]  ;;  %v1336_v54 = vpack.c.bf16 %v1272_v44, %v1272_v44 }
 0x45b   :  { %v5614_v11 = vpop.f32.mrf.mxu3  ;;  %v1335_v22 = vpack.c.bf16 %v1271_v14, %v1271_v14 }
 0x45c   :  { %v12930_v3 = vadd.f32 %v5614_v11, %v5446_v31  ;;  %v1465_v31 = vld [vmem:[#allocation2 + $0x2a8] sm:$0xff]  ;;  %1400 = vst [vmem:[#allocation3 + $0x6f8] sm:$0xf] %v1336_v54 }
 0x45d   :  { %1399 = vst [vmem:[#allocation3 + $0x6d4] sm:$0xf] %v1335_v22 }
 0x45e   :  { %5487 = vmatmul.bf16.gmra.mxu2 %v9716_v59  ;;  %v1801_v59 = vld [vmem:[#allocation2 + $0x3a] sm:$0xff] }
 0x45f   :  { %v5281_v17 = vpop.f32.mrf.mxu1  ;;  %v5155_v30 = vpop.f32.mrf.mxu0 }
 0x460   :  { %5656 = vmatmul.bf16.gmra.mxu3 %v9720_v56  ;;  %v5282_v60 = vadd.f32 %v5281_v17, %v12826_v0  ;;  %v12934_v12 = vadd.f32 %v5155_v30, %v14750_v51  ;;  %v1529_v56 = vpack.c.bf16 %v1465_v31, %v1465_v31  ;;  %v1864_v17 = vpack.c.bf16 %v1800_v52, %v1800_v52 }
 0x461   :  { %v5448_v46 = vpop.f32.mrf.mxu2  ;;  %v1865_v30 = vpack.c.bf16 %v1801_v59, %v1801_v59  ;;  %v9748_v51 = vor.u32 %v11149_v27, %v9745_v10  ;;  %v11234_v59 = vld [vmem:[#allocation3 + $0x8e8] sm:$0xf0] }
 0x462   :  { %v5449_v33 = vadd.f32 %v5448_v46, %v5280_v20  ;;  %5194 = vmatmul.bf16.gmra.mxu0 %v10032_v55  ;;  %v9751_v55 = vld [vmem:[#allocation3 + $0x648] sm:$0xf]  ;;  %v11154_v46 = vld [vmem:[#allocation3 + $0x668] sm:$0xf0]  ;;  %1593 = vst [vmem:[#allocation3 + $0x6fc] sm:$0xf] %v1529_v56  ;;  %v10068_v56 = vor.u32 %v11234_v59, %v10067_v26 }
 0x463   :  { %v5617_v11 = vpop.f32.mrf.mxu3  ;;  %1928 = vst [vmem:[#allocation3 + $0x20] sm:$0xf] %v1864_v17  ;;  %v9752_v54 = vor.u32 %v11154_v46, %v9751_v55  ;;  %v1466_v55 = vld [vmem:[#allocation2 + $0x2b8] sm:$0xff]  ;;  %v11158_v26 = vld [vmem:[#allocation3 + $0x68c] sm:$0xf] }
 0x464   :  { %v12936_v0 = vadd.f32 %v5617_v11, %v5449_v33  ;;  %v11150_v33 = vld [vmem:[#allocation3 + $0x64c] sm:$0xf]  ;;  %v9753_v11 = vld [vmem:[#allocation3 + $0x66c] sm:$0xf0]  ;;  %1929 = vst [vmem:[#allocation3 + $0x44] sm:$0xf] %v1865_v30 }
 0x465   :  { %v9756_v10 = vor.u32 %v11150_v33, %v9753_v11  ;;  %v1530_v33 = vpack.c.bf16 %v1466_v55, %v1466_v55  ;;  %v1802_v11 = vld [vmem:[#allocation2 + $0x4a] sm:$0xff] }
 0x466   :  { %v9781_v59 = vld [vmem:[#allocation3 + $0x6ac] sm:$0xf0] }
 0x467   :  { %v5284_v20 = vpop.f32.mrf.mxu1  ;;  %v5157_v14 = vpop.f32.mrf.mxu0  ;;  %1594 = vst [vmem:[#allocation3 + $0x720] sm:$0xf] %v1530_v33 }
 0x468   :  { %v5285_v44 = vadd.f32 %v5284_v20, %v12832_v61  ;;  %v12940_v7 = vadd.f32 %v5157_v14, %v12651_v53 }
 0x469   :  { %v5450_v31 = vpop.f32.mrf.mxu2 }
 0x46a   :  { %v5451_v22 = vadd.f32 %v5450_v31, %v5282_v60  ;;  %5323 = vmatmul.bf16.gmra.mxu1 %v9748_v51  ;;  %v1273_v60 = vld [vmem:[#allocation2 + $0x2a2] sm:$0xff]  ;;  %v1274_v51 = vld [vmem:[#allocation2 + $0x2aa] sm:$0xff] }
 0x46b   :  { %v5619_v52 = vpop.f32.mrf.mxu3  ;;  %v1337_v14 = vpack.c.bf16 %v1273_v60, %v1273_v60  ;;  %v1338_v31 = vpack.c.bf16 %v1274_v51, %v1274_v51  ;;  %v8967_v33 = vld [vmem:[#allocation3 + $0x20] sm:$0xf] }
 0x46c   :  { %v12942_v27 = vadd.f32 %v5619_v52, %v5451_v22  ;;  %v1467_v22 = vld [vmem:[#allocation2 + $0x2c0] sm:$0xff] }
 0x46d   :  { %1401 = vst [vmem:[#allocation3 + $0x71c] sm:$0xf] %v1337_v14 }
 0x46e   :  { %5492 = vmatmul.bf16.gmra.mxu2 %v9752_v54  ;;  %v1803_v54 = vld [vmem:[#allocation2 + $0x52] sm:$0xff]  ;;  %1402 = vst [vmem:[#allocation3 + $0x740] sm:$0xf] %v1338_v31 }
 0x46f   :  { %v5286_v61 = vpop.f32.mrf.mxu1  ;;  %v5160_v20 = vpop.f32.mrf.mxu0 }
 0x470   :  { %5661 = vmatmul.bf16.gmra.mxu3 %v9756_v10  ;;  %v5287_v53 = vadd.f32 %v5286_v61, %v12838_v16  ;;  %v12946_v17 = vadd.f32 %v5160_v20, %v12657_v36  ;;  %v1531_v10 = vpack.c.bf16 %v1467_v22, %v1467_v22  ;;  %v1866_v36 = vpack.c.bf16 %v1802_v11, %v1802_v11 }
 0x471   :  { %v5453_v30 = vpop.f32.mrf.mxu2  ;;  %v1867_v61 = vpack.c.bf16 %v1803_v54, %v1803_v54  ;;  %v9784_v20 = vor.u32 %v11158_v26, %v9781_v59  ;;  %v10957_v54 = vld [vmem:[#allocation3 + $0x40] sm:$0xf0] }
 0x472   :  { %v5454_v46 = vadd.f32 %v5453_v30, %v5285_v44  ;;  %5199 = vmatmul.bf16.gmra.mxu0 %v10068_v56  ;;  %v9787_v56 = vld [vmem:[#allocation3 + $0x690] sm:$0xf]  ;;  %v11163_v30 = vld [vmem:[#allocation3 + $0x6b0] sm:$0xf0]  ;;  %1595 = vst [vmem:[#allocation3 + $0x744] sm:$0xf] %v1531_v10  ;;  %v8968_v10 = vor.u32 %v10957_v54, %v8967_v33 }
 0x473   :  { %v5622_v52 = vpop.f32.mrf.mxu3  ;;  %1930 = vst [vmem:[#allocation3 + $0x68] sm:$0xf] %v1866_v36  ;;  %v9788_v31 = vor.u32 %v11163_v30, %v9787_v56  ;;  %v1468_v56 = vld [vmem:[#allocation2 + $0x2d0] sm:$0xff]  ;;  %v9817_v54 = vld [vmem:[#allocation3 + $0x6f4] sm:$0xf0] }
 0x474   :  { %v12948_v16 = vadd.f32 %v5622_v52, %v5454_v46  ;;  %v11159_v46 = vld [vmem:[#allocation3 + $0x694] sm:$0xf]  ;;  %v9789_v52 = vld [vmem:[#allocation3 + $0x6b4] sm:$0xf0]  ;;  %1931 = vst [vmem:[#allocation3 + $0x8c] sm:$0xf] %v1867_v61 }
 0x475   :  { %v9792_v59 = vor.u32 %v11159_v46, %v9789_v52  ;;  %v1532_v46 = vpack.c.bf16 %v1468_v56, %v1468_v56  ;;  %v1804_v52 = vld [vmem:[#allocation2 + $0x62] sm:$0xff]  ;;  %v11167_v33 = vld [vmem:[#allocation3 + $0x6d4] sm:$0xf] }
 0x477   :  { %v5289_v44 = vpop.f32.mrf.mxu1  ;;  %v5162_v60 = vpop.f32.mrf.mxu0  ;;  %1596 = vst [vmem:[#allocation3 + $0x768] sm:$0xf] %v1532_v46 }
 0x478   :  { %v5290_v51 = vadd.f32 %v5289_v44, %v12847_v19  ;;  %v12952_v55 = vadd.f32 %v5162_v60, %v12663_v18 }
 0x479   :  { %v5455_v22 = vpop.f32.mrf.mxu2 }
 0x47a   :  { %v5456_v14 = vadd.f32 %v5455_v22, %v5287_v53  ;;  %5328 = vmatmul.bf16.gmra.mxu1 %v9784_v20  ;;  %v1275_v53 = vld [vmem:[#allocation2 + $0x2ba] sm:$0xff]  ;;  %v1276_v20 = vld [vmem:[#allocation2 + $0x2c2] sm:$0xff] }
 0x47b   :  { %v5624_v11 = vpop.f32.mrf.mxu3  ;;  %v1339_v60 = vpack.c.bf16 %v1275_v53, %v1275_v53  ;;  %v1340_v22 = vpack.c.bf16 %v1276_v20, %v1276_v20  ;;  %v9003_v46 = vld [vmem:[#allocation3 + $0x68] sm:$0xf] }
 0x47c   :  { %v12954_v26 = vadd.f32 %v5624_v11, %v5456_v14  ;;  %v1469_v14 = vld [vmem:[#allocation2 + $0x2d8] sm:$0xff] }
 0x47d   :  { %1403 = vst [vmem:[#allocation3 + $0x764] sm:$0xf] %v1339_v60 }
 0x47e   :  { %5497 = vmatmul.bf16.gmra.mxu2 %v9788_v31  ;;  %v1805_v31 = vld [vmem:[#allocation2 + $0x6a] sm:$0xff]  ;;  %1404 = vst [vmem:[#allocation3 + $0x788] sm:$0xf] %v1340_v22 }
 0x47f   :  { %v5291_v19 = vpop.f32.mrf.mxu1  ;;  %v5165_v44 = vpop.f32.mrf.mxu0 }
 0x480   :  { %5666 = vmatmul.bf16.gmra.mxu3 %v9792_v59  ;;  %v5292_v18 = vadd.f32 %v5291_v19, %v12853_v13  ;;  %v12958_v36 = vadd.f32 %v5165_v44, %v12669_v62  ;;  %v1533_v59 = vpack.c.bf16 %v1469_v14, %v1469_v14  ;;  %v1868_v62 = vpack.c.bf16 %v1804_v52, %v1804_v52 }
 0x481   :  { %v5458_v61 = vpop.f32.mrf.mxu2  ;;  %v1869_v19 = vpack.c.bf16 %v1805_v31, %v1805_v31  ;;  %v9820_v44 = vor.u32 %v11167_v33, %v9817_v54  ;;  %v10966_v31 = vld [vmem:[#allocation3 + $0x88] sm:$0xf0] }
 0x482   :  { %v5459_v30 = vadd.f32 %v5458_v61, %v5290_v51  ;;  %5720 = vmatmul.bf16.vlgmr.msra.gmra.mxu0 %v8968_v10  ;;  %v9823_v10 = vld [vmem:[#allocation3 + $0x6d8] sm:$0xf]  ;;  %v11172_v61 = vld [vmem:[#allocation3 + $0x6f8] sm:$0xf0]  ;;  %1597 = vst [vmem:[#allocation3 + $0x78c] sm:$0xf] %v1533_v59  ;;  %v9004_v59 = vor.u32 %v10966_v31, %v9003_v46 }
 0x483   :  { %v5627_v11 = vpop.f32.mrf.mxu3  ;;  %1932 = vst [vmem:[#allocation3 + $0xb0] sm:$0xf] %v1868_v62  ;;  %v9824_v22 = vor.u32 %v11172_v61, %v9823_v10  ;;  %v1470_v10 = vld [vmem:[#allocation2 + $0x2e8] sm:$0xff]  ;;  %v11176_v46 = vld [vmem:[#allocation3 + $0x71c] sm:$0xf] }
 0x484   :  { %v12960_v13 = vadd.f32 %v5627_v11, %v5459_v30  ;;  %v11168_v30 = vld [vmem:[#allocation3 + $0x6dc] sm:$0xf]  ;;  %v9825_v11 = vld [vmem:[#allocation3 + $0x6fc] sm:$0xf0]  ;;  %1933 = vst [vmem:[#allocation3 + $0xd4] sm:$0xf] %v1869_v19 }
 0x485   :  { %v9828_v54 = vor.u32 %v11168_v30, %v9825_v11  ;;  %v1534_v30 = vpack.c.bf16 %v1470_v10, %v1470_v10  ;;  %v1806_v11 = vld [vmem:[#allocation2 + $0x7a] sm:$0xff] }
 0x486   :  { %v9853_v31 = vld [vmem:[#allocation3 + $0x73c] sm:$0xf0] }
 0x487   :  { %v5294_v51 = vpop.f32.mrf.mxu1  ;;  %v5167_v53 = vpop.f32.mrf.mxu0  ;;  %1598 = vst [vmem:[#allocation3 + $0x7b0] sm:$0xf] %v1534_v30 }
 0x488   :  { %v5295_v20 = vadd.f32 %v5294_v51, %v12859_v6  ;;  %v12964_v56 = vadd.f32 %v5167_v53, %v12675_v48 }
 0x489   :  { %v5460_v14 = vpop.f32.mrf.mxu2 }
 0x48a   :  { %v5461_v60 = vadd.f32 %v5460_v14, %v5292_v18  ;;  %5333 = vmatmul.bf16.gmra.mxu1 %v9820_v44  ;;  %v1277_v18 = vld [vmem:[#allocation2 + $0x2d2] sm:$0xff]  ;;  %v1278_v44 = vld [vmem:[#allocation2 + $0x2da] sm:$0xff] }
 0x48b   :  { %v5629_v52 = vpop.f32.mrf.mxu3  ;;  %v1341_v53 = vpack.c.bf16 %v1277_v18, %v1277_v18  ;;  %v1342_v14 = vpack.c.bf16 %v1278_v44, %v1278_v44  ;;  %v9039_v30 = vld [vmem:[#allocation3 + $0xb0] sm:$0xf] }
 0x48c   :  { %v12966_v33 = vadd.f32 %v5629_v52, %v5461_v60  ;;  %v1471_v60 = vld [vmem:[#allocation2 + $0x2f0] sm:$0xff] }
 0x48d   :  { %1405 = vst [vmem:[#allocation3 + $0x7ac] sm:$0xf] %v1341_v53 }
 0x48e   :  { %5502 = vmatmul.bf16.gmra.mxu2 %v9824_v22  ;;  %v1807_v22 = vld [vmem:[#allocation2 + $0x82] sm:$0xff]  ;;  %1406 = vst [vmem:[#allocation3 + $0x7d0] sm:$0xf] %v1342_v14 }
 0x48f   :  { %v5296_v6 = vpop.f32.mrf.mxu1  ;;  %v5170_v51 = vpop.f32.mrf.mxu0 }
 0x490   :  { %5671 = vmatmul.bf16.gmra.mxu3 %v9828_v54  ;;  %v5297_v48 = vadd.f32 %v5296_v6, %v12865_v58  ;;  %v12970_v62 = vadd.f32 %v5170_v51, %v12681_v42  ;;  %v1535_v54 = vpack.c.bf16 %v1471_v60, %v1471_v60  ;;  %v1870_v42 = vpack.c.bf16 %v1806_v11, %v1806_v11 }
 0x491   :  { %v5463_v19 = vpop.f32.mrf.mxu2  ;;  %v1871_v6 = vpack.c.bf16 %v1807_v22, %v1807_v22  ;;  %v9856_v51 = vor.u32 %v11176_v46, %v9853_v31  ;;  %v10975_v22 = vld [vmem:[#allocation3 + $0xd0] sm:$0xf0] }
 0x492   :  { %v5464_v61 = vadd.f32 %v5463_v19, %v5295_v20  ;;  %5725 = vmatmul.bf16.gmra.mxu0 %v9004_v59  ;;  %v9859_v59 = vld [vmem:[#allocation3 + $0x720] sm:$0xf]  ;;  %v11181_v19 = vld [vmem:[#allocation3 + $0x740] sm:$0xf0]  ;;  %1599 = vst [vmem:[#allocation3 + $0x7d4] sm:$0xf] %v1535_v54  ;;  %v9040_v54 = vor.u32 %v10975_v22, %v9039_v30 }
 0x493   :  { %v5632_v52 = vpop.f32.mrf.mxu3  ;;  %1934 = vst [vmem:[#allocation3 + $0xf8] sm:$0xf] %v1870_v42  ;;  %v9860_v14 = vor.u32 %v11181_v19, %v9859_v59  ;;  %v14752_v42 = vld [vmem:[#allocation27_spill] sm:$0xff]  ;;  %v1472_v59 = vld [vmem:[#allocation2 + $0x300] sm:$0xff] }
 0x494   :  { %v12972_v58 = vadd.f32 %v5632_v52, %v5464_v61  ;;  %v11177_v61 = vld [vmem:[#allocation3 + $0x724] sm:$0xf]  ;;  %v9861_v52 = vld [vmem:[#allocation3 + $0x744] sm:$0xf0]  ;;  %1935 = vst [vmem:[#allocation3 + $0x11c] sm:$0xf] %v1871_v6 }
 0x495   :  { %v9864_v31 = vor.u32 %v11177_v61, %v9861_v52  ;;  %v1536_v61 = vpack.c.bf16 %v1472_v59, %v1472_v59  ;;  %v1808_v52 = vld [vmem:[#allocation2 + $0x92] sm:$0xff]  ;;  %v11185_v22 = vld [vmem:[#allocation3 + $0x764] sm:$0xf] }
 0x497   :  { %v5299_v20 = vpop.f32.mrf.mxu1  ;;  %v5172_v18 = vpop.f32.mrf.mxu0  ;;  %1600 = vst [vmem:[#allocation3 + $0x7f8] sm:$0xf] %v1536_v61 }
 0x498   :  { %v5300_v44 = vadd.f32 %v5299_v20, %v12871_v39  ;;  %v12976_v10 = vadd.f32 %v5172_v18, %v12686_v4 }
 0x499   :  { %v5465_v60 = vpop.f32.mrf.mxu2 }
 0x49a   :  { %14751 = vst [vmem:[#allocation25_spill] sm:$0xff] %v12976_v10  ;;  %v5466_v53 = vadd.f32 %v5465_v60, %v5297_v48  ;;  %5338 = vmatmul.bf16.gmra.mxu1 %v9856_v51  ;;  %v1279_v48 = vld [vmem:[#allocation2 + $0x2ea] sm:$0xff]  ;;  %v1280_v51 = vld [vmem:[#allocation2 + $0x2f2] sm:$0xff] }
 0x49b   :  { %v5634_v11 = vpop.f32.mrf.mxu3  ;;  %v1343_v60 = vpack.c.bf16 %v1279_v48, %v1279_v48  ;;  %v9075_v61 = vld [vmem:[#allocation3 + $0xf8] sm:$0xf] }
 0x49c   :  { %v12978_v46 = vadd.f32 %v5634_v11, %v5466_v53  ;;  %v1344_v53 = vpack.c.bf16 %v1280_v51, %v1280_v51  ;;  %v1473_v11 = vld [vmem:[#allocation2 + $0x308] sm:$0xff] }
 0x49d   :  { %v1537_v10 = vpack.c.bf16 %v1473_v11, %v1473_v11  ;;  %1407 = vst [vmem:[#allocation3 + $0x7f4] sm:$0xf] %v1343_v60 }
 0x49e   :  { %5507 = vmatmul.bf16.gmra.mxu2 %v9860_v14  ;;  %v1809_v14 = vld [vmem:[#allocation2 + $0x9a] sm:$0xff]  ;;  %1408 = vst [vmem:[#allocation3 + $0x818] sm:$0xf] %v1344_v53 }
 0x49f   :  { %v5301_v39 = vpop.f32.mrf.mxu1  ;;  %v5175_v20 = vpop.f32.mrf.mxu0  ;;  %1601 = vst [vmem:[#allocation3 + $0x81c] sm:$0xf] %v1537_v10 }
 0x4a0   :  { %5676 = vmatmul.bf16.gmra.mxu3 %v9864_v31  ;;  %v5302_v4 = vadd.f32 %v5301_v39, %v12877_v8  ;;  %v12982_v18 = vadd.f32 %v5175_v20, %v14752_v42  ;;  %v9889_v31 = vld [vmem:[#allocation3 + $0x784] sm:$0xf0]  ;;  %v1872_v39 = vpack.c.bf16 %v1808_v52, %v1808_v52  ;;  %v1873_v20 = vpack.c.bf16 %v1809_v14, %v1809_v14  ;;  %v10984_v14 = vld [vmem:[#allocation3 + $0x118] sm:$0xf0] }
 0x4a1   :  { %v5468_v6 = vpop.f32.mrf.mxu2  ;;  %v9892_v42 = vor.u32 %v11185_v22, %v9889_v31  ;;  %v9076_v10 = vor.u32 %v10984_v14, %v9075_v61  ;;  %v11194_v61 = vld [vmem:[#allocation3 + $0x7ac] sm:$0xf]  ;;  %v9925_v14 = vld [vmem:[#allocation3 + $0x7cc] sm:$0xf0] }
 0x4a2   :  { %v5469_v19 = vadd.f32 %v5468_v6, %v5300_v44  ;;  %5730 = vmatmul.bf16.gmra.mxu0 %v9040_v54  ;;  %v9895_v54 = vld [vmem:[#allocation3 + $0x768] sm:$0xf]  ;;  %v11190_v6 = vld [vmem:[#allocation3 + $0x788] sm:$0xf0]  ;;  %1936 = vst [vmem:[#allocation3 + $0x140] sm:$0xf] %v1872_v39 }
 0x4a3   :  { %v5637_v30 = vpop.f32.mrf.mxu3  ;;  %1937 = vst [vmem:[#allocation3 + $0x164] sm:$0xf] %v1873_v20  ;;  %v9896_v53 = vor.u32 %v11190_v6, %v9895_v54  ;;  %v1474_v54 = vld [vmem:[#allocation2 + $0x318] sm:$0xff] }
 0x4a4   :  { %v12984_v8 = vadd.f32 %v5637_v30, %v5469_v19  ;;  %v11186_v19 = vld [vmem:[#allocation3 + $0x76c] sm:$0xf]  ;;  %v9897_v30 = vld [vmem:[#allocation3 + $0x78c] sm:$0xf0] }
 0x4a5   :  { %v9900_v31 = vor.u32 %v11186_v19, %v9897_v30  ;;  %v1538_v19 = vpack.c.bf16 %v1474_v54, %v1474_v54  ;;  %v1810_v30 = vld [vmem:[#allocation2 + $0xaa] sm:$0xff] }
 0x4a7   :  { %v5304_v44 = vpop.f32.mrf.mxu1  ;;  %v5177_v48 = vpop.f32.mrf.mxu0  ;;  %1602 = vst [vmem:[#allocation3 + $0x840] sm:$0xf] %v1538_v19 }
 0x4a8   :  { %v5305_v51 = vadd.f32 %v5304_v44, %v12883_v41  ;;  %v12988_v59 = vadd.f32 %v5177_v48, %v12701_v35 }
 0x4a9   :  { %v5470_v11 = vpop.f32.mrf.mxu2  ;;  %v9111_v19 = vld [vmem:[#allocation3 + $0x140] sm:$0xf] }
 0x4aa   :  { %14753 = vst [vmem:[#allocation26_spill] sm:$0xff] %v12988_v59  ;;  %v5471_v60 = vadd.f32 %v5470_v11, %v5302_v4  ;;  %5343 = vmatmul.bf16.gmra.mxu1 %v9892_v42  ;;  %v1281_v4 = vld [vmem:[#allocation2 + $0x302] sm:$0xff]  ;;  %v1282_v42 = vld [vmem:[#allocation2 + $0x30a] sm:$0xff]  ;;  %v1825_v59 = vld [vmem:[#allocation2 + $0x15a] sm:$0xff] }
 0x4ab   :  { %v5639_v52 = vpop.f32.mrf.mxu3  ;;  %v1345_v48 = vpack.c.bf16 %v1281_v4, %v1281_v4  ;;  %v1346_v11 = vpack.c.bf16 %v1282_v42, %v1282_v42 }
 0x4ac   :  { %v12990_v22 = vadd.f32 %v5639_v52, %v5471_v60  ;;  %v1475_v60 = vld [vmem:[#allocation2 + $0x320] sm:$0xff] }
 0x4ad   :  { %1409 = vst [vmem:[#allocation3 + $0x83c] sm:$0xf] %v1345_v48 }
 0x4ae   :  { %5512 = vmatmul.bf16.gmra.mxu2 %v9896_v53  ;;  %v1811_v53 = vld [vmem:[#allocation2 + $0xb2] sm:$0xff]  ;;  %1410 = vst [vmem:[#allocation3 + $0x860] sm:$0xf] %v1346_v11 }
 0x4af   :  { %v5306_v41 = vpop.f32.mrf.mxu1  ;;  %v5180_v44 = vpop.f32.mrf.mxu0 }
 0x4b0   :  { %5681 = vmatmul.bf16.gmra.mxu3 %v9900_v31  ;;  %v5307_v35 = vadd.f32 %v5306_v41, %v12889_v23  ;;  %v12994_v39 = vadd.f32 %v5180_v44, %v12707_v5  ;;  %v1539_v31 = vpack.c.bf16 %v1475_v60, %v1475_v60  ;;  %v1874_v5 = vpack.c.bf16 %v1810_v30, %v1810_v30 }
 0x4b1   :  { %v5473_v20 = vpop.f32.mrf.mxu2  ;;  %v1875_v41 = vpack.c.bf16 %v1811_v53, %v1811_v53  ;;  %v9928_v44 = vor.u32 %v11194_v61, %v9925_v14  ;;  %v10993_v53 = vld [vmem:[#allocation3 + $0x160] sm:$0xf0] }
 0x4b2   :  { %14754 = vst [vmem:[#allocation27_spill] sm:$0xff] %v12994_v39  ;;  %v5474_v6 = vadd.f32 %v5473_v20, %v5305_v51  ;;  %5735 = vmatmul.bf16.gmra.mxu0 %v9076_v10  ;;  %v9931_v10 = vld [vmem:[#allocation3 + $0x7b0] sm:$0xf]  ;;  %v11199_v20 = vld [vmem:[#allocation3 + $0x7d0] sm:$0xf0] }
 0x4b3   :  { %v5642_v52 = vpop.f32.mrf.mxu3  ;;  %1603 = vst [vmem:[#allocation3 + $0x864] sm:$0xf] %v1539_v31  ;;  %v9932_v11 = vor.u32 %v11199_v20, %v9931_v10  ;;  %v9112_v31 = vor.u32 %v10993_v53, %v9111_v19  ;;  %v1476_v10 = vld [vmem:[#allocation2 + $0x330] sm:$0xff]  ;;  %v9961_v53 = vld [vmem:[#allocation3 + $0x814] sm:$0xf0] }
 0x4b4   :  { %v12996_v23 = vadd.f32 %v5642_v52, %v5474_v6  ;;  %1938 = vst [vmem:[#allocation3 + $0x188] sm:$0xf] %v1874_v5  ;;  %v11195_v6 = vld [vmem:[#allocation3 + $0x7b4] sm:$0xf]  ;;  %v9933_v52 = vld [vmem:[#allocation3 + $0x7d4] sm:$0xf0] }
 0x4b5   :  { %1939 = vst [vmem:[#allocation3 + $0x1ac] sm:$0xf] %v1875_v41  ;;  %v9936_v14 = vor.u32 %v11195_v6, %v9933_v52  ;;  %v1540_v6 = vpack.c.bf16 %v1476_v10, %v1476_v10  ;;  %v1812_v52 = vld [vmem:[#allocation2 + $0xc2] sm:$0xff]  ;;  %v11203_v19 = vld [vmem:[#allocation3 + $0x7f4] sm:$0xf] }
 0x4b7   :  { %v5309_v51 = vpop.f32.mrf.mxu1  ;;  %v5182_v4 = vpop.f32.mrf.mxu0  ;;  %1604 = vst [vmem:[#allocation3 + $0x888] sm:$0xf] %v1540_v6 }
 0x4b8   :  { %v5310_v42 = vadd.f32 %v5309_v51, %v12898_v9  ;;  %v13000_v54 = vadd.f32 %v5182_v4, %v12713_v49 }
 0x4b9   :  { %v5475_v60 = vpop.f32.mrf.mxu2 }
 0x4ba   :  { %14755 = vst [vmem:[#allocation28_spill] sm:$0xff] %v13000_v54  ;;  %v5476_v48 = vadd.f32 %v5475_v60, %v5307_v35  ;;  %5348 = vmatmul.bf16.gmra.mxu1 %v9928_v44  ;;  %v1283_v35 = vld [vmem:[#allocation2 + $0x31a] sm:$0xff]  ;;  %v1284_v44 = vld [vmem:[#allocation2 + $0x322] sm:$0xff] }
 0x4bb   :  { %v5644_v30 = vpop.f32.mrf.mxu3  ;;  %v1347_v4 = vpack.c.bf16 %v1283_v35, %v1283_v35  ;;  %v1348_v60 = vpack.c.bf16 %v1284_v44, %v1284_v44  ;;  %v9147_v6 = vld [vmem:[#allocation3 + $0x188] sm:$0xf] }
 0x4bc   :  { %v13002_v61 = vadd.f32 %v5644_v30, %v5476_v48  ;;  %v1477_v48 = vld [vmem:[#allocation2 + $0x338] sm:$0xff] }
 0x4bd   :  { %1411 = vst [vmem:[#allocation3 + $0x884] sm:$0xf] %v1347_v4 }
 0x4be   :  { %5517 = vmatmul.bf16.gmra.mxu2 %v9932_v11  ;;  %v1813_v11 = vld [vmem:[#allocation2 + $0xca] sm:$0xff]  ;;  %1412 = vst [vmem:[#allocation3 + $0x8a8] sm:$0xf] %v1348_v60 }
 0x4bf   :  { %v5311_v9 = vpop.f32.mrf.mxu1  ;;  %v5185_v51 = vpop.f32.mrf.mxu0 }
 0x4c0   :  { %5686 = vmatmul.bf16.gmra.mxu3 %v9936_v14  ;;  %v5312_v49 = vadd.f32 %v5311_v9, %v12904_v21  ;;  %v13006_v5 = vadd.f32 %v5185_v51, %v12719_v63  ;;  %v1541_v14 = vpack.c.bf16 %v1477_v48, %v1477_v48  ;;  %v1876_v63 = vpack.c.bf16 %v1812_v52, %v1812_v52 }
 0x4c1   :  { %v5478_v41 = vpop.f32.mrf.mxu2  ;;  %v1877_v9 = vpack.c.bf16 %v1813_v11, %v1813_v11  ;;  %v9964_v51 = vor.u32 %v11203_v19, %v9961_v53  ;;  %v11002_v11 = vld [vmem:[#allocation3 + $0x1a8] sm:$0xf0] }
 0x4c2   :  { %14756 = vst [vmem:[#allocation29_spill] sm:$0xff] %v13006_v5  ;;  %v5479_v20 = vadd.f32 %v5478_v41, %v5310_v42  ;;  %5740 = vmatmul.bf16.gmra.mxu0 %v9112_v31  ;;  %v9967_v31 = vld [vmem:[#allocation3 + $0x7f8] sm:$0xf]  ;;  %v11208_v41 = vld [vmem:[#allocation3 + $0x818] sm:$0xf0] }
 0x4c3   :  { %v5647_v30 = vpop.f32.mrf.mxu3  ;;  %1605 = vst [vmem:[#allocation3 + $0x8ac] sm:$0xf] %v1541_v14  ;;  %v9968_v60 = vor.u32 %v11208_v41, %v9967_v31  ;;  %v9148_v14 = vor.u32 %v11002_v11, %v9147_v6  ;;  %v1670_v6 = vld [vmem:[#allocation2 + $0x349] sm:$0xff] }
 0x4c4   :  { %v13008_v21 = vadd.f32 %v5647_v30, %v5479_v20  ;;  %1940 = vst [vmem:[#allocation3 + $0x1d0] sm:$0xf] %v1876_v63  ;;  %v11204_v20 = vld [vmem:[#allocation3 + $0x7fc] sm:$0xf]  ;;  %v9969_v30 = vld [vmem:[#allocation3 + $0x81c] sm:$0xf0] }
 0x4c5   :  { %1941 = vst [vmem:[#allocation3 + $0x1f4] sm:$0xf] %v1877_v9  ;;  %v9972_v53 = vor.u32 %v11204_v20, %v9969_v30  ;;  %v1285_v9 = vld [vmem:[#allocation2 + $0x332] sm:$0xff]  ;;  %v1815_v20 = vld [vmem:[#allocation2 + $0xe2] sm:$0xff] }
 0x4c6   :  { %v1349_v41 = vpack.c.bf16 %v1285_v9, %v1285_v9  ;;  %v11217_v9 = vld [vmem:[#allocation3 + $0x860] sm:$0xf0] }
 0x4c7   :  { %v5314_v42 = vpop.f32.mrf.mxu1  ;;  %v5187_v35 = vpop.f32.mrf.mxu0 }
 0x4c8   :  { %v5315_v44 = vadd.f32 %v5314_v42, %v12910_v15  ;;  %v13012_v10 = vadd.f32 %v5187_v35, %v12725_v34  ;;  %1413 = vst [vmem:[#allocation3 + $0x8cc] sm:$0xf] %v1349_v41  ;;  %v10005_v41 = vld [vmem:[#allocation3 + $0x864] sm:$0xf0] }
 0x4c9   :  { %v5480_v48 = vpop.f32.mrf.mxu2 }
 0x4ca   :  { %14757 = vst [vmem:[#allocation30_spill] sm:$0xff] %v13012_v10  ;;  %v5481_v4 = vadd.f32 %v5480_v48, %v5312_v49  ;;  %5353 = vmatmul.bf16.gmra.mxu1 %v9964_v51  ;;  %v1286_v49 = vld [vmem:[#allocation2 + $0x33a] sm:$0xff] }
 0x4cb   :  { %v5649_v52 = vpop.f32.mrf.mxu3  ;;  %v1814_v51 = vld [vmem:[#allocation2 + $0xda] sm:$0xff]  ;;  %v1350_v35 = vpack.c.bf16 %v1286_v49, %v1286_v49 }
 0x4cc   :  { %v13014_v19 = vadd.f32 %v5649_v52, %v5481_v4  ;;  %v11490_v48 = vld [vmem:[#allocation2] sm:$0xff] }
 0x4cd   :  { %v1542_v4 = vpack.c.bf16 %v11490_v48, %v11490_v48  ;;  %v9997_v52 = vld [vmem:[#allocation3 + $0x85c] sm:$0xf0]  ;;  %1414 = vst [vmem:[#allocation3 + $0x8f0] sm:$0xf] %v1350_v35 }
 0x4ce   :  { %5522 = vmatmul.bf16.gmra.mxu2 %v9968_v60  ;;  %v11212_v60 = vld [vmem:[#allocation3 + $0x83c] sm:$0xf] }
 0x4cf   :  { %v13016_v15 = vpop.f32.mrf.mxu1  ;;  %v5190_v34 = vpop.f32.mrf.mxu0  ;;  %1606 = vst [vmem:[#allocation3 + $0x8d0] sm:$0xf] %v1542_v4 }
 0x4d0   :  { %5691 = vmatmul.bf16.gmra.mxu3 %v9972_v53  ;;  %v13019_v63 = vadd.f32 %v5190_v34, %v12731_v24  ;;  %v1878_v24 = vpack.c.bf16 %v1814_v51, %v1814_v51  ;;  %v1671_v53 = vld [vmem:[#allocation2 + $0x351] sm:$0xff]  ;;  %v1879_v34 = vpack.c.bf16 %v1815_v20, %v1815_v20  ;;  %1607 = vst [vmem:[#allocation3 + $0x8f4] sm:$0xf] %v1542_v4  ;;  %v11213_v51 = vld [vmem:[#allocation3 + $0x844] sm:$0xf] }
 0x4d1   :  { %v5483_v42 = vpop.f32.mrf.mxu2  ;;  %v1735_v48 = vpack.c.bf16 %v1671_v53, %v1671_v53  ;;  %v10008_v4 = vor.u32 %v11213_v51, %v10005_v41  ;;  %v1816_v53 = vld [vmem:[#allocation2 + $0xf2] sm:$0xff] }
 0x4d2   :  { %14758 = vst [vmem:[#allocation31_spill] sm:$0xff] %v13019_v63  ;;  %v5484_v31 = vadd.f32 %v5483_v42, %v5315_v44  ;;  %5745 = vmatmul.bf16.gmra.mxu0 %v9148_v14  ;;  %v10000_v63 = vor.u32 %v11212_v60, %v9997_v52  ;;  %v1734_v44 = vpack.c.bf16 %v1670_v6, %v1670_v6  ;;  %v10003_v42 = vld [vmem:[#allocation3 + $0x840] sm:$0xf]  ;;  %v11011_v60 = vld [vmem:[#allocation3 + $0x1f0] sm:$0xf0] }
 0x4d3   :  { %v5652_v30 = vpop.f32.mrf.mxu3  ;;  %1942 = vst [vmem:[#allocation3 + $0x218] sm:$0xf] %v1878_v24  ;;  %v10004_v35 = vor.u32 %v11217_v9, %v10003_v42  ;;  %v11221_v9 = vld [vmem:[#allocation3 + $0x884] sm:$0xf] }
 0x4d4   :  { %v13021_v11 = vadd.f32 %v5652_v30, %v5484_v31  ;;  %1943 = vst [vmem:[#allocation3 + $0x23c] sm:$0xf] %v1879_v34  ;;  %v9183_v30 = vld [vmem:[#allocation3 + $0x1d0] sm:$0xf] }
 0x4d5   :  { %1798 = vst [vmem:[#allocation3 + $0x8d4] sm:$0xf] %v1734_v44  ;;  %v1880_v44 = vpack.c.bf16 %v1816_v53, %v1816_v53 }
 0x4d6   :  { %1799 = vst [vmem:[#allocation3 + $0x8f8] sm:$0xf] %v1735_v48 }
 0x4d7   :  { %v5319_v14 = vpop.f32.mrf.mxu1  ;;  %v5192_v49 = vpop.f32.mrf.mxu0  ;;  %1944 = vst [vmem:[#allocation3 + $0x260] sm:$0xf] %v1880_v44 }
 0x4d8   :  { %v5320_v10 = vadd.f32 %v5319_v14, %v12922_v38  ;;  %v13025_v5 = vadd.f32 %v5192_v49, %v12737_v29  ;;  %v9184_v38 = vor.u32 %v11011_v60, %v9183_v30  ;;  %v10033_v49 = vld [vmem:[#allocation3 + $0x8a4] sm:$0xf0]  ;;  %v11226_v30 = vld [vmem:[#allocation3 + $0x8a8] sm:$0xf0] }
 0x4d9   :  { %v13027_v31 = vpop.f32.mrf.mxu2  ;;  %v10036_v51 = vor.u32 %v11221_v9, %v10033_v49  ;;  %v1818_v49 = vld [vmem:[#allocation2 + $0x10a] sm:$0xff] }
 0x4da   :  { %14759 = vst [vmem:[#allocation32_spill] sm:$0xff] %v13025_v5  ;;  %5358 = vmatmul.bf16.gmra.mxu1 %v10000_v63  ;;  %v1817_v63 = vld [vmem:[#allocation2 + $0xfa] sm:$0xff] }
 0x4db   :  { %v13029_v20 = vpop.f32.mrf.mxu3  ;;  %v1881_v14 = vpack.c.bf16 %v1817_v63, %v1817_v63  ;;  %v9219_v63 = vld [vmem:[#allocation3 + $0x218] sm:$0xf] }
 0x4dd   :  { %1945 = vst [vmem:[#allocation3 + $0x284] sm:$0xf] %v1881_v14 }
 0x4de   :  { %5527 = vmatmul.bf16.gmra.mxu2 %v10004_v35  ;;  %v10039_v35 = vld [vmem:[#allocation3 + $0x888] sm:$0xf] }
 0x4df   :  { %v13031_v52 = vpop.f32.mrf.mxu1  ;;  %v5195_v29 = vpop.f32.mrf.mxu0 }
 0x4e0   :  { %5696 = vmatmul.bf16.gmra.mxu3 %v10008_v4  ;;  %v13034_v6 = vadd.f32 %v5195_v29, %v12746_v28  ;;  %v10041_v29 = vld [vmem:[#allocation3 + $0x8ac] sm:$0xf0] }
 0x4e1   :  { %v5488_v24 = vpop.f32.mrf.mxu2 }
 0x4e2   :  { %14760 = vst [vmem:[#allocation33_spill] sm:$0xff] %v13034_v6  ;;  %v5489_v34 = vadd.f32 %v5488_v24, %v5320_v10  ;;  %5750 = vmatmul.bf16.gmra.mxu0 %v9184_v38  ;;  %v11222_v38 = vld [vmem:[#allocation3 + $0x88c] sm:$0xf]  ;;  %v10040_v24 = vor.u32 %v11226_v30, %v10039_v35  ;;  %v10069_v6 = vld [vmem:[#allocation3 + $0x8ec] sm:$0xf0] }
 0x4e3   :  { %v5657_v42 = vpop.f32.mrf.mxu3  ;;  %v10044_v44 = vor.u32 %v11222_v38, %v10041_v29 }
 0x4e4   :  { %v13036_v48 = vadd.f32 %v5657_v42, %v5489_v34  ;;  %v11020_v34 = vld [vmem:[#allocation3 + $0x238] sm:$0xf0] }
 0x4e5   :  { %v9220_v14 = vor.u32 %v11020_v34, %v9219_v63  ;;  %v10075_v63 = vld [vmem:[#allocation3 + $0x8d0] sm:$0xf]  ;;  %v11235_v34 = vld [vmem:[#allocation3 + $0x8f0] sm:$0xf0] }
 0x4e7   :  { %v5324_v41 = vpop.f32.mrf.mxu1  ;;  %v5197_v28 = vpop.f32.mrf.mxu0 }
 0x4e8   :  { %v5325_v60 = vadd.f32 %v5324_v41, %v12934_v12  ;;  %v13040_v4 = vadd.f32 %v5197_v28, %v12752_v57  ;;  %v1819_v41 = vld [vmem:[#allocation2 + $0x112] sm:$0xff] }
 0x4e9   :  { %v13042_v10 = vpop.f32.mrf.mxu2  ;;  %v1883_v35 = vpack.c.bf16 %v1819_v41, %v1819_v41 }
 0x4ea   :  { %14761 = vst [vmem:[#allocation34_spill] sm:$0xff] %v13040_v4  ;;  %5363 = vmatmul.bf16.gmra.mxu1 %v10036_v51  ;;  %v1882_v51 = vpack.c.bf16 %v1818_v49, %v1818_v49  ;;  %v11230_v4 = vld [vmem:[#allocation3 + $0x8cc] sm:$0xf]  ;;  %v10076_v49 = vor.u32 %v11235_v34, %v10075_v63 }
 0x4eb   :  { %v13044_v53 = vpop.f32.mrf.mxu3  ;;  %1947 = vst [vmem:[#allocation3 + $0x2cc] sm:$0xf] %v1883_v35  ;;  %v10072_v29 = vor.u32 %v11230_v4, %v10069_v6 }
 0x4ec   :  { %1946 = vst [vmem:[#allocation3 + $0x2a8] sm:$0xf] %v1882_v51  ;;  %v11029_v51 = vld [vmem:[#allocation3 + $0x280] sm:$0xf0] }
 0x4ee   :  { %5532 = vmatmul.bf16.gmra.mxu2 %v10040_v24 }
 0x4ef   :  { %v13046_v42 = vpop.f32.mrf.mxu1  ;;  %v5200_v9 = vpop.f32.mrf.mxu0 }
 0x4f0   :  { %5701 = vmatmul.bf16.gmra.mxu3 %v10044_v44  ;;  %v13049_v57 = vadd.f32 %v5200_v9, %v12758_v50 }
 0x4f1   :  { %v5493_v12 = vpop.f32.mrf.mxu2 }
 0x4f2   :  { %14762 = vst [vmem:[#allocation35_spill] sm:$0xff] %v13049_v57  ;;  %v5494_v28 = vadd.f32 %v5493_v12, %v5325_v60  ;;  %5755 = vmatmul.bf16.gmra.mxu0 %v9220_v14  ;;  %v11231_v14 = vld [vmem:[#allocation3 + $0x8d4] sm:$0xf]  ;;  %v10077_v12 = vld [vmem:[#allocation3 + $0x8f4] sm:$0xf0] }
 0x4f3   :  { %v5662_v30 = vpop.f32.mrf.mxu3  ;;  %v10080_v6 = vor.u32 %v11231_v14, %v10077_v12 }
 0x4f4   :  { %v13051_v38 = vadd.f32 %v5662_v30, %v5494_v28  ;;  %v9255_v28 = vld [vmem:[#allocation3 + $0x260] sm:$0xf] }
 0x4f5   :  { %v9256_v4 = vor.u32 %v11029_v51, %v9255_v28  ;;  %v14765_v28 = vld [vmem:[#allocation6_spill] sm:$0xff] }
 0x4f7   :  { %v5329_v24 = vpop.f32.mrf.mxu1  ;;  %v5202_v50 = vpop.f32.mrf.mxu0 }
 0x4f8   :  { %v5330_v44 = vadd.f32 %v5329_v24, %v12946_v17  ;;  %v13055_v9 = vadd.f32 %v5202_v50, %v12765_v25  ;;  %v1820_v24 = vld [vmem:[#allocation2 + $0x122] sm:$0xff]  ;;  %v1821_v50 = vld [vmem:[#allocation2 + $0x12a] sm:$0xff] }
 0x4f9   :  { %v13057_v60 = vpop.f32.mrf.mxu2  ;;  %v1885_v63 = vpack.c.bf16 %v1821_v50, %v1821_v50 }
 0x4fa   :  { %14763 = vst [vmem:[#allocation36_spill] sm:$0xff] %v13055_v9  ;;  %5368 = vmatmul.bf16.gmra.mxu1 %v10072_v29  ;;  %v1884_v29 = vpack.c.bf16 %v1820_v24, %v1820_v24  ;;  %v14767_v24 = vld [vmem:[#allocation7_spill] sm:$0xff] }
 0x4fb   :  { %v13059_v41 = vpop.f32.mrf.mxu3  ;;  %1949 = vst [vmem:[#allocation3 + $0x314] sm:$0xf] %v1885_v63  ;;  %v1822_v63 = vld [vmem:[#allocation2 + $0x13a] sm:$0xff] }
 0x4fc   :  { %1948 = vst [vmem:[#allocation3 + $0x2f0] sm:$0xf] %v1884_v29 }
 0x4fe   :  { %5537 = vmatmul.bf16.gmra.mxu2 %v10076_v49 }
 0x4ff   :  { %v13061_v35 = vpop.f32.mrf.mxu1  ;;  %v5721_v30 = vpop.f32.mrf.mxu0 }
 0x500   :  { %5706 = vmatmul.bf16.gmra.mxu3 %v10080_v6  ;;  %v13064_v25 = vadd.f32 %v5721_v30, %v12771_v43 }
 0x501   :  { %v5498_v17 = vpop.f32.mrf.mxu2 }
 0x502   :  { %14764 = vst [vmem:[#allocation37_spill] sm:$0xff] %v13064_v25  ;;  %v5499_v9 = vadd.f32 %v5498_v17, %v5330_v44  ;;  %5760 = vmatmul.bf16.gmra.mxu0 %v9256_v4  ;;  %v9291_v44 = vld [vmem:[#allocation3 + $0x2a8] sm:$0xf]  ;;  %v11038_v4 = vld [vmem:[#allocation3 + $0x2c8] sm:$0xf0] }
 0x503   :  { %v5667_v34 = vpop.f32.mrf.mxu3  ;;  %v9292_v30 = vor.u32 %v11038_v4, %v9291_v44 }
 0x504   :  { %v13066_v57 = vadd.f32 %v5667_v34, %v5499_v9  ;;  %v1823_v34 = vld [vmem:[#allocation2 + $0x142] sm:$0xff] }
 0x507   :  { %v5334_v14 = vpop.f32.mrf.mxu1  ;;  %v5723_v12 = vpop.f32.mrf.mxu0 }
 0x508   :  { %v5335_v49 = vadd.f32 %v5334_v14, %v12958_v36  ;;  %v13070_v51 = vadd.f32 %v5723_v12, %v14765_v28  ;;  %v1886_v14 = vpack.c.bf16 %v1822_v63, %v1822_v63  ;;  %v1887_v28 = vpack.c.bf16 %v1823_v34, %v1823_v34 }
 0x509   :  { %v13072_v43 = vpop.f32.mrf.mxu2 }
 0x50a   :  { %14766 = vst [vmem:[#allocation6_spill] sm:$0xff] %v13070_v51 }
 0x50b   :  { %v13074_v6 = vpop.f32.mrf.mxu3  ;;  %1950 = vst [vmem:[#allocation3 + $0x338] sm:$0xf] %v1886_v14 }
 0x50c   :  { %1951 = vst [vmem:[#allocation3 + $0x35c] sm:$0xf] %v1887_v28  ;;  %v1824_v28 = vld [vmem:[#allocation2 + $0x152] sm:$0xff] }
 0x50f   :  { %v13076_v17 = vpop.f32.mrf.mxu1  ;;  %v5726_v9 = vpop.f32.mrf.mxu0 }
 0x510   :  { %v13079_v50 = vadd.f32 %v5726_v9, %v14767_v24 }
 0x511   :  { %v5503_v29 = vpop.f32.mrf.mxu2 }
 0x512   :  { %v5504_v36 = vadd.f32 %v5503_v29, %v5335_v49  ;;  %5765 = vmatmul.bf16.gmra.mxu0 %v9292_v30  ;;  %v9327_v49 = vld [vmem:[#allocation3 + $0x2f0] sm:$0xf]  ;;  %v11047_v30 = vld [vmem:[#allocation3 + $0x310] sm:$0xf0] }
 0x513   :  { %v5672_v12 = vpop.f32.mrf.mxu3  ;;  %v9328_v29 = vor.u32 %v11047_v30, %v9327_v49 }
 0x514   :  { %v13081_v5 = vadd.f32 %v5672_v12, %v5504_v36  ;;  %v14771_v36 = vld [vmem:[#allocation8_spill] sm:$0xff] }
 0x517   :  { %v5339_v54 = vpop.f32.mrf.mxu1  ;;  %v5728_v44 = vpop.f32.mrf.mxu0 }
 0x518   :  { %v5340_v4 = vadd.f32 %v5339_v54, %v12970_v62  ;;  %v13085_v39 = vadd.f32 %v5728_v44, %v12789_v32  ;;  %v1888_v32 = vpack.c.bf16 %v1824_v28, %v1824_v28  ;;  %v1889_v44 = vpack.c.bf16 %v1825_v59, %v1825_v59  ;;  %v11396_v59 = vld [vmem:[%s14622_s4 + $0x78] sm:$0xff] }
 0x519   :  { %v13087_v9 = vpop.f32.mrf.mxu2  ;;  %8256 = vmatpush.bf16.msrb.mxu2 %v11396_v59 }
 0x51a   :  { %14768 = vst [vmem:[#allocation7_spill] sm:$0xff] %v13087_v9 }
 0x51b   :  { %v13089_v24 = vpop.f32.mrf.mxu3  ;;  %1952 = vst [vmem:[#allocation3 + $0x380] sm:$0xf] %v1888_v32 }
 0x51c   :  { %14769 = vst [vmem:[#allocation38_spill] sm:$0xff] %v13089_v24 }
 0x51d   :  { %1953 = vst [vmem:[#allocation3 + $0x3a4] sm:$0xf] %v1889_v44  ;;  %v11404_v44 = vld [vmem:[%s14622_s4 + $0xb8] sm:$0xff] }
 0x51e   :  { %8305 = vmatpush.bf16.msrb.mxu3 %v11404_v44 }
 0x51f   :  { %v13091_v63 = vpop.f32.mrf.mxu1  ;;  %v5731_v34 = vpop.f32.mrf.mxu0 }
 0x520   :  { %14770 = vst [vmem:[#allocation39_spill] sm:$0xff] %v13091_v63  ;;  %v13094_v14 = vadd.f32 %v5731_v34, %v14771_v36 }
 0x521   :  { %v5508_v12 = vpop.f32.mrf.mxu2 }
 0x522   :  { %v5509_v62 = vadd.f32 %v5508_v12, %v5340_v4  ;;  %5770 = vmatmul.bf16.gmra.mxu0 %v9328_v29  ;;  %v9363_v4 = vld [vmem:[#allocation3 + $0x338] sm:$0xf]  ;;  %v11056_v29 = vld [vmem:[#allocation3 + $0x358] sm:$0xf0]  ;;  %v9399_v59 = vld [vmem:[#allocation3 + $0x380] sm:$0xf] }
 0x523   :  { %v5677_v54 = vpop.f32.mrf.mxu3  ;;  %v9364_v12 = vor.u32 %v11056_v29, %v9363_v4  ;;  %v11388_v4 = vld [vmem:[%s14622_s4 + $0x38] sm:$0xff] }
 0x524   :  { %v13096_v9 = vadd.f32 %v5677_v54, %v5509_v62  ;;  %v14775_v62 = vld [vmem:[#allocation9_spill] sm:$0xff]  ;;  %8207 = vmatpush.bf16.msrb.mxu1 %v11388_v4 }
 0x526   :  { %14772 = vst [vmem:[#allocation8_spill] sm:$0xff] %v13096_v9 }
 0x527   :  { %v5344_v24 = vpop.f32.mrf.mxu1  ;;  %v5733_v49 = vpop.f32.mrf.mxu0 }
 0x528   :  { %v5345_v30 = vadd.f32 %v5344_v24, %v12982_v18  ;;  %v13100_v63 = vadd.f32 %v5733_v49, %v12804_v37  ;;  %v1826_v24 = vld [vmem:[#allocation2 + $0x16a] sm:$0xff]  ;;  %v1827_v37 = vld [vmem:[#allocation2 + $0x172] sm:$0xff] }
 0x529   :  { %v13102_v34 = vpop.f32.mrf.mxu2  ;;  %v1890_v49 = vpack.c.bf16 %v1826_v24, %v1826_v24 }
 0x52a   :  { %14773 = vst [vmem:[#allocation40_spill] sm:$0xff] %v13102_v34  ;;  %v1891_v34 = vpack.c.bf16 %v1827_v37, %v1827_v37  ;;  %v1829_v37 = vld [vmem:[#allocation2 + $0x18a] sm:$0xff] }
 0x52b   :  { %v13104_v36 = vpop.f32.mrf.mxu3  ;;  %1954 = vst [vmem:[#allocation3 + $0x3c8] sm:$0xf] %v1890_v49  ;;  %v1893_v44 = vpack.c.bf16 %v1829_v37, %v1829_v37  ;;  %v14782_v37 = vld [vmem:[#allocation12_spill] sm:$0xff] }
 0x52c   :  { %14774 = vst [vmem:[#allocation41_spill] sm:$0xff] %v13104_v36 }
 0x52d   :  { %1955 = vst [vmem:[#allocation3 + $0x3ec] sm:$0xf] %v1891_v34 }
 0x52e   :  { %1957 = vst [vmem:[#allocation3 + $0x434] sm:$0xf] %v1893_v44 }
 0x52f   :  { %v5736_v28 = vpop.f32.mrf.mxu0 }
 0x530   :  { %v13110_v32 = vadd.f32 %v5736_v28, %v14775_v62 }
 0x531   :  { %v5513_v18 = vpop.f32.mrf.mxu2 }
 0x532   :  { %v5514_v54 = vadd.f32 %v5513_v18, %v5345_v30  ;;  %5775 = vmatmul.bf16.gmra.mxu0 %v9364_v12  ;;  %v11065_v12 = vld [vmem:[#allocation3 + $0x3a0] sm:$0xf0] }
 0x533   :  { %v5682_v36 = vpop.f32.mrf.mxu3  ;;  %v9400_v28 = vor.u32 %v11065_v12, %v9399_v59  ;;  %v14777_v18 = vld [vmem:[#allocation10_spill] sm:$0xff]  ;;  %v14780_v59 = vld [vmem:[#allocation11_spill] sm:$0xff] }
 0x534   :  { %v13115_v9 = vadd.f32 %v5682_v36, %v5514_v54  ;;  %v1828_v36 = vld [vmem:[#allocation2 + $0x182] sm:$0xff]  ;;  %v11074_v4 = vld [vmem:[#allocation3 + $0x3e8] sm:$0xf0] }
 0x535   :  { %v1892_v54 = vpack.c.bf16 %v1828_v36, %v1828_v36  ;;  %v11083_v44 = vld [vmem:[#allocation3 + $0x430] sm:$0xf0] }
 0x536   :  { %14776 = vst [vmem:[#allocation9_spill] sm:$0xff] %v13115_v9 }
 0x537   :  { %v5738_v29 = vpop.f32.mrf.mxu0  ;;  %1956 = vst [vmem:[#allocation3 + $0x410] sm:$0xf] %v1892_v54 }
 0x538   :  { %v13121_v30 = vadd.f32 %v5738_v29, %v12816_v47  ;;  %v9435_v47 = vld [vmem:[#allocation3 + $0x3c8] sm:$0xf] }
 0x539   :  { %v9436_v29 = vor.u32 %v11074_v4, %v9435_v47  ;;  %v14784_v47 = vld [vmem:[#allocation13_spill] sm:$0xff] }
 0x53f   :  { %v5741_v62 = vpop.f32.mrf.mxu0 }
 0x540   :  { %v13124_v24 = vadd.f32 %v5741_v62, %v14777_v18  ;;  %v1830_v62 = vld [vmem:[#allocation2 + $0x19a] sm:$0xff]  ;;  %v1831_v18 = vld [vmem:[#allocation2 + $0x1a2] sm:$0xff] }
 0x542   :  { %14778 = vst [vmem:[#allocation10_spill] sm:$0xff] %v13124_v24  ;;  %5780 = vmatmul.bf16.gmra.mxu0 %v9400_v28  ;;  %v1894_v24 = vpack.c.bf16 %v1830_v62, %v1830_v62  ;;  %v1895_v28 = vpack.c.bf16 %v1831_v18, %v1831_v18  ;;  %v14786_v62 = vld [vmem:[#allocation14_spill] sm:$0xff] }
 0x544   :  { %1958 = vst [vmem:[#allocation3 + $0x458] sm:$0xf] %v1894_v24 }
 0x545   :  { %1959 = vst [vmem:[#allocation3 + $0x47c] sm:$0xf] %v1895_v28 }
 0x547   :  { %v5743_v34 = vpop.f32.mrf.mxu0 }
 0x548   :  { %v13127_v49 = vadd.f32 %v5743_v34, %v12828_v45  ;;  %v9471_v45 = vld [vmem:[#allocation3 + $0x410] sm:$0xf] }
 0x549   :  { %v9472_v34 = vor.u32 %v11083_v44, %v9471_v45  ;;  %v11387_v45 = vld [vmem:[%s14622_s4 + $0x30] sm:$0xff] }
 0x54a   :  { %14779 = vst [vmem:[#allocation42_spill] sm:$0xff] %v13127_v49  ;;  %8208 = vmatpush.bf16.msrb.mxu1 %v11387_v45 }
 0x54b   :  { %v9507_v28 = vld [vmem:[#allocation3 + $0x458] sm:$0xf] }
 0x54f   :  { %v5746_v9 = vpop.f32.mrf.mxu0 }
 0x550   :  { %v13130_v12 = vadd.f32 %v5746_v9, %v14780_v59  ;;  %v1832_v9 = vld [vmem:[#allocation2 + $0x1e2] sm:$0xff]  ;;  %v1833_v59 = vld [vmem:[#allocation2 + $0x1ea] sm:$0xff] }
 0x552   :  { %14781 = vst [vmem:[#allocation11_spill] sm:$0xff] %v13130_v12  ;;  %5785 = vmatmul.bf16.gmra.mxu0 %v9436_v29  ;;  %v1896_v12 = vpack.c.bf16 %v1832_v9, %v1832_v9  ;;  %v1897_v29 = vpack.c.bf16 %v1833_v59, %v1833_v59  ;;  %v1834_v9 = vld [vmem:[#allocation2 + $0x1fa] sm:$0xff]  ;;  %v1835_v59 = vld [vmem:[#allocation2 + $0x202] sm:$0xff] }
 0x554   :  { %1960 = vst [vmem:[#allocation3 + $0x4a0] sm:$0xf] %v1896_v12 }
 0x555   :  { %1961 = vst [vmem:[#allocation3 + $0x4c4] sm:$0xf] %v1897_v29  ;;  %v1898_v29 = vpack.c.bf16 %v1834_v9, %v1834_v9 }
 0x557   :  { %v5748_v36 = vpop.f32.mrf.mxu0  ;;  %1962 = vst [vmem:[#allocation3 + $0x4e8] sm:$0xf] %v1898_v29 }
 0x558   :  { %v13133_v54 = vadd.f32 %v5748_v36, %v14782_v37  ;;  %v11092_v36 = vld [vmem:[#allocation3 + $0x478] sm:$0xf0]  ;;  %v11395_v37 = vld [vmem:[%s14622_s4 + $0x70] sm:$0xff] }
 0x559   :  { %v9508_v12 = vor.u32 %v11092_v36, %v9507_v28  ;;  %8257 = vmatpush.bf16.msrb.mxu2 %v11395_v37 }
 0x55a   :  { %14783 = vst [vmem:[#allocation12_spill] sm:$0xff] %v13133_v54 }
 0x55b   :  { %v9543_v54 = vld [vmem:[#allocation3 + $0x4a0] sm:$0xf] }
 0x55c   :  { %v11101_v28 = vld [vmem:[#allocation3 + $0x4c0] sm:$0xf0] }
 0x55d   :  { %v9544_v36 = vor.u32 %v11101_v28, %v9543_v54  ;;  %v14796_v54 = vld [vmem:[#allocation19_spill] sm:$0xff] }
 0x55f   :  { %v5751_v49 = vpop.f32.mrf.mxu0 }
 0x560   :  { %v13136_v4 = vadd.f32 %v5751_v49, %v14784_v47  ;;  %v11403_v49 = vld [vmem:[%s14622_s4 + $0xb0] sm:$0xff] }
 0x561   :  { %8306 = vmatpush.bf16.msrb.mxu3 %v11403_v49  ;;  %v14792_v49 = vld [vmem:[#allocation17_spill] sm:$0xff] }
 0x562   :  { %14785 = vst [vmem:[#allocation13_spill] sm:$0xff] %v13136_v4  ;;  %5790 = vmatmul.bf16.gmra.mxu0 %v9472_v34  ;;  %v14788_v34 = vld [vmem:[#allocation15_spill] sm:$0xff] }
 0x567   :  { %v5753_v24 = vpop.f32.mrf.mxu0 }
 0x568   :  { %v13139_v18 = vadd.f32 %v5753_v24, %v14786_v62  ;;  %v1899_v24 = vpack.c.bf16 %v1835_v59, %v1835_v59  ;;  %v14794_v59 = vld [vmem:[#allocation18_spill] sm:$0xff] }
 0x56a   :  { %14787 = vst [vmem:[#allocation14_spill] sm:$0xff] %v13139_v18  ;;  %v14790_v18 = vld [vmem:[#allocation16_spill] sm:$0xff] }
 0x56b   :  { %1963 = vst [vmem:[#allocation3 + $0x50c] sm:$0xf] %v1899_v24 }
 0x56f   :  { %v5756_v44 = vpop.f32.mrf.mxu0 }
 0x570   :  { %v13151_v47 = vadd.f32 %v5756_v44, %v14788_v34  ;;  %v1836_v44 = vld [vmem:[#allocation2 + $0x212] sm:$0xff]  ;;  %v1837_v34 = vld [vmem:[#allocation2 + $0x21a] sm:$0xff] }
 0x572   :  { %14789 = vst [vmem:[#allocation15_spill] sm:$0xff] %v13151_v47  ;;  %5795 = vmatmul.bf16.gmra.mxu0 %v9508_v12  ;;  %v1900_v47 = vpack.c.bf16 %v1836_v44, %v1836_v44  ;;  %v1901_v12 = vpack.c.bf16 %v1837_v34, %v1837_v34  ;;  %v11110_v24 = vld [vmem:[#allocation3 + $0x508] sm:$0xf0] }
 0x574   :  { %1964 = vst [vmem:[#allocation3 + $0x530] sm:$0xf] %v1900_v47 }
 0x575   :  { %1965 = vst [vmem:[#allocation3 + $0x554] sm:$0xf] %v1901_v12 }
 0x577   :  { %v5758_v62 = vpop.f32.mrf.mxu0 }
 0x578   :  { %v13154_v4 = vadd.f32 %v5758_v62, %v14790_v18  ;;  %v9579_v18 = vld [vmem:[#allocation3 + $0x4e8] sm:$0xf] }
 0x579   :  { %v9580_v62 = vor.u32 %v11110_v24, %v9579_v18  ;;  %v14799_v18 = vld [vmem:[#allocation20_spill] sm:$0xff] }
 0x57a   :  { %14791 = vst [vmem:[#allocation16_spill] sm:$0xff] %v13154_v4 }
 0x57b   :  { %v9615_v34 = vld [vmem:[#allocation3 + $0x530] sm:$0xf] }
 0x57c   :  { %v11119_v12 = vld [vmem:[#allocation3 + $0x550] sm:$0xf0] }
 0x57f   :  { %v5761_v37 = vpop.f32.mrf.mxu0 }
 0x580   :  { %v13157_v45 = vadd.f32 %v5761_v37, %v14792_v49  ;;  %v1838_v37 = vld [vmem:[#allocation2 + $0x22a] sm:$0xff]  ;;  %v1839_v49 = vld [vmem:[#allocation2 + $0x232] sm:$0xff] }
 0x582   :  { %14793 = vst [vmem:[#allocation17_spill] sm:$0xff] %v13157_v45  ;;  %5800 = vmatmul.bf16.gmra.mxu0 %v9544_v36  ;;  %v1902_v45 = vpack.c.bf16 %v1838_v37, %v1838_v37  ;;  %v1903_v36 = vpack.c.bf16 %v1839_v49, %v1839_v49  ;;  %v14801_v49 = vld [vmem:[#allocation21_spill] sm:$0xff] }
 0x584   :  { %1966 = vst [vmem:[#allocation3 + $0x578] sm:$0xf] %v1902_v45  ;;  %v11394_v45 = vld [vmem:[%s14622_s4 + $0x68] sm:$0xff] }
 0x585   :  { %1967 = vst [vmem:[#allocation3 + $0x59c] sm:$0xf] %v1903_v36  ;;  %8258 = vmatpush.bf16.msrb.mxu2 %v11394_v45 }
 0x587   :  { %v5763_v9 = vpop.f32.mrf.mxu0 }
 0x588   :  { %v13160_v29 = vadd.f32 %v5763_v9, %v14794_v59  ;;  %v9616_v9 = vor.u32 %v11119_v12, %v9615_v34 }
 0x58a   :  { %14795 = vst [vmem:[#allocation18_spill] sm:$0xff] %v13160_v29 }
 0x58c   :  { %v11128_v34 = vld [vmem:[#allocation3 + $0x598] sm:$0xf0] }
 0x58f   :  { %v5766_v4 = vpop.f32.mrf.mxu0 }
 0x590   :  { %v13163_v28 = vadd.f32 %v5766_v4, %v14796_v54  ;;  %v1840_v4 = vld [vmem:[#allocation2 + $0x242] sm:$0xff]  ;;  %v1841_v54 = vld [vmem:[#allocation2 + $0x24a] sm:$0xff] }
 0x592   :  { %14797 = vst [vmem:[#allocation19_spill] sm:$0xff] %v13163_v28  ;;  %5805 = vmatmul.bf16.gmra.mxu0 %v9580_v62  ;;  %v1904_v28 = vpack.c.bf16 %v1840_v4, %v1840_v4  ;;  %v1905_v62 = vpack.c.bf16 %v1841_v54, %v1841_v54  ;;  %v1842_v4 = vld [vmem:[#allocation2 + $0x25a] sm:$0xff]  ;;  %v1843_v54 = vld [vmem:[#allocation2 + $0x262] sm:$0xff] }
 0x593   :  { %v1907_v45 = vpack.c.bf16 %v1843_v54, %v1843_v54 }
 0x594   :  { %1968 = vst [vmem:[#allocation3 + $0x5c0] sm:$0xf] %v1904_v28  ;;  %v11386_v28 = vld [vmem:[%s14622_s4 + $0x28] sm:$0xff] }
 0x595   :  { %1969 = vst [vmem:[#allocation3 + $0x5e4] sm:$0xf] %v1905_v62  ;;  %8209 = vmatpush.bf16.msrb.mxu1 %v11386_v28  ;;  %v1906_v62 = vpack.c.bf16 %v1842_v4, %v1842_v4 }
 0x596   :  { %1971 = vst [vmem:[#allocation3 + $0x62c] sm:$0xf] %v1907_v45 }
 0x597   :  { %v5768_v47 = vpop.f32.mrf.mxu0  ;;  %1970 = vst [vmem:[#allocation3 + $0x608] sm:$0xf] %v1906_v62 }
 0x598   :  { %v13166_v44 = vadd.f32 %v5768_v47, %v12891_v1  ;;  %v11402_v1 = vld [vmem:[%s14622_s4 + $0xa8] sm:$0xff]  ;;  %v9651_v47 = vld [vmem:[#allocation3 + $0x578] sm:$0xf] }
 0x599   :  { %8307 = vmatpush.bf16.msrb.mxu3 %v11402_v1  ;;  %v9652_v12 = vor.u32 %v11128_v34, %v9651_v47  ;;  %v14806_v34 = vld [vmem:[#allocation24_spill] sm:$0xff] }
 0x59a   :  { %14798 = vst [vmem:[#allocation43_spill] sm:$0xff] %v13166_v44 }
 0x59d   :  { %v11146_v62 = vld [vmem:[#allocation3 + $0x628] sm:$0xf0] }
 0x59f   :  { %v5771_v59 = vpop.f32.mrf.mxu0 }
 0x5a0   :  { %v13169_v24 = vadd.f32 %v5771_v59, %v14799_v18  ;;  %v14803_v59 = vld [vmem:[#allocation22_spill] sm:$0xff] }
 0x5a2   :  { %14800 = vst [vmem:[#allocation20_spill] sm:$0xff] %v13169_v24  ;;  %5810 = vmatmul.bf16.gmra.mxu0 %v9616_v9 }
 0x5a7   :  { %v5773_v37 = vpop.f32.mrf.mxu0 }
 0x5a8   :  { %v13178_v36 = vadd.f32 %v5773_v37, %v14801_v49  ;;  %v9687_v49 = vld [vmem:[#allocation3 + $0x5c0] sm:$0xf] }
 0x5aa   :  { %14802 = vst [vmem:[#allocation21_spill] sm:$0xff] %v13178_v36  ;;  %v11137_v36 = vld [vmem:[#allocation3 + $0x5e0] sm:$0xf0] }
 0x5ab   :  { %v9688_v24 = vor.u32 %v11137_v36, %v9687_v49  ;;  %v1846_v49 = vld [vmem:[#allocation2 + $0x28a] sm:$0xff] }
 0x5af   :  { %v5776_v9 = vpop.f32.mrf.mxu0 }
 0x5b0   :  { %v13184_v18 = vadd.f32 %v5776_v9, %v14803_v59  ;;  %v1844_v9 = vld [vmem:[#allocation2 + $0x272] sm:$0xff]  ;;  %v1845_v59 = vld [vmem:[#allocation2 + $0x27a] sm:$0xff] }
 0x5b2   :  { %14804 = vst [vmem:[#allocation22_spill] sm:$0xff] %v13184_v18  ;;  %5815 = vmatmul.bf16.gmra.mxu0 %v9652_v12  ;;  %v1908_v18 = vpack.c.bf16 %v1844_v9, %v1844_v9  ;;  %v1909_v12 = vpack.c.bf16 %v1845_v59, %v1845_v59 }
 0x5b4   :  { %1972 = vst [vmem:[#allocation3 + $0x650] sm:$0xf] %v1908_v18 }
 0x5b5   :  { %1973 = vst [vmem:[#allocation3 + $0x674] sm:$0xf] %v1909_v12 }
 0x5b7   :  { %v5778_v1 = vpop.f32.mrf.mxu0 }
 0x5b8   :  { %v13187_v37 = vadd.f32 %v5778_v1, %v12918_v2  ;;  %v9723_v2 = vld [vmem:[#allocation3 + $0x608] sm:$0xf] }
 0x5b9   :  { %v9724_v45 = vor.u32 %v11146_v62, %v9723_v2  ;;  %v1849_v62 = vld [vmem:[#allocation2 + $0x2aa] sm:$0xff] }
 0x5ba   :  { %14805 = vst [vmem:[#allocation44_spill] sm:$0xff] %v13187_v37 }
 0x5bc   :  { %v11155_v59 = vld [vmem:[#allocation3 + $0x670] sm:$0xf0] }
 0x5bf   :  { %v5781_v47 = vpop.f32.mrf.mxu0 }
 0x5c0   :  { %v13190_v28 = vadd.f32 %v5781_v47, %v14806_v34  ;;  %v1847_v47 = vld [vmem:[#allocation2 + $0x292] sm:$0xff]  ;;  %v1910_v34 = vpack.c.bf16 %v1846_v49, %v1846_v49  ;;  %v11393_v49 = vld [vmem:[%s14622_s4 + $0x60] sm:$0xff] }
 0x5c1   :  { %8259 = vmatpush.bf16.msrb.mxu2 %v11393_v49 }
 0x5c2   :  { %14807 = vst [vmem:[#allocation24_spill] sm:$0xff] %v13190_v28  ;;  %5820 = vmatmul.bf16.gmra.mxu0 %v9688_v24  ;;  %v1911_v24 = vpack.c.bf16 %v1847_v47, %v1847_v47 }
 0x5c3   :  { %1974 = vst [vmem:[#allocation3 + $0x698] sm:$0xf] %v1910_v34 }
 0x5c4   :  { %1975 = vst [vmem:[#allocation3 + $0x6bc] sm:$0xf] %v1911_v24 }
 0x5c7   :  { %v5783_v4 = vpop.f32.mrf.mxu0 }
 0x5c8   :  { %v13193_v54 = vadd.f32 %v5783_v4, %v12930_v3  ;;  %v9759_v3 = vld [vmem:[#allocation3 + $0x650] sm:$0xf] }
 0x5c9   :  { %v9760_v12 = vor.u32 %v11155_v59, %v9759_v3 }
 0x5ca   :  { %14808 = vst [vmem:[#allocation45_spill] sm:$0xff] %v13193_v54  ;;  %v9795_v34 = vld [vmem:[#allocation3 + $0x698] sm:$0xf] }
 0x5cb   :  { %v11164_v24 = vld [vmem:[#allocation3 + $0x6b8] sm:$0xf0] }
 0x5cc   :  { %v9796_v3 = vor.u32 %v11164_v24, %v9795_v34 }
 0x5cf   :  { %v5786_v1 = vpop.f32.mrf.mxu0 }
 0x5d0   :  { %v13196_v36 = vadd.f32 %v5786_v1, %v12936_v0  ;;  %v1848_v0 = vld [vmem:[#allocation2 + $0x2a2] sm:$0xff] }
 0x5d1   :  { %v1912_v1 = vpack.c.bf16 %v1848_v0, %v1848_v0  ;;  %v1851_v0 = vld [vmem:[#allocation2 + $0x2c2] sm:$0xff] }
 0x5d2   :  { %14809 = vst [vmem:[#allocation46_spill] sm:$0xff] %v13196_v36  ;;  %5825 = vmatmul.bf16.gmra.mxu0 %v9724_v45  ;;  %v1913_v45 = vpack.c.bf16 %v1849_v62, %v1849_v62 }
 0x5d3   :  { %1976 = vst [vmem:[#allocation3 + $0x6e0] sm:$0xf] %v1912_v1  ;;  %v1915_v1 = vpack.c.bf16 %v1851_v0, %v1851_v0 }
 0x5d4   :  { %1977 = vst [vmem:[#allocation3 + $0x704] sm:$0xf] %v1913_v45 }
 0x5d5   :  { %1979 = vst [vmem:[#allocation3 + $0x74c] sm:$0xf] %v1915_v1 }
 0x5d7   :  { %v5788_v18 = vpop.f32.mrf.mxu0 }
 0x5d8   :  { %v13199_v9 = vadd.f32 %v5788_v18, %v12942_v27  ;;  %v11401_v27 = vld [vmem:[%s14622_s4 + $0xa0] sm:$0xff] }
 0x5d9   :  { %8308 = vmatpush.bf16.msrb.mxu3 %v11401_v27  ;;  %v11385_v18 = vld [vmem:[%s14622_s4 + $0x20] sm:$0xff] }
 0x5da   :  { %8210 = vmatpush.bf16.msrb.mxu1 %v11385_v18  ;;  %v9831_v49 = vld [vmem:[#allocation3 + $0x6e0] sm:$0xf] }
 0x5db   :  { %v11173_v27 = vld [vmem:[#allocation3 + $0x700] sm:$0xf0]  ;;  %v1853_v18 = vld [vmem:[#allocation2 + $0x2da] sm:$0xff] }
 0x5df   :  { %v5791_v4 = vpop.f32.mrf.mxu0 }
 0x5e0   :  { %v13202_v2 = vadd.f32 %v5791_v4, %v12948_v16  ;;  %v1850_v4 = vld [vmem:[#allocation2 + $0x2ba] sm:$0xff] }
 0x5e1   :  { %v1914_v62 = vpack.c.bf16 %v1850_v4, %v1850_v4 }
 0x5e2   :  { %14810 = vst [vmem:[#allocation47_spill] sm:$0xff] %v13202_v2  ;;  %5830 = vmatmul.bf16.gmra.mxu0 %v9760_v12 }
 0x5e3   :  { %1978 = vst [vmem:[#allocation3 + $0x728] sm:$0xf] %v1914_v62  ;;  %v11182_v62 = vld [vmem:[#allocation3 + $0x748] sm:$0xf0] }
 0x5e7   :  { %v5793_v47 = vpop.f32.mrf.mxu0 }
 0x5e8   :  { %v13211_v16 = vadd.f32 %v5793_v47, %v12954_v26  ;;  %v9832_v47 = vor.u32 %v11173_v27, %v9831_v49  ;;  %v1855_v27 = vld [vmem:[#allocation2 + $0x2f2] sm:$0xff] }
 0x5ea   :  { %14811 = vst [vmem:[#allocation48_spill] sm:$0xff] %v13211_v16 }
 0x5ef   :  { %v5796_v59 = vpop.f32.mrf.mxu0 }
 0x5f0   :  { %v13217_v12 = vadd.f32 %v5796_v59, %v12960_v13  ;;  %v1852_v13 = vld [vmem:[#allocation2 + $0x2d2] sm:$0xff] }
 0x5f1   :  { %v1916_v59 = vpack.c.bf16 %v1852_v13, %v1852_v13 }
 0x5f2   :  { %14812 = vst [vmem:[#allocation49_spill] sm:$0xff] %v13217_v12  ;;  %5835 = vmatmul.bf16.gmra.mxu0 %v9796_v3  ;;  %v1917_v3 = vpack.c.bf16 %v1853_v18, %v1853_v18 }
 0x5f3   :  { %1980 = vst [vmem:[#allocation3 + $0x770] sm:$0xf] %v1916_v59 }
 0x5f4   :  { %1981 = vst [vmem:[#allocation3 + $0x794] sm:$0xf] %v1917_v3 }
 0x5f7   :  { %v5798_v26 = vpop.f32.mrf.mxu0 }
 0x5f8   :  { %v13220_v45 = vadd.f32 %v5798_v26, %v12966_v33  ;;  %v9867_v33 = vld [vmem:[#allocation3 + $0x728] sm:$0xf] }
 0x5f9   :  { %v9868_v1 = vor.u32 %v11182_v62, %v9867_v33  ;;  %v1857_v62 = vld [vmem:[#allocation2 + $0x30a] sm:$0xff] }
 0x5fb   :  { %v11191_v59 = vld [vmem:[#allocation3 + $0x790] sm:$0xf0] }
 0x5ff   :  { %v5801_v34 = vpop.f32.mrf.mxu0 }
 0x600   :  { %v13223_v24 = vadd.f32 %v5801_v34, %v12972_v58  ;;  %v1854_v58 = vld [vmem:[#allocation2 + $0x2ea] sm:$0xff] }
 0x601   :  { %v1918_v34 = vpack.c.bf16 %v1854_v58, %v1854_v58  ;;  %v11392_v58 = vld [vmem:[%s14622_s4 + $0x58] sm:$0xff] }
 0x602   :  { %14813 = vst [vmem:[#allocation50_spill] sm:$0xff] %v13223_v24  ;;  %5840 = vmatmul.bf16.gmra.mxu0 %v9832_v47  ;;  %v1919_v47 = vpack.c.bf16 %v1855_v27, %v1855_v27  ;;  %8260 = vmatpush.bf16.msrb.mxu2 %v11392_v58 }
 0x603   :  { %1982 = vst [vmem:[#allocation3 + $0x7b8] sm:$0xf] %v1918_v34 }
 0x604   :  { %1983 = vst [vmem:[#allocation3 + $0x7dc] sm:$0xf] %v1919_v47 }
 0x607   :  { %v5803_v4 = vpop.f32.mrf.mxu0 }
 0x608   :  { %v13226_v0 = vadd.f32 %v5803_v4, %v12978_v46  ;;  %v9903_v46 = vld [vmem:[#allocation3 + $0x770] sm:$0xf] }
 0x609   :  { %v9904_v3 = vor.u32 %v11191_v59, %v9903_v46 }
 0x60a   :  { %14814 = vst [vmem:[#allocation51_spill] sm:$0xff] %v13226_v0  ;;  %v9939_v34 = vld [vmem:[#allocation3 + $0x7b8] sm:$0xf] }
 0x60b   :  { %v11200_v47 = vld [vmem:[#allocation3 + $0x7d8] sm:$0xf0] }
 0x60c   :  { %v9940_v46 = vor.u32 %v11200_v47, %v9939_v34  ;;  %v14821_v47 = vld [vmem:[#allocation23_spill] sm:$0xff] }
 0x60f   :  { %v5806_v26 = vpop.f32.mrf.mxu0 }
 0x610   :  { %v13229_v49 = vadd.f32 %v5806_v26, %v12984_v8  ;;  %v1856_v8 = vld [vmem:[#allocation2 + $0x302] sm:$0xff] }
 0x611   :  { %v1920_v26 = vpack.c.bf16 %v1856_v8, %v1856_v8  ;;  %v1859_v8 = vld [vmem:[#allocation2 + $0x322] sm:$0xff] }
 0x612   :  { %14815 = vst [vmem:[#allocation52_spill] sm:$0xff] %v13229_v49  ;;  %5845 = vmatmul.bf16.gmra.mxu0 %v9868_v1  ;;  %v1921_v1 = vpack.c.bf16 %v1857_v62, %v1857_v62 }
 0x613   :  { %1984 = vst [vmem:[#allocation3 + $0x800] sm:$0xf] %v1920_v26  ;;  %v1923_v26 = vpack.c.bf16 %v1859_v8, %v1859_v8 }
 0x614   :  { %1985 = vst [vmem:[#allocation3 + $0x824] sm:$0xf] %v1921_v1 }
 0x615   :  { %1987 = vst [vmem:[#allocation3 + $0x86c] sm:$0xf] %v1923_v26 }
 0x617   :  { %v5808_v13 = vpop.f32.mrf.mxu0 }
 0x618   :  { %v13232_v18 = vadd.f32 %v5808_v13, %v12990_v22  ;;  %v11400_v22 = vld [vmem:[%s14622_s4 + $0x98] sm:$0xff] }
 0x619   :  { %8309 = vmatpush.bf16.msrb.mxu3 %v11400_v22  ;;  %v11384_v13 = vld [vmem:[%s14622_s4 + $0x18] sm:$0xff] }
 0x61a   :  { %14816 = vst [vmem:[#allocation53_spill] sm:$0xff] %v13232_v18  ;;  %8211 = vmatpush.bf16.msrb.mxu1 %v11384_v13  ;;  %v9975_v58 = vld [vmem:[#allocation3 + $0x800] sm:$0xf]  ;;  %v5317_v13 = vadd.f32 %v13016_v15, %v14821_v47 }
 0x61b   :  { %v11209_v22 = vld [vmem:[#allocation3 + $0x820] sm:$0xf0] }
 0x61f   :  { %v5811_v4 = vpop.f32.mrf.mxu0 }
 0x620   :  { %v13235_v33 = vadd.f32 %v5811_v4, %v12996_v23  ;;  %v1858_v4 = vld [vmem:[#allocation2 + $0x31a] sm:$0xff] }
 0x621   :  { %v1922_v62 = vpack.c.bf16 %v1858_v4, %v1858_v4  ;;  %v5486_v4 = vadd.f32 %v13027_v31, %v5317_v13  ;;  %v1862_v31 = vld [vmem:[#allocation2 + $0x34a] sm:$0xff] }
 0x622   :  { %14817 = vst [vmem:[#allocation54_spill] sm:$0xff] %v13235_v33  ;;  %5850 = vmatmul.bf16.gmra.mxu0 %v9904_v3 }
 0x623   :  { %1986 = vst [vmem:[#allocation3 + $0x848] sm:$0xf] %v1922_v62 }
 0x627   :  { %v5813_v27 = vpop.f32.mrf.mxu0 }
 0x628   :  { %v13244_v23 = vadd.f32 %v5813_v27, %v13002_v61  ;;  %v9976_v27 = vor.u32 %v11209_v22, %v9975_v58  ;;  %v11218_v22 = vld [vmem:[#allocation3 + $0x868] sm:$0xf0] }
 0x62a   :  { %14818 = vst [vmem:[#allocation55_spill] sm:$0xff] %v13244_v23  ;;  %v10011_v58 = vld [vmem:[#allocation3 + $0x848] sm:$0xf] }
 0x62b   :  { %v10012_v15 = vor.u32 %v11218_v22, %v10011_v58  ;;  %v11399_v58 = vld [vmem:[%s14622_s4 + $0x90] sm:$0xff] }
 0x62c   :  { %8310 = vmatpush.bf16.msrb.mxu3 %v11399_v58 }
 0x62f   :  { %v5816_v59 = vpop.f32.mrf.mxu0 }
 0x630   :  { %v13250_v3 = vadd.f32 %v5816_v59, %v13008_v21  ;;  %v1860_v59 = vld [vmem:[#allocation2 + $0x332] sm:$0xff] }
 0x631   :  { %v1924_v8 = vpack.c.bf16 %v1860_v59, %v1860_v59  ;;  %v1926_v59 = vpack.c.bf16 %v1862_v31, %v1862_v31  ;;  %v5332_v31 = vadd.f32 %v13061_v35, %v12952_v55  ;;  %v5962_v55 = vmul.f32 %v13079_v50, %v13079_v50 }
 0x632   :  { %14819 = vst [vmem:[#allocation56_spill] sm:$0xff] %v13250_v3  ;;  %5855 = vmatmul.bf16.gmra.mxu0 %v9940_v46  ;;  %v1861_v46 = vld [vmem:[#allocation2 + $0x33a] sm:$0xff] }
 0x633   :  { %v1925_v62 = vpack.c.bf16 %v1861_v46, %v1861_v46  ;;  %1988 = vst [vmem:[#allocation3 + $0x890] sm:$0xf] %v1924_v8 }
 0x634   :  { %1990 = vst [vmem:[#allocation3 + $0x8d8] sm:$0xf] %v1926_v59 }
 0x635   :  { %1989 = vst [vmem:[#allocation3 + $0x8b4] sm:$0xf] %v1925_v62 }
 0x637   :  { %v5818_v61 = vpop.f32.mrf.mxu0 }
 0x638   :  { %v13253_v1 = vadd.f32 %v5818_v61, %v13014_v19  ;;  %v5655_v19 = vadd.f32 %v13029_v20, %v5486_v4 }
 0x63a   :  { %14820 = vst [vmem:[#allocation57_spill] sm:$0xff] %v13253_v1  ;;  %v10047_v62 = vld [vmem:[#allocation3 + $0x890] sm:$0xf] }
 0x63f   :  { %v5821_v34 = vpop.f32.mrf.mxu0 }
 0x640   :  { %v13258_v21 = vadd.f32 %v5821_v34, %v13021_v11  ;;  %v5322_v11 = vadd.f32 %v13031_v52, %v12928_v40 }
 0x642   :  { %14822 = vst [vmem:[#allocation23_spill] sm:$0xff] %v13258_v21  ;;  %5860 = vmatmul.bf16.gmra.mxu0 %v9976_v27  ;;  %v1863_v27 = vld [vmem:[#allocation2 + $0x352] sm:$0xff]  ;;  %v5491_v13 = vadd.f32 %v13042_v10, %v5322_v11 }
 0x643   :  { %v1927_v20 = vpack.c.bf16 %v1863_v27, %v1863_v27 }
 0x644   :  { %v5660_v46 = vadd.f32 %v13044_v53, %v5491_v13  ;;  %v11391_v53 = vld [vmem:[%s14622_s4 + $0x50] sm:$0xff] }
 0x645   :  { %1991 = vst [vmem:[#allocation3 + $0x8fc] sm:$0xf] %v1927_v20  ;;  %8261 = vmatpush.bf16.msrb.mxu2 %v11391_v53 }
 0x647   :  { %v5823_v26 = vpop.f32.mrf.mxu0 }
 0x648   :  { %v13262_v61 = vadd.f32 %v5823_v26, %v5655_v19  ;;  %v11227_v19 = vld [vmem:[#allocation3 + $0x8b0] sm:$0xf0] }
 0x649   :  { %v10048_v40 = vor.u32 %v11227_v19, %v10047_v62  ;;  %v5337_v62 = vadd.f32 %v13076_v17, %v12964_v56  ;;  %v5966_v17 = vmul.f32 %v13110_v32, %v13110_v32 }
 0x64a   :  { %14823 = vst [vmem:[#allocation58_spill] sm:$0xff] %v13262_v61 }
 0x64f   :  { %v5826_v47 = vpop.f32.mrf.mxu0 }
 0x650   :  { %v13267_v34 = vadd.f32 %v5826_v47, %v13036_v48  ;;  %v5327_v48 = vadd.f32 %v13046_v42, %v12940_v7  ;;  %v10083_v42 = vld [vmem:[#allocation3 + $0x8d8] sm:$0xf] }
 0x652   :  { %14824 = vst [vmem:[#allocation59_spill] sm:$0xff] %v13267_v34  ;;  %5865 = vmatmul.bf16.gmra.mxu0 %v10012_v15  ;;  %v5496_v10 = vadd.f32 %v13057_v60, %v5327_v48  ;;  %v11383_v60 = vld [vmem:[%s14622_s4 + $0x10] sm:$0xff]  ;;  %v5964_v48 = vmul.f32 %v13094_v14, %v13094_v14 }
 0x653   :  { %8212 = vmatpush.bf16.msrb.mxu1 %v11383_v60 }
 0x654   :  { %v5665_v22 = vadd.f32 %v13059_v41, %v5496_v10  ;;  %v5501_v41 = vadd.f32 %v13072_v43, %v5332_v31  ;;  %v5963_v43 = vmul.f32 %v13085_v39, %v13085_v39  ;;  %v14828_v10 = vld [vmem:[#allocation7_spill] sm:$0xff] }
 0x655   :  { %v5506_v53 = vadd.f32 %v14828_v10, %v5337_v62 }
 0x656   :  { %v5670_v13 = vadd.f32 %v13074_v6, %v5501_v41  ;;  %v13329_v41 = vpop.f32.mrf.mxu1 }
 0x657   :  { %v5828_v4 = vpop.f32.mrf.mxu0 }
 0x658   :  { %v13271_v8 = vadd.f32 %v5828_v4, %v5660_v46  ;;  %v5961_v46 = vmul.f32 %v13070_v51, %v13070_v51  ;;  %v5960_v4 = vmul.f32 %v13064_v25, %v13064_v25 }
 0x65a   :  { %14825 = vst [vmem:[#allocation60_spill] sm:$0xff] %v13271_v8  ;;  %v6024_v35 = vadd.f32 %v5961_v46, %v5960_v4  ;;  %v14830_v4 = vld [vmem:[#allocation10_spill] sm:$0xff] }
 0x65f   :  { %v5831_v52 = vpop.f32.mrf.mxu0 }
 0x660   :  { %v13276_v26 = vadd.f32 %v5831_v52, %v13051_v38  ;;  %v11236_v38 = vld [vmem:[#allocation3 + $0x8f8] sm:$0xf0]  ;;  %v6025_v52 = vadd.f32 %v6024_v35, %v5962_v55  ;;  %v5968_v55 = vmul.f32 %v14830_v4, %v14830_v4 }
 0x661   :  { %v10084_v47 = vor.u32 %v11236_v38, %v10083_v42 }
 0x662   :  { %14826 = vst [vmem:[#allocation61_spill] sm:$0xff] %v13276_v26  ;;  %5870 = vmatmul.bf16.gmra.mxu0 %v10048_v40 }
 0x667   :  { %v5833_v15 = vpop.f32.mrf.mxu0 }
 0x668   :  { %v13286_v7 = vadd.f32 %v5833_v15, %v5665_v22  ;;  %v6026_v22 = vadd.f32 %v6025_v52, %v5963_v43  ;;  %v5965_v15 = vmul.f32 %v13100_v63, %v13100_v63 }
 0x66a   :  { %14827 = vst [vmem:[#allocation62_spill] sm:$0xff] %v13286_v7  ;;  %v6027_v56 = vadd.f32 %v6026_v22, %v5964_v48  ;;  %v14832_v48 = vld [vmem:[#allocation11_spill] sm:$0xff] }
 0x66b   :  { %v5970_v10 = vmul.f32 %v14832_v48, %v14832_v48 }
 0x66f   :  { %v5836_v11 = vpop.f32.mrf.mxu0 }
 0x670   :  { %v13294_v27 = vadd.f32 %v5836_v11, %v13066_v57  ;;  %v5883_v57 = vadd.f32 %v13070_v51, %v13064_v25  ;;  %v5967_v11 = vmul.f32 %v13121_v30, %v13121_v30  ;;  %v14842_v25 = vld [vmem:[#allocation16_spill] sm:$0xff] }
 0x672   :  { %5875 = vmatmul.bf16.gmra.mxu0 %v10084_v47  ;;  %v5884_v19 = vadd.f32 %v5883_v57, %v13079_v50  ;;  %v6028_v47 = vadd.f32 %v6027_v56, %v5965_v15  ;;  %v13336_v57 = vpop.f32.mrf.mxu2  ;;  %v14833_v15 = vld [vmem:[#allocation12_spill] sm:$0xff] }
 0x674   :  { %v5885_v58 = vadd.f32 %v5884_v19, %v13085_v39  ;;  %v6029_v46 = vadd.f32 %v6028_v47, %v5966_v17  ;;  %v14834_v17 = vld [vmem:[#allocation25_spill] sm:$0xff]  ;;  %v14836_v47 = vld [vmem:[#allocation8_spill] sm:$0xff] }
 0x676   :  { %v5886_v42 = vadd.f32 %v5885_v58, %v13094_v14  ;;  %v6030_v43 = vadd.f32 %v6029_v46, %v5967_v11  ;;  %v13345_v58 = vpop.f32.mrf.mxu3 }
 0x677   :  { %v5838_v59 = vpop.f32.mrf.mxu0 }
 0x678   :  { %v13298_v20 = vadd.f32 %v5838_v59, %v5670_v13  ;;  %v5887_v60 = vadd.f32 %v5886_v42, %v13100_v63  ;;  %v6031_v52 = vadd.f32 %v6030_v43, %v5968_v55  ;;  %v5971_v42 = vmul.f32 %v14833_v15, %v14833_v15  ;;  %v14838_v55 = vld [vmem:[#allocation40_spill] sm:$0xff]  ;;  %v13358_v43 = vpop.f32.mrf.mxu1 }
 0x67a   :  { %v5888_v13 = vadd.f32 %v5887_v60, %v13110_v32 }
 0x67c   :  { %v5889_v35 = vadd.f32 %v5888_v13, %v13121_v30  ;;  %v14837_v13 = vld [vmem:[#allocation13_spill] sm:$0xff] }
 0x67d   :  { %v5972_v46 = vmul.f32 %v14837_v13, %v14837_v13 }
 0x67e   :  { %v5890_v19 = vadd.f32 %v5889_v35, %v14830_v4 }
 0x67f   :  { %v5841_v6 = vpop.f32.mrf.mxu0 }
 0x680   :  { %v13314_v40 = vadd.f32 %v5841_v6, %v13081_v5  ;;  %v14829_v5 = vld [vmem:[#allocation38_spill] sm:$0xff] }
 0x681   :  { %v5675_v38 = vadd.f32 %v14829_v5, %v5506_v53  ;;  %v14831_v6 = vld [vmem:[#allocation42_spill] sm:$0xff]  ;;  %v14835_v5 = vld [vmem:[#allocation39_spill] sm:$0xff] }
 0x682   :  { %v5969_v62 = vmul.f32 %v14831_v6, %v14831_v6  ;;  %v5891_v53 = vadd.f32 %v5890_v19, %v14831_v6 }
 0x684   :  { %v6032_v22 = vadd.f32 %v6031_v52, %v5969_v62  ;;  %v5892_v60 = vadd.f32 %v5891_v53, %v14832_v48  ;;  %v14839_v52 = vld [vmem:[#allocation14_spill] sm:$0xff]  ;;  %v13375_v48 = vpop.f32.mrf.mxu3 }
 0x685   :  { %v5973_v51 = vmul.f32 %v14839_v52, %v14839_v52 }
 0x686   :  { %v5893_v62 = vadd.f32 %v5892_v60, %v14833_v15  ;;  %v5975_v60 = vmul.f32 %v14842_v25, %v14842_v25 }
 0x687   :  { %v5843_v31 = vpop.f32.mrf.mxu0 }
 0x688   :  { %v13332_v59 = vadd.f32 %v5843_v31, %v5675_v38  ;;  %v5342_v38 = vadd.f32 %v14835_v5, %v14834_v17  ;;  %v6033_v31 = vadd.f32 %v6032_v22, %v5970_v10  ;;  %v13363_v17 = vpop.f32.mrf.mxu2  ;;  %v5894_v53 = vadd.f32 %v5893_v62, %v14837_v13  ;;  %v14840_v5 = vld [vmem:[#allocation15_spill] sm:$0xff]  ;;  %v14841_v22 = vld [vmem:[#allocation41_spill] sm:$0xff] }
 0x689   :  { %v5974_v10 = vmul.f32 %v14840_v5, %v14840_v5 }
 0x68a   :  { %v5511_v35 = vadd.f32 %v14838_v55, %v5342_v38  ;;  %v6034_v19 = vadd.f32 %v6033_v31, %v5971_v42  ;;  %v5895_v38 = vadd.f32 %v5894_v53, %v14839_v52  ;;  %v13382_v53 = vpop.f32.mrf.mxu1 }
 0x68c   :  { %v5896_v31 = vadd.f32 %v5895_v38, %v14840_v5  ;;  %v14844_v38 = vld [vmem:[#allocation19_spill] sm:$0xff] }
 0x68e   :  { %v5897_v13 = vadd.f32 %v5896_v31, %v14842_v25  ;;  %v5979_v31 = vmul.f32 %v13166_v44, %v13166_v44  ;;  %v14845_v25 = vld [vmem:[#allocation9_spill] sm:$0xff] }
 0x68f   :  { %v5846_v56 = vpop.f32.mrf.mxu0 }
 0x690   :  { %v13353_v11 = vadd.f32 %v5846_v56, %v14836_v47  ;;  %v6035_v56 = vadd.f32 %v6034_v19, %v5972_v46  ;;  %v5680_v47 = vadd.f32 %v14841_v22, %v5511_v35  ;;  %v14843_v46 = vld [vmem:[#allocation17_spill] sm:$0xff] }
 0x691   :  { %v5976_v19 = vmul.f32 %v14843_v46, %v14843_v46 }
 0x692   :  { %v6036_v55 = vadd.f32 %v6035_v56, %v5973_v51  ;;  %v5977_v51 = vmul.f32 %v13160_v29, %v13160_v29  ;;  %v5898_v56 = vadd.f32 %v5897_v13, %v14843_v46  ;;  %v14846_v13 = vld [vmem:[#allocation20_spill] sm:$0xff]  ;;  %v13399_v46 = vpop.f32.mrf.mxu3 }
 0x694   :  { %v6037_v62 = vadd.f32 %v6036_v55, %v5974_v10  ;;  %v5899_v10 = vadd.f32 %v5898_v56, %v13160_v29  ;;  %v14847_v56 = vld [vmem:[#allocation21_spill] sm:$0xff] }
 0x696   :  { %v6038_v35 = vadd.f32 %v6037_v62, %v5975_v60  ;;  %v5900_v62 = vadd.f32 %v5899_v10, %v14844_v38  ;;  %v11390_v10 = vld [vmem:[%s14622_s4 + $0x48] sm:$0xff] }
 0x697   :  { %v5848_v42 = vpop.f32.mrf.mxu0  ;;  %8262 = vmatpush.bf16.msrb.mxu2 %v11390_v10  ;;  %v11382_v10 = vld [vmem:[%s14622_s4 + $0x8] sm:$0xff] }
 0x698   :  { %v13373_v15 = vadd.f32 %v5848_v42, %v5680_v47  ;;  %v6039_v22 = vadd.f32 %v6038_v35, %v5976_v19  ;;  %v5978_v47 = vmul.f32 %v14844_v38, %v14844_v38  ;;  %v13387_v42 = vpop.f32.mrf.mxu2  ;;  %v5980_v19 = vmul.f32 %v14846_v13, %v14846_v13  ;;  %8213 = vmatpush.bf16.msrb.mxu1 %v11382_v10 }
 0x699   :  { %v5901_v35 = vadd.f32 %v5900_v62, %v13166_v44  ;;  %v13412_v62 = vpop.f32.mrf.mxu1 }
 0x69a   :  { %v6040_v55 = vadd.f32 %v6039_v22, %v5977_v51  ;;  %v5981_v51 = vmul.f32 %v14847_v56, %v14847_v56 }
 0x69b   :  { %v5902_v22 = vadd.f32 %v5901_v35, %v14846_v13  ;;  %v5983_v35 = vmul.f32 %v13187_v37, %v13187_v37 }
 0x69c   :  { %v6041_v52 = vadd.f32 %v6040_v55, %v5978_v47  ;;  %v14848_v55 = vld [vmem:[#allocation22_spill] sm:$0xff] }
 0x69e   :  { %v6042_v6 = vadd.f32 %v6041_v52, %v5979_v31  ;;  %v5903_v52 = vadd.f32 %v5902_v22, %v14847_v56  ;;  %v5985_v22 = vmul.f32 %v13193_v54, %v13193_v54 }
 0x69f   :  { %v5851_v60 = vpop.f32.mrf.mxu0 }
 0x6a0   :  { %v13394_v5 = vadd.f32 %v5851_v60, %v14845_v25  ;;  %v11398_v25 = vld [vmem:[%s14622_s4 + $0x88] sm:$0xff]  ;;  %v6043_v47 = vadd.f32 %v6042_v6, %v5980_v19  ;;  %v5982_v60 = vmul.f32 %v14848_v55, %v14848_v55  ;;  %v13419_v44 = vpop.f32.mrf.mxu2  ;;  %v5904_v38 = vadd.f32 %v5903_v52, %v14848_v55 }
 0x6a1   :  { %8311 = vmatpush.bf16.msrb.mxu3 %v11398_v25  ;;  %v5984_v19 = vmul.f32 %v13190_v28, %v13190_v28  ;;  %v13431_v25 = vpop.f32.mrf.mxu3 }
 0x6a2   :  { %v6044_v31 = vadd.f32 %v6043_v47, %v5981_v51  ;;  %v5905_v29 = vadd.f32 %v5904_v38, %v13187_v37 }
 0x6a4   :  { %v6045_v6 = vadd.f32 %v6044_v31, %v5982_v60  ;;  %v5906_v51 = vadd.f32 %v5905_v29, %v13190_v28  ;;  %v5986_v60 = vmul.f32 %v13196_v36, %v13196_v36  ;;  %v5987_v31 = vmul.f32 %v13199_v9, %v13199_v9  ;;  %v13440_v29 = vpop.f32.mrf.mxu1 }
 0x6a6   :  { %v6046_v4 = vadd.f32 %v6045_v6, %v5983_v35  ;;  %v5907_v52 = vadd.f32 %v5906_v51, %v13193_v54  ;;  %v5990_v54 = vmul.f32 %v13217_v12, %v13217_v12 }
 0x6a7   :  { %v13417_v13 = vpop.f32.mrf.mxu0 }
 0x6a8   :  { %v6047_v47 = vadd.f32 %v6046_v4, %v5984_v19  ;;  %v5908_v6 = vadd.f32 %v5907_v52, %v13196_v36  ;;  %v5988_v4 = vmul.f32 %v13202_v2, %v13202_v2  ;;  %v13445_v19 = vpop.f32.mrf.mxu2  ;;  %v5991_v36 = vmul.f32 %v13220_v45, %v13220_v45 }
 0x6aa   :  { %v6048_v38 = vadd.f32 %v6047_v47, %v5985_v22  ;;  %v5909_v37 = vadd.f32 %v5908_v6, %v13199_v9  ;;  %v5989_v22 = vmul.f32 %v13211_v16, %v13211_v16 }
 0x6ac   :  { %v6049_v28 = vadd.f32 %v6048_v38, %v5986_v60  ;;  %v5910_v10 = vadd.f32 %v5909_v37, %v13202_v2  ;;  %v13454_v60 = vpop.f32.mrf.mxu3  ;;  %v5992_v37 = vmul.f32 %v13223_v24, %v13223_v24  ;;  %v13463_v6 = vpop.f32.mrf.mxu1 }
 0x6ae   :  { %v6050_v51 = vadd.f32 %v6049_v28, %v5987_v31  ;;  %v5911_v52 = vadd.f32 %v5910_v10, %v13211_v16  ;;  %v5993_v10 = vmul.f32 %v13226_v0, %v13226_v0 }
 0x6af   :  { %v13438_v35 = vpop.f32.mrf.mxu0 }
 0x6b0   :  { %v6051_v47 = vadd.f32 %v6050_v51, %v5988_v4  ;;  %v5912_v28 = vadd.f32 %v5911_v52, %v13217_v12  ;;  %v5994_v52 = vmul.f32 %v13229_v49, %v13229_v49  ;;  %v5995_v12 = vmul.f32 %v13232_v18, %v13232_v18 }
 0x6b2   :  { %v6052_v38 = vadd.f32 %v6051_v47, %v5989_v22  ;;  %v5913_v4 = vadd.f32 %v5912_v28, %v13220_v45  ;;  %v13468_v22 = vpop.f32.mrf.mxu2 }
 0x6b4   :  { %v6053_v31 = vadd.f32 %v6052_v38, %v5990_v54  ;;  %v5914_v47 = vadd.f32 %v5913_v4, %v13223_v24  ;;  %v13479_v28 = vpop.f32.mrf.mxu3  ;;  %v5996_v4 = vmul.f32 %v13235_v33, %v13235_v33 }
 0x6b6   :  { %v6054_v51 = vadd.f32 %v6053_v31, %v5991_v36  ;;  %v5915_v54 = vadd.f32 %v5914_v47, %v13226_v0  ;;  %v5997_v47 = vmul.f32 %v13244_v23, %v13244_v23 }
 0x6b7   :  { %v13458_v55 = vpop.f32.mrf.mxu0 }
 0x6b8   :  { %v6055_v16 = vadd.f32 %v6054_v51, %v5992_v37  ;;  %v5916_v36 = vadd.f32 %v5915_v54, %v13229_v49  ;;  %v5998_v54 = vmul.f32 %v13250_v3, %v13250_v3 }
 0x6ba   :  { %v6056_v38 = vadd.f32 %v6055_v16, %v5993_v10  ;;  %v5917_v37 = vadd.f32 %v5916_v36, %v13232_v18  ;;  %v13486_v16 = vpop.f32.mrf.mxu1  ;;  %v13491_v49 = vpop.f32.mrf.mxu2  ;;  %v5999_v36 = vmul.f32 %v13253_v1, %v13253_v1 }
 0x6bc   :  { %v6057_v31 = vadd.f32 %v6056_v38, %v5994_v52  ;;  %v5918_v10 = vadd.f32 %v5917_v37, %v13235_v33  ;;  %v6000_v37 = vmul.f32 %v13258_v21, %v13258_v21 }
 0x6be   :  { %v6058_v51 = vadd.f32 %v6057_v31, %v5995_v12  ;;  %v5919_v52 = vadd.f32 %v5918_v10, %v13244_v23  ;;  %v6001_v10 = vmul.f32 %v13262_v61, %v13262_v61  ;;  %v6002_v23 = vmul.f32 %v13267_v34, %v13267_v34 }
 0x6bf   :  { %v13476_v2 = vpop.f32.mrf.mxu0 }
 0x6c0   :  { %v6059_v0 = vadd.f32 %v6058_v51, %v5996_v4  ;;  %v5920_v31 = vadd.f32 %v5919_v52, %v13250_v3  ;;  %v13502_v51 = vpop.f32.mrf.mxu3 }
 0x6c2   :  { %v6060_v38 = vadd.f32 %v6059_v0, %v5997_v47  ;;  %v5921_v4 = vadd.f32 %v5920_v31, %v13253_v1  ;;  %v13509_v24 = vpop.f32.mrf.mxu1 }
 0x6c4   :  { %v6061_v18 = vadd.f32 %v6060_v38, %v5998_v54  ;;  %v5922_v0 = vadd.f32 %v5921_v4, %v13258_v21  ;;  %v6003_v38 = vmul.f32 %v13271_v8, %v13271_v8  ;;  %v6006_v21 = vmul.f32 %v13294_v27, %v13294_v27 }
 0x6c6   :  { %v6062_v33 = vadd.f32 %v6061_v18, %v5999_v36  ;;  %v5923_v54 = vadd.f32 %v5922_v0, %v13262_v61  ;;  %v13516_v18 = vpop.f32.mrf.mxu2  ;;  %v6005_v0 = vmul.f32 %v13286_v7, %v13286_v7 }
 0x6c7   :  { %v13496_v12 = vpop.f32.mrf.mxu0 }
 0x6c8   :  { %v6063_v47 = vadd.f32 %v6062_v33, %v6000_v37  ;;  %v5924_v36 = vadd.f32 %v5923_v54, %v13267_v34  ;;  %v6004_v33 = vmul.f32 %v13276_v26, %v13276_v26 }
 0x6ca   :  { %v6064_v52 = vadd.f32 %v6063_v47, %v6001_v10  ;;  %v5925_v37 = vadd.f32 %v5924_v36, %v13271_v8  ;;  %v13525_v47 = vpop.f32.mrf.mxu3  ;;  %v5366_v36 = vpop.f32.mrf.mxu1 }
 0x6cc   :  { %v6065_v1 = vadd.f32 %v6064_v52, %v6002_v23  ;;  %v5926_v10 = vadd.f32 %v5925_v37, %v13276_v26  ;;  %v14849_v23 = vld [vmem:[#allocation26_spill] sm:$0xff] }
 0x6cd   :  { %v5347_v52 = vadd.f32 %v13329_v41, %v14849_v23 }
 0x6ce   :  { %v6066_v4 = vadd.f32 %v6065_v1, %v6003_v38  ;;  %v5927_v54 = vadd.f32 %v5926_v10, %v13286_v7  ;;  %v6007_v1 = vmul.f32 %v13298_v20, %v13298_v20  ;;  %v6008_v10 = vmul.f32 %v13314_v40, %v13314_v40  ;;  %v5535_v7 = vpop.f32.mrf.mxu2 }
 0x6cf   :  { %v13514_v31 = vpop.f32.mrf.mxu0  ;;  %v5516_v26 = vadd.f32 %v13336_v57, %v5347_v52  ;;  %v6010_v52 = vmul.f32 %v13353_v11, %v13353_v11 }
 0x6d0   :  { %v6067_v61 = vadd.f32 %v6066_v4, %v6004_v33  ;;  %v5928_v37 = vadd.f32 %v5927_v54, %v13294_v27  ;;  %v14850_v33 = vld [vmem:[#allocation27_spill] sm:$0xff]  ;;  %v6009_v54 = vmul.f32 %v13332_v59, %v13332_v59 }
 0x6d1   :  { %v5350_v4 = vadd.f32 %v13358_v43, %v14850_v33  ;;  %v5685_v43 = vadd.f32 %v13345_v58, %v5516_v26 }
 0x6d2   :  { %v6068_v34 = vadd.f32 %v6067_v61, %v6005_v0  ;;  %v5929_v61 = vadd.f32 %v5928_v37, %v13298_v20  ;;  %v14851_v0 = vld [vmem:[#allocation28_spill] sm:$0xff]  ;;  %v14852_v37 = vld [vmem:[#allocation29_spill] sm:$0xff] }
 0x6d3   :  { %v5519_v41 = vadd.f32 %v13363_v17, %v5350_v4  ;;  %v5352_v23 = vadd.f32 %v13382_v53, %v14851_v0  ;;  %v5355_v17 = vadd.f32 %v13412_v62, %v14852_v37  ;;  %v5704_v53 = vpop.f32.mrf.mxu3  ;;  %v6011_v4 = vmul.f32 %v13373_v15, %v13373_v15  ;;  %v14856_v37 = vld [vmem:[#allocation33_spill] sm:$0xff] }
 0x6d4   :  { %v6069_v8 = vadd.f32 %v6068_v34, %v6006_v21  ;;  %v5930_v57 = vadd.f32 %v5929_v61, %v13314_v40  ;;  %v13560_v26 = vadd.f32 %v13417_v13, %v5685_v43 }
 0x6d5   :  { %v5521_v21 = vadd.f32 %v13387_v42, %v5352_v23  ;;  %v14853_v42 = vld [vmem:[#allocation30_spill] sm:$0xff]  ;;  %v14854_v23 = vld [vmem:[#allocation31_spill] sm:$0xff] }
 0x6d6   :  { %v6070_v3 = vadd.f32 %v6069_v8, %v6007_v1  ;;  %v5931_v33 = vadd.f32 %v5930_v57, %v13332_v59  ;;  %v5688_v8 = vadd.f32 %v13375_v48, %v5519_v41  ;;  %v6012_v48 = vmul.f32 %v13394_v5, %v13394_v5 }
 0x6d7   :  { %v13534_v38 = vpop.f32.mrf.mxu0  ;;  %v5690_v61 = vadd.f32 %v13399_v46, %v5521_v21  ;;  %v6013_v43 = vmul.f32 %v13560_v26, %v13560_v26 }
 0x6d8   :  { %v6071_v34 = vadd.f32 %v6070_v3, %v6008_v10  ;;  %v5524_v3 = vadd.f32 %v13419_v44, %v5355_v17  ;;  %v5357_v10 = vadd.f32 %v13440_v29, %v14853_v42  ;;  %v5932_v62 = vadd.f32 %v5931_v33, %v13353_v11  ;;  %v5369_v44 = vpop.f32.mrf.mxu1 }
 0x6d9   :  { %v13570_v41 = vadd.f32 %v13438_v35, %v5688_v8  ;;  %v13579_v46 = vadd.f32 %v13458_v55, %v5690_v61  ;;  %v5365_v17 = vadd.f32 %v13509_v24, %v14856_v37 }
 0x6da   :  { %v6072_v1 = vadd.f32 %v6071_v34, %v6009_v54  ;;  %v5526_v13 = vadd.f32 %v13445_v19, %v5357_v10  ;;  %v5360_v54 = vadd.f32 %v13463_v6, %v14854_v23  ;;  %v5933_v57 = vadd.f32 %v5932_v62, %v13373_v15  ;;  %v14855_v34 = vld [vmem:[#allocation32_spill] sm:$0xff] }
 0x6db   :  { %v5693_v21 = vadd.f32 %v13431_v25, %v5524_v3  ;;  %v5362_v19 = vadd.f32 %v13486_v16, %v14855_v34  ;;  %v6014_v8 = vmul.f32 %v13570_v41, %v13570_v41  ;;  %v5534_v16 = vadd.f32 %v13516_v18, %v5365_v17 }
 0x6dc   :  { %v6073_v0 = vadd.f32 %v6072_v1, %v6010_v52  ;;  %v5529_v35 = vadd.f32 %v13468_v22, %v5360_v54  ;;  %v5538_v52 = vpop.f32.mrf.mxu2  ;;  %v5934_v6 = vadd.f32 %v5933_v57, %v13394_v5  ;;  %v5695_v55 = vadd.f32 %v13454_v60, %v5526_v13 }
 0x6dd   :  { %v5531_v1 = vadd.f32 %v13491_v49, %v5362_v19  ;;  %v13594_v22 = vadd.f32 %v13476_v2, %v5693_v21  ;;  %v6015_v24 = vmul.f32 %v13579_v46, %v13579_v46 }
 0x6de   :  { %v6074_v29 = vadd.f32 %v6073_v0, %v6011_v4  ;;  %v5935_v25 = vadd.f32 %v5934_v6, %v13560_v26  ;;  %v14857_v4 = vld [vmem:[#allocation34_spill] sm:$0xff]  ;;  %v5698_v62 = vadd.f32 %v13479_v28, %v5529_v35  ;;  %v13603_v49 = vadd.f32 %v13496_v12, %v5695_v55  ;;  %v14858_v0 = vld [vmem:[#allocation35_spill] sm:$0xff] }
 0x6df   :  { %v5871_v58 = vpop.f32.mrf.mxu0  ;;  %v5367_v3 = vadd.f32 %v5366_v36, %v14857_v4  ;;  %v5370_v2 = vadd.f32 %v5369_v44, %v14858_v0  ;;  %v5700_v18 = vadd.f32 %v13502_v51, %v5531_v1  ;;  %v6016_v23 = vmul.f32 %v13594_v22, %v13594_v22 }
 0x6e0   :  { %v6075_v33 = vadd.f32 %v6074_v29, %v6012_v48  ;;  %v5936_v60 = vadd.f32 %v5935_v25, %v13570_v41  ;;  %v5707_v48 = vpop.f32.mrf.mxu3  ;;  %v13611_v54 = vadd.f32 %v13514_v31, %v5698_v62  ;;  %v5703_v28 = vadd.f32 %v13525_v47, %v5534_v16  ;;  %v5371_v29 = vpop.f32.mrf.mxu1 }
 0x6e1   :  { %v5536_v61 = vadd.f32 %v5535_v7, %v5367_v3  ;;  %v5539_v57 = vadd.f32 %v5538_v52, %v5370_v2  ;;  %v6017_v44 = vmul.f32 %v13603_v49, %v13603_v49  ;;  %v13618_v51 = vadd.f32 %v13534_v38, %v5700_v18  ;;  %v14859_v52 = vld [vmem:[#allocation36_spill] sm:$0xff] }
 0x6e2   :  { %v6076_v42 = vadd.f32 %v6075_v33, %v6013_v43  ;;  %v5937_v36 = vadd.f32 %v5936_v60, %v13579_v46  ;;  %v11493_v43 = vmov 512.0   ;;  %v6018_v47 = vmul.f32 %v13611_v54, %v13611_v54 }
 0x6e3   :  { %11480 = vrcp.f32 %v11493_v43  ;;  %v5705_v21 = vadd.f32 %v5704_v53, %v5536_v61  ;;  %v13623_v19 = vadd.f32 %v5871_v58, %v5703_v28  ;;  %v5372_v6 = vadd.f32 %v5371_v29, %v14859_v52 }
 0x6e4   :  { %v6077_v13 = vadd.f32 %v6076_v42, %v6014_v8  ;;  %v5938_v7 = vadd.f32 %v5937_v36, %v13594_v22  ;;  %v5540_v35 = vpop.f32.mrf.mxu2  ;;  %v5708_v37 = vadd.f32 %v5707_v48, %v5539_v57  ;;  %v6019_v8 = vmul.f32 %v13618_v51, %v13618_v51 }
 0x6e5   :  { %v5541_v55 = vadd.f32 %v5540_v35, %v5372_v6  ;;  %v6020_v58 = vmul.f32 %v13623_v19, %v13623_v19 }
 0x6e6   :  { %v6078_v12 = vadd.f32 %v6077_v13, %v6015_v24  ;;  %v5939_v31 = vadd.f32 %v5938_v7, %v13603_v49 }
 0x6e7   :  { %v5873_v10 = vpop.f32.mrf.mxu0 }
 0x6e8   :  { %v6079_v34 = vadd.f32 %v6078_v12, %v6016_v23  ;;  %v5940_v38 = vadd.f32 %v5939_v31, %v13611_v54  ;;  %v13629_v53 = vadd.f32 %v5873_v10, %v5705_v21  ;;  %v5709_v3 = vpop.f32.mrf.mxu3 }
 0x6e9   :  { %v11481_v1 = vpop.eup %11480  ;;  %v5710_v10 = vadd.f32 %v5709_v3, %v5541_v55 }
 0x6ea   :  { %v6080_v33 = vadd.f32 %v6079_v34, %v6017_v44  ;;  %v5941_v16 = vadd.f32 %v5940_v38, %v13618_v51  ;;  %v6021_v62 = vmul.f32 %v13629_v53, %v13629_v53  ;;  %v5953_v60 = vmul.f32 512.0, %v11481_v1 }
 0x6eb   :  { %vm5957_vm0 = vweird.f32 %v11481_v1 }
 0x6ec   :  { %v6081_v25 = vadd.f32 %v6080_v33, %v6018_v47  ;;  %v5942_v24 = vadd.f32 %v5941_v16, %v13623_v19  ;;  %v5954_v23 = vsub.f32 1.0, %v5953_v60 }
 0x6ee   :  { %v6082_v42 = vadd.f32 %v6081_v25, %v6019_v8  ;;  %v5943_v0 = vadd.f32 %v5942_v24, %v13629_v53  ;;  %v5955_v44 = vmul.f32 %v11481_v1, %v5954_v23 }
 0x6ef   :  { %v5876_v17 = vpop.f32.mrf.mxu0 }
 0x6f0   :  { %v13634_v4 = vadd.f32 %v5876_v17, %v5708_v37  ;;  %v6083_v61 = vadd.f32 %v6082_v42, %v6020_v58  ;;  %v5956_v31 = vadd.f32 %v11481_v1, %v5955_v44 }
 0x6f2   :  { %v6022_v2 = vmul.f32 %v13634_v4, %v13634_v4  ;;  %v6084_v13 = vadd.f32 %v6083_v61, %v6021_v62  ;;  %v5944_v18 = vadd.f32 %v5943_v0, %v13634_v4  ;;  %v5958_v17 = vsel %vm5957_vm0, %v11481_v1, %v5956_v31  ;;  %v11389_v62 = vld [vmem:[%s14622_s4 + $0x40] sm:$0xff]  ;;  %v14862_v31 = vld [vmem:[#allocation11_spill] sm:$0xff] }
 0x6f3   :  { %8263 = vmatpush.bf16.msrb.mxu2 %v11389_v62  ;;  %v5881_v1 = vld [vmem:[%s14623_s2] sm:$0x1] }
 0x6f4   :  { %v6085_v28 = vadd.f32 %v6084_v13, %v6022_v2  ;;  %v5882_v13 = vld [vmem:[%s14624_s3] sm:$0x1] }
 0x6f7   :  { %v5878_v48 = vpop.f32.mrf.mxu0 }
 0x6f8   :  { %v5879_v36 = vadd.f32 %v5878_v48, %v5710_v10 }
 0x6fa   :  { %v5945_v57 = vadd.f32 %v5944_v18, %v5879_v36  ;;  %v6023_v12 = vmul.f32 %v5879_v36, %v5879_v36 }
 0x6fc   :  { %v5946_v29 = vrot.slane %v5945_v57, 4  ;;  %v6086_v7 = vadd.f32 %v6085_v28, %v6023_v12 }
 0x6fe   :  { %v5947_v43 = vadd.f32 %v5946_v29, %v5945_v57  ;;  %v6087_v21 = vrot.slane %v6086_v7, 4 }
 0x700   :  { %v5948_v35 = vrot.slane %v5947_v43, 2  ;;  %v6088_v34 = vadd.f32 %v6087_v21, %v6086_v7  ;;  %v11397_v7 = vld [vmem:[%s14622_s4 + $0x80] sm:$0xff] }
 0x701   :  { %v14860_v21 = vld [vmem:[#allocation10_spill] sm:$0xff]  ;;  %8312 = vmatpush.bf16.msrb.mxu3 %v11397_v7 }
 0x702   :  { %v5949_v47 = vadd.f32 %v5948_v35, %v5947_v43  ;;  %v6089_v52 = vrot.slane %v6088_v34, 2 }
 0x704   :  { %v5950_v6 = vrot.slane %v5949_v47, 1  ;;  %v6090_v37 = vadd.f32 %v6089_v52, %v6088_v34  ;;  %v14861_v34 = vld [vmem:[#allocation42_spill] sm:$0xff] }
 0x706   :  { %v5951_v33 = vadd.f32 %v5950_v6, %v5949_v47  ;;  %v6091_v38 = vrot.slane %v6090_v37, 1  ;;  %v14863_v47 = vld [vmem:[#allocation12_spill] sm:$0xff] }
 0x708   :  { %v5959_v8 = vmul.f32 %v5958_v17, %v5951_v33  ;;  %v6092_v55 = vadd.f32 %v6091_v38, %v6090_v37  ;;  %v14865_v37 = vld [vmem:[#allocation14_spill] sm:$0xff]  ;;  %v14866_v33 = vld [vmem:[#allocation15_spill] sm:$0xff] }
 0x70a   :  { %v6093_v25 = vmul.f32 %v6092_v55, %v5958_v17  ;;  %v6094_v16 = vmul.f32 %v5959_v8, %v5959_v8 }
 0x70c   :  { %v6095_v58 = vsub.f32 %v6093_v25, %v6094_v16  ;;  %v14868_v25 = vld [vmem:[#allocation17_spill] sm:$0xff] }
 0x70e   :  { %v6096_v3 = vadd.f32 1e-05, %v6095_v58  ;;  %v14869_v58 = vld [vmem:[#allocation18_spill] sm:$0xff] }
 0x710   :  { %11482 = vrsqrt.f32 %v6096_v3  ;;  %vm6103_vm2 = vweird.f32 %v6096_v3 }
 0x716   :  { %v11483_v42 = vpop.eup %11482 }
 0x717   :  { %v6098_v24 = vmul.f32 %v11483_v42, %v6096_v3  ;;  %vm6104_vm1 = vweird.f32 %v11483_v42 }
 0x718   :  { %vm6105_vm3 = vmor %vm6103_vm2, %vm6104_vm1 }
 0x719   :  { %v6099_v60 = vmul.f32 %v11483_v42, %v6098_v24  ;;  %v14870_v24 = vld [vmem:[#allocation19_spill] sm:$0xff] }
 0x71b   :  { %v6100_v10 = vmul.f32 0.5, %v6099_v60  ;;  %v14872_v60 = vld [vmem:[#allocation43_spill] sm:$0xff] }
 0x71d   :  { %v6101_v61 = vsub.f32 1.5, %v6100_v10 }
 0x71f   :  { %v6102_v0 = vmul.f32 %v11483_v42, %v6101_v61  ;;  %v14874_v61 = vld [vmem:[#allocation20_spill] sm:$0xff] }
 0x721   :  { %v6106_v2 = vsel %vm6105_vm3, %v11483_v42, %v6102_v0 }
 0x722   :  { %v6107_v48 = vmul.f32 %v6106_v2, %v5881_v1  ;;  %v14877_v2 = vld [vmem:[#allocation22_spill] sm:$0xff] }
 0x724   :  { %v6108_v18 = vmul.f32 %v6107_v48, %v5959_v8  ;;  %v13652_v23 = vperm.slane %v6107_v48, 0  ;;  %v14867_v8 = vld [vmem:[#allocation16_spill] sm:$0xff] }
 0x726   :  { %v6109_v28 = vsub.f32 %v5882_v13, %v6108_v18  ;;  %v6176_v57 = vmul.f32 %v13652_v23, %v5879_v36  ;;  %v13657_v12 = vmul.f32 %v13652_v23, %v13079_v50  ;;  %v13661_v29 = vmul.f32 %v13652_v23, %v13085_v39  ;;  %v14879_v13 = vld [vmem:[#allocation44_spill] sm:$0xff] }
 0x727   :  { %v13670_v43 = vmul.f32 %v13652_v23, %v13094_v14  ;;  %v13674_v36 = vmul.f32 %v13652_v23, %v13100_v63  ;;  %v13678_v50 = vmul.f32 %v13652_v23, %v13110_v32  ;;  %v13682_v39 = vmul.f32 %v13652_v23, %v13121_v30  ;;  %v14864_v30 = vld [vmem:[#allocation13_spill] sm:$0xff] }
 0x728   :  { %v13666_v44 = vperm.slane %v6109_v28, 0  ;;  %v13686_v35 = vmul.f32 %v13652_v23, %v14860_v21  ;;  %v13690_v14 = vmul.f32 %v13652_v23, %v14861_v34  ;;  %v13694_v63 = vmul.f32 %v13652_v23, %v14862_v31  ;;  %v14882_v21 = vld [vmem:[#allocation45_spill] sm:$0xff]  ;;  %v14883_v31 = vld [vmem:[#allocation46_spill] sm:$0xff] }
 0x729   :  { %v13699_v52 = vmul.f32 %v13652_v23, %v14863_v47  ;;  %v13703_v6 = vmul.f32 %v13652_v23, %v14864_v30  ;;  %v13707_v17 = vmul.f32 %v13652_v23, %v14865_v37  ;;  %v13711_v38 = vmul.f32 %v13652_v23, %v14866_v33  ;;  %v14884_v30 = vld [vmem:[#allocation47_spill] sm:$0xff]  ;;  %v14885_v33 = vld [vmem:[#allocation48_spill] sm:$0xff] }
 0x72a   :  { %v6243_v32 = vadd.f32 %v13666_v44, %v6176_v57  ;;  %v13715_v55 = vmul.f32 %v13652_v23, %v14867_v8  ;;  %v13719_v16 = vmul.f32 %v13652_v23, %v14868_v25  ;;  %v13723_v3 = vmul.f32 %v13652_v23, %v14869_v58  ;;  %v14881_v57 = vld [vmem:[#allocation24_spill] sm:$0xff] }
 0x72b   :  { %v13727_v62 = vmul.f32 %v13652_v23, %v14870_v24  ;;  %v13731_v10 = vmul.f32 %v13652_v23, %v14872_v60  ;;  %v13735_v1 = vmul.f32 %v13652_v23, %v14874_v61  ;;  %v13739_v0 = vmul.f32 %v13652_v23, %v14847_v56  ;;  %v14888_v60 = vld [vmem:[#allocation51_spill] sm:$0xff] }
 0x72c   :  { %vm6307_vm4 = vcmp.ge.f32.partialorder %v6243_v32, 0.0  ;;  %v6371_v42 = vmul.f32 0.01, %v6243_v32  ;;  %v13743_v48 = vmul.f32 %v13652_v23, %v14877_v2  ;;  %v13747_v18 = vmul.f32 %v13652_v23, %v14879_v13  ;;  %v14889_v2 = vld [vmem:[#allocation52_spill] sm:$0xff]  ;;  %v14890_v13 = vld [vmem:[#allocation53_spill] sm:$0xff] }
 0x72d   :  { %14871 = vst [vmem:[#allocation7_spill] sm:$0xff] %v13727_v62  ;;  %v6137_v7 = vmul.f32 %v13652_v23, %v14881_v57  ;;  %v6138_v34 = vmul.f32 %v13652_v23, %v14882_v21  ;;  %v6139_v47 = vmul.f32 %v13652_v23, %v14883_v31  ;;  %v6140_v56 = vmul.f32 %v13652_v23, %v13199_v9  ;;  %v14891_v57 = vld [vmem:[#allocation54_spill] sm:$0xff]  ;;  %v14892_v31 = vld [vmem:[#allocation55_spill] sm:$0xff] }
 0x72e   :  { %14873 = vst [vmem:[#allocation38_spill] sm:$0xff] %v13731_v10  ;;  %v6435_v28 = vsel %vm6307_vm4, %v6243_v32, %v6371_v42  ;;  %v6141_v37 = vmul.f32 %v13652_v23, %v14884_v30  ;;  %v6142_v8 = vmul.f32 %v13652_v23, %v14885_v33  ;;  %v14886_v32 = vld [vmem:[#allocation49_spill] sm:$0xff]  ;;  %v6144_v58 = vmul.f32 %v13652_v23, %v13220_v45  ;;  %v14887_v42 = vld [vmem:[#allocation50_spill] sm:$0xff]  ;;  %v14893_v33 = vld [vmem:[#allocation56_spill] sm:$0xff] }
 0x72f   :  { %14875 = vst [vmem:[#allocation25_spill] sm:$0xff] %v13735_v1  ;;  %v6143_v25 = vmul.f32 %v13652_v23, %v14886_v32  ;;  %v6145_v24 = vmul.f32 %v13652_v23, %v14887_v42  ;;  %v6146_v61 = vmul.f32 %v13652_v23, %v14888_v60  ;;  %v6147_v9 = vmul.f32 %v13652_v23, %v14889_v2  ;;  %v14894_v32 = vld [vmem:[#allocation57_spill] sm:$0xff]  ;;  %v14898_v1 = vld [vmem:[#allocation60_spill] sm:$0xff]  ;;  %v14900_v62 = vld [vmem:[#allocation62_spill] sm:$0xff] }
 0x730   :  { %14876 = vst [vmem:[#allocation39_spill] sm:$0xff] %v13739_v0  ;;  %v6149_v21 = vmul.f32 %v13652_v23, %v14891_v57  ;;  %v6150_v30 = vmul.f32 %v13652_v23, %v14892_v31  ;;  %v6151_v45 = vmul.f32 %v13652_v23, %v14893_v33  ;;  %v6152_v42 = vmul.f32 %v13652_v23, %v14894_v32  ;;  %v14897_v0 = vld [vmem:[#allocation59_spill] sm:$0xff]  ;;  %v14899_v10 = vld [vmem:[#allocation61_spill] sm:$0xff] }
 0x731   :  { %14878 = vst [vmem:[#allocation8_spill] sm:$0xff] %v13743_v48  ;;  %v14896_v48 = vld [vmem:[#allocation58_spill] sm:$0xff]  ;;  %v6156_v57 = vmul.f32 %v13652_v23, %v14898_v1  ;;  %v6157_v31 = vmul.f32 %v13652_v23, %v14899_v10  ;;  %v6158_v33 = vmul.f32 %v13652_v23, %v14900_v62  ;;  %v6159_v32 = vmul.f32 %v13652_v23, %v13294_v27 }
 0x732   :  { %14880 = vst [vmem:[#allocation40_spill] sm:$0xff] %v13747_v18  ;;  %v14895_v18 = vld [vmem:[#allocation23_spill] sm:$0xff]  ;;  %v6154_v2 = vmul.f32 %v13652_v23, %v14896_v48  ;;  %v6161_v48 = vmul.f32 %v13652_v23, %v13314_v40  ;;  %v6163_v1 = vmul.f32 %v13652_v23, %v13353_v11  ;;  %v6164_v10 = vmul.f32 %v13652_v23, %v13373_v15 }
 0x733   :  { %6608 = vst [vmem:[#allocation4 + $0x339] sm:$0xff] %v6435_v28  ;;  %v6148_v28 = vmul.f32 %v13652_v23, %v14890_v13  ;;  %v6153_v60 = vmul.f32 %v13652_v23, %v14895_v18  ;;  %v6155_v13 = vmul.f32 %v13652_v23, %v14897_v0  ;;  %v6160_v18 = vmul.f32 %v13652_v23, %v13298_v20 }
 0x734   :  { %v6162_v0 = vmul.f32 %v13652_v23, %v13332_v59  ;;  %v6165_v62 = vmul.f32 %v13652_v23, %v13394_v5  ;;  %v6166_v27 = vmul.f32 %v13652_v23, %v13560_v26  ;;  %v6167_v20 = vmul.f32 %v13652_v23, %v13570_v41 }
 0x735   :  { %v6168_v40 = vmul.f32 %v13652_v23, %v13579_v46  ;;  %v6169_v59 = vmul.f32 %v13652_v23, %v13594_v22  ;;  %v6170_v11 = vmul.f32 %v13652_v23, %v13603_v49  ;;  %v6171_v15 = vmul.f32 %v13652_v23, %v13611_v54 }
 0x736   :  { %v6172_v5 = vmul.f32 %v13652_v23, %v13618_v51  ;;  %v6173_v26 = vmul.f32 %v13652_v23, %v13623_v19  ;;  %v6174_v41 = vmul.f32 %v13652_v23, %v13629_v53  ;;  %v6175_v46 = vmul.f32 %v13652_v23, %v13634_v4 }
 0x737   :  { %v13829_v22 = vadd.f32 %v13666_v44, %v13657_v12  ;;  %v13833_v49 = vadd.f32 %v13666_v44, %v13661_v29  ;;  %v13837_v54 = vadd.f32 %v13666_v44, %v13670_v43  ;;  %v13841_v51 = vadd.f32 %v13666_v44, %v13674_v36 }
 0x738   :  { %v13845_v19 = vadd.f32 %v13666_v44, %v13678_v50  ;;  %v13849_v53 = vadd.f32 %v13666_v44, %v13682_v39  ;;  %v13853_v4 = vadd.f32 %v13666_v44, %v13686_v35  ;;  %v13857_v12 = vadd.f32 %v13666_v44, %v13690_v14 }
 0x739   :  { %v13861_v29 = vadd.f32 %v13666_v44, %v13694_v63  ;;  %v13865_v43 = vadd.f32 %v13666_v44, %v13699_v52  ;;  %v13869_v36 = vadd.f32 %v13666_v44, %v13703_v6  ;;  %v13873_v50 = vadd.f32 %v13666_v44, %v13707_v17  ;;  %v14905_v52 = vld [vmem:[#allocation7_spill] sm:$0xff]  ;;  %v14907_v17 = vld [vmem:[#allocation38_spill] sm:$0xff] }
 0x73a   :  { %v13877_v39 = vadd.f32 %v13666_v44, %v13711_v38  ;;  %v13881_v35 = vadd.f32 %v13666_v44, %v13715_v55  ;;  %v13885_v14 = vadd.f32 %v13666_v44, %v13719_v16  ;;  %v13889_v63 = vadd.f32 %v13666_v44, %v13723_v3 }
 0x73b   :  { %v13893_v6 = vadd.f32 %v13666_v44, %v14905_v52  ;;  %v13897_v38 = vadd.f32 %v13666_v44, %v14907_v17  ;;  %v13919_v17 = vadd.f32 %v13666_v44, %v6138_v34  ;;  %v13940_v34 = vadd.f32 %v13666_v44, %v6145_v24 }
 0x73c   :  { %14901 = vst [vmem:[#allocation41_spill] sm:$0xff] %v13877_v39  ;;  %v14908_v39 = vld [vmem:[#allocation25_spill] sm:$0xff]  ;;  %v13961_v24 = vadd.f32 %v13666_v44, %v6152_v42  ;;  %v13982_v42 = vadd.f32 %v13666_v44, %v6159_v32  ;;  %v14003_v32 = vadd.f32 %v13666_v44, %v6166_v27  ;;  %v14024_v27 = vadd.f32 %v13666_v44, %v6173_v26 }
 0x73d   :  { %14902 = vst [vmem:[#allocation9_spill] sm:$0xff] %v13881_v35  ;;  %v13901_v55 = vadd.f32 %v13666_v44, %v14908_v39  ;;  %v14909_v35 = vld [vmem:[#allocation39_spill] sm:$0xff]  ;;  %v13922_v39 = vadd.f32 %v13666_v44, %v6139_v47  ;;  %v13943_v47 = vadd.f32 %v13666_v44, %v6146_v61  ;;  %v13964_v61 = vadd.f32 %v13666_v44, %v6153_v60 }
 0x73e   :  { %14903 = vst [vmem:[#allocation21_spill] sm:$0xff] %v13885_v14  ;;  %v13905_v16 = vadd.f32 %v13666_v44, %v14909_v35  ;;  %v14911_v14 = vld [vmem:[#allocation8_spill] sm:$0xff]  ;;  %v13925_v35 = vadd.f32 %v13666_v44, %v6140_v56  ;;  %v13946_v56 = vadd.f32 %v13666_v44, %v6147_v9  ;;  %v13967_v9 = vadd.f32 %v13666_v44, %v6154_v2 }
 0x73f   :  { %14904 = vst [vmem:[#allocation26_spill] sm:$0xff] %v13889_v63  ;;  %v13909_v3 = vadd.f32 %v13666_v44, %v14911_v14  ;;  %v14912_v63 = vld [vmem:[#allocation40_spill] sm:$0xff]  ;;  %v13931_v14 = vadd.f32 %v13666_v44, %v6142_v8  ;;  %v13952_v8 = vadd.f32 %v13666_v44, %v6149_v21  ;;  %v13973_v21 = vadd.f32 %v13666_v44, %v6156_v57 }
 0x740   :  { %14906 = vst [vmem:[#allocation27_spill] sm:$0xff] %v13893_v6  ;;  %v13913_v52 = vadd.f32 %v13666_v44, %v14912_v63  ;;  %v13916_v6 = vadd.f32 %v13666_v44, %v6137_v7  ;;  %v13934_v63 = vadd.f32 %v13666_v44, %v6143_v25  ;;  %v13937_v7 = vadd.f32 %v13666_v44, %v6144_v58 }
 0x741   :  { %14910 = vst [vmem:[#allocation28_spill] sm:$0xff] %v13905_v16  ;;  %v13928_v16 = vadd.f32 %v13666_v44, %v6141_v37  ;;  %v13949_v37 = vadd.f32 %v13666_v44, %v6148_v28  ;;  %v13955_v25 = vadd.f32 %v13666_v44, %v6150_v30  ;;  %v13958_v58 = vadd.f32 %v13666_v44, %v6151_v45 }
 0x742   :  { %v13970_v28 = vadd.f32 %v13666_v44, %v6155_v13  ;;  %v13976_v30 = vadd.f32 %v13666_v44, %v6157_v31  ;;  %v13979_v45 = vadd.f32 %v13666_v44, %v6158_v33  ;;  %v13985_v60 = vadd.f32 %v13666_v44, %v6160_v18 }
 0x743   :  { %v13988_v2 = vadd.f32 %v13666_v44, %v6161_v48  ;;  %v13991_v13 = vadd.f32 %v13666_v44, %v6162_v0  ;;  %v13994_v57 = vadd.f32 %v13666_v44, %v6163_v1  ;;  %v13997_v31 = vadd.f32 %v13666_v44, %v6164_v10 }
 0x744   :  { %v14000_v33 = vadd.f32 %v13666_v44, %v6165_v62  ;;  %v14006_v18 = vadd.f32 %v13666_v44, %v6167_v20  ;;  %v14009_v48 = vadd.f32 %v13666_v44, %v6168_v40  ;;  %v14012_v0 = vadd.f32 %v13666_v44, %v6169_v59  ;;  %v14918_v59 = vld [vmem:[#allocation37_spill] sm:$0xff] }
 0x745   :  { %v14015_v1 = vadd.f32 %v13666_v44, %v6170_v11  ;;  %v14018_v10 = vadd.f32 %v13666_v44, %v6171_v15  ;;  %v14021_v62 = vadd.f32 %v13666_v44, %v6172_v5  ;;  %v14027_v20 = vadd.f32 %v13666_v44, %v6174_v41  ;;  %v14919_v11 = vld [vmem:[#allocation6_spill] sm:$0xff] }
 0x746   :  { %14913 = vst [vmem:[#allocation29_spill] sm:$0xff] %v14012_v0  ;;  %v14030_v40 = vadd.f32 %v13666_v44, %v6175_v46  ;;  %v6113_v0 = vmul.f32 %v13652_v23, %v14918_v59  ;;  %v6310_v41 = vmul.f32 0.01, %v13829_v22  ;;  %vm6246_vm7 = vcmp.ge.f32.partialorder %v13829_v22, 0.0 }
 0x747   :  { %14914 = vst [vmem:[#allocation30_spill] sm:$0xff] %v14015_v1  ;;  %v6114_v1 = vmul.f32 %v13652_v23, %v14919_v11  ;;  %v6311_v46 = vmul.f32 0.01, %v13833_v49  ;;  %vm6247_vm8 = vcmp.ge.f32.partialorder %v13833_v49, 0.0  ;;  %v6312_v59 = vmul.f32 0.01, %v13837_v54 }
 0x748   :  { %14915 = vst [vmem:[#allocation31_spill] sm:$0xff] %v14021_v62  ;;  %v6180_v15 = vadd.f32 %v13666_v44, %v6113_v0  ;;  %vm6248_vm9 = vcmp.ge.f32.partialorder %v13837_v54, 0.0  ;;  %v6313_v23 = vmul.f32 0.01, %v13841_v51  ;;  %vm6249_vm10 = vcmp.ge.f32.partialorder %v13841_v51, 0.0 }
 0x749   :  { %14916 = vst [vmem:[#allocation32_spill] sm:$0xff] %v14027_v20  ;;  %v6181_v5 = vadd.f32 %v13666_v44, %v6114_v1  ;;  %v6314_v0 = vmul.f32 0.01, %v13845_v19  ;;  %v6374_v1 = vsel %vm6246_vm7, %v13829_v22, %v6310_v41  ;;  %vm6250_vm11 = vcmp.ge.f32.partialorder %v13845_v19, 0.0 }
 0x74a   :  { %14917 = vst [vmem:[#allocation33_spill] sm:$0xff] %v14030_v40  ;;  %v6308_v62 = vmul.f32 0.01, %v6180_v15  ;;  %vm6244_vm5 = vcmp.ge.f32.partialorder %v6180_v15, 0.0  ;;  %v6315_v11 = vmul.f32 0.01, %v13849_v53  ;;  %v6375_v20 = vsel %vm6247_vm8, %v13833_v49, %v6311_v46 }
 0x74b   :  { %v6309_v26 = vmul.f32 0.01, %v6181_v5  ;;  %vm6245_vm6 = vcmp.ge.f32.partialorder %v6181_v5, 0.0  ;;  %vm6251_vm12 = vcmp.ge.f32.partialorder %v13849_v53, 0.0  ;;  %vm6252_vm13 = vcmp.ge.f32.partialorder %v13853_v4, 0.0  ;;  %6547 = vst [vmem:[#allocation4 + $0x31] sm:$0xff] %v6374_v1 }
 0x74c   :  { %v6372_v40 = vsel %vm6244_vm5, %v6180_v15, %v6308_v62  ;;  %v6316_v62 = vmul.f32 0.01, %v13853_v4  ;;  %v6376_v15 = vsel %vm6248_vm9, %v13837_v54, %v6312_v59  ;;  %v6377_v22 = vsel %vm6249_vm10, %v13841_v51, %v6313_v23  ;;  %6548 = vst [vmem:[#allocation4 + $0x39] sm:$0xff] %v6375_v20  ;;  %v14920_v20 = vld [vmem:[#allocation41_spill] sm:$0xff] }
 0x74d   :  { %v6373_v44 = vsel %vm6245_vm6, %v6181_v5, %v6309_v26  ;;  %6545 = vst [vmem:[#allocation4 + $0x19] sm:$0xff] %v6372_v40  ;;  %v6317_v5 = vmul.f32 0.01, %v13857_v12  ;;  %vm6253_vm14 = vcmp.ge.f32.partialorder %v13857_v12, 0.0  ;;  %v6318_v26 = vmul.f32 0.01, %v13861_v29 }
 0x74e   :  { %6546 = vst [vmem:[#allocation4 + $0x21] sm:$0xff] %v6373_v44  ;;  %v6378_v49 = vsel %vm6250_vm11, %v13845_v19, %v6314_v0  ;;  %vm6254_vm15 = vcmp.ge.f32.partialorder %v13861_v29, 0.0  ;;  %v6319_v40 = vmul.f32 0.01, %v13865_v43  ;;  %v6379_v54 = vsel %vm6251_vm12, %v13849_v53, %v6315_v11  ;;  %v14921_v23 = vld [vmem:[#allocation9_spill] sm:$0xff]  ;;  %v14923_v11 = vld [vmem:[#allocation26_spill] sm:$0xff] }
 0x74f   :  { %6549 = vst [vmem:[#allocation4 + $0x49] sm:$0xff] %v6376_v15  ;;  %vm6255_vm0 = vcmp.ge.f32.partialorder %v13865_v43, 0.0  ;;  %v6320_v41 = vmul.f32 0.01, %v13869_v36  ;;  %v6380_v51 = vsel %vm6252_vm13, %v13853_v4, %v6316_v62  ;;  %vm6256_vm1 = vcmp.ge.f32.partialorder %v13869_v36, 0.0  ;;  %v14922_v0 = vld [vmem:[#allocation21_spill] sm:$0xff] }
 0x750   :  { %6550 = vst [vmem:[#allocation4 + $0x51] sm:$0xff] %v6377_v22  ;;  %v6321_v46 = vmul.f32 0.01, %v13873_v50  ;;  %v6381_v19 = vsel %vm6253_vm14, %v13857_v12, %v6317_v5  ;;  %vm6257_vm2 = vcmp.ge.f32.partialorder %v13873_v50, 0.0  ;;  %v6322_v59 = vmul.f32 0.01, %v14920_v20 }
 0x751   :  { %6551 = vst [vmem:[#allocation4 + $0x61] sm:$0xff] %v6378_v49  ;;  %v6382_v53 = vsel %vm6254_vm15, %v13861_v29, %v6318_v26  ;;  %vm6258_vm3 = vcmp.ge.f32.partialorder %v14920_v20, 0.0  ;;  %v6323_v44 = vmul.f32 0.01, %v14921_v23  ;;  %v6383_v4 = vsel %vm6255_vm0, %v13865_v43, %v6319_v40  ;;  %v14924_v15 = vld [vmem:[#allocation27_spill] sm:$0xff]  ;;  %v14925_v49 = vld [vmem:[#allocation28_spill] sm:$0xff] }
 0x752   :  { %6552 = vst [vmem:[#allocation4 + $0x69] sm:$0xff] %v6379_v54  ;;  %vm6259_vm4 = vcmp.ge.f32.partialorder %v14921_v23, 0.0  ;;  %v6324_v1 = vmul.f32 0.01, %v14922_v0  ;;  %v6384_v12 = vsel %vm6256_vm1, %v13869_v36, %v6320_v41  ;;  %vm6260_vm5 = vcmp.ge.f32.partialorder %v14922_v0, 0.0 }
 0x753   :  { %6553 = vst [vmem:[#allocation4 + $0x79] sm:$0xff] %v6380_v51  ;;  %v6325_v62 = vmul.f32 0.01, %v14923_v11  ;;  %v6385_v29 = vsel %vm6257_vm2, %v13873_v50, %v6321_v46  ;;  %vm6261_vm6 = vcmp.ge.f32.partialorder %v14923_v11, 0.0  ;;  %v6326_v5 = vmul.f32 0.01, %v14924_v15 }
 0x754   :  { %6554 = vst [vmem:[#allocation4 + $0x81] sm:$0xff] %v6381_v19  ;;  %v6386_v43 = vsel %vm6258_vm3, %v14920_v20, %v6322_v59  ;;  %vm6262_vm7 = vcmp.ge.f32.partialorder %v14924_v15, 0.0  ;;  %v6327_v22 = vmul.f32 0.01, %v13897_v38  ;;  %v6387_v36 = vsel %vm6259_vm4, %v14921_v23, %v6323_v44 }
 0x755   :  { %6555 = vst [vmem:[#allocation4 + $0x91] sm:$0xff] %v6382_v53  ;;  %vm6263_vm8 = vcmp.ge.f32.partialorder %v13897_v38, 0.0  ;;  %v6328_v26 = vmul.f32 0.01, %v13901_v55  ;;  %v6388_v50 = vsel %vm6260_vm5, %v14922_v0, %v6324_v1  ;;  %vm6264_vm9 = vcmp.ge.f32.partialorder %v13901_v55, 0.0 }
 0x756   :  { %6556 = vst [vmem:[#allocation4 + $0x99] sm:$0xff] %v6383_v4  ;;  %v6329_v40 = vmul.f32 0.01, %v14925_v49  ;;  %v6389_v54 = vsel %vm6261_vm6, %v14923_v11, %v6325_v62  ;;  %vm6265_vm10 = vcmp.ge.f32.partialorder %v14925_v49, 0.0  ;;  %v6330_v41 = vmul.f32 0.01, %v13909_v3 }
 0x757   :  { %6557 = vst [vmem:[#allocation4 + $0xa9] sm:$0xff] %v6384_v12  ;;  %v6390_v51 = vsel %vm6262_vm7, %v14924_v15, %v6326_v5  ;;  %vm6266_vm11 = vcmp.ge.f32.partialorder %v13909_v3, 0.0  ;;  %v6331_v46 = vmul.f32 0.01, %v13913_v52  ;;  %v6391_v19 = vsel %vm6263_vm8, %v13897_v38, %v6327_v22 }
 0x758   :  { %6558 = vst [vmem:[#allocation4 + $0xb1] sm:$0xff] %v6385_v29  ;;  %vm6267_vm12 = vcmp.ge.f32.partialorder %v13913_v52, 0.0  ;;  %v6332_v20 = vmul.f32 0.01, %v13916_v6  ;;  %v6392_v59 = vsel %vm6264_vm9, %v13901_v55, %v6328_v26  ;;  %vm6268_vm13 = vcmp.ge.f32.partialorder %v13916_v6, 0.0  ;;  %v11381_v26 = vld [vmem:[%s14622_s4] sm:$0xff] }
 0x759   :  { %6559 = vst [vmem:[#allocation4 + $0xc1] sm:$0xff] %v6386_v43  ;;  %v6333_v53 = vmul.f32 0.01, %v13919_v17  ;;  %v6393_v23 = vsel %vm6265_vm10, %v14925_v49, %v6329_v40  ;;  %vm6269_vm14 = vcmp.ge.f32.partialorder %v13919_v17, 0.0  ;;  %v6334_v44 = vmul.f32 0.01, %v13922_v39  ;;  %8214 = vmatpush.bf16.msrb.mxu1 %v11381_v26 }
 0x75a   :  { %6560 = vst [vmem:[#allocation4 + $0xc9] sm:$0xff] %v6387_v36  ;;  %v6394_v38 = vsel %vm6266_vm11, %v13909_v3, %v6330_v41  ;;  %vm6270_vm15 = vcmp.ge.f32.partialorder %v13922_v39, 0.0  ;;  %v6335_v4 = vmul.f32 0.01, %v13925_v35  ;;  %v6395_v55 = vsel %vm6267_vm12, %v13913_v52, %v6331_v46  ;;  %v6611_v26 = vld [vmem:[#allocation4 + $0x30] ss:$2 sm:$0xff] }
 0x75b   :  { %6561 = vst [vmem:[#allocation4 + $0xd9] sm:$0xff] %v6388_v50  ;;  %vm6271_vm0 = vcmp.ge.f32.partialorder %v13925_v35, 0.0  ;;  %v6336_v0 = vmul.f32 0.01, %v13928_v16  ;;  %v6396_v1 = vsel %vm6268_vm13, %v13916_v6, %v6332_v20  ;;  %vm6272_vm1 = vcmp.ge.f32.partialorder %v13928_v16, 0.0 }
 0x75c   :  { %6562 = vst [vmem:[#allocation4 + $0xe1] sm:$0xff] %v6389_v54  ;;  %v6337_v12 = vmul.f32 0.01, %v13931_v14  ;;  %v6397_v3 = vsel %vm6269_vm14, %v13919_v17, %v6333_v53  ;;  %vm6273_vm2 = vcmp.ge.f32.partialorder %v13931_v14, 0.0  ;;  %v6338_v11 = vmul.f32 0.01, %v13934_v63 }
 0x75d   :  { %6563 = vst [vmem:[#allocation4 + $0xf1] sm:$0xff] %v6390_v51  ;;  %v6398_v52 = vsel %vm6270_vm15, %v13922_v39, %v6334_v44  ;;  %vm6274_vm3 = vcmp.ge.f32.partialorder %v13934_v63, 0.0  ;;  %v6339_v62 = vmul.f32 0.01, %v13937_v7  ;;  %v6399_v6 = vsel %vm6271_vm0, %v13925_v35, %v6335_v4 }
 0x75e   :  { %6564 = vst [vmem:[#allocation4 + $0xf9] sm:$0xff] %v6391_v19  ;;  %vm6275_vm4 = vcmp.ge.f32.partialorder %v13937_v7, 0.0  ;;  %v6340_v29 = vmul.f32 0.01, %v13940_v34  ;;  %v6400_v17 = vsel %vm6272_vm1, %v13928_v16, %v6336_v0  ;;  %vm6276_vm5 = vcmp.ge.f32.partialorder %v13940_v34, 0.0  ;;  %v11420_v0 = vld [vmem:[%s14622_s4 + $0x138] sm:$0xff] }
 0x75f   :  { %6565 = vst [vmem:[#allocation4 + $0x109] sm:$0xff] %v6392_v59  ;;  %v6341_v15 = vmul.f32 0.01, %v13943_v47  ;;  %v6401_v39 = vsel %vm6273_vm2, %v13931_v14, %v6337_v12  ;;  %vm6277_vm6 = vcmp.ge.f32.partialorder %v13943_v47, 0.0  ;;  %v6342_v5 = vmul.f32 0.01, %v13946_v56  ;;  %8403 = vmatpush.bf16.msra.mxu2 %v11420_v0 }
 0x760   :  { %6566 = vst [vmem:[#allocation4 + $0x111] sm:$0xff] %v6393_v23  ;;  %v6402_v35 = vsel %vm6274_vm3, %v13934_v63, %v6338_v11  ;;  %vm6278_vm7 = vcmp.ge.f32.partialorder %v13946_v56, 0.0  ;;  %v6343_v43 = vmul.f32 0.01, %v13949_v37  ;;  %v6403_v16 = vsel %vm6275_vm4, %v13937_v7, %v6339_v62  ;;  %v14926_v11 = vld [vmem:[#allocation29_spill] sm:$0xff]  ;;  %v14927_v62 = vld [vmem:[#allocation30_spill] sm:$0xff] }
 0x761   :  { %6567 = vst [vmem:[#allocation4 + $0x121] sm:$0xff] %v6394_v38  ;;  %vm6279_vm8 = vcmp.ge.f32.partialorder %v13949_v37, 0.0  ;;  %v6344_v22 = vmul.f32 0.01, %v13952_v8  ;;  %v6404_v14 = vsel %vm6276_vm5, %v13940_v34, %v6340_v29  ;;  %vm6280_vm9 = vcmp.ge.f32.partialorder %v13952_v8, 0.0 }
 0x762   :  { %6568 = vst [vmem:[#allocation4 + $0x129] sm:$0xff] %v6395_v55  ;;  %v6345_v36 = vmul.f32 0.01, %v13955_v25  ;;  %v6405_v63 = vsel %vm6277_vm6, %v13943_v47, %v6341_v15  ;;  %vm6281_vm10 = vcmp.ge.f32.partialorder %v13955_v25, 0.0  ;;  %v6346_v7 = vmul.f32 0.01, %v13958_v58 }
 0x763   :  { %6569 = vst [vmem:[#allocation4 + $0x139] sm:$0xff] %v6396_v1  ;;  %v6406_v50 = vsel %vm6278_vm7, %v13946_v56, %v6342_v5  ;;  %vm6282_vm11 = vcmp.ge.f32.partialorder %v13958_v58, 0.0  ;;  %v6347_v34 = vmul.f32 0.01, %v13961_v24  ;;  %v6407_v49 = vsel %vm6279_vm8, %v13949_v37, %v6343_v43  ;;  %v11412_v1 = vld [vmem:[%s14622_s4 + $0xf8] sm:$0xff] }
 0x764   :  { %6570 = vst [vmem:[#allocation4 + $0x141] sm:$0xff] %v6397_v3  ;;  %vm6283_vm12 = vcmp.ge.f32.partialorder %v13961_v24, 0.0  ;;  %v6348_v47 = vmul.f32 0.01, %v13964_v61  ;;  %v6408_v40 = vsel %vm6280_vm9, %v13952_v8, %v6344_v22  ;;  %vm6284_vm13 = vcmp.ge.f32.partialorder %v13964_v61, 0.0  ;;  %8354 = vmatpush.bf16.msra.mxu1 %v11412_v1 }
 0x765   :  { %6571 = vst [vmem:[#allocation4 + $0x151] sm:$0xff] %v6398_v52  ;;  %v6349_v56 = vmul.f32 0.01, %v13967_v9  ;;  %v6409_v54 = vsel %vm6281_vm10, %v13955_v25, %v6345_v36  ;;  %vm6285_vm14 = vcmp.ge.f32.partialorder %v13967_v9, 0.0  ;;  %v6350_v37 = vmul.f32 0.01, %v13970_v28 }
 0x766   :  { %6572 = vst [vmem:[#allocation4 + $0x159] sm:$0xff] %v6399_v6  ;;  %v6410_v41 = vsel %vm6282_vm11, %v13958_v58, %v6346_v7  ;;  %vm6286_vm15 = vcmp.ge.f32.partialorder %v13970_v28, 0.0  ;;  %v6351_v51 = vmul.f32 0.01, %v13973_v21  ;;  %v6411_v8 = vsel %vm6283_vm12, %v13961_v24, %v6347_v34  ;;  %v6609_v36 = vld [vmem:[#allocation4] ss:$2 sm:$0xff] }
 0x767   :  { %6573 = vst [vmem:[#allocation4 + $0x169] sm:$0xff] %v6400_v17  ;;  %vm6287_vm0 = vcmp.ge.f32.partialorder %v13973_v21, 0.0  ;;  %v6352_v46 = vmul.f32 0.01, %v13976_v30  ;;  %v6412_v25 = vsel %vm6284_vm13, %v13964_v61, %v6348_v47  ;;  %vm6288_vm1 = vcmp.ge.f32.partialorder %v13976_v30, 0.0 }
 0x768   :  { %6574 = vst [vmem:[#allocation4 + $0x171] sm:$0xff] %v6401_v39  ;;  %v6353_v19 = vmul.f32 0.01, %v13979_v45  ;;  %v6413_v58 = vsel %vm6285_vm14, %v13967_v9, %v6349_v56  ;;  %vm6289_vm2 = vcmp.ge.f32.partialorder %v13979_v45, 0.0  ;;  %v6354_v20 = vmul.f32 0.01, %v13982_v42 }
 0x769   :  { %6575 = vst [vmem:[#allocation4 + $0x181] sm:$0xff] %v6402_v35  ;;  %v6414_v24 = vsel %vm6286_vm15, %v13970_v28, %v6350_v37  ;;  %vm6290_vm3 = vcmp.ge.f32.partialorder %v13982_v42, 0.0  ;;  %v6355_v59 = vmul.f32 0.01, %v13985_v60  ;;  %v6415_v61 = vsel %vm6287_vm0, %v13973_v21, %v6351_v51  ;;  %v14929_v35 = vld [vmem:[#allocation32_spill] sm:$0xff] }
 0x76a   :  { %6576 = vst [vmem:[#allocation4 + $0x189] sm:$0xff] %v6403_v16  ;;  %vm6291_vm4 = vcmp.ge.f32.partialorder %v13985_v60, 0.0  ;;  %v6356_v53 = vmul.f32 0.01, %v13988_v2  ;;  %v6416_v9 = vsel %vm6288_vm1, %v13976_v30, %v6352_v46  ;;  %vm6292_vm5 = vcmp.ge.f32.partialorder %v13988_v2, 0.0  ;;  %v14930_v16 = vld [vmem:[#allocation33_spill] sm:$0xff] }
 0x76b   :  { %6577 = vst [vmem:[#allocation4 + $0x1c9] sm:$0xff] %v6404_v14  ;;  %v6357_v23 = vmul.f32 0.01, %v13991_v13  ;;  %v6417_v28 = vsel %vm6289_vm2, %v13979_v45, %v6353_v19  ;;  %vm6293_vm6 = vcmp.ge.f32.partialorder %v13991_v13, 0.0  ;;  %v6358_v44 = vmul.f32 0.01, %v13994_v57 }
 0x76c   :  { %6578 = vst [vmem:[#allocation4 + $0x1d1] sm:$0xff] %v6405_v63  ;;  %v6418_v21 = vsel %vm6290_vm3, %v13982_v42, %v6354_v20  ;;  %vm6294_vm7 = vcmp.ge.f32.partialorder %v13994_v57, 0.0  ;;  %v6359_v38 = vmul.f32 0.01, %v13997_v31  ;;  %v6419_v30 = vsel %vm6291_vm4, %v13985_v60, %v6355_v59  ;;  %v11428_v60 = vld [vmem:[%s14622_s4 + $0x178] sm:$0xff]  ;;  %v11427_v51 = vld [vmem:[%s14622_s4 + $0x170] sm:$0xff] }
 0x76d   :  { %6579 = vst [vmem:[#allocation4 + $0x1e1] sm:$0xff] %v6406_v50  ;;  %vm6295_vm8 = vcmp.ge.f32.partialorder %v13997_v31, 0.0  ;;  %vm6296_vm9 = vcmp.ge.f32.partialorder %v14000_v33, 0.0  ;;  %v6360_v45 = vmul.f32 0.01, %v14000_v33  ;;  %v6420_v4 = vsel %vm6292_vm5, %v13988_v2, %v6356_v53  ;;  %8452 = vmatpush.bf16.msra.mxu3 %v11428_v60 }
 0x76e   :  { %6580 = vst [vmem:[#allocation4 + $0x1e9] sm:$0xff] %v6407_v49  ;;  %v6361_v55 = vmul.f32 0.01, %v14003_v32  ;;  %v6421_v42 = vsel %vm6293_vm6, %v13991_v13, %v6357_v23  ;;  %vm6297_vm10 = vcmp.ge.f32.partialorder %v14003_v32, 0.0  ;;  %v6362_v2 = vmul.f32 0.01, %v14006_v18 }
 0x76f   :  { %6581 = vst [vmem:[#allocation4 + $0x1f9] sm:$0xff] %v6408_v40  ;;  %v6422_v13 = vsel %vm6294_vm7, %v13994_v57, %v6358_v44  ;;  %vm6298_vm11 = vcmp.ge.f32.partialorder %v14006_v18, 0.0  ;;  %v6363_v12 = vmul.f32 0.01, %v14009_v48  ;;  %v6423_v3 = vsel %vm6295_vm8, %v13997_v31, %v6359_v38  ;;  %v6673_v50 = vld [vmem:[#allocation4 + $0x1] ss:$2 sm:$0xff] }
 0x770   :  { %6582 = vst [vmem:[#allocation4 + $0x201] sm:$0xff] %v6409_v54  ;;  %vm6299_vm12 = vcmp.ge.f32.partialorder %v14009_v48, 0.0  ;;  %v6364_v52 = vmul.f32 0.01, %v14926_v11  ;;  %v6424_v57 = vsel %vm6296_vm9, %v14000_v33, %v6360_v45  ;;  %vm6300_vm13 = vcmp.ge.f32.partialorder %v14926_v11, 0.0  ;;  %v14928_v33 = vld [vmem:[#allocation31_spill] sm:$0xff] }
 0x771   :  { %6583 = vst [vmem:[#allocation4 + $0x211] sm:$0xff] %v6410_v41  ;;  %v6365_v6 = vmul.f32 0.01, %v14927_v62  ;;  %v6425_v31 = vsel %vm6297_vm10, %v14003_v32, %v6361_v55  ;;  %vm6301_vm14 = vcmp.ge.f32.partialorder %v14927_v62, 0.0  ;;  %v6366_v29 = vmul.f32 0.01, %v14018_v10  ;;  %8453 = vmatpush.bf16.msra.mxu3 %v11427_v51 }
 0x772   :  { %6584 = vst [vmem:[#allocation4 + $0x219] sm:$0xff] %v6411_v8  ;;  %v6426_v17 = vsel %vm6298_vm11, %v14006_v18, %v6362_v2  ;;  %vm6302_vm15 = vcmp.ge.f32.partialorder %v14018_v10, 0.0  ;;  %v6367_v15 = vmul.f32 0.01, %v14928_v33  ;;  %v6427_v39 = vsel %vm6299_vm12, %v14009_v48, %v6363_v12  ;;  %v6737_v40 = vld [vmem:[#allocation4 + $0x2] ss:$2 sm:$0xff] }
 0x773   :  { %6585 = vst [vmem:[#allocation4 + $0x229] sm:$0xff] %v6412_v25  ;;  %vm6303_vm0 = vcmp.ge.f32.partialorder %v14928_v33, 0.0  ;;  %v6368_v32 = vmul.f32 0.01, %v14024_v27  ;;  %v6428_v5 = vsel %vm6300_vm13, %v14926_v11, %v6364_v52  ;;  %vm6304_vm1 = vcmp.ge.f32.partialorder %v14024_v27, 0.0  ;;  %v11419_v41 = vld [vmem:[%s14622_s4 + $0x130] sm:$0xff] }
 0x774   :  { %6586 = vst [vmem:[#allocation4 + $0x231] sm:$0xff] %v6413_v58  ;;  %v6369_v43 = vmul.f32 0.01, %v14929_v35  ;;  %v6429_v18 = vsel %vm6301_vm14, %v14927_v62, %v6365_v6  ;;  %vm6305_vm2 = vcmp.ge.f32.partialorder %v14929_v35, 0.0  ;;  %v6370_v22 = vmul.f32 0.01, %v14930_v16  ;;  %8404 = vmatpush.bf16.msra.mxu2 %v11419_v41 }
 0x775   :  { %6587 = vst [vmem:[#allocation4 + $0x241] sm:$0xff] %v6414_v24  ;;  %v6430_v48 = vsel %vm6302_vm15, %v14018_v10, %v6366_v29  ;;  %vm6306_vm3 = vcmp.ge.f32.partialorder %v14930_v16, 0.0  ;;  %v6431_v14 = vsel %vm6303_vm0, %v14928_v33, %v6367_v15  ;;  %v6432_v63 = vsel %vm6304_vm1, %v14024_v27, %v6368_v32  ;;  %v6675_v10 = vld [vmem:[#allocation4 + $0x31] ss:$2 sm:$0xff]  ;;  %v6739_v54 = vld [vmem:[#allocation4 + $0x32] ss:$2 sm:$0xff] }
 0x776   :  { %6588 = vst [vmem:[#allocation4 + $0x249] sm:$0xff] %v6415_v61  ;;  %v6433_v7 = vsel %vm6305_vm2, %v14929_v35, %v6369_v43  ;;  %v6434_v34 = vsel %vm6306_vm3, %v14930_v16, %v6370_v22  ;;  %v6640_v49 = vpack.c.bf16 %v6609_v36, %v6609_v36  ;;  %v6641_v47 = vpack.c.bf16 %v6611_v26, %v6611_v26  ;;  %v6613_v37 = vld [vmem:[#allocation4 + $0x60] ss:$2 sm:$0xff]  ;;  %v11411_v8 = vld [vmem:[%s14622_s4 + $0xf0] sm:$0xff]  ;;  %v6677_v58 = vld [vmem:[#allocation4 + $0x61] ss:$2 sm:$0xff] }
 0x777   :  { %6589 = vst [vmem:[#allocation4 + $0x259] sm:$0xff] %v6416_v9  ;;  %v6704_v56 = vpack.c.bf16 %v6673_v50, %v6673_v50  ;;  %v6705_v27 = vpack.c.bf16 %v6675_v10, %v6675_v10  ;;  %v6768_v46 = vpack.c.bf16 %v6737_v40, %v6737_v40  ;;  %v6615_v25 = vld [vmem:[#allocation4 + $0x90] ss:$2 sm:$0xff]  ;;  %v6769_v19 = vpack.c.bf16 %v6739_v54, %v6739_v54  ;;  %v6679_v24 = vld [vmem:[#allocation4 + $0x91] ss:$2 sm:$0xff]  ;;  %v11426_v35 = vld [vmem:[%s14622_s4 + $0x168] sm:$0xff] }
 0x778   :  { %6590 = vst [vmem:[#allocation4 + $0x261] sm:$0xff] %v6417_v28  ;;  %v6642_v20 = vpack.c.bf16 %v6613_v37, %v6613_v37  ;;  %8355 = vmatpush.bf16.msra.mxu1 %v11411_v8  ;;  %v6643_v59 = vpack.c.bf16 %v6615_v25, %v6615_v25  ;;  %v6741_v61 = vld [vmem:[#allocation4 + $0x62] ss:$2 sm:$0xff]  ;;  %v6706_v53 = vpack.c.bf16 %v6677_v58, %v6677_v58  ;;  %v6743_v9 = vld [vmem:[#allocation4 + $0x92] ss:$2 sm:$0xff] }
 0x779   :  { %6591 = vst [vmem:[#allocation4 + $0x271] sm:$0xff] %v6418_v21  ;;  %v6707_v23 = vpack.c.bf16 %v6679_v24, %v6679_v24  ;;  %v6617_v28 = vld [vmem:[#allocation4 + $0xc0] ss:$2 sm:$0xff]  ;;  %v6770_v44 = vpack.c.bf16 %v6741_v61, %v6741_v61  ;;  %v6619_v21 = vld [vmem:[#allocation4 + $0xf0] ss:$2 sm:$0xff]  ;;  %8454 = vmatpush.bf16.msra.mxu3 %v11426_v35 }
 0x77a   :  { %6592 = vst [vmem:[#allocation4 + $0x279] sm:$0xff] %v6419_v30  ;;  %v6771_v30 = vpack.c.bf16 %v6743_v9, %v6743_v9  ;;  %v6681_v45 = vld [vmem:[#allocation4 + $0xc1] ss:$2 sm:$0xff]  ;;  %v6644_v55 = vpack.c.bf16 %v6617_v28, %v6617_v28  ;;  %v6645_v1 = vpack.c.bf16 %v6619_v21, %v6619_v21  ;;  %v6745_v2 = vld [vmem:[#allocation4 + $0xc2] ss:$2 sm:$0xff] }
 0x77b   :  { %6593 = vst [vmem:[#allocation4 + $0x289] sm:$0xff] %v6420_v4  ;;  %v6708_v12 = vpack.c.bf16 %v6681_v45, %v6681_v45  ;;  %v6621_v62 = vld [vmem:[#allocation4 + $0x120] ss:$2 sm:$0xff]  ;;  %v6623_v29 = vld [vmem:[#allocation4 + $0x150] ss:$2 sm:$0xff] }
 0x77c   :  { %6594 = vst [vmem:[#allocation4 + $0x291] sm:$0xff] %v6421_v42  ;;  %v6683_v42 = vld [vmem:[#allocation4 + $0xf1] ss:$2 sm:$0xff]  ;;  %v6685_v15 = vld [vmem:[#allocation4 + $0x121] ss:$2 sm:$0xff]  ;;  %v6647_v43 = vpack.c.bf16 %v6623_v29, %v6623_v29 }
 0x77d   :  { %6595 = vst [vmem:[#allocation4 + $0x2a1] sm:$0xff] %v6422_v13  ;;  %v6687_v32 = vld [vmem:[#allocation4 + $0x151] ss:$2 sm:$0xff]  ;;  %v11410_v16 = vld [vmem:[%s14622_s4 + $0xe8] sm:$0xff]  ;;  %v6710_v22 = vpack.c.bf16 %v6685_v15, %v6685_v15  ;;  %v6625_v36 = vld [vmem:[#allocation4 + $0x1b0] ss:$2 sm:$0xff] }
 0x77e   :  { %6596 = vst [vmem:[#allocation4 + $0x2a9] sm:$0xff] %v6423_v3  ;;  %v6747_v3 = vld [vmem:[#allocation4 + $0xf2] ss:$2 sm:$0xff]  ;;  %8356 = vmatpush.bf16.msra.mxu1 %v11410_v16  ;;  %v6689_v50 = vld [vmem:[#allocation4 + $0x1b1] ss:$2 sm:$0xff] }
 0x77f   :  { %6597 = vst [vmem:[#allocation4 + $0x2b9] sm:$0xff] %v6424_v57  ;;  %v6709_v57 = vpack.c.bf16 %v6683_v42, %v6683_v42  ;;  %v6773_v33 = vpack.c.bf16 %v6747_v3, %v6747_v3  ;;  %v6627_v26 = vld [vmem:[#allocation4 + $0x1e0] ss:$2 sm:$0xff]  ;;  %v6712_v37 = vpack.c.bf16 %v6689_v50, %v6689_v50  ;;  %v6629_v41 = vld [vmem:[#allocation4 + $0x210] ss:$2 sm:$0xff] }
 0x780   :  { %6598 = vst [vmem:[#allocation4 + $0x2c1] sm:$0xff] %v6425_v31  ;;  %v6772_v31 = vpack.c.bf16 %v6745_v2, %v6745_v2  ;;  %v6649_v10 = vpack.c.bf16 %v6627_v26, %v6627_v26  ;;  %v6755_v40 = vld [vmem:[#allocation4 + $0x1e2] ss:$2 sm:$0xff]  ;;  %v6695_v24 = vld [vmem:[#allocation4 + $0x241] ss:$2 sm:$0xff] }
 0x781   :  { %6599 = vst [vmem:[#allocation4 + $0x2d1] sm:$0xff] %v6426_v17  ;;  %v6631_v51 = vld [vmem:[#allocation4 + $0x240] ss:$2 sm:$0xff]  ;;  %v6777_v58 = vpack.c.bf16 %v6755_v40, %v6755_v40  ;;  %v6633_v45 = vld [vmem:[#allocation4 + $0x270] ss:$2 sm:$0xff] }
 0x782   :  { %6600 = vst [vmem:[#allocation4 + $0x2d9] sm:$0xff] %v6427_v39  ;;  %v6646_v39 = vpack.c.bf16 %v6621_v62, %v6621_v62  ;;  %v6757_v28 = vld [vmem:[#allocation4 + $0x212] ss:$2 sm:$0xff]  ;;  %v6759_v21 = vld [vmem:[#allocation4 + $0x242] ss:$2 sm:$0xff] }
 0x783   :  { %6601 = vst [vmem:[#allocation4 + $0x2e9] sm:$0xff] %v6428_v5  ;;  %v11418_v5 = vld [vmem:[%s14622_s4 + $0x128] sm:$0xff]  ;;  %v6697_v42 = vld [vmem:[#allocation4 + $0x271] ss:$2 sm:$0xff]  ;;  %v6779_v2 = vpack.c.bf16 %v6759_v21, %v6759_v21 }
 0x784   :  { %6602 = vst [vmem:[#allocation4 + $0x2f1] sm:$0xff] %v6429_v18  ;;  %v6749_v18 = vld [vmem:[#allocation4 + $0x122] ss:$2 sm:$0xff]  ;;  %8405 = vmatpush.bf16.msra.mxu2 %v11418_v5 }
 0x785   :  { %6603 = vst [vmem:[#allocation4 + $0x301] sm:$0xff] %v6430_v48  ;;  %v6751_v48 = vld [vmem:[#allocation4 + $0x152] ss:$2 sm:$0xff] }
 0x786   :  { %6604 = vst [vmem:[#allocation4 + $0x309] sm:$0xff] %v6431_v14  ;;  %v6711_v14 = vpack.c.bf16 %v6687_v32, %v6687_v32  ;;  %v6802_v26 = vld [vmem:[#allocation4 + $0x48] ss:$2 sm:$0xff] }
 0x787   :  { %6605 = vst [vmem:[#allocation4 + $0x319] sm:$0xff] %v6432_v63  ;;  %v6774_v63 = vpack.c.bf16 %v6749_v18, %v6749_v18  ;;  %v6934_v21 = vld [vmem:[#allocation4 + $0xaa] ss:$2 sm:$0xff] }
 0x788   :  { %6606 = vst [vmem:[#allocation4 + $0x321] sm:$0xff] %v6433_v7  ;;  %v6775_v7 = vpack.c.bf16 %v6751_v48, %v6751_v48 }
 0x789   :  { %6607 = vst [vmem:[#allocation4 + $0x331] sm:$0xff] %v6434_v34  ;;  %v6648_v34 = vpack.c.bf16 %v6625_v36, %v6625_v36 }
 0x78a   :  { %6656 = vst [vmem:[#allocation5] sm:$0xf] %v6640_v49  ;;  %v6691_v49 = vld [vmem:[#allocation4 + $0x1e1] ss:$2 sm:$0xff] }
 0x78b   :  { %6657 = vst [vmem:[#allocation5 + $0x24] sm:$0xf] %v6641_v47  ;;  %v6753_v47 = vld [vmem:[#allocation4 + $0x1b2] ss:$2 sm:$0xff] }
 0x78c   :  { %6720 = vst [vmem:[#allocation5 + $0x4] sm:$0xf] %v6704_v56  ;;  %v6776_v25 = vpack.c.bf16 %v6753_v47, %v6753_v47  ;;  %v6864_v47 = vld [vmem:[#allocation4 + $0x19] ss:$2 sm:$0xff] }
 0x78d   :  { %6721 = vst [vmem:[#allocation5 + $0x28] sm:$0xf] %v6705_v27  ;;  %v6713_v27 = vpack.c.bf16 %v6691_v49, %v6691_v49  ;;  %v6639_v29 = vld [vmem:[#allocation4 + $0x300] ss:$2 sm:$0xff]  ;;  %v6703_v15 = vld [vmem:[#allocation4 + $0x301] ss:$2 sm:$0xff] }
 0x78e   :  { %6784 = vst [vmem:[#allocation5 + $0x8] sm:$0xf] %v6768_v46  ;;  %v6655_v35 = vpack.c.bf16 %v6639_v29, %v6639_v29  ;;  %v6767_v18 = vld [vmem:[#allocation4 + $0x302] ss:$2 sm:$0xff]  ;;  %v6719_v36 = vpack.c.bf16 %v6703_v15, %v6703_v15 }
 0x78f   :  { %6785 = vst [vmem:[#allocation5 + $0x2c] sm:$0xf] %v6769_v19 }
 0x790   :  { %6658 = vst [vmem:[#allocation5 + $0x48] sm:$0xf] %v6642_v20  ;;  %v6693_v20 = vld [vmem:[#allocation4 + $0x211] ss:$2 sm:$0xff] }
 0x791   :  { %v10375_v38 = vld [vmem:[#allocation5] sm:$0xf]  ;;  %6659 = vst [vmem:[#allocation5 + $0x6c] sm:$0xf] %v6643_v59 }
 0x792   :  { %v11313_v4 = vld [vmem:[#allocation5 + $0x20] sm:$0xf0]  ;;  %6722 = vst [vmem:[#allocation5 + $0x4c] sm:$0xf] %v6706_v53  ;;  %v6650_v53 = vpack.c.bf16 %v6629_v41, %v6629_v41  ;;  %v6895_v41 = vpack.c.bf16 %v6864_v47, %v6864_v47  ;;  %v6880_v47 = vld [vmem:[#allocation4 + $0x1c9] ss:$2 sm:$0xff] }
 0x793   :  { %v10376_v0 = vor.u32 %v11313_v4, %v10375_v38  ;;  %v11309_v60 = vld [vmem:[#allocation5 + $0x4] sm:$0xf]  ;;  %6723 = vst [vmem:[#allocation5 + $0x70] sm:$0xf] %v6707_v23  ;;  %v6651_v23 = vpack.c.bf16 %v6631_v51, %v6631_v51  ;;  %v6778_v4 = vpack.c.bf16 %v6757_v28, %v6757_v28  ;;  %v6930_v51 = vld [vmem:[#allocation4 + $0x4a] ss:$2 sm:$0xff] }
 0x794   :  { %v10377_v13 = vld [vmem:[#allocation5 + $0x24] sm:$0xf0]  ;;  %6786 = vst [vmem:[#allocation5 + $0x50] sm:$0xf] %v6770_v44  ;;  %v6714_v44 = vpack.c.bf16 %v6693_v20, %v6693_v20 }
 0x795   :  { %8215 = vmatmul.bf16.vlgmr.msrb.gmra.mxu1 %v10376_v0  ;;  %v10380_v11 = vor.u32 %v11309_v60, %v10377_v13  ;;  %v10383_v52 = vld [vmem:[#allocation5 + $0x8] sm:$0xf]  ;;  %6787 = vst [vmem:[#allocation5 + $0x74] sm:$0xf] %v6771_v30  ;;  %v6715_v30 = vpack.c.bf16 %v6695_v24, %v6695_v24  ;;  %v11417_v0 = vld [vmem:[%s14622_s4 + $0x120] sm:$0xff]  ;;  %v6652_v13 = vpack.c.bf16 %v6633_v45, %v6633_v45 }
 0x796   :  { %v11314_v6 = vld [vmem:[#allocation5 + $0x28] sm:$0xf0]  ;;  %6660 = vst [vmem:[#allocation5 + $0x90] sm:$0xf] %v6644_v55  ;;  %v11425_v60 = vld [vmem:[%s14622_s4 + $0x160] sm:$0xff]  ;;  %8406 = vmatpush.bf16.msra.mxu2 %v11417_v0 }
 0x797   :  { %8264 = vmatmul.bf16.vlgmr.msrb.gmra.mxu2 %v10380_v11  ;;  %v10384_v17 = vor.u32 %v11314_v6, %v10383_v52  ;;  %6661 = vst [vmem:[#allocation5 + $0xb4] sm:$0xf] %v6645_v1  ;;  %v10411_v56 = vld [vmem:[#allocation5 + $0x48] sm:$0xf]  ;;  %v11409_v1 = vld [vmem:[%s14622_s4 + $0xe0] sm:$0xff]  ;;  %8455 = vmatpush.bf16.msra.mxu3 %v11425_v60  ;;  %v6716_v52 = vpack.c.bf16 %v6697_v42, %v6697_v42 }
 0x798   :  { %6724 = vst [vmem:[#allocation5 + $0x94] sm:$0xf] %v6708_v12  ;;  %v11322_v54 = vld [vmem:[#allocation5 + $0x68] sm:$0xf0]  ;;  %v6761_v11 = vld [vmem:[#allocation4 + $0x272] ss:$2 sm:$0xff]  ;;  %8357 = vmatpush.bf16.msra.mxu1 %v11409_v1  ;;  %v6962_v60 = vpack.c.bf16 %v6934_v21, %v6934_v21 }
 0x799   :  { %8313 = vmatmul.bf16.vlgmr.msrb.gmra.mxu3 %v10384_v17  ;;  %6725 = vst [vmem:[#allocation5 + $0xb8] sm:$0xf] %v6709_v57  ;;  %v11318_v8 = vld [vmem:[#allocation5 + $0x4c] sm:$0xf]  ;;  %v10412_v19 = vor.u32 %v11322_v54, %v10411_v56  ;;  %v6637_v6 = vld [vmem:[#allocation4 + $0x2d0] ss:$2 sm:$0xff] }
 0x79a   :  { %6788 = vst [vmem:[#allocation5 + $0x98] sm:$0xf] %v6772_v31  ;;  %v10413_v46 = vld [vmem:[#allocation5 + $0x6c] sm:$0xf0]  ;;  %v6635_v55 = vld [vmem:[#allocation4 + $0x2a0] ss:$2 sm:$0xff]  ;;  %v6780_v31 = vpack.c.bf16 %v6761_v11, %v6761_v11  ;;  %v6654_v5 = vpack.c.bf16 %v6637_v6, %v6637_v6 }
 0x79b   :  { %6789 = vst [vmem:[#allocation5 + $0xbc] sm:$0xf] %v6773_v33  ;;  %v10419_v59 = vld [vmem:[#allocation5 + $0x50] sm:$0xf]  ;;  %v10416_v9 = vor.u32 %v11318_v8, %v10413_v46  ;;  %v6699_v12 = vld [vmem:[#allocation4 + $0x2a1] ss:$2 sm:$0xff]  ;;  %v6653_v3 = vpack.c.bf16 %v6635_v55, %v6635_v55 }
 0x79c   :  { %6662 = vst [vmem:[#allocation5 + $0xd8] sm:$0xf] %v6646_v39  ;;  %v11323_v61 = vld [vmem:[#allocation5 + $0x70] sm:$0xf0]  ;;  %v6763_v57 = vld [vmem:[#allocation4 + $0x2a2] ss:$2 sm:$0xff]  ;;  %v6717_v62 = vpack.c.bf16 %v6699_v12, %v6699_v12 }
 0x79d   :  { %6663 = vst [vmem:[#allocation5 + $0xfc] sm:$0xf] %v6647_v43  ;;  %v10420_v38 = vor.u32 %v11323_v61, %v10419_v59  ;;  %v6781_v17 = vpack.c.bf16 %v6763_v57, %v6763_v57  ;;  %v6701_v33 = vld [vmem:[#allocation4 + $0x2d1] ss:$2 sm:$0xff]  ;;  %v6765_v43 = vld [vmem:[#allocation4 + $0x2d2] ss:$2 sm:$0xff]  ;;  %v6960_v59 = vpack.c.bf16 %v6930_v51, %v6930_v51  ;;  %v6903_v51 = vpack.c.bf16 %v6880_v47, %v6880_v47 }
 0x79e   :  { %6726 = vst [vmem:[#allocation5 + $0xdc] sm:$0xf] %v6710_v22  ;;  %v10447_v39 = vld [vmem:[#allocation5 + $0x90] sm:$0xf]  ;;  %v11331_v32 = vld [vmem:[#allocation5 + $0xb0] sm:$0xf0]  ;;  %v6718_v48 = vpack.c.bf16 %v6701_v33, %v6701_v33 }
 0x79f   :  { %6727 = vst [vmem:[#allocation5 + $0x100] sm:$0xf] %v6711_v14  ;;  %v11327_v16 = vld [vmem:[#allocation5 + $0x94] sm:$0xf]  ;;  %v10448_v14 = vor.u32 %v11331_v32, %v10447_v39  ;;  %v6804_v8 = vld [vmem:[#allocation4 + $0x78] ss:$2 sm:$0xff] }
 0x7a0   :  { %6790 = vst [vmem:[#allocation5 + $0xe0] sm:$0xf] %v6774_v63  ;;  %v10449_v22 = vld [vmem:[#allocation5 + $0xb4] sm:$0xf0]  ;;  %v6866_v56 = vld [vmem:[#allocation4 + $0x49] ss:$2 sm:$0xff] }
 0x7a1   :  { %6791 = vst [vmem:[#allocation5 + $0x104] sm:$0xf] %v6775_v7  ;;  %v6800_v63 = vld [vmem:[#allocation4 + $0x18] ss:$2 sm:$0xff]  ;;  %v10452_v49 = vor.u32 %v11327_v16, %v10449_v22  ;;  %v6806_v24 = vld [vmem:[#allocation4 + $0xa8] ss:$2 sm:$0xff] }
 0x7a2   :  { %6664 = vst [vmem:[#allocation5 + $0x120] sm:$0xf] %v6648_v34  ;;  %v10455_v7 = vld [vmem:[#allocation5 + $0x98] sm:$0xf]  ;;  %v11332_v50 = vld [vmem:[#allocation5 + $0xb8] sm:$0xf0]  ;;  %v6782_v34 = vpack.c.bf16 %v6765_v43, %v6765_v43  ;;  %v6831_v40 = vpack.c.bf16 %v6800_v63, %v6800_v63 }
 0x7a3   :  { %6665 = vst [vmem:[#allocation5 + $0x144] sm:$0xf] %v6649_v10  ;;  %v6783_v10 = vpack.c.bf16 %v6767_v18, %v6767_v18  ;;  %v10456_v54 = vor.u32 %v11332_v50, %v10455_v7  ;;  %v11416_v46 = vld [vmem:[%s14622_s4 + $0x118] sm:$0xff]  ;;  %v6810_v42 = vld [vmem:[#allocation4 + $0x108] ss:$2 sm:$0xff] }
 0x7a4   :  { %6728 = vst [vmem:[#allocation5 + $0x124] sm:$0xf] %v6712_v37  ;;  %v6832_v37 = vpack.c.bf16 %v6802_v26, %v6802_v26  ;;  %8407 = vmatpush.bf16.msra.mxu2 %v11416_v46  ;;  %v6868_v61 = vld [vmem:[#allocation4 + $0x79] ss:$2 sm:$0xff]  ;;  %v6932_v28 = vld [vmem:[#allocation4 + $0x7a] ss:$2 sm:$0xff] }
 0x7a5   :  { %8220 = vmatmul.bf16.gmra.mxu1 %v10412_v19  ;;  %6729 = vst [vmem:[#allocation5 + $0x148] sm:$0xf] %v6713_v27  ;;  %v6928_v27 = vld [vmem:[#allocation4 + $0x1a] ss:$2 sm:$0xff]  ;;  %v6961_v55 = vpack.c.bf16 %v6932_v28, %v6932_v28  ;;  %v6872_v1 = vld [vmem:[#allocation4 + $0xd9] ss:$2 sm:$0xff] }
 0x7a6   :  { %6792 = vst [vmem:[#allocation5 + $0x128] sm:$0xf] %v6776_v25  ;;  %v11424_v25 = vld [vmem:[%s14622_s4 + $0x158] sm:$0xff]  ;;  %v6959_v20 = vpack.c.bf16 %v6928_v27, %v6928_v27  ;;  %v6874_v12 = vld [vmem:[#allocation4 + $0x109] ss:$2 sm:$0xff]  ;;  %v6899_v6 = vpack.c.bf16 %v6872_v1, %v6872_v1 }
 0x7a7   :  { %8269 = vmatmul.bf16.gmra.mxu2 %v10416_v9  ;;  %6793 = vst [vmem:[#allocation5 + $0x14c] sm:$0xf] %v6777_v58  ;;  %v11408_v19 = vld [vmem:[%s14622_s4 + $0xd8] sm:$0xff]  ;;  %v6896_v58 = vpack.c.bf16 %v6866_v56, %v6866_v56  ;;  %8456 = vmatpush.bf16.msra.mxu3 %v11424_v25  ;;  %v6870_v9 = vld [vmem:[#allocation4 + $0xa9] ss:$2 sm:$0xff] }
 0x7a8   :  { %6666 = vst [vmem:[#allocation5 + $0x168] sm:$0xf] %v6650_v53  ;;  %8358 = vmatpush.bf16.msra.mxu1 %v11408_v19  ;;  %v6833_v53 = vpack.c.bf16 %v6804_v8, %v6804_v8  ;;  %v6808_v45 = vld [vmem:[#allocation4 + $0xd8] ss:$2 sm:$0xff]  ;;  %v6814_v39 = vld [vmem:[#allocation4 + $0x168] ss:$2 sm:$0xff] }
 0x7a9   :  { %8318 = vmatmul.bf16.gmra.mxu3 %v10420_v38  ;;  %6667 = vst [vmem:[#allocation5 + $0x18c] sm:$0xf] %v6651_v23  ;;  %v6834_v23 = vpack.c.bf16 %v6806_v24, %v6806_v24  ;;  %v10483_v38 = vld [vmem:[#allocation5 + $0xd8] sm:$0xf]  ;;  %v11336_v0 = vld [vmem:[#allocation5 + $0xdc] sm:$0xf] }
 0x7aa   :  { %6730 = vst [vmem:[#allocation5 + $0x16c] sm:$0xf] %v6714_v44  ;;  %v6897_v44 = vpack.c.bf16 %v6868_v61, %v6868_v61  ;;  %v10491_v11 = vld [vmem:[#allocation5 + $0xe0] sm:$0xf]  ;;  %v6878_v18 = vld [vmem:[#allocation4 + $0x169] ss:$2 sm:$0xff] }
 0x7ab   :  { %6731 = vst [vmem:[#allocation5 + $0x190] sm:$0xf] %v6715_v30  ;;  %v6898_v30 = vpack.c.bf16 %v6870_v9, %v6870_v9  ;;  %v6936_v57 = vld [vmem:[#allocation4 + $0xda] ss:$2 sm:$0xff]  ;;  %v11415_v22 = vld [vmem:[%s14622_s4 + $0x110] sm:$0xff]  ;;  %v6902_v7 = vpack.c.bf16 %v6878_v18, %v6878_v18 }
 0x7ac   :  { %6794 = vst [vmem:[#allocation5 + $0x170] sm:$0xf] %v6778_v4  ;;  %v11340_v4 = vld [vmem:[#allocation5 + $0xf8] sm:$0xf0]  ;;  %v6963_v15 = vpack.c.bf16 %v6936_v57, %v6936_v57  ;;  %v6942_v26 = vld [vmem:[#allocation4 + $0x16a] ss:$2 sm:$0xff]  ;;  %8408 = vmatpush.bf16.msra.mxu2 %v11415_v22 }
 0x7ad   :  { %6795 = vst [vmem:[#allocation5 + $0x194] sm:$0xf] %v6779_v2  ;;  %v10485_v2 = vld [vmem:[#allocation5 + $0xfc] sm:$0xf0]  ;;  %v6816_v50 = vld [vmem:[#allocation4 + $0x1c8] ss:$2 sm:$0xff] }
 0x7ae   :  { %6668 = vst [vmem:[#allocation5 + $0x1b0] sm:$0xf] %v6652_v13  ;;  %v6835_v13 = vpack.c.bf16 %v6808_v45, %v6808_v45  ;;  %v10488_v29 = vor.u32 %v11336_v0, %v10485_v2  ;;  %v6812_v33 = vld [vmem:[#allocation4 + $0x138] ss:$2 sm:$0xff]  ;;  %v6882_v56 = vld [vmem:[#allocation4 + $0x1f9] ss:$2 sm:$0xff] }
 0x7af   :  { %6669 = vst [vmem:[#allocation5 + $0x1d4] sm:$0xf] %v6653_v3  ;;  %v10484_v3 = vor.u32 %v11340_v4, %v10483_v38  ;;  %v6837_v43 = vpack.c.bf16 %v6812_v33, %v6812_v33  ;;  %v6940_v16 = vld [vmem:[#allocation4 + $0x13a] ss:$2 sm:$0xff]  ;;  %v6944_v27 = vld [vmem:[#allocation4 + $0x1ca] ss:$2 sm:$0xff]  ;;  %v6904_v25 = vpack.c.bf16 %v6882_v56, %v6882_v56 }
 0x7b0   :  { %6732 = vst [vmem:[#allocation5 + $0x1b4] sm:$0xf] %v6716_v52  ;;  %v6836_v52 = vpack.c.bf16 %v6810_v42, %v6810_v42  ;;  %v6946_v8 = vld [vmem:[#allocation4 + $0x1fa] ss:$2 sm:$0xff]  ;;  %v6884_v9 = vld [vmem:[#allocation4 + $0x229] ss:$2 sm:$0xff] }
 0x7b1   :  { %6733 = vst [vmem:[#allocation5 + $0x1d8] sm:$0xf] %v6717_v62  ;;  %v11341_v62 = vld [vmem:[#allocation5 + $0x100] sm:$0xf0]  ;;  %v6820_v19 = vld [vmem:[#allocation4 + $0x228] ss:$2 sm:$0xff]  ;;  %v6905_v45 = vpack.c.bf16 %v6884_v9, %v6884_v9 }
 0x7b2   :  { %6796 = vst [vmem:[#allocation5 + $0x1b8] sm:$0xf] %v6780_v31  ;;  %v6938_v31 = vld [vmem:[#allocation4 + $0x10a] ss:$2 sm:$0xff]  ;;  %v10492_v32 = vor.u32 %v11341_v62, %v10491_v11  ;;  %v11345_v46 = vld [vmem:[#allocation5 + $0x124] sm:$0xf]  ;;  %v6841_v28 = vpack.c.bf16 %v6820_v19, %v6820_v19 }
 0x7b3   :  { %6797 = vst [vmem:[#allocation5 + $0x1dc] sm:$0xf] %v6781_v17  ;;  %v6900_v17 = vpack.c.bf16 %v6874_v12, %v6874_v12  ;;  %v6822_v24 = vld [vmem:[#allocation4 + $0x258] ss:$2 sm:$0xff]  ;;  %v10527_v61 = vld [vmem:[#allocation5 + $0x128] sm:$0xf] }
 0x7b4   :  { %6670 = vst [vmem:[#allocation5 + $0x1f8] sm:$0xf] %v6654_v5  ;;  %v6964_v5 = vpack.c.bf16 %v6938_v31, %v6938_v31  ;;  %v6842_v38 = vpack.c.bf16 %v6822_v24, %v6822_v24  ;;  %v6950_v4 = vld [vmem:[#allocation4 + $0x25a] ss:$2 sm:$0xff]  ;;  %v6888_v2 = vld [vmem:[#allocation4 + $0x289] ss:$2 sm:$0xff] }
 0x7b5   :  { %8225 = vmatmul.bf16.gmra.mxu1 %v10448_v14  ;;  %6671 = vst [vmem:[#allocation5 + $0x21c] sm:$0xf] %v6655_v35  ;;  %v6876_v35 = vld [vmem:[#allocation4 + $0x139] ss:$2 sm:$0xff]  ;;  %v11407_v14 = vld [vmem:[%s14622_s4 + $0xd0] sm:$0xff]  ;;  %v11422_v12 = vld [vmem:[%s14622_s4 + $0x148] sm:$0xff]  ;;  %v6970_v11 = vpack.c.bf16 %v6950_v4, %v6950_v4  ;;  %v6907_v31 = vpack.c.bf16 %v6888_v2, %v6888_v2 }
 0x7b6   :  { %6734 = vst [vmem:[#allocation5 + $0x1fc] sm:$0xf] %v6718_v48  ;;  %v11423_v48 = vld [vmem:[%s14622_s4 + $0x150] sm:$0xff]  ;;  %v6901_v63 = vpack.c.bf16 %v6876_v35, %v6876_v35  ;;  %8359 = vmatpush.bf16.msra.mxu1 %v11407_v14  ;;  %v6826_v1 = vld [vmem:[#allocation4 + $0x2b8] ss:$2 sm:$0xff] }
 0x7b7   :  { %8274 = vmatmul.bf16.gmra.mxu2 %v10452_v49  ;;  %6735 = vst [vmem:[#allocation5 + $0x220] sm:$0xf] %v6719_v36  ;;  %v6838_v36 = vpack.c.bf16 %v6814_v39, %v6814_v39  ;;  %8457 = vmatpush.bf16.msra.mxu3 %v11423_v48  ;;  %v6818_v49 = vld [vmem:[#allocation4 + $0x1f8] ss:$2 sm:$0xff]  ;;  %v6824_v0 = vld [vmem:[#allocation4 + $0x288] ss:$2 sm:$0xff]  ;;  %v6844_v62 = vpack.c.bf16 %v6826_v1, %v6826_v1 }
 0x7b8   :  { %6798 = vst [vmem:[#allocation5 + $0x200] sm:$0xf] %v6782_v34  ;;  %v6965_v34 = vpack.c.bf16 %v6940_v16, %v6940_v16  ;;  %v6890_v57 = vld [vmem:[#allocation4 + $0x2b9] ss:$2 sm:$0xff]  ;;  %v6828_v33 = vld [vmem:[#allocation4 + $0x2e8] ss:$2 sm:$0xff] }
 0x7b9   :  { %8323 = vmatmul.bf16.gmra.mxu3 %v10456_v54  ;;  %6799 = vst [vmem:[#allocation5 + $0x224] sm:$0xf] %v6783_v10  ;;  %v6966_v10 = vpack.c.bf16 %v6942_v26, %v6942_v26  ;;  %v10519_v54 = vld [vmem:[#allocation5 + $0x120] sm:$0xf]  ;;  %v6892_v35 = vld [vmem:[#allocation4 + $0x2e9] ss:$2 sm:$0xff]  ;;  %v6845_v18 = vpack.c.bf16 %v6828_v33, %v6828_v33 }
 0x7ba   :  { %6847 = vst [vmem:[#allocation5 + $0xc] sm:$0xf] %v6831_v40  ;;  %v6839_v40 = vpack.c.bf16 %v6816_v50, %v6816_v50  ;;  %v6830_v39 = vld [vmem:[#allocation4 + $0x318] ss:$2 sm:$0xff]  ;;  %v6894_v16 = vld [vmem:[#allocation4 + $0x319] ss:$2 sm:$0xff] }
 0x7bb   :  { %6848 = vst [vmem:[#allocation5 + $0x30] sm:$0xf] %v6832_v37  ;;  %v6840_v37 = vpack.c.bf16 %v6818_v49, %v6818_v49  ;;  %8458 = vmatpush.bf16.msra.mxu3 %v11422_v12  ;;  %v11354_v22 = vld [vmem:[#allocation5 + $0x16c] sm:$0xf]  ;;  %v6846_v48 = vpack.c.bf16 %v6830_v39, %v6830_v39  ;;  %v6958_v26 = vld [vmem:[#allocation4 + $0x31a] ss:$2 sm:$0xff] }
 0x7bc   :  { %6911 = vst [vmem:[#allocation5 + $0x10] sm:$0xf] %v6895_v41  ;;  %v11349_v41 = vld [vmem:[#allocation5 + $0x140] sm:$0xf0]  ;;  %v6956_v14 = vld [vmem:[#allocation4 + $0x2ea] ss:$2 sm:$0xff] }
 0x7bd   :  { %6912 = vst [vmem:[#allocation5 + $0x34] sm:$0xf] %v6896_v58  ;;  %v10521_v58 = vld [vmem:[#allocation5 + $0x144] sm:$0xf0]  ;;  %v10563_v50 = vld [vmem:[#allocation5 + $0x170] sm:$0xf]  ;;  %v6973_v47 = vpack.c.bf16 %v6956_v14, %v6956_v14 }
 0x7be   :  { %6975 = vst [vmem:[#allocation5 + $0x14] sm:$0xf] %v6959_v20  ;;  %v6967_v20 = vpack.c.bf16 %v6944_v27, %v6944_v27  ;;  %v10524_v21 = vor.u32 %v11345_v46, %v10521_v58  ;;  %v6992_v49 = vld [vmem:[#allocation4 + $0x30] ss:$2 sm:$0xff]  ;;  %v11421_v24 = vld [vmem:[%s14622_s4 + $0x140] sm:$0xff] }
 0x7bf   :  { %6976 = vst [vmem:[#allocation5 + $0x38] sm:$0xf] %v6960_v59  ;;  %v10520_v59 = vor.u32 %v11349_v41, %v10519_v54  ;;  %v6974_v54 = vpack.c.bf16 %v6958_v26, %v6958_v26  ;;  %v7023_v27 = vpack.c.bf16 %v6992_v49, %v6992_v49  ;;  %v7058_v41 = vld [vmem:[#allocation4 + $0x61] ss:$2 sm:$0xff]  ;;  %v7120_v46 = vld [vmem:[#allocation4 + $0x32] ss:$2 sm:$0xff]  ;;  %8459 = vmatpush.bf16.msra.mxu3 %v11421_v24 }
 0x7c0   :  { %6849 = vst [vmem:[#allocation5 + $0x54] sm:$0xf] %v6833_v53  ;;  %v6968_v53 = vpack.c.bf16 %v6946_v8, %v6946_v8  ;;  %v7122_v19 = vld [vmem:[#allocation4 + $0x62] ss:$2 sm:$0xff]  ;;  %v7070_v14 = vld [vmem:[#allocation4 + $0x181] ss:$2 sm:$0xff] }
 0x7c1   :  { %6850 = vst [vmem:[#allocation5 + $0x78] sm:$0xf] %v6834_v23  ;;  %v11350_v23 = vld [vmem:[#allocation5 + $0x148] sm:$0xf0]  ;;  %v6996_v58 = vld [vmem:[#allocation4 + $0x90] ss:$2 sm:$0xff]  ;;  %v7094_v49 = vpack.c.bf16 %v7070_v14, %v7070_v14 }
 0x7c2   :  { %6913 = vst [vmem:[#allocation5 + $0x58] sm:$0xf] %v6897_v44  ;;  %v6886_v44 = vld [vmem:[#allocation4 + $0x259] ss:$2 sm:$0xff]  ;;  %v6998_v9 = vld [vmem:[#allocation4 + $0xc0] ss:$2 sm:$0xff] }
 0x7c3   :  { %6914 = vst [vmem:[#allocation5 + $0x7c] sm:$0xf] %v6898_v30  ;;  %v6948_v30 = vld [vmem:[#allocation4 + $0x22a] ss:$2 sm:$0xff]  ;;  %v6906_v42 = vpack.c.bf16 %v6886_v44, %v6886_v44  ;;  %v7025_v44 = vpack.c.bf16 %v6996_v58, %v6996_v58 }
 0x7c4   :  { %6977 = vst [vmem:[#allocation5 + $0x5c] sm:$0xf] %v6961_v55  ;;  %v10528_v55 = vor.u32 %v11350_v23, %v10527_v61  ;;  %v7088_v61 = vpack.c.bf16 %v7058_v41, %v7058_v41  ;;  %v7152_v23 = vpack.c.bf16 %v7122_v19, %v7122_v19  ;;  %v7126_v4 = vld [vmem:[#allocation4 + $0xc2] ss:$2 sm:$0xff]  ;;  %v7074_v41 = vld [vmem:[#allocation4 + $0x211] ss:$2 sm:$0xff] }
 0x7c5   :  { %8230 = vmatmul.bf16.gmra.mxu1 %v10484_v3  ;;  %6978 = vst [vmem:[#allocation5 + $0x80] sm:$0xf] %v6962_v60  ;;  %v6969_v60 = vpack.c.bf16 %v6948_v30, %v6948_v30  ;;  %v11406_v3 = vld [vmem:[%s14622_s4 + $0xc8] sm:$0xff]  ;;  %v7124_v30 = vld [vmem:[#allocation4 + $0x92] ss:$2 sm:$0xff]  ;;  %v7154_v12 = vpack.c.bf16 %v7126_v4, %v7126_v4  ;;  %v7096_v24 = vpack.c.bf16 %v7074_v41, %v7074_v41 }
 0x7c6   :  { %6851 = vst [vmem:[#allocation5 + $0x9c] sm:$0xf] %v6835_v13  ;;  %v11414_v13 = vld [vmem:[%s14622_s4 + $0x108] sm:$0xff]  ;;  %8360 = vmatpush.bf16.msra.mxu1 %v11406_v3  ;;  %v7153_v1 = vpack.c.bf16 %v7124_v30, %v7124_v30  ;;  %v7064_v3 = vld [vmem:[#allocation4 + $0xf1] ss:$2 sm:$0xff] }
 0x7c7   :  { %8279 = vmatmul.bf16.gmra.mxu2 %v10488_v29  ;;  %6852 = vst [vmem:[#allocation5 + $0xc0] sm:$0xf] %v6836_v52  ;;  %v6843_v52 = vpack.c.bf16 %v6824_v0, %v6824_v0  ;;  %v6954_v29 = vld [vmem:[#allocation4 + $0x2ba] ss:$2 sm:$0xff]  ;;  %v7091_v33 = vpack.c.bf16 %v7064_v3, %v7064_v3 }
 0x7c8   :  { %6915 = vst [vmem:[#allocation5 + $0xa0] sm:$0xf] %v6899_v6  ;;  %8409 = vmatpush.bf16.msra.mxu2 %v11414_v13  ;;  %v6952_v6 = vld [vmem:[#allocation4 + $0x28a] ss:$2 sm:$0xff] }
 0x7c9   :  { %8328 = vmatmul.bf16.gmra.mxu3 %v10492_v32  ;;  %6916 = vst [vmem:[#allocation5 + $0xc4] sm:$0xf] %v6900_v17  ;;  %v6908_v17 = vpack.c.bf16 %v6890_v57, %v6890_v57  ;;  %v10555_v32 = vld [vmem:[#allocation5 + $0x168] sm:$0xf]  ;;  %v7000_v0 = vld [vmem:[#allocation4 + $0xf0] ss:$2 sm:$0xff] }
 0x7ca   :  { %6979 = vst [vmem:[#allocation5 + $0xa4] sm:$0xf] %v6963_v15  ;;  %v6971_v15 = vpack.c.bf16 %v6952_v6, %v6952_v6  ;;  %v7002_v2 = vld [vmem:[#allocation4 + $0x120] ss:$2 sm:$0xff]  ;;  %v11363_v13 = vld [vmem:[#allocation5 + $0x1b4] sm:$0xf] }
 0x7cb   :  { %6980 = vst [vmem:[#allocation5 + $0xc8] sm:$0xf] %v6964_v5  ;;  %v6972_v5 = vpack.c.bf16 %v6954_v29, %v6954_v29  ;;  %v7066_v57 = vld [vmem:[#allocation4 + $0x121] ss:$2 sm:$0xff]  ;;  %v10599_v6 = vld [vmem:[#allocation5 + $0x1b8] sm:$0xf] }
 0x7cc   :  { %6853 = vst [vmem:[#allocation5 + $0xe4] sm:$0xf] %v6837_v43  ;;  %v11358_v43 = vld [vmem:[#allocation5 + $0x188] sm:$0xf0]  ;;  %v7128_v29 = vld [vmem:[#allocation4 + $0xf2] ss:$2 sm:$0xff] }
 0x7cd   :  { %6854 = vst [vmem:[#allocation5 + $0x108] sm:$0xf] %v6838_v36  ;;  %v10557_v36 = vld [vmem:[#allocation5 + $0x18c] sm:$0xf0] }
 0x7ce   :  { %6917 = vst [vmem:[#allocation5 + $0xe8] sm:$0xf] %v6901_v63  ;;  %v6909_v63 = vpack.c.bf16 %v6892_v35, %v6892_v35  ;;  %v10560_v56 = vor.u32 %v11354_v22, %v10557_v36  ;;  %v7155_v35 = vpack.c.bf16 %v7128_v29, %v7128_v29  ;;  %v7068_v22 = vld [vmem:[#allocation4 + $0x151] ss:$2 sm:$0xff]  ;;  %v7138_v58 = vld [vmem:[#allocation4 + $0x212] ss:$2 sm:$0xff] }
 0x7cf   :  { %6918 = vst [vmem:[#allocation5 + $0x10c] sm:$0xf] %v6902_v7  ;;  %v10556_v7 = vor.u32 %v11358_v43, %v10555_v32  ;;  %v7092_v32 = vpack.c.bf16 %v7066_v57, %v7066_v57  ;;  %v7006_v43 = vld [vmem:[#allocation4 + $0x180] ss:$2 sm:$0xff]  ;;  %v11444_v36 = vld [vmem:[%s14622_s4 + $0x1f8] sm:$0xff] }
 0x7d0   :  { %6981 = vst [vmem:[#allocation5 + $0xec] sm:$0xf] %v6965_v34  ;;  %v6910_v34 = vpack.c.bf16 %v6894_v16, %v6894_v16  ;;  %v7030_v26 = vpack.c.bf16 %v7006_v43, %v7006_v43  ;;  %v7018_v3 = vld [vmem:[#allocation4 + $0x2d0] ss:$2 sm:$0xff] }
 0x7d1   :  { %6982 = vst [vmem:[#allocation5 + $0x110] sm:$0xf] %v6966_v10  ;;  %v11359_v10 = vld [vmem:[#allocation5 + $0x190] sm:$0xf0]  ;;  %v7036_v29 = vpack.c.bf16 %v7018_v3, %v7018_v3 }
 0x7d2   :  { %6855 = vst [vmem:[#allocation5 + $0x12c] sm:$0xf] %v6839_v40  ;;  %v6994_v40 = vld [vmem:[#allocation4 + $0x60] ss:$2 sm:$0xff]  ;;  %v7022_v43 = vld [vmem:[#allocation4 + $0x330] ss:$2 sm:$0xff] }
 0x7d3   :  { %6856 = vst [vmem:[#allocation5 + $0x150] sm:$0xf] %v6840_v37  ;;  %v7056_v37 = vld [vmem:[#allocation4 + $0x31] ss:$2 sm:$0xff]  ;;  %v7024_v8 = vpack.c.bf16 %v6994_v40, %v6994_v40  ;;  %v7010_v40 = vld [vmem:[#allocation4 + $0x210] ss:$2 sm:$0xff] }
 0x7d4   :  { %6919 = vst [vmem:[#allocation5 + $0x130] sm:$0xf] %v6903_v51  ;;  %v10564_v51 = vor.u32 %v11359_v10, %v10563_v50  ;;  %v7093_v50 = vpack.c.bf16 %v7068_v22, %v7068_v22  ;;  %v7008_v10 = vld [vmem:[#allocation4 + $0x1e0] ss:$2 sm:$0xff]  ;;  %v7084_v22 = vld [vmem:[#allocation4 + $0x301] ss:$2 sm:$0xff] }
 0x7d5   :  { %8235 = vmatmul.bf16.gmra.mxu1 %v10520_v59  ;;  %6920 = vst [vmem:[#allocation5 + $0x154] sm:$0xf] %v6904_v25  ;;  %v7087_v25 = vpack.c.bf16 %v7056_v37, %v7056_v37  ;;  %v11405_v59 = vld [vmem:[%s14622_s4 + $0xc0] sm:$0xff] }
 0x7d6   :  { %6983 = vst [vmem:[#allocation5 + $0x134] sm:$0xf] %v6967_v20  ;;  %v11413_v20 = vld [vmem:[%s14622_s4 + $0x100] sm:$0xff]  ;;  %8361 = vmatpush.bf16.msra.mxu1 %v11405_v59 }
 0x7d7   :  { %8284 = vmatmul.bf16.gmra.mxu2 %v10524_v21  ;;  %6984 = vst [vmem:[#allocation5 + $0x158] sm:$0xf] %v6968_v53  ;;  %v7151_v53 = vpack.c.bf16 %v7120_v46, %v7120_v46  ;;  %v7062_v21 = vld [vmem:[#allocation4 + $0xc1] ss:$2 sm:$0xff]  ;;  %v7136_v46 = vld [vmem:[#allocation4 + $0x1e2] ss:$2 sm:$0xff] }
 0x7d8   :  { %6857 = vst [vmem:[#allocation5 + $0x174] sm:$0xf] %v6841_v28  ;;  %8410 = vmatpush.bf16.msra.mxu2 %v11413_v20  ;;  %v7060_v28 = vld [vmem:[#allocation4 + $0x91] ss:$2 sm:$0xff]  ;;  %v7072_v37 = vld [vmem:[#allocation4 + $0x1e1] ss:$2 sm:$0xff] }
 0x7d9   :  { %8333 = vmatmul.bf16.gmra.mxu3 %v10528_v55  ;;  %6858 = vst [vmem:[#allocation5 + $0x198] sm:$0xf] %v6842_v38  ;;  %v7026_v38 = vpack.c.bf16 %v6998_v9, %v6998_v9  ;;  %v10591_v55 = vld [vmem:[#allocation5 + $0x1b0] sm:$0xf]  ;;  %v7095_v19 = vpack.c.bf16 %v7072_v37, %v7072_v37  ;;  %v11372_v20 = vld [vmem:[#allocation5 + $0x1fc] sm:$0xf] }
 0x7da   :  { %6921 = vst [vmem:[#allocation5 + $0x178] sm:$0xf] %v6905_v45  ;;  %v7089_v45 = vpack.c.bf16 %v7060_v28, %v7060_v28  ;;  %v7012_v59 = vld [vmem:[#allocation4 + $0x240] ss:$2 sm:$0xff]  ;;  %v7014_v9 = vld [vmem:[#allocation4 + $0x270] ss:$2 sm:$0xff] }
 0x7db   :  { %6922 = vst [vmem:[#allocation5 + $0x19c] sm:$0xf] %v6906_v42  ;;  %v7090_v42 = vpack.c.bf16 %v7062_v21, %v7062_v21  ;;  %v10635_v28 = vld [vmem:[#allocation5 + $0x200] sm:$0xf]  ;;  %v7033_v30 = vpack.c.bf16 %v7012_v59, %v7012_v59  ;;  %v11434_v59 = vld [vmem:[%s14622_s4 + $0x1a8] sm:$0xff] }
 0x7dc   :  { %6985 = vst [vmem:[#allocation5 + $0x17c] sm:$0xf] %v6969_v60  ;;  %v11367_v60 = vld [vmem:[#allocation5 + $0x1d0] sm:$0xf0]  ;;  %8550 = vmatpush.bf16.msrb.mxu2 %v11444_v36  ;;  %v7076_v21 = vld [vmem:[#allocation4 + $0x241] ss:$2 sm:$0xff] }
 0x7dd   :  { %6986 = vst [vmem:[#allocation5 + $0x1a0] sm:$0xf] %v6970_v11  ;;  %v10593_v11 = vld [vmem:[#allocation5 + $0x1d4] sm:$0xf0] }
 0x7de   :  { %6859 = vst [vmem:[#allocation5 + $0x1bc] sm:$0xf] %v6843_v52  ;;  %v7027_v52 = vpack.c.bf16 %v7000_v0, %v7000_v0  ;;  %v10596_v39 = vor.u32 %v11363_v13, %v10593_v11  ;;  %v7097_v0 = vpack.c.bf16 %v7076_v21, %v7076_v21  ;;  %v7016_v13 = vld [vmem:[#allocation4 + $0x2a0] ss:$2 sm:$0xff]  ;;  %v11443_v11 = vld [vmem:[%s14622_s4 + $0x1f0] sm:$0xff] }
 0x7df   :  { %6860 = vst [vmem:[#allocation5 + $0x1e0] sm:$0xf] %v6844_v62  ;;  %v10592_v62 = vor.u32 %v11367_v60, %v10591_v55  ;;  %v7034_v55 = vpack.c.bf16 %v7014_v9, %v7014_v9  ;;  %v7142_v60 = vld [vmem:[#allocation4 + $0x272] ss:$2 sm:$0xff]  ;;  %v7086_v36 = vld [vmem:[#allocation4 + $0x331] ss:$2 sm:$0xff] }
 0x7e0   :  { %6923 = vst [vmem:[#allocation5 + $0x1c0] sm:$0xf] %v6907_v31  ;;  %v7028_v31 = vpack.c.bf16 %v7002_v2, %v7002_v2  ;;  %v7162_v57 = vpack.c.bf16 %v7142_v60, %v7142_v60  ;;  %8551 = vmatpush.bf16.msrb.mxu2 %v11443_v11  ;;  %v11441_v60 = vld [vmem:[%s14622_s4 + $0x1e0] sm:$0xff] }
 0x7e1   :  { %6924 = vst [vmem:[#allocation5 + $0x1e4] sm:$0xf] %v6908_v17  ;;  %v11368_v17 = vld [vmem:[#allocation5 + $0x1d8] sm:$0xf0] }
 0x7e2   :  { %6987 = vst [vmem:[#allocation5 + $0x1c4] sm:$0xf] %v6971_v15  ;;  %v7130_v15 = vld [vmem:[#allocation4 + $0x122] ss:$2 sm:$0xff] }
 0x7e3   :  { %6988 = vst [vmem:[#allocation5 + $0x1e8] sm:$0xf] %v6972_v5  ;;  %v7004_v5 = vld [vmem:[#allocation4 + $0x150] ss:$2 sm:$0xff]  ;;  %v7156_v16 = vpack.c.bf16 %v7130_v15, %v7130_v15 }
 0x7e4   :  { %6861 = vst [vmem:[#allocation5 + $0x204] sm:$0xf] %v6845_v18  ;;  %v10600_v18 = vor.u32 %v11368_v17, %v10599_v6  ;;  %v7035_v6 = vpack.c.bf16 %v7016_v13, %v7016_v13  ;;  %v7144_v17 = vld [vmem:[#allocation4 + $0x2a2] ss:$2 sm:$0xff]  ;;  %v7146_v15 = vld [vmem:[#allocation4 + $0x2d2] ss:$2 sm:$0xff] }
 0x7e5   :  { %8240 = vmatmul.bf16.gmra.mxu1 %v10556_v7  ;;  %6862 = vst [vmem:[#allocation5 + $0x228] sm:$0xf] %v6846_v48  ;;  %v7029_v48 = vpack.c.bf16 %v7004_v5, %v7004_v5  ;;  %v7132_v7 = vld [vmem:[#allocation4 + $0x152] ss:$2 sm:$0xff] }
 0x7e6   :  { %6925 = vst [vmem:[#allocation5 + $0x208] sm:$0xf] %v6909_v63  ;;  %v11452_v63 = vld [vmem:[%s14622_s4 + $0x238] sm:$0xff]  ;;  %v7020_v5 = vld [vmem:[#allocation4 + $0x300] ss:$2 sm:$0xff] }
 0x7e7   :  { %8289 = vmatmul.bf16.gmra.mxu2 %v10560_v56  ;;  %6926 = vst [vmem:[#allocation5 + $0x22c] sm:$0xf] %v6910_v34  ;;  %v7134_v34 = vld [vmem:[#allocation4 + $0x182] ss:$2 sm:$0xff]  ;;  %8599 = vmatpush.bf16.msrb.mxu3 %v11452_v63  ;;  %v11436_v56 = vld [vmem:[%s14622_s4 + $0x1b8] sm:$0xff]  ;;  %v7037_v14 = vpack.c.bf16 %v7020_v5, %v7020_v5 }
 0x7e8   :  { %6989 = vst [vmem:[#allocation5 + $0x20c] sm:$0xf] %v6973_v47  ;;  %v7157_v47 = vpack.c.bf16 %v7132_v7, %v7132_v7  ;;  %8501 = vmatpush.bf16.msrb.mxu1 %v11436_v56  ;;  %v10391_v63 = vld [vmem:[#allocation5 + $0x10] sm:$0xf]  ;;  %v11311_v56 = vld [vmem:[#allocation5 + $0x14] sm:$0xf] }
 0x7e9   :  { %8338 = vmatmul.bf16.gmra.mxu3 %v10564_v51  ;;  %6990 = vst [vmem:[#allocation5 + $0x230] sm:$0xf] %v6974_v54  ;;  %v7158_v54 = vpack.c.bf16 %v7134_v34, %v7134_v34  ;;  %v10627_v51 = vld [vmem:[#allocation5 + $0x1f8] sm:$0xf]  ;;  %v7148_v7 = vld [vmem:[#allocation4 + $0x302] ss:$2 sm:$0xff] }
 0x7ea   :  { %7039 = vst [vmem:[#allocation5 + $0x18] sm:$0xf] %v7023_v27  ;;  %v7031_v27 = vpack.c.bf16 %v7008_v10, %v7008_v10  ;;  %v11315_v34 = vld [vmem:[#allocation5 + $0x30] sm:$0xf0]  ;;  %v7165_v37 = vpack.c.bf16 %v7148_v7, %v7148_v7  ;;  %v10465_v5 = vld [vmem:[#allocation5 + $0xc4] sm:$0xf0] }
 0x7eb   :  { %7040 = vst [vmem:[#allocation5 + $0x3c] sm:$0xf] %v7024_v8  ;;  %v7032_v8 = vpack.c.bf16 %v7010_v40, %v7010_v40  ;;  %v7150_v10 = vld [vmem:[#allocation4 + $0x332] ss:$2 sm:$0xff]  ;;  %v7102_v40 = vpack.c.bf16 %v7086_v36, %v7086_v36 }
 0x7ec   :  { %7103 = vst [vmem:[#allocation5 + $0x1c] sm:$0xf] %v7087_v25  ;;  %v11376_v25 = vld [vmem:[#allocation5 + $0x218] sm:$0xf0]  ;;  %v7166_v41 = vpack.c.bf16 %v7150_v10, %v7150_v10 }
 0x7ed   :  { %7104 = vst [vmem:[#allocation5 + $0x40] sm:$0xf] %v7088_v61  ;;  %v10629_v61 = vld [vmem:[#allocation5 + $0x21c] sm:$0xf0]  ;;  %v11432_v7 = vld [vmem:[%s14622_s4 + $0x198] sm:$0xff] }
 0x7ee   :  { %7167 = vst [vmem:[#allocation5 + $0x20] sm:$0xf] %v7151_v53  ;;  %v7159_v53 = vpack.c.bf16 %v7136_v46, %v7136_v46  ;;  %v10632_v4 = vor.u32 %v11372_v20, %v10629_v61  ;;  %v11450_v46 = vld [vmem:[%s14622_s4 + $0x228] sm:$0xff]  ;;  %v11319_v61 = vld [vmem:[#allocation5 + $0x54] sm:$0xf] }
 0x7ef   :  { %7168 = vst [vmem:[#allocation5 + $0x44] sm:$0xf] %v7152_v23  ;;  %v10628_v23 = vor.u32 %v11376_v25, %v10627_v51 }
 0x7f0   :  { %7041 = vst [vmem:[#allocation5 + $0x60] sm:$0xf] %v7025_v44  ;;  %v7160_v44 = vpack.c.bf16 %v7138_v58, %v7138_v58 }
 0x7f1   :  { %7042 = vst [vmem:[#allocation5 + $0x84] sm:$0xf] %v7026_v38  ;;  %v11377_v38 = vld [vmem:[#allocation5 + $0x220] sm:$0xf0] }
 0x7f2   :  { %7105 = vst [vmem:[#allocation5 + $0x64] sm:$0xf] %v7089_v45  ;;  %v7078_v45 = vld [vmem:[#allocation4 + $0x271] ss:$2 sm:$0xff] }
 0x7f3   :  { %7106 = vst [vmem:[#allocation5 + $0x88] sm:$0xf] %v7090_v42  ;;  %v7140_v42 = vld [vmem:[#allocation4 + $0x242] ss:$2 sm:$0xff]  ;;  %v7098_v2 = vpack.c.bf16 %v7078_v45, %v7078_v45  ;;  %v11320_v45 = vld [vmem:[#allocation5 + $0x5c] sm:$0xf] }
 0x7f4   :  { %7169 = vst [vmem:[#allocation5 + $0x68] sm:$0xf] %v7153_v1  ;;  %v10636_v1 = vor.u32 %v11377_v38, %v10635_v28  ;;  %v10427_v28 = vld [vmem:[#allocation5 + $0x58] sm:$0xf] }
 0x7f5   :  { %8245 = vmatmul.bf16.gmra.mxu1 %v10592_v62  ;;  %7170 = vst [vmem:[#allocation5 + $0x8c] sm:$0xf] %v7154_v12  ;;  %v7161_v12 = vpack.c.bf16 %v7140_v42, %v7140_v42  ;;  %v7080_v62 = vld [vmem:[#allocation4 + $0x2a1] ss:$2 sm:$0xff] }
 0x7f6   :  { %7043 = vst [vmem:[#allocation5 + $0xa8] sm:$0xf] %v7027_v52  ;;  %v11451_v52 = vld [vmem:[%s14622_s4 + $0x230] sm:$0xff] }
 0x7f7   :  { %8294 = vmatmul.bf16.gmra.mxu2 %v10596_v39  ;;  %7044 = vst [vmem:[#allocation5 + $0xcc] sm:$0xf] %v7028_v31  ;;  %v7082_v31 = vld [vmem:[#allocation4 + $0x2d1] ss:$2 sm:$0xff]  ;;  %8600 = vmatpush.bf16.msrb.mxu3 %v11451_v52  ;;  %v11433_v52 = vld [vmem:[%s14622_s4 + $0x1a0] sm:$0xff] }
 0x7f8   :  { %7107 = vst [vmem:[#allocation5 + $0xac] sm:$0xf] %v7091_v33  ;;  %v7099_v33 = vpack.c.bf16 %v7080_v62, %v7080_v62  ;;  %v11435_v39 = vld [vmem:[%s14622_s4 + $0x1b0] sm:$0xff]  ;;  %v10457_v62 = vld [vmem:[#allocation5 + $0xbc] sm:$0xf0] }
 0x7f9   :  { %8343 = vmatmul.bf16.gmra.mxu3 %v10600_v18  ;;  %7108 = vst [vmem:[#allocation5 + $0xd0] sm:$0xf] %v7092_v32  ;;  %v7100_v32 = vpack.c.bf16 %v7082_v31, %v7082_v31  ;;  %v11310_v18 = vld [vmem:[#allocation5 + $0xc] sm:$0xf]  ;;  %8502 = vmatpush.bf16.msrb.mxu1 %v11435_v39 }
 0x7fa   :  { %7171 = vst [vmem:[#allocation5 + $0xb0] sm:$0xf] %v7155_v35  ;;  %v7163_v35 = vpack.c.bf16 %v7144_v17, %v7144_v17  ;;  %v11333_v17 = vld [vmem:[#allocation5 + $0xc0] sm:$0xf0] }
 0x7fb   :  { %7172 = vst [vmem:[#allocation5 + $0xd4] sm:$0xf] %v7156_v16  ;;  %v7164_v16 = vpack.c.bf16 %v7146_v15, %v7146_v15  ;;  %8601 = vmatpush.bf16.msrb.mxu3 %v11450_v46 }
 0x7fc   :  { %7045 = vst [vmem:[#allocation5 + $0xf0] sm:$0xf] %v7029_v48  ;;  %v10385_v48 = vld [vmem:[#allocation5 + $0x2c] sm:$0xf0] }
 0x7fd   :  { %7046 = vst [vmem:[#allocation5 + $0x114] sm:$0xf] %v7030_v26  ;;  %v7038_v26 = vpack.c.bf16 %v7022_v43, %v7022_v43  ;;  %8503 = vmatpush.bf16.msrb.mxu1 %v11434_v59 }
 0x7fe   :  { %7109 = vst [vmem:[#allocation5 + $0xf4] sm:$0xf] %v7093_v50 }
 0x7ff   :  { %7110 = vst [vmem:[#allocation5 + $0x118] sm:$0xf] %v7094_v49  ;;  %v7101_v49 = vpack.c.bf16 %v7084_v22, %v7084_v22  ;;  %v11448_v22 = vld [vmem:[%s14622_s4 + $0x218] sm:$0xff] }
 0x800   :  { %7173 = vst [vmem:[#allocation5 + $0xf8] sm:$0xf] %v7157_v47  ;;  %v10388_v47 = vor.u32 %v11310_v18, %v10385_v48 }
 0x801   :  { %7174 = vst [vmem:[#allocation5 + $0x11c] sm:$0xf] %v7158_v54  ;;  %v10393_v54 = vld [vmem:[#allocation5 + $0x34] sm:$0xf0]  ;;  %8504 = vmatpush.bf16.msrb.mxu1 %v11433_v52 }
 0x802   :  { %7047 = vst [vmem:[#allocation5 + $0x138] sm:$0xf] %v7031_v27  ;;  %v10392_v27 = vor.u32 %v11315_v34, %v10391_v63  ;;  %v10396_v51 = vor.u32 %v11311_v56, %v10393_v54  ;;  %v10493_v34 = vld [vmem:[#allocation5 + $0x104] sm:$0xf0] }
 0x803   :  { %7048 = vst [vmem:[#allocation5 + $0x15c] sm:$0xf] %v7032_v8  ;;  %v11442_v8 = vld [vmem:[%s14622_s4 + $0x1e8] sm:$0xff] }
 0x804   :  { %7111 = vst [vmem:[#allocation5 + $0x13c] sm:$0xf] %v7095_v19  ;;  %8552 = vmatpush.bf16.msrb.mxu2 %v11442_v8 }
 0x805   :  { %8250 = vmatmul.bf16.gmra.mxu1 %v10628_v23  ;;  %7112 = vst [vmem:[#allocation5 + $0x160] sm:$0xf] %v7096_v24 }
 0x806   :  { %7175 = vst [vmem:[#allocation5 + $0x140] sm:$0xf] %v7159_v53  ;;  %v10421_v53 = vld [vmem:[#allocation5 + $0x74] sm:$0xf0]  ;;  %8505 = vmatpush.bf16.msrb.mxu1 %v11432_v7  ;;  %v11437_v7 = vld [vmem:[%s14622_s4 + $0x1c0] sm:$0xff] }
 0x807   :  { %8299 = vmatmul.bf16.gmra.mxu2 %v10632_v4  ;;  %7176 = vst [vmem:[#allocation5 + $0x164] sm:$0xf] %v7160_v44  ;;  %v11324_v44 = vld [vmem:[#allocation5 + $0x78] sm:$0xf0]  ;;  %v10424_v38 = vor.u32 %v11319_v61, %v10421_v53  ;;  %v10429_v4 = vld [vmem:[#allocation5 + $0x7c] sm:$0xf0] }
 0x808   :  { %7049 = vst [vmem:[#allocation5 + $0x180] sm:$0xf] %v7033_v30  ;;  %v10428_v42 = vor.u32 %v11324_v44, %v10427_v28  ;;  %8553 = vmatpush.bf16.msrb.mxu2 %v11441_v60  ;;  %v10529_v28 = vld [vmem:[#allocation5 + $0x14c] sm:$0xf0]  ;;  %v10537_v60 = vld [vmem:[#allocation5 + $0x154] sm:$0xf0] }
 0x809   :  { %8348 = vmatmul.bf16.gmra.mxu3 %v10636_v1  ;;  %7050 = vst [vmem:[#allocation5 + $0x1a4] sm:$0xf] %v7034_v55  ;;  %v11449_v1 = vld [vmem:[%s14622_s4 + $0x220] sm:$0xff] }
 0x80a   :  { %7113 = vst [vmem:[#allocation5 + $0x184] sm:$0xf] %v7097_v0  ;;  %v10432_v0 = vor.u32 %v11320_v45, %v10429_v4  ;;  %8602 = vmatpush.bf16.msrb.mxu3 %v11449_v1 }
 0x80b   :  { %7114 = vst [vmem:[#allocation5 + $0x1a8] sm:$0xf] %v7098_v2 }
 0x80c   :  { %7177 = vst [vmem:[#allocation5 + $0x188] sm:$0xf] %v7161_v12 }
 0x80d   :  { %7178 = vst [vmem:[#allocation5 + $0x1ac] sm:$0xf] %v7162_v57  ;;  %v11328_v57 = vld [vmem:[#allocation5 + $0x9c] sm:$0xf] }
 0x80e   :  { %7051 = vst [vmem:[#allocation5 + $0x1c8] sm:$0xf] %v7035_v6  ;;  %v10460_v15 = vor.u32 %v11328_v57, %v10457_v62  ;;  %8603 = vmatpush.bf16.msrb.mxu3 %v11448_v22  ;;  %v11356_v22 = vld [vmem:[#allocation5 + $0x17c] sm:$0xf] }
 0x80f   :  { %7052 = vst [vmem:[#allocation5 + $0x1ec] sm:$0xf] %v7036_v29  ;;  %v10463_v29 = vld [vmem:[#allocation5 + $0xa0] sm:$0xf] }
 0x810   :  { %7115 = vst [vmem:[#allocation5 + $0x1cc] sm:$0xf] %v7099_v33  ;;  %v10464_v43 = vor.u32 %v11333_v17, %v10463_v29  ;;  %v11430_v29 = vld [vmem:[%s14622_s4 + $0x188] sm:$0xff]  ;;  %v11355_v17 = vld [vmem:[#allocation5 + $0x174] sm:$0xf] }
 0x811   :  { %7116 = vst [vmem:[#allocation5 + $0x1f0] sm:$0xf] %v7100_v32  ;;  %v11329_v32 = vld [vmem:[#allocation5 + $0xa4] sm:$0xf] }
 0x812   :  { %v8216_v50 = vpop.f32.mrf.mxu1  ;;  %7179 = vst [vmem:[#allocation5 + $0x1d0] sm:$0xf] %v7163_v35  ;;  %v10468_v18 = vor.u32 %v11329_v32, %v10465_v5  ;;  %v10571_v32 = vld [vmem:[#allocation5 + $0x178] sm:$0xf]  ;;  %v11360_v5 = vld [vmem:[#allocation5 + $0x198] sm:$0xf0] }
 0x813   :  { %7180 = vst [vmem:[#allocation5 + $0x1f4] sm:$0xf] %v7164_v16  ;;  %v11440_v16 = vld [vmem:[%s14622_s4 + $0x1d8] sm:$0xff] }
 0x814   :  { %7053 = vst [vmem:[#allocation5 + $0x210] sm:$0xf] %v7037_v14  ;;  %8554 = vmatpush.bf16.msrb.mxu2 %v11440_v16 }
 0x815   :  { %8362 = vmatmul.bf16.vlgmr.msra.gmra.mxu1 %v10388_v47  ;;  %7054 = vst [vmem:[#allocation5 + $0x234] sm:$0xf] %v7038_v26  ;;  %v10499_v47 = vld [vmem:[#allocation5 + $0xe8] sm:$0xf] }
 0x816   :  { %7117 = vst [vmem:[#allocation5 + $0x214] sm:$0xf] %v7101_v49 }
 0x817   :  { %8411 = vmatmul.bf16.vlgmr.msra.gmra.mxu2 %v10392_v27  ;;  %7118 = vst [vmem:[#allocation5 + $0x238] sm:$0xf] %v7102_v40  ;;  %v11342_v40 = vld [vmem:[#allocation5 + $0x108] sm:$0xf0] }
 0x818   :  { %7181 = vst [vmem:[#allocation5 + $0x218] sm:$0xf] %v7165_v37  ;;  %v11338_v27 = vld [vmem:[#allocation5 + $0xec] sm:$0xf]  ;;  %v10500_v8 = vor.u32 %v11342_v40, %v10499_v47 }
 0x819   :  { %8460 = vmatmul.bf16.vlgmr.msra.gmra.mxu3 %v10396_v51  ;;  %7182 = vst [vmem:[#allocation5 + $0x23c] sm:$0xf] %v7166_v41  ;;  %v10501_v41 = vld [vmem:[#allocation5 + $0x10c] sm:$0xf0] }
 0x81a   :  { %v8265_v25 = vpop.f32.mrf.mxu2  ;;  %v8218_v19 = vpop.f32.mrf.mxu1  ;;  %v10504_v46 = vor.u32 %v11338_v27, %v10501_v41 }
 0x81b   :  { %v8266_v58 = vadd.f32 %v8265_v25, %v8216_v50  ;;  %v11337_v50 = vld [vmem:[#allocation5 + $0xe4] sm:$0xf]  ;;  %v11439_v25 = vld [vmem:[%s14622_s4 + $0x1d0] sm:$0xff] }
 0x81c   :  { %v8314_v20 = vpop.f32.mrf.mxu3  ;;  %v10496_v54 = vor.u32 %v11337_v50, %v10493_v34  ;;  %8555 = vmatpush.bf16.msrb.mxu2 %v11439_v25  ;;  %v11445_v50 = vld [vmem:[%s14622_s4 + $0x200] sm:$0xff] }
 0x81d   :  { %v14332_v24 = vadd.f32 %v8314_v20, %v8266_v58 }
 0x822   :  { %v8267_v9 = vpop.f32.mrf.mxu2  ;;  %v8221_v23 = vpop.f32.mrf.mxu1 }
 0x823   :  { %v8268_v21 = vadd.f32 %v8267_v9, %v8218_v19  ;;  %v11447_v19 = vld [vmem:[%s14622_s4 + $0x210] sm:$0xff] }
 0x824   :  { %v8316_v30 = vpop.f32.mrf.mxu3  ;;  %8604 = vmatpush.bf16.msrb.mxu3 %v11447_v19  ;;  %v11431_v9 = vld [vmem:[%s14622_s4 + $0x190] sm:$0xff] }
 0x825   :  { %v14337_v55 = vadd.f32 %v8316_v30, %v8268_v21  ;;  %8367 = vmatmul.bf16.gmra.mxu1 %v10424_v38  ;;  %v10535_v38 = vld [vmem:[#allocation5 + $0x130] sm:$0xf]  ;;  %v11351_v30 = vld [vmem:[#allocation5 + $0x150] sm:$0xf0] }
 0x826   :  { %8506 = vmatpush.bf16.msrb.mxu1 %v11431_v9 }
 0x827   :  { %8416 = vmatmul.bf16.gmra.mxu2 %v10428_v42 }
 0x829   :  { %8465 = vmatmul.bf16.gmra.mxu3 %v10432_v0  ;;  %v11347_v0 = vld [vmem:[#allocation5 + $0x134] sm:$0xf] }
 0x82a   :  { %v8270_v2 = vpop.f32.mrf.mxu2  ;;  %v8223_v13 = vpop.f32.mrf.mxu1  ;;  %8507 = vmatpush.bf16.msrb.mxu1 %v11430_v29 }
 0x82b   :  { %v8271_v12 = vadd.f32 %v8270_v2, %v8221_v23  ;;  %v11346_v23 = vld [vmem:[#allocation5 + $0x12c] sm:$0xf]  ;;  %v10536_v2 = vor.u32 %v11351_v30, %v10535_v38 }
 0x82c   :  { %v8319_v3 = vpop.f32.mrf.mxu3  ;;  %v10532_v4 = vor.u32 %v11346_v23, %v10529_v28 }
 0x82d   :  { %v14345_v11 = vadd.f32 %v8319_v3, %v8271_v12  ;;  %v11438_v12 = vld [vmem:[%s14622_s4 + $0x1c8] sm:$0xff] }
 0x82e   :  { %v11446_v3 = vld [vmem:[%s14622_s4 + $0x208] sm:$0xff]  ;;  %8556 = vmatpush.bf16.msrb.mxu2 %v11438_v12 }
 0x82f   :  { %8605 = vmatpush.bf16.msrb.mxu3 %v11446_v3 }
 0x832   :  { %v8272_v6 = vpop.f32.mrf.mxu2  ;;  %v8226_v31 = vpop.f32.mrf.mxu1  ;;  %8557 = vmatpush.bf16.msrb.mxu2 %v11437_v7 }
 0x833   :  { %v8273_v33 = vadd.f32 %v8272_v6, %v8223_v13  ;;  %v10540_v13 = vor.u32 %v11347_v0, %v10537_v60  ;;  %8606 = vmatpush.bf16.msrb.mxu3 %v11445_v50  ;;  %v10643_v60 = vld [vmem:[#allocation5 + $0x208] sm:$0xf] }
 0x834   :  { %v8321_v39 = vpop.f32.mrf.mxu3 }
 0x835   :  { %v14350_v35 = vadd.f32 %v8321_v39, %v8273_v33  ;;  %8372 = vmatmul.bf16.gmra.mxu1 %v10460_v15  ;;  %v10565_v33 = vld [vmem:[#allocation5 + $0x194] sm:$0xf0] }
 0x837   :  { %8421 = vmatmul.bf16.gmra.mxu2 %v10464_v43 }
 0x839   :  { %8470 = vmatmul.bf16.gmra.mxu3 %v10468_v18  ;;  %v10568_v18 = vor.u32 %v11355_v17, %v10565_v33 }
 0x83a   :  { %v8275_v48 = vpop.f32.mrf.mxu2  ;;  %v8228_v14 = vpop.f32.mrf.mxu1 }
 0x83b   :  { %v8276_v36 = vadd.f32 %v8275_v48, %v8226_v31  ;;  %v10573_v48 = vld [vmem:[#allocation5 + $0x19c] sm:$0xf0] }
 0x83c   :  { %v8324_v63 = vpop.f32.mrf.mxu3 }
 0x83d   :  { %v14358_v26 = vadd.f32 %v8324_v63, %v8276_v36  ;;  %v10572_v36 = vor.u32 %v11360_v5, %v10571_v32  ;;  %v10576_v63 = vor.u32 %v11356_v22, %v10573_v48  ;;  %v10399_v5 = vld [vmem:[#allocation5 + $0x18] sm:$0xf]  ;;  %v11312_v22 = vld [vmem:[#allocation5 + $0x1c] sm:$0xf]  ;;  %v10401_v48 = vld [vmem:[#allocation5 + $0x3c] sm:$0xf0] }
 0x842   :  { %v8277_v49 = vpop.f32.mrf.mxu2  ;;  %v8231_v10 = vpop.f32.mrf.mxu1 }
 0x843   :  { %v8278_v56 = vadd.f32 %v8277_v49, %v8228_v14 }
 0x844   :  { %v8326_v37 = vpop.f32.mrf.mxu3 }
 0x845   :  { %v14363_v51 = vadd.f32 %v8326_v37, %v8278_v56  ;;  %8377 = vmatmul.bf16.gmra.mxu1 %v10496_v54  ;;  %v11429_v56 = vld [vmem:[%s14622_s4 + $0x180] sm:$0xff]  ;;  %v11364_v54 = vld [vmem:[#allocation5 + $0x1bc] sm:$0xf] }
 0x846   :  { %8508 = vmatpush.bf16.msrb.mxu1 %v11429_v56  ;;  %v10601_v37 = vld [vmem:[#allocation5 + $0x1dc] sm:$0xf0] }
 0x847   :  { %8426 = vmatmul.bf16.gmra.mxu2 %v10500_v8  ;;  %v10607_v8 = vld [vmem:[#allocation5 + $0x1c0] sm:$0xf]  ;;  %v10604_v19 = vor.u32 %v11364_v54, %v10601_v37 }
 0x849   :  { %8475 = vmatmul.bf16.gmra.mxu3 %v10504_v46  ;;  %v11369_v46 = vld [vmem:[#allocation5 + $0x1e0] sm:$0xf0] }
 0x84a   :  { %v8280_v58 = vpop.f32.mrf.mxu2  ;;  %v8233_v20 = vpop.f32.mrf.mxu1  ;;  %v10608_v9 = vor.u32 %v11369_v46, %v10607_v8 }
 0x84b   :  { %v8281_v59 = vadd.f32 %v8280_v58, %v8231_v10 }
 0x84c   :  { %v8329_v61 = vpop.f32.mrf.mxu3 }
 0x84d   :  { %v14371_v53 = vadd.f32 %v8329_v61, %v8281_v59  ;;  %v10609_v59 = vld [vmem:[#allocation5 + $0x1e4] sm:$0xf0] }
 0x852   :  { %v8282_v44 = vpop.f32.mrf.mxu2  ;;  %v8236_v21 = vpop.f32.mrf.mxu1 }
 0x853   :  { %v8283_v45 = vadd.f32 %v8282_v44, %v8233_v20  ;;  %v11365_v20 = vld [vmem:[#allocation5 + $0x1c4] sm:$0xf] }
 0x854   :  { %v8331_v42 = vpop.f32.mrf.mxu3  ;;  %v10612_v23 = vor.u32 %v11365_v20, %v10609_v59  ;;  %v11321_v20 = vld [vmem:[#allocation5 + $0x64] sm:$0xf]  ;;  %v10437_v59 = vld [vmem:[#allocation5 + $0x84] sm:$0xf0] }
 0x855   :  { %v14376_v1 = vadd.f32 %v8331_v42, %v8283_v45  ;;  %8382 = vmatmul.bf16.gmra.mxu1 %v10532_v4  ;;  %v11373_v45 = vld [vmem:[#allocation5 + $0x204] sm:$0xf]  ;;  %v10637_v4 = vld [vmem:[#allocation5 + $0x224] sm:$0xf0] }
 0x856   :  { %v10640_v12 = vor.u32 %v11373_v45, %v10637_v4 }
 0x857   :  { %8431 = vmatmul.bf16.gmra.mxu2 %v10536_v2  ;;  %v11378_v2 = vld [vmem:[#allocation5 + $0x228] sm:$0xf0] }
 0x859   :  { %8480 = vmatmul.bf16.gmra.mxu3 %v10540_v13 }
 0x85a   :  { %v8285_v52 = vpop.f32.mrf.mxu2  ;;  %v8238_v57 = vpop.f32.mrf.mxu1 }
 0x85b   :  { %v8286_v62 = vadd.f32 %v8285_v52, %v8236_v21  ;;  %v11374_v52 = vld [vmem:[#allocation5 + $0x20c] sm:$0xf] }
 0x85c   :  { %v8334_v6 = vpop.f32.mrf.mxu3 }
 0x85d   :  { %v14384_v31 = vadd.f32 %v8334_v6, %v8286_v62  ;;  %v10644_v6 = vor.u32 %v11378_v2, %v10643_v60 }
 0x862   :  { %v8287_v15 = vpop.f32.mrf.mxu2  ;;  %v8241_v39 = vpop.f32.mrf.mxu1 }
 0x863   :  { %v8288_v43 = vadd.f32 %v8287_v15, %v8238_v57  ;;  %v10645_v57 = vld [vmem:[#allocation5 + $0x22c] sm:$0xf0] }
 0x864   :  { %v8336_v16 = vpop.f32.mrf.mxu3  ;;  %v10648_v29 = vor.u32 %v11374_v52, %v10645_v57 }
 0x865   :  { %v14389_v14 = vadd.f32 %v8336_v16, %v8288_v43  ;;  %8387 = vmatmul.bf16.gmra.mxu1 %v10568_v18  ;;  %v11316_v43 = vld [vmem:[#allocation5 + $0x38] sm:$0xf0] }
 0x866   :  { %v10400_v7 = vor.u32 %v11316_v43, %v10399_v5  ;;  %v10479_v5 = vld [vmem:[#allocation5 + $0xb0] sm:$0xf]  ;;  %v11335_v43 = vld [vmem:[#allocation5 + $0xd0] sm:$0xf0] }
 0x867   :  { %8436 = vmatmul.bf16.gmra.mxu2 %v10572_v36 }
 0x869   :  { %8485 = vmatmul.bf16.gmra.mxu3 %v10576_v63 }
 0x86a   :  { %v8290_v34 = vpop.f32.mrf.mxu2  ;;  %v8243_v49 = vpop.f32.mrf.mxu1 }
 0x86b   :  { %v8291_v10 = vadd.f32 %v8290_v34, %v8241_v39  ;;  %v10407_v34 = vld [vmem:[#allocation5 + $0x20] sm:$0xf] }
 0x86c   :  { %v8339_v47 = vpop.f32.mrf.mxu3 }
 0x86d   :  { %v14397_v40 = vadd.f32 %v8339_v47, %v8291_v10  ;;  %v10404_v47 = vor.u32 %v11312_v22, %v10401_v48 }
 0x872   :  { %v8292_v27 = vpop.f32.mrf.mxu2  ;;  %v8246_v41 = vpop.f32.mrf.mxu1 }
 0x873   :  { %v8293_v25 = vadd.f32 %v8292_v27, %v8243_v49  ;;  %v11317_v49 = vld [vmem:[#allocation5 + $0x40] sm:$0xf0] }
 0x874   :  { %v8341_v58 = vpop.f32.mrf.mxu3  ;;  %v10408_v56 = vor.u32 %v11317_v49, %v10407_v34  ;;  %v11343_v34 = vld [vmem:[#allocation5 + $0x110] sm:$0xf0] }
 0x875   :  { %v14402_v61 = vadd.f32 %v8341_v58, %v8293_v25  ;;  %8392 = vmatmul.bf16.gmra.mxu1 %v10604_v19  ;;  %v11325_v25 = vld [vmem:[#allocation5 + $0x80] sm:$0xf0] }
 0x877   :  { %8441 = vmatmul.bf16.gmra.mxu2 %v10608_v9 }
 0x879   :  { %8490 = vmatmul.bf16.gmra.mxu3 %v10612_v23 }
 0x87a   :  { %v8295_v28 = vpop.f32.mrf.mxu2  ;;  %v8248_v44 = vpop.f32.mrf.mxu1 }
 0x87b   :  { %v8296_v21 = vadd.f32 %v8295_v28, %v8246_v41 }
 0x87c   :  { %v8344_v38 = vpop.f32.mrf.mxu3 }
 0x87d   :  { %v14404_v30 = vadd.f32 %v8344_v38, %v8296_v21  ;;  %v10443_v21 = vld [vmem:[#allocation5 + $0x68] sm:$0xf]  ;;  %v11326_v38 = vld [vmem:[#allocation5 + $0x88] sm:$0xf0] }
 0x87e   :  { %v10444_v4 = vor.u32 %v11326_v38, %v10443_v21  ;;  %v11352_v21 = vld [vmem:[#allocation5 + $0x158] sm:$0xf0] }
 0x882   :  { %v8297_v42 = vpop.f32.mrf.mxu2  ;;  %v8251_v0 = vpop.f32.mrf.mxu1 }
 0x883   :  { %v8298_v13 = vadd.f32 %v8297_v42, %v8248_v44 }
 0x884   :  { %v8346_v3 = vpop.f32.mrf.mxu3 }
 0x885   :  { %v14406_v62 = vadd.f32 %v8346_v3, %v8298_v13  ;;  %8397 = vmatmul.bf16.gmra.mxu1 %v10640_v12  ;;  %v11334_v3 = vld [vmem:[#allocation5 + $0xc8] sm:$0xf0] }
 0x887   :  { %8446 = vmatmul.bf16.gmra.mxu2 %v10644_v6  ;;  %v11330_v6 = vld [vmem:[#allocation5 + $0xac] sm:$0xf] }
 0x889   :  { %8495 = vmatmul.bf16.gmra.mxu3 %v10648_v29  ;;  %v10473_v29 = vld [vmem:[#allocation5 + $0xcc] sm:$0xf0] }
 0x88a   :  { %v8300_v17 = vpop.f32.mrf.mxu2  ;;  %v8253_v33 = vpop.f32.mrf.mxu1 }
 0x88b   :  { %v8301_v15 = vadd.f32 %v8300_v17, %v8251_v0 }
 0x88c   :  { %v8349_v39 = vpop.f32.mrf.mxu3 }
 0x88d   :  { %v14408_v32 = vadd.f32 %v8349_v39, %v8301_v15 }
 0x892   :  { %v8302_v18 = vpop.f32.mrf.mxu2  ;;  %v8363_v16 = vpop.f32.mrf.mxu1 }
 0x893   :  { %v8303_v36 = vadd.f32 %v8302_v18, %v8253_v33  ;;  %v8364_v63 = vadd.f32 %v8363_v16, %v14332_v24  ;;  %v10435_v24 = vld [vmem:[#allocation5 + $0x60] sm:$0xf]  ;;  %v10480_v16 = vor.u32 %v11335_v43, %v10479_v5  ;;  %v11361_v5 = vld [vmem:[#allocation5 + $0x1a0] sm:$0xf0] }
 0x894   :  { %v8351_v50 = vpop.f32.mrf.mxu3  ;;  %v10436_v28 = vor.u32 %v11325_v25, %v10435_v24  ;;  %v10515_v24 = vld [vmem:[#allocation5 + $0xf8] sm:$0xf]  ;;  %v11344_v25 = vld [vmem:[#allocation5 + $0x118] sm:$0xf0] }
 0x895   :  { %v14411_v10 = vadd.f32 %v8351_v50, %v8303_v36  ;;  %8509 = vmatmul.bf16.vlgmr.msrb.gmra.mxu1 %v10400_v7 }
 0x897   :  { %8558 = vmatmul.bf16.vlgmr.msrb.gmra.mxu2 %v10404_v47 }
 0x899   :  { %8607 = vmatmul.bf16.vlgmr.msrb.gmra.mxu3 %v10408_v56  ;;  %v11339_v56 = vld [vmem:[#allocation5 + $0xf4] sm:$0xf] }
 0x89a   :  { %v8412_v54 = vpop.f32.mrf.mxu2  ;;  %v8365_v37 = vpop.f32.mrf.mxu1 }
 0x89b   :  { %v8413_v27 = vadd.f32 %v8412_v54, %v8364_v63  ;;  %v8366_v41 = vadd.f32 %v8365_v37, %v14337_v55  ;;  %v10440_v55 = vor.u32 %v11321_v20, %v10437_v59  ;;  %v10509_v54 = vld [vmem:[#allocation5 + $0x114] sm:$0xf0] }
 0x89c   :  { %v8461_v8 = vpop.f32.mrf.mxu3 }
 0x89d   :  { %v14414_v46 = vadd.f32 %v8461_v8, %v8413_v27 }
 0x8a2   :  { %v8414_v19 = vpop.f32.mrf.mxu2  ;;  %v8368_v58 = vpop.f32.mrf.mxu1 }
 0x8a3   :  { %v8415_v9 = vadd.f32 %v8414_v19, %v8366_v41  ;;  %v8369_v23 = vadd.f32 %v8368_v58, %v14345_v11  ;;  %v10471_v11 = vld [vmem:[#allocation5 + $0xa8] sm:$0xf]  ;;  %v10516_v58 = vor.u32 %v11344_v25, %v10515_v24  ;;  %v11370_v24 = vld [vmem:[#allocation5 + $0x1e8] sm:$0xf0] }
 0x8a4   :  { %v8463_v44 = vpop.f32.mrf.mxu3  ;;  %v10472_v15 = vor.u32 %v11334_v3, %v10471_v11  ;;  %v10551_v11 = vld [vmem:[#allocation5 + $0x140] sm:$0xf]  ;;  %v11353_v3 = vld [vmem:[#allocation5 + $0x160] sm:$0xf0] }
 0x8a5   :  { %v14417_v45 = vadd.f32 %v8463_v44, %v8415_v9  ;;  %8514 = vmatmul.bf16.gmra.mxu1 %v10436_v28 }
 0x8a7   :  { %8563 = vmatmul.bf16.gmra.mxu2 %v10440_v55 }
 0x8a9   :  { %8612 = vmatmul.bf16.gmra.mxu3 %v10444_v4  ;;  %v11348_v4 = vld [vmem:[#allocation5 + $0x13c] sm:$0xf] }
 0x8aa   :  { %v8417_v42 = vpop.f32.mrf.mxu2  ;;  %v8370_v0 = vpop.f32.mrf.mxu1 }
 0x8ab   :  { %v8418_v60 = vadd.f32 %v8417_v42, %v8369_v23  ;;  %v8371_v2 = vadd.f32 %v8370_v0, %v14350_v35  ;;  %v10476_v35 = vor.u32 %v11330_v6, %v10473_v29  ;;  %v10545_v42 = vld [vmem:[#allocation5 + $0x15c] sm:$0xf0] }
 0x8ac   :  { %v8466_v13 = vpop.f32.mrf.mxu3 }
 0x8ad   :  { %v14420_v12 = vadd.f32 %v8466_v13, %v8418_v60 }
 0x8b2   :  { %v8419_v52 = vpop.f32.mrf.mxu2  ;;  %v8373_v57 = vpop.f32.mrf.mxu1 }
 0x8b3   :  { %v8420_v17 = vadd.f32 %v8419_v52, %v8371_v2  ;;  %v8374_v33 = vadd.f32 %v8373_v57, %v14358_v26  ;;  %v10507_v26 = vld [vmem:[#allocation5 + $0xf0] sm:$0xf]  ;;  %v10552_v57 = vor.u32 %v11353_v3, %v10551_v11  ;;  %v11379_v11 = vld [vmem:[#allocation5 + $0x230] sm:$0xf0] }
 0x8b4   :  { %v8468_v39 = vpop.f32.mrf.mxu3  ;;  %v10508_v41 = vor.u32 %v11343_v34, %v10507_v26  ;;  %v10587_v26 = vld [vmem:[#allocation5 + $0x188] sm:$0xf]  ;;  %v11362_v34 = vld [vmem:[#allocation5 + $0x1a8] sm:$0xf0] }
 0x8b5   :  { %v14423_v18 = vadd.f32 %v8468_v39, %v8420_v17  ;;  %8519 = vmatmul.bf16.gmra.mxu1 %v10472_v15 }
 0x8b7   :  { %8568 = vmatmul.bf16.gmra.mxu2 %v10476_v35 }
 0x8b9   :  { %8617 = vmatmul.bf16.gmra.mxu3 %v10480_v16  ;;  %v11357_v16 = vld [vmem:[#allocation5 + $0x184] sm:$0xf] }
 0x8ba   :  { %v8422_v22 = vpop.f32.mrf.mxu2  ;;  %v8375_v48 = vpop.f32.mrf.mxu1 }
 0x8bb   :  { %v8423_v36 = vadd.f32 %v8422_v22, %v8374_v33  ;;  %v8376_v63 = vadd.f32 %v8375_v48, %v14363_v51  ;;  %v10512_v51 = vor.u32 %v11339_v56, %v10509_v54  ;;  %v10581_v22 = vld [vmem:[#allocation5 + $0x1a4] sm:$0xf0] }
 0x8bc   :  { %v8471_v7 = vpop.f32.mrf.mxu3 }
 0x8bd   :  { %v14426_v50 = vadd.f32 %v8471_v7, %v8423_v36 }
 0x8c2   :  { %v8424_v49 = vpop.f32.mrf.mxu2  ;;  %v8378_v47 = vpop.f32.mrf.mxu1 }
 0x8c3   :  { %v8425_v37 = vadd.f32 %v8424_v49, %v8376_v63  ;;  %v8379_v27 = vadd.f32 %v8378_v47, %v14371_v53  ;;  %v10543_v53 = vld [vmem:[#allocation5 + $0x138] sm:$0xf]  ;;  %v10588_v47 = vor.u32 %v11362_v34, %v10587_v26 }
 0x8c4   :  { %v8473_v8 = vpop.f32.mrf.mxu3  ;;  %v10544_v2 = vor.u32 %v11352_v21, %v10543_v53  ;;  %v10623_v53 = vld [vmem:[#allocation5 + $0x1d0] sm:$0xf]  ;;  %v11371_v21 = vld [vmem:[#allocation5 + $0x1f0] sm:$0xf0] }
 0x8c5   :  { %v14429_v19 = vadd.f32 %v8473_v8, %v8425_v37  ;;  %8524 = vmatmul.bf16.gmra.mxu1 %v10508_v41 }
 0x8c7   :  { %8573 = vmatmul.bf16.gmra.mxu2 %v10512_v51 }
 0x8c9   :  { %8622 = vmatmul.bf16.gmra.mxu3 %v10516_v58  ;;  %v11366_v58 = vld [vmem:[#allocation5 + $0x1cc] sm:$0xf] }
 0x8ca   :  { %v8427_v20 = vpop.f32.mrf.mxu2  ;;  %v8380_v59 = vpop.f32.mrf.mxu1 }
 0x8cb   :  { %v8428_v9 = vadd.f32 %v8427_v20, %v8379_v27  ;;  %v8381_v23 = vadd.f32 %v8380_v59, %v14376_v1  ;;  %v10548_v1 = vor.u32 %v11348_v4, %v10545_v42  ;;  %v10617_v20 = vld [vmem:[#allocation5 + $0x1ec] sm:$0xf0] }
 0x8cc   :  { %v8476_v28 = vpop.f32.mrf.mxu3 }
 0x8cd   :  { %v14432_v44 = vadd.f32 %v8476_v28, %v8428_v9 }
 0x8d2   :  { %v8429_v38 = vpop.f32.mrf.mxu2  ;;  %v8383_v55 = vpop.f32.mrf.mxu1 }
 0x8d3   :  { %v8430_v0 = vadd.f32 %v8429_v38, %v8381_v23  ;;  %v8384_v60 = vadd.f32 %v8383_v55, %v14384_v31  ;;  %v10579_v31 = vld [vmem:[#allocation5 + $0x180] sm:$0xf]  ;;  %v10624_v55 = vor.u32 %v11371_v21, %v10623_v53 }
 0x8d4   :  { %v8478_v13 = vpop.f32.mrf.mxu3  ;;  %v10580_v63 = vor.u32 %v11361_v5, %v10579_v31  ;;  %v10659_v31 = vld [vmem:[#allocation5 + $0x218] sm:$0xf]  ;;  %v11380_v5 = vld [vmem:[#allocation5 + $0x238] sm:$0xf0] }
 0x8d5   :  { %v14435_v52 = vadd.f32 %v8478_v13, %v8430_v0  ;;  %8529 = vmatmul.bf16.gmra.mxu1 %v10544_v2 }
 0x8d7   :  { %8578 = vmatmul.bf16.gmra.mxu2 %v10548_v1 }
 0x8d9   :  { %8627 = vmatmul.bf16.gmra.mxu3 %v10552_v57  ;;  %v11375_v57 = vld [vmem:[#allocation5 + $0x214] sm:$0xf] }
 0x8da   :  { %v8432_v6 = vpop.f32.mrf.mxu2  ;;  %v8385_v29 = vpop.f32.mrf.mxu1 }
 0x8db   :  { %v8433_v17 = vadd.f32 %v8432_v6, %v8384_v60  ;;  %v8386_v33 = vadd.f32 %v8385_v29, %v14389_v14  ;;  %v10584_v14 = vor.u32 %v11357_v16, %v10581_v22  ;;  %v10653_v6 = vld [vmem:[#allocation5 + $0x234] sm:$0xf0] }
 0x8dc   :  { %v8481_v15 = vpop.f32.mrf.mxu3 }
 0x8dd   :  { %v14438_v39 = vadd.f32 %v8481_v15, %v8433_v17 }
 0x8e2   :  { %v8434_v43 = vpop.f32.mrf.mxu2  ;;  %v8388_v35 = vpop.f32.mrf.mxu1 }
 0x8e3   :  { %v8435_v48 = vadd.f32 %v8434_v43, %v8386_v33  ;;  %v8389_v36 = vadd.f32 %v8388_v35, %v14397_v40  ;;  %v10615_v40 = vld [vmem:[#allocation5 + $0x1c8] sm:$0xf]  ;;  %v10660_v35 = vor.u32 %v11380_v5, %v10659_v31 }
 0x8e4   :  { %v8483_v7 = vpop.f32.mrf.mxu3  ;;  %v10616_v23 = vor.u32 %v11370_v24, %v10615_v40 }
 0x8e5   :  { %v14441_v49 = vadd.f32 %v8483_v7, %v8435_v48  ;;  %8534 = vmatmul.bf16.gmra.mxu1 %v10580_v63 }
 0x8e7   :  { %8583 = vmatmul.bf16.gmra.mxu2 %v10584_v14 }
 0x8e9   :  { %8632 = vmatmul.bf16.gmra.mxu3 %v10588_v47 }
 0x8ea   :  { %v8437_v56 = vpop.f32.mrf.mxu2  ;;  %v8390_v54 = vpop.f32.mrf.mxu1 }
 0x8eb   :  { %v8438_v37 = vadd.f32 %v8437_v56, %v8389_v36  ;;  %v8391_v27 = vadd.f32 %v8390_v54, %v14402_v61  ;;  %v10620_v61 = vor.u32 %v11366_v58, %v10617_v20 }
 0x8ec   :  { %v8486_v41 = vpop.f32.mrf.mxu3 }
 0x8ed   :  { %v14444_v8 = vadd.f32 %v8486_v41, %v8438_v37 }
 0x8f2   :  { %v8439_v25 = vpop.f32.mrf.mxu2  ;;  %v8393_v51 = vpop.f32.mrf.mxu1 }
 0x8f3   :  { %v8440_v59 = vadd.f32 %v8439_v25, %v8391_v27  ;;  %v8394_v9 = vadd.f32 %v8393_v51, %v14404_v30  ;;  %v10651_v30 = vld [vmem:[#allocation5 + $0x210] sm:$0xf] }
 0x8f4   :  { %v8488_v28 = vpop.f32.mrf.mxu3  ;;  %v10652_v33 = vor.u32 %v11379_v11, %v10651_v30 }
 0x8f5   :  { %v14447_v38 = vadd.f32 %v8488_v28, %v8440_v59  ;;  %8539 = vmatmul.bf16.gmra.mxu1 %v10616_v23 }
 0x8f7   :  { %8588 = vmatmul.bf16.gmra.mxu2 %v10620_v61 }
 0x8f9   :  { %8637 = vmatmul.bf16.gmra.mxu3 %v10624_v55 }
 0x8fa   :  { %v8442_v4 = vpop.f32.mrf.mxu2  ;;  %v8395_v42 = vpop.f32.mrf.mxu1 }
 0x8fb   :  { %v8443_v0 = vadd.f32 %v8442_v4, %v8394_v9  ;;  %v8396_v60 = vadd.f32 %v8395_v42, %v14406_v62  ;;  %v10656_v62 = vor.u32 %v11375_v57, %v10653_v6 }
 0x8fc   :  { %v8491_v2 = vpop.f32.mrf.mxu3 }
 0x8fd   :  { %v14450_v13 = vadd.f32 %v8491_v2, %v8443_v0 }
 0x902   :  { %v8444_v3 = vpop.f32.mrf.mxu2  ;;  %v8398_v1 = vpop.f32.mrf.mxu1 }
 0x903   :  { %v8445_v29 = vadd.f32 %v8444_v3, %v8396_v60  ;;  %v8399_v17 = vadd.f32 %v8398_v1, %v14408_v32 }
 0x904   :  { %v8493_v15 = vpop.f32.mrf.mxu3 }
 0x905   :  { %v14453_v43 = vadd.f32 %v8493_v15, %v8445_v29  ;;  %8544 = vmatmul.bf16.gmra.mxu1 %v10652_v33 }
 0x907   :  { %8593 = vmatmul.bf16.gmra.mxu2 %v10656_v62 }
 0x909   :  { %8642 = vmatmul.bf16.gmra.mxu3 %v10660_v35 }
 0x90a   :  { %v8447_v16 = vpop.f32.mrf.mxu2  ;;  %v8400_v22 = vpop.f32.mrf.mxu1 }
 0x90b   :  { %v8448_v48 = vadd.f32 %v8447_v16, %v8399_v17  ;;  %v8401_v36 = vadd.f32 %v8400_v22, %v14411_v10 }
 0x90c   :  { %v8496_v63 = vpop.f32.mrf.mxu3 }
 0x90d   :  { %v14456_v7 = vadd.f32 %v8496_v63, %v8448_v48 }
 0x912   :  { %v8449_v32 = vpop.f32.mrf.mxu2  ;;  %v8510_v26 = vpop.f32.mrf.mxu1 }
 0x913   :  { %v8450_v34 = vadd.f32 %v8449_v32, %v8401_v36  ;;  %v8511_v14 = vadd.f32 %v8510_v26, %v14414_v46 }
 0x914   :  { %v8498_v47 = vpop.f32.mrf.mxu3 }
 0x915   :  { %v14459_v56 = vadd.f32 %v8498_v47, %v8450_v34 }
 0x91a   :  { %v8559_v54 = vpop.f32.mrf.mxu2  ;;  %v8512_v37 = vpop.f32.mrf.mxu1 }
 0x91b   :  { %v8560_v27 = vadd.f32 %v8559_v54, %v8511_v14  ;;  %v8513_v41 = vadd.f32 %v8512_v37, %v14417_v45 }
 0x91c   :  { %v8608_v40 = vpop.f32.mrf.mxu3 }
 0x91d   :  { %v14462_v24 = vadd.f32 %v8608_v40, %v8560_v27 }
 0x91f   :  { %v8679_v54 = vmul.f32 %v14462_v24, %v14462_v24 }
 0x922   :  { %v8561_v10 = vpop.f32.mrf.mxu2  ;;  %v8515_v25 = vpop.f32.mrf.mxu1 }
 0x923   :  { %v8562_v51 = vadd.f32 %v8561_v10, %v8513_v41  ;;  %v8516_v58 = vadd.f32 %v8515_v25, %v14420_v12 }
 0x924   :  { %v8610_v20 = vpop.f32.mrf.mxu3 }
 0x925   :  { %v14465_v59 = vadd.f32 %v8610_v20, %v8562_v51 }
 0x927   :  { %v8680_v32 = vmul.f32 %v14465_v59, %v14465_v59 }
 0x929   :  { %v8695_v10 = vadd.f32 %v8680_v32, %v8679_v54 }
 0x92a   :  { %v8564_v46 = vpop.f32.mrf.mxu2  ;;  %v8517_v9 = vpop.f32.mrf.mxu1 }
 0x92b   :  { %v8565_v23 = vadd.f32 %v8564_v46, %v8516_v58  ;;  %v8518_v28 = vadd.f32 %v8517_v9, %v14423_v18 }
 0x92c   :  { %v8613_v53 = vpop.f32.mrf.mxu3 }
 0x92d   :  { %v14468_v21 = vadd.f32 %v8613_v53, %v8565_v23 }
 0x92f   :  { %v8681_v37 = vmul.f32 %v14468_v21, %v14468_v21 }
 0x931   :  { %v8696_v46 = vadd.f32 %v8695_v10, %v8681_v37 }
 0x932   :  { %v8566_v45 = vpop.f32.mrf.mxu2  ;;  %v8520_v61 = vpop.f32.mrf.mxu1 }
 0x933   :  { %v8567_v55 = vadd.f32 %v8566_v45, %v8518_v28  ;;  %v8521_v4 = vadd.f32 %v8520_v61, %v14426_v50 }
 0x934   :  { %v8615_v42 = vpop.f32.mrf.mxu3 }
 0x935   :  { %v14471_v0 = vadd.f32 %v8615_v42, %v8567_v55 }
 0x937   :  { %v8682_v25 = vmul.f32 %v14471_v0, %v14471_v0 }
 0x939   :  { %v8697_v45 = vadd.f32 %v8696_v46, %v8682_v25 }
 0x93a   :  { %v8569_v12 = vpop.f32.mrf.mxu2  ;;  %v8522_v60 = vpop.f32.mrf.mxu1 }
 0x93b   :  { %v8570_v2 = vadd.f32 %v8569_v12, %v8521_v4  ;;  %v8523_v63 = vadd.f32 %v8522_v60, %v14429_v19  ;;  %v8650_v19 = vadd.f32 %v14465_v59, %v14462_v24 }
 0x93c   :  { %v8618_v30 = vpop.f32.mrf.mxu3 }
 0x93d   :  { %v14473_v11 = vadd.f32 %v8618_v30, %v8570_v2  ;;  %v8651_v20 = vadd.f32 %v8650_v19, %v14468_v21 }
 0x93f   :  { %v8683_v9 = vmul.f32 %v14473_v11, %v14473_v11  ;;  %v8652_v53 = vadd.f32 %v8651_v20, %v14471_v0 }
 0x941   :  { %v8653_v60 = vadd.f32 %v8652_v53, %v14473_v11  ;;  %v8698_v2 = vadd.f32 %v8697_v45, %v8683_v9 }
 0x942   :  { %v8571_v3 = vpop.f32.mrf.mxu2  ;;  %v8525_v1 = vpop.f32.mrf.mxu1 }
 0x943   :  { %v8572_v26 = vadd.f32 %v8571_v3, %v8523_v63  ;;  %v8526_v34 = vadd.f32 %v8525_v1, %v14432_v44 }
 0x944   :  { %v8620_v18 = vpop.f32.mrf.mxu3 }
 0x945   :  { %v14488_v44 = vadd.f32 %v8620_v18, %v8572_v26 }
 0x947   :  { %v8684_v61 = vmul.f32 %v14488_v44, %v14488_v44  ;;  %v8654_v18 = vadd.f32 %v8653_v60, %v14488_v44 }
 0x94a   :  { %v8574_v57 = vpop.f32.mrf.mxu2  ;;  %v8527_v6 = vpop.f32.mrf.mxu1 }
 0x94b   :  { %v8575_v27 = vadd.f32 %v8574_v57, %v8526_v34  ;;  %v8528_v41 = vadd.f32 %v8527_v6, %v14435_v52  ;;  %v8699_v6 = vadd.f32 %v8698_v2, %v8684_v61 }
 0x94c   :  { %v8623_v29 = vpop.f32.mrf.mxu3 }
 0x94d   :  { %v14494_v52 = vadd.f32 %v8623_v29, %v8575_v27 }
 0x94f   :  { %v8685_v30 = vmul.f32 %v14494_v52, %v14494_v52 }
 0x952   :  { %v8576_v17 = vpop.f32.mrf.mxu2  ;;  %v8530_v33 = vpop.f32.mrf.mxu1 }
 0x953   :  { %v8577_v51 = vadd.f32 %v8576_v17, %v8528_v41  ;;  %v8531_v58 = vadd.f32 %v8530_v33, %v14438_v39  ;;  %v8655_v17 = vadd.f32 %v8654_v18, %v14494_v52 }
 0x954   :  { %v8625_v15 = vpop.f32.mrf.mxu3 }
 0x955   :  { %v14500_v55 = vadd.f32 %v8625_v15, %v8577_v51  ;;  %v11494_v51 = vmov 128.0  }
 0x956   :  { %11484 = vrcp.f32 %v11494_v51 }
 0x95a   :  { %v8579_v31 = vpop.f32.mrf.mxu2  ;;  %v8532_v50 = vpop.f32.mrf.mxu1 }
 0x95b   :  { %v8580_v23 = vadd.f32 %v8579_v31, %v8531_v58  ;;  %v8533_v28 = vadd.f32 %v8532_v50, %v14441_v49  ;;  %v8700_v31 = vadd.f32 %v8699_v6, %v8685_v30 }
 0x95c   :  { %v8628_v5 = vpop.f32.mrf.mxu3 }
 0x95d   :  { %v14506_v49 = vadd.f32 %v8628_v5, %v8580_v23 }
 0x95f   :  { %v8687_v50 = vmul.f32 %v14506_v49, %v14506_v49 }
 0x962   :  { %v8581_v62 = vpop.f32.mrf.mxu2  ;;  %v8535_v35 = vpop.f32.mrf.mxu1 }
 0x963   :  { %v8582_v39 = vadd.f32 %v8581_v62, %v8533_v28  ;;  %v8536_v4 = vadd.f32 %v8535_v35, %v14444_v8  ;;  %v8686_v8 = vmul.f32 %v14500_v55, %v14500_v55  ;;  %v8656_v62 = vadd.f32 %v8655_v17, %v14500_v55 }
 0x964   :  { %v8630_v16 = vpop.f32.mrf.mxu3 }
 0x965   :  { %v14512_v29 = vadd.f32 %v8630_v16, %v8582_v39  ;;  %v8657_v63 = vadd.f32 %v8656_v62, %v14506_v49 }
 0x967   :  { %v8688_v16 = vmul.f32 %v14512_v29, %v14512_v29 }
 0x96a   :  { %v8584_v22 = vpop.f32.mrf.mxu2  ;;  %v8537_v48 = vpop.f32.mrf.mxu1 }
 0x96b   :  { %v8585_v3 = vadd.f32 %v8584_v22, %v8536_v4  ;;  %v8538_v57 = vadd.f32 %v8537_v48, %v14447_v38  ;;  %v8701_v22 = vadd.f32 %v8700_v31, %v8686_v8  ;;  %v11485_v4 = vpop.eup %11484 }
 0x96c   :  { %v8633_v36 = vpop.f32.mrf.mxu3  ;;  %vm8676_vm4 = vweird.f32 %v11485_v4 }
 0x96d   :  { %v14518_v5 = vadd.f32 %v8633_v36, %v8585_v3  ;;  %v8702_v26 = vadd.f32 %v8701_v22, %v8687_v50  ;;  %v8672_v3 = vmul.f32 128.0, %v11485_v4 }
 0x96f   :  { %v8689_v36 = vmul.f32 %v14518_v5, %v14518_v5  ;;  %v8673_v6 = vsub.f32 1.0, %v8672_v3 }
 0x971   :  { %v8674_v31 = vmul.f32 %v11485_v4, %v8673_v6 }
 0x972   :  { %v8586_v14 = vpop.f32.mrf.mxu2  ;;  %v8540_v47 = vpop.f32.mrf.mxu1 }
 0x973   :  { %v8587_v33 = vadd.f32 %v8586_v14, %v8538_v57  ;;  %v8541_v15 = vadd.f32 %v8540_v47, %v14450_v13  ;;  %v8658_v47 = vadd.f32 %v8657_v63, %v14512_v29  ;;  %v8675_v22 = vadd.f32 %v11485_v4, %v8674_v31 }
 0x974   :  { %v8635_v40 = vpop.f32.mrf.mxu3 }
 0x975   :  { %v14525_v32 = vadd.f32 %v8635_v40, %v8587_v33  ;;  %v8659_v37 = vadd.f32 %v8658_v47, %v14518_v5 }
 0x977   :  { %v8690_v27 = vmul.f32 %v14525_v32, %v14525_v32  ;;  %v8660_v19 = vadd.f32 %v8659_v37, %v14525_v32 }
 0x97a   :  { %v8589_v42 = vpop.f32.mrf.mxu2  ;;  %v8542_v12 = vpop.f32.mrf.mxu1 }
 0x97b   :  { %v8590_v38 = vadd.f32 %v8589_v42, %v8541_v15  ;;  %v8543_v35 = vadd.f32 %v8542_v12, %v14453_v43  ;;  %v8703_v43 = vadd.f32 %v8702_v26, %v8688_v16 }
 0x97c   :  { %v8638_v1 = vpop.f32.mrf.mxu3 }
 0x97d   :  { %v14530_v54 = vadd.f32 %v8638_v1, %v8590_v38  ;;  %v8704_v40 = vadd.f32 %v8703_v43, %v8689_v36 }
 0x97f   :  { %v8691_v10 = vmul.f32 %v14530_v54, %v14530_v54  ;;  %v8705_v20 = vadd.f32 %v8704_v40, %v8690_v27  ;;  %v8661_v46 = vadd.f32 %v8660_v19, %v14530_v54 }
 0x981   :  { %v8706_v53 = vadd.f32 %v8705_v20, %v8691_v10 }
 0x982   :  { %v8591_v48 = vpop.f32.mrf.mxu2  ;;  %v8545_v14 = vpop.f32.mrf.mxu1 }
 0x983   :  { %v8592_v13 = vadd.f32 %v8591_v48, %v8543_v35  ;;  %v8546_v25 = vadd.f32 %v8545_v14, %v14456_v7 }
 0x984   :  { %v8640_v34 = vpop.f32.mrf.mxu3 }
 0x985   :  { %v14535_v41 = vadd.f32 %v8640_v34, %v8592_v13  ;;  %v8677_v13 = vsel %vm8676_vm4, %v11485_v4, %v8675_v22 }
 0x987   :  { %v8692_v9 = vmul.f32 %v14535_v41, %v14535_v41  ;;  %v8662_v45 = vadd.f32 %v8661_v46, %v14535_v41 }
 0x989   :  { %v8707_v42 = vadd.f32 %v8706_v53, %v8692_v9 }
 0x98a   :  { %v8594_v58 = vpop.f32.mrf.mxu2  ;;  %v8547_v39 = vpop.f32.mrf.mxu1 }
 0x98b   :  { %v8595_v23 = vadd.f32 %v8594_v58, %v8546_v25  ;;  %v8548_v2 = vadd.f32 %v8547_v39, %v14459_v56  ;;  %v8648_v58 = vld [vmem:[%s14625_s5] sm:$0x1] }
 0x98c   :  { %v8643_v28 = vpop.f32.mrf.mxu3 }
 0x98d   :  { %v14545_v61 = vadd.f32 %v8643_v28, %v8595_v23  ;;  %v8649_v23 = vld [vmem:[%s14626_s6] sm:$0x1] }
 0x98f   :  { %v8663_v7 = vadd.f32 %v8662_v45, %v14545_v61  ;;  %v8693_v12 = vmul.f32 %v14545_v61, %v14545_v61 }
 0x991   :  { %v8708_v60 = vadd.f32 %v8707_v42, %v8693_v12 }
 0x992   :  { %v8596_v30 = vpop.f32.mrf.mxu2 }
 0x993   :  { %v8597_v1 = vadd.f32 %v8596_v30, %v8548_v2 }
 0x994   :  { %v8645_v18 = vpop.f32.mrf.mxu3 }
 0x995   :  { %v8646_v57 = vadd.f32 %v8645_v18, %v8597_v1 }
 0x997   :  { %v8664_v8 = vadd.f32 %v8663_v7, %v8646_v57  ;;  %v8694_v17 = vmul.f32 %v8646_v57, %v8646_v57 }
 0x999   :  { %v8665_v33 = vrot.slane %v8664_v8, 4  ;;  %v8709_v15 = vadd.f32 %v8708_v60, %v8694_v17 }
 0x99b   :  { %v8666_v50 = vadd.f32 %v8665_v33, %v8664_v8  ;;  %v8710_v62 = vrot.slane %v8709_v15, 4 }
 0x99d   :  { %v8667_v38 = vrot.slane %v8666_v50, 2  ;;  %v8711_v35 = vadd.f32 %v8710_v62, %v8709_v15 }
 0x99f   :  { %v8668_v16 = vadd.f32 %v8667_v38, %v8666_v50  ;;  %v8712_v48 = vrot.slane %v8711_v35, 2 }
 0x9a1   :  { %v8669_v56 = vrot.slane %v8668_v16, 1  ;;  %v8713_v63 = vadd.f32 %v8712_v48, %v8711_v35 }
 0x9a3   :  { %v8670_v26 = vadd.f32 %v8669_v56, %v8668_v16  ;;  %v8714_v36 = vrot.slane %v8713_v63, 1 }
 0x9a5   :  { %v8678_v34 = vmul.f32 %v8677_v13, %v8670_v26  ;;  %v8715_v14 = vadd.f32 %v8714_v36, %v8713_v63 }
 0x9a7   :  { %v8716_v47 = vmul.f32 %v8715_v14, %v8677_v13  ;;  %v8717_v43 = vmul.f32 %v8678_v34, %v8678_v34 }
 0x9a9   :  { %v8718_v37 = vsub.f32 %v8716_v47, %v8717_v43 }
 0x9ab   :  { %v8719_v27 = vadd.f32 1e-05, %v8718_v37 }
 0x9ad   :  { %11486 = vrsqrt.f32 %v8719_v27  ;;  %vm8726_vm6 = vweird.f32 %v8719_v27 }
 0x9b3   :  { %v11487_v40 = vpop.eup %11486 }
 0x9b4   :  { %v8721_v19 = vmul.f32 %v11487_v40, %v8719_v27  ;;  %vm8727_vm5 = vweird.f32 %v11487_v40 }
 0x9b5   :  { %vm8728_vm7 = vmor %vm8726_vm6, %vm8727_vm5 }
 0x9b6   :  { %v8722_v10 = vmul.f32 %v11487_v40, %v8721_v19 }
 0x9b8   :  { %v8723_v25 = vmul.f32 0.5, %v8722_v10 }
 0x9ba   :  { %v8724_v51 = vsub.f32 1.5, %v8723_v25 }
 0x9bc   :  { %v8725_v20 = vmul.f32 %v11487_v40, %v8724_v51 }
 0x9be   :  { %v8729_v46 = vsel %vm8728_vm7, %v11487_v40, %v8725_v20 }
 0x9bf   :  { %v8730_v9 = vmul.f32 %v8729_v46, %v8648_v58 }
 0x9c1   :  { %v8731_v28 = vmul.f32 %v8730_v9, %v8678_v34  ;;  %v8734_v53 = vperm.slane %v8730_v9, 0 }
 0x9c3   :  { %v8732_v45 = vsub.f32 %v8649_v23, %v8731_v28  ;;  %v8736_v39 = vmul.f32 %v8734_v53, %v14462_v24  ;;  %v8737_v4 = vmul.f32 %v8734_v53, %v14465_v59  ;;  %v8738_v42 = vmul.f32 %v8734_v53, %v14468_v21 }
 0x9c4   :  { %v8739_v7 = vmul.f32 %v8734_v53, %v14471_v0  ;;  %v8740_v12 = vmul.f32 %v8734_v53, %v14473_v11  ;;  %v8741_v60 = vmul.f32 %v8734_v53, %v14488_v44  ;;  %v8742_v2 = vmul.f32 %v8734_v53, %v14494_v52 }
 0x9c5   :  { %v8749_v30 = vmul.f32 %v8734_v53, %v14535_v41  ;;  %v8750_v3 = vmul.f32 %v8734_v53, %v14545_v61  ;;  %v8743_v1 = vmul.f32 %v8734_v53, %v14500_v55  ;;  %v8744_v24 = vmul.f32 %v8734_v53, %v14506_v49 }
 0x9c6   :  { %v8751_v18 = vmul.f32 %v8734_v53, %v8646_v57  ;;  %v8753_v59 = vperm.slane %v8732_v45, 0  ;;  %v8745_v21 = vmul.f32 %v8734_v53, %v14512_v29  ;;  %v8746_v0 = vmul.f32 %v8734_v53, %v14518_v5 }
 0x9c7   :  { %v8747_v11 = vmul.f32 %v8734_v53, %v14525_v32  ;;  %v8748_v44 = vmul.f32 %v8734_v53, %v14530_v54 }
 0x9c8   :  { %v8755_v6 = vadd.f32 %v8753_v59, %v8736_v39  ;;  %v8756_v52 = vadd.f32 %v8753_v59, %v8737_v4  ;;  %v8757_v8 = vadd.f32 %v8753_v59, %v8738_v42  ;;  %v8758_v41 = vadd.f32 %v8753_v59, %v8739_v7 }
 0x9c9   :  { %v8759_v17 = vadd.f32 %v8753_v59, %v8740_v12  ;;  %v8760_v61 = vadd.f32 %v8753_v59, %v8741_v60  ;;  %v8761_v33 = vadd.f32 %v8753_v59, %v8742_v2  ;;  %v8762_v55 = vadd.f32 %v8753_v59, %v8743_v1 }
 0x9ca   :  { %v8763_v15 = vadd.f32 %v8753_v59, %v8744_v24  ;;  %v8764_v49 = vadd.f32 %v8753_v59, %v8745_v21  ;;  %v8765_v57 = vadd.f32 %v8753_v59, %v8746_v0  ;;  %v8766_v31 = vadd.f32 %v8753_v59, %v8747_v11 }
 0x9cb   :  { %v8767_v50 = vadd.f32 %v8753_v59, %v8748_v44  ;;  %v8768_v29 = vadd.f32 %v8753_v59, %v8749_v30  ;;  %v8769_v62 = vadd.f32 %v8753_v59, %v8750_v3  ;;  %v8770_v5 = vadd.f32 %v8753_v59, %v8751_v18 }
 0x9cc   :  { %vm8771_vm8 = vcmp.ge.f32.partialorder %v8755_v6, 0.0  ;;  %vm8772_vm9 = vcmp.ge.f32.partialorder %v8756_v52, 0.0  ;;  %v8787_v32 = vmul.f32 0.01, %v8755_v6  ;;  %v8788_v54 = vmul.f32 0.01, %v8756_v52 }
 0x9cd   :  { %v8789_v38 = vmul.f32 0.01, %v8757_v8  ;;  %vm8773_vm10 = vcmp.ge.f32.partialorder %v8757_v8, 0.0  ;;  %v8790_v35 = vmul.f32 0.01, %v8758_v41  ;;  %vm8774_vm11 = vcmp.ge.f32.partialorder %v8758_v41, 0.0 }
 0x9ce   :  { %v8791_v22 = vmul.f32 0.01, %v8759_v17  ;;  %vm8775_vm12 = vcmp.ge.f32.partialorder %v8759_v17, 0.0  ;;  %v8792_v16 = vmul.f32 0.01, %v8760_v61  ;;  %v8803_v48 = vsel %vm8771_vm8, %v8755_v6, %v8787_v32 }
 0x9cf   :  { %vm8776_vm13 = vcmp.ge.f32.partialorder %v8760_v61, 0.0  ;;  %v8793_v56 = vmul.f32 0.01, %v8761_v33  ;;  %v8804_v63 = vsel %vm8772_vm9, %v8756_v52, %v8788_v54  ;;  %8819 = vst [vmem:[%s14627_s7] sm:$0xff] %v8803_v48  ;;  %vm8777_vm14 = vcmp.ge.f32.partialorder %v8761_v33, 0.0 }
 0x9d0   :  { %v8794_v13 = vmul.f32 0.01, %v8762_v55  ;;  %v8805_v26 = vsel %vm8773_vm10, %v8757_v8, %v8789_v38  ;;  %vm8778_vm15 = vcmp.ge.f32.partialorder %v8762_v55, 0.0  ;;  %v8795_v36 = vmul.f32 0.01, %v8763_v15  ;;  %8820 = vst [vmem:[%s14627_s7 + $0x8] sm:$0xff] %v8804_v63 }
 0x9d1   :  { %v8806_v34 = vsel %vm8774_vm11, %v8758_v41, %v8790_v35  ;;  %v8807_v14 = vsel %vm8775_vm12, %v8759_v17, %v8791_v22  ;;  %vm8779_vm0 = vcmp.ge.f32.partialorder %v8763_v15, 0.0  ;;  %v8796_v47 = vmul.f32 0.01, %v8764_v49  ;;  %8821 = vst [vmem:[%s14627_s7 + $0x10] sm:$0xff] %v8805_v26 }
 0x9d2   :  { %v8808_v43 = vsel %vm8776_vm13, %v8760_v61, %v8792_v16  ;;  %vm8780_vm1 = vcmp.ge.f32.partialorder %v8764_v49, 0.0  ;;  %v8797_v37 = vmul.f32 0.01, %v8765_v57  ;;  %v8809_v27 = vsel %vm8777_vm14, %v8761_v33, %v8793_v56  ;;  %8822 = vst [vmem:[%s14627_s7 + $0x18] sm:$0xff] %v8806_v34 }
 0x9d3   :  { %vm8781_vm2 = vcmp.ge.f32.partialorder %v8765_v57, 0.0  ;;  %v8798_v40 = vmul.f32 0.01, %v8766_v31  ;;  %v8810_v19 = vsel %vm8778_vm15, %v8762_v55, %v8794_v13  ;;  %8823 = vst [vmem:[%s14627_s7 + $0x20] sm:$0xff] %v8807_v14  ;;  %vm8782_vm3 = vcmp.ge.f32.partialorder %v8766_v31, 0.0 }
 0x9d4   :  { %v8799_v10 = vmul.f32 0.01, %v8767_v50  ;;  %v8811_v25 = vsel %vm8779_vm0, %v8763_v15, %v8795_v36  ;;  %8824 = vst [vmem:[%s14627_s7 + $0x28] sm:$0xff] %v8808_v43  ;;  %vm8783_vm4 = vcmp.ge.f32.partialorder %v8767_v50, 0.0  ;;  %v8800_v51 = vmul.f32 0.01, %v8768_v29 }
 0x9d5   :  { %v8812_v58 = vsel %vm8780_vm1, %v8764_v49, %v8796_v47  ;;  %8825 = vst [vmem:[%s14627_s7 + $0x30] sm:$0xff] %v8809_v27  ;;  %vm8784_vm5 = vcmp.ge.f32.partialorder %v8768_v29, 0.0  ;;  %v8801_v20 = vmul.f32 0.01, %v8769_v62  ;;  %v8813_v46 = vsel %vm8781_vm2, %v8765_v57, %v8797_v37 }
 0x9d6   :  { %8826 = vst [vmem:[%s14627_s7 + $0x38] sm:$0xff] %v8810_v19  ;;  %vm8785_vm6 = vcmp.ge.f32.partialorder %v8769_v62, 0.0  ;;  %v8802_v9 = vmul.f32 0.01, %v8770_v5  ;;  %v8814_v23 = vsel %vm8782_vm3, %v8766_v31, %v8798_v40  ;;  %vm8786_vm7 = vcmp.ge.f32.partialorder %v8770_v5, 0.0 }
 0x9d7   :  { %8827 = vst [vmem:[%s14627_s7 + $0x40] sm:$0xff] %v8811_v25  ;;  %v8815_v28 = vsel %vm8783_vm4, %v8767_v50, %v8799_v10  ;;  %v8816_v53 = vsel %vm8784_vm5, %v8768_v29, %v8800_v51  ;;  %v8817_v45 = vsel %vm8785_vm6, %v8769_v62, %v8801_v20 }
 0x9d8   :  { %8828 = vst [vmem:[%s14627_s7 + $0x48] sm:$0xff] %v8812_v58  ;;  %v8818_v39 = vsel %vm8786_vm7, %v8770_v5, %v8802_v9 }
 0x9d9   :  { %8829 = vst [vmem:[%s14627_s7 + $0x50] sm:$0xff] %v8813_v46 }
 0x9da   :  { %8830 = vst [vmem:[%s14627_s7 + $0x58] sm:$0xff] %v8814_v23 }
 0x9db   :  { %8831 = vst [vmem:[%s14627_s7 + $0x60] sm:$0xff] %v8815_v28 }
 0x9dc   :  { %8832 = vst [vmem:[%s14627_s7 + $0x68] sm:$0xff] %v8816_v53 }
 0x9dd   :  { %8833 = vst [vmem:[%s14627_s7 + $0x70] sm:$0xff] %v8817_v45 }
 0x9de   :  { %8834 = vst [vmem:[%s14627_s7 + $0x78] sm:$0xff] %v8818_v39 }

</bundles_post_ra>
